<compile_context>
chip_gen: v7x
topology: tpu7x:2x2x1
jax: 0.10.0
libtpu: 0.0.40
codegen_flags: <defaults>
</compile_context>

<pallas_src>
import jax
import jax.numpy as jnp
from jax.experimental import pallas as pl
from jax.experimental.pallas import tpu as pltpu

# ---- synthetic model dims (small) ----
VOCAB = 32
CE = 32            # args.Ce (embedding dim)
CX = 32            # args.Cx
ENC_DIM = 2 * CX   # encoder output dim (bi-GRU)
N_MELS = 8
R = 2
DM = N_MELS * R    # n_mels * r (decoder frame dim)
N_MAGS = 32
N = 2              # batch
TX = 8             # text length
TDEC = 8           # Ty / r
TY = TDEC * R
ATTN_PAD = 128     # lane-dense padded attention output width (>= TDEC*TX)


# ------------------------------- fused kernel ---------------------------------
def tacotron_kernel(
    x_ref, dec_ref,
    ew1_ref, eb1_ref, ew2_ref, eb2_ref,
    wih_fb_ref, bih_fb_ref, whh_f_ref, bhh_f_ref, whh_b_ref, bhh_b_ref,
    dw1_ref, db1_ref, dw2_ref, db2_ref,
    wih_a_ref, bih_a_ref, whh_a_ref, bhh_a_ref,
    wq_ref, bq_ref, wdi_ref, bdi_ref,
    wih_d_ref, bih_d_ref, whh_d_ref, bhh_d_ref,
    wmel_ref, bmel_ref,
    pw1_ref, pb1_ref, pw2_ref, pb2_ref,
    mels_ref, attn_ref, mags_ref,
    encf_scr, encb_scr, hatt_scr, hdec_scr,
):
    f32 = jnp.float32
    bf16 = jnp.bfloat16

    n, tx, ce = x_ref.shape
    _, tdec, dm = dec_ref.shape
    hdim = whh_f_ref.shape[0]
    enc_dim = 2 * hdim

    def mm(a, b):
        # batched / hoisted matmuls: bf16 operands, f32 accumulate (MXU-native)
        return jnp.dot(a.astype(bf16), b.astype(bf16), preferred_element_type=f32)

    def gru_step(gx, hprev, whh, bhh):
        # one fused (H, 3H) recurrent matmul per step (f32, on the serial chain);
        # gate split is static lane slices.
        gh = jnp.dot(hprev, whh, preferred_element_type=f32) + bhh
        r = jax.nn.sigmoid(gx[:, :hdim] + gh[:, :hdim])
        z = jax.nn.sigmoid(gx[:, hdim:2 * hdim] + gh[:, hdim:2 * hdim])
        ng = jnp.tanh(gx[:, 2 * hdim:] + r * gh[:, 2 * hdim:])
        return (1.0 - z) * ng + z * hprev

    # ---------------- encoder prenet (all timesteps in one matmul) ------------
    x = x_ref[...].reshape(n * tx, ce)
    p = jnp.maximum(mm(x, ew1_ref[...]) + eb1_ref[...], 0.0)
    p = jnp.maximum(mm(p, ew2_ref[...]) + eb2_ref[...], 0.0)

    # hoisted fwd+bwd input-to-hidden gates: single (N*Tx, Cx) @ (Cx, 6H) matmul
    gx_all = mm(p, wih_fb_ref[...]) + bih_fb_ref[...]            # (N*Tx, 6H)
    gxf = gx_all[:, :3 * hdim].reshape(n, tx, 3 * hdim)
    gxb = gx_all[:, 3 * hdim:].reshape(n, tx, 3 * hdim)

    whh_f = whh_f_ref[...]
    whh_b = whh_b_ref[...]
    bhh_f = jnp.broadcast_to(bhh_f_ref[...], (n, 3 * hdim))
    bhh_b = jnp.broadcast_to(bhh_b_ref[...], (n, 3 * hdim))

    # interleaved fwd/bwd recurrences (fully unrolled); outputs go straight to
    # VMEM scratch (no stack/concat relayouts on the chain).
    h_f = jnp.zeros((n, hdim), f32)
    h_b = jnp.zeros((n, hdim), f32)
    for i in range(tx):
        tb = tx - 1 - i
        h_f = gru_step(gxf[:, i, :], h_f, whh_f, bhh_f)
        h_b = gru_step(gxb[:, tb, :], h_b, whh_b, bhh_b)
        encf_scr[:, i, :] = h_f
        encb_scr[:, tb, :] = h_b

    enc = jnp.concatenate(
        [encf_scr[...].reshape(n * tx, hdim),
         encb_scr[...].reshape(n * tx, hdim)], axis=-1
    ).reshape(n, tx, enc_dim)                                    # (N, Tx, 2H)

    # ---------------- decoder prenet (all frames in one matmul) ---------------
    d = dec_ref[...].reshape(n * tdec, dm)
    pd = jnp.maximum(mm(d, dw1_ref[...]) + db1_ref[...], 0.0)
    pd = jnp.maximum(mm(pd, dw2_ref[...]) + db2_ref[...], 0.0)

    # hoisted attention-GRU input gates
    gxa = (mm(pd, wih_a_ref[...]) + bih_a_ref[...]).reshape(n, tdec, 3 * hdim)
    whh_a = whh_a_ref[...]
    bhh_a = jnp.broadcast_to(bhh_a_ref[...], (n, 3 * hdim))

    # attention-GRU recurrence (teacher forcing: independent of ctx / h_dec),
    # hoisted out of the decoder loop.
    h_att = jnp.zeros((n, hdim), f32)
    for t in range(tdec):
        h_att = gru_step(gxa[:, t, :], h_att, whh_a, bhh_a)
        hatt_scr[:, t, :] = h_att

    h_att_all = hatt_scr[...]                                    # (N, Tdec, H)
    ha_flat = h_att_all.reshape(n * tdec, hdim)

    # -------- batched dot attention over encoder outputs (q = Tdec, not 1) ----
    q_all = (mm(ha_flat, wq_ref[...]) + bq_ref[...]).reshape(n, tdec, enc_dim)
    s = jnp.einsum('nqh,nth->nqt', q_all.astype(bf16), enc.astype(bf16),
                   preferred_element_type=f32)                   # (N, Tdec, Tx)
    s = s - jnp.max(s, axis=-1, keepdims=True)
    e = jnp.exp(s)
    attn_w = e / jnp.sum(e, axis=-1, keepdims=True)              # exact softmax
    ctx_all = jnp.einsum('nqt,nth->nqh', attn_w.astype(bf16), enc.astype(bf16),
                         preferred_element_type=f32)             # (N, Tdec, 2H)

    # batched decoder-input projection + decoder-GRU input gates (off-chain)
    dec_in = jnp.concatenate(
        [ha_flat, ctx_all.reshape(n * tdec, enc_dim)], axis=-1)  # (N*Tdec, 3H)
    dec_in = mm(dec_in, wdi_ref[...]) + bdi_ref[...]             # (N*Tdec, H)
    gxd = (mm(dec_in, wih_d_ref[...]) + bih_d_ref[...]).reshape(n, tdec, 3 * hdim)

    whh_d = whh_d_ref[...]
    bhh_d = jnp.broadcast_to(bhh_d_ref[...], (n, 3 * hdim))

    # decoder-GRU recurrence: only the fused recurrent matmul remains serial
    h_dec = jnp.zeros((n, hdim), f32)
    for t in range(tdec):
        h_dec = gru_step(gxd[:, t, :], h_dec, whh_d, bhh_d)
        hdec_scr[:, t, :] = h_dec

    # -------- batched mel projection (off-chain), lane-dense packing ----------
    mel_all = (mm(hdec_scr[...].reshape(n * tdec, hdim), wmel_ref[...])
               + bmel_ref[...])                                  # (N*Tdec, DM)
    mel_3d = mel_all.reshape(n, tdec, dm)
    mels_ref[...] = jnp.concatenate(
        [mel_3d[:, t, :] for t in range(tdec)], axis=-1)         # (N, Tdec*DM)

    # lane-dense attention output (zero-padded to 128 lanes)
    attn_flat = jnp.concatenate(
        [attn_w[:, t, :] for t in range(tdec)], axis=-1)         # (N, Tdec*Tx)
    attn_ref[...] = jnp.concatenate(
        [attn_flat, jnp.zeros((n, attn_ref.shape[1] - tdec * tx), f32)], axis=-1)

    # -------- postnet: small per-frame MLP on each r-frame (no block-diag) ----
    nm = pw1_ref.shape[0]                                        # n_mels
    mag_parts = []
    for rf in range(dm // nm):
        fr = mel_all[:, rf * nm:(rf + 1) * nm]                   # (N*Tdec, n_mels)
        hr = jnp.maximum(mm(fr, pw1_ref[...]) + pb1_ref[...], 0.0)
        mag_parts.append(mm(hr, pw2_ref[...]) + pb2_ref[...])    # (N*Tdec, n_mags)
    mag_nt = jnp.concatenate(mag_parts, axis=-1)                 # (N*Tdec, R*n_mags)
    mag_3d = mag_nt.reshape(n, tdec, mag_nt.shape[-1])
    mags_ref[...] = jnp.concatenate(
        [mag_3d[:, t, :] for t in range(tdec)], axis=-1)         # (N, Ty*n_mags)


# -------------------- parameter init (deterministic, synthetic) ----------------
def init_params(key):
    ks = jax.random.split(key, 33)

    def nrm(k, shape, scale=0.1):
        return (scale * jax.random.normal(k, shape)).astype(jnp.float32)

    p = {}
    p['embed'] = nrm(ks[0], (VOCAB, CE)).at[0].set(0.0)    # padding_idx=0
    # encoder prenet
    p['enc_w1'] = nrm(ks[1], (CE, CX));   p['enc_b1'] = nrm(ks[2], (1, CX))
    p['enc_w2'] = nrm(ks[3], (CX, CX));   p['enc_b2'] = nrm(ks[4], (1, CX))
    # encoder bi-GRU: fwd+bwd input-to-hidden fused once at init (Cx, 6H),
    # recurrent weights per direction fused over gates (H, 3H) (r, z, n order)
    p['wih_fb'] = nrm(ks[5], (CX, 6 * CX)); p['bih_fb'] = nrm(ks[6], (1, 6 * CX))
    p['whh_f'] = nrm(ks[7], (CX, 3 * CX));  p['bhh_f'] = nrm(ks[8], (1, 3 * CX))
    p['whh_b'] = nrm(ks[9], (CX, 3 * CX));  p['bhh_b'] = nrm(ks[10], (1, 3 * CX))
    # decoder prenet
    p['dec_wp1'] = nrm(ks[11], (DM, CX));   p['dec_bp1'] = nrm(ks[12], (1, CX))
    p['dec_wp2'] = nrm(ks[13], (CX, CX));   p['dec_bp2'] = nrm(ks[14], (1, CX))
    # attention GRU
    p['wih_a'] = nrm(ks[15], (CX, 3 * CX)); p['bih_a'] = nrm(ks[16], (1, 3 * CX))
    p['whh_a'] = nrm(ks[17], (CX, 3 * CX)); p['bhh_a'] = nrm(ks[18], (1, 3 * CX))
    # attention query projection
    p['wq'] = nrm(ks[19], (CX, ENC_DIM));   p['bq'] = nrm(ks[20], (1, ENC_DIM))
    # decoder input projection (concat(h_att, ctx) -> Cx)
    p['wdi'] = nrm(ks[21], (CX + ENC_DIM, CX)); p['bdi'] = nrm(ks[22], (1, CX))
    # decoder GRU
    p['wih_d'] = nrm(ks[23], (CX, 3 * CX)); p['bih_d'] = nrm(ks[24], (1, 3 * CX))
    p['whh_d'] = nrm(ks[25], (CX, 3 * CX)); p['bhh_d'] = nrm(ks[26], (1, 3 * CX))
    # mel projection
    p['wmel'] = nrm(ks[27], (CX, DM));      p['bmel'] = nrm(ks[28], (1, DM))
    # postnet per-frame MLP (small weights passed directly; no block-diag)
    p['post_w1'] = nrm(ks[29], (N_MELS, CX)); p['post_b1'] = nrm(ks[30], (1, CX))
    p['post_w2'] = nrm(ks[31], (CX, N_MAGS)); p['post_b2'] = nrm(ks[32], (1, N_MAGS))
    return p


def _vmem_spec():
    return pl.BlockSpec(memory_space=pltpu.MemorySpace.VMEM)


# -------------------- forward pass (JAX glue around ONE Pallas kernel) ---------
def tacotron_forward(params, enc_inputs, dec_inputs):
    # embedding lookup (glue) — batch-major, no transposes needed
    x = jnp.take(params['embed'], enc_inputs, axis=0).astype(jnp.float32)  # (N, Tx, CE)
    dec = dec_inputs.astype(jnp.float32)                                   # (N, Tdec, DM)

    n_inputs = 34
    mels_flat, attn_pad, mags_flat = pl.pallas_call(
        tacotron_kernel,
        out_shape=(jax.ShapeDtypeStruct((N, TDEC * DM), jnp.float32),
                   jax.ShapeDtypeStruct((N, ATTN_PAD), jnp.float32),
                   jax.ShapeDtypeStruct((N, TY * N_MAGS), jnp.float32)),
        in_specs=[_vmem_spec() for _ in range(n_inputs)],
        out_specs=(_vmem_spec(), _vmem_spec(), _vmem_spec()),
        scratch_shapes=[pltpu.VMEM((N, TX, CX), jnp.float32),
                        pltpu.VMEM((N, TX, CX), jnp.float32),
                        pltpu.VMEM((N, TDEC, CX), jnp.float32),
                        pltpu.VMEM((N, TDEC, CX), jnp.float32)],
    )(x, dec,
      params['enc_w1'], params['enc_b1'], params['enc_w2'], params['enc_b2'],
      params['wih_fb'], params['bih_fb'], params['whh_f'], params['bhh_f'],
      params['whh_b'], params['bhh_b'],
      params['dec_wp1'], params['dec_bp1'], params['dec_wp2'], params['dec_bp2'],
      params['wih_a'], params['bih_a'], params['whh_a'], params['bhh_a'],
      params['wq'], params['bq'], params['wdi'], params['bdi'],
      params['wih_d'], params['bih_d'], params['whh_d'], params['bhh_d'],
      params['wmel'], params['bmel'],
      params['post_w1'], params['post_b1'], params['post_w2'], params['post_b2'])

    mels_hat = mels_flat.reshape(N, TDEC, DM)                # (N, Ty/r, n_mels*r)
    attentions = attn_pad[:, :TDEC * TX].reshape(N, TDEC, TX)  # (N, Ty/r, Tx)
    mags_hat = mags_flat.reshape(N, TY, N_MAGS)              # (N, Ty, n_mags)
    return mels_hat, mags_hat, attentions


if __name__ == "__main__":
    key = jax.random.PRNGKey(0)
    pkey, k1, k2 = jax.random.split(key, 3)
    params = init_params(pkey)

    enc_inputs = jax.random.randint(k1, (N, TX), 0, VOCAB, dtype=jnp.int32)        # (N, Tx)
    dec_inputs = (0.1 * jax.random.normal(k2, (N, TDEC, DM))).astype(jnp.float32)  # (N, Ty/r, n_mels*r)

    fwd = jax.jit(tacotron_forward)
    mels_hat, mags_hat, attentions = fwd(params, enc_inputs, dec_inputs)
    jax.block_until_ready((mels_hat, mags_hat, attentions))

    assert mels_hat.shape == (N, TDEC, DM)
    assert mags_hat.shape == (N, TY, N_MAGS)
    assert attentions.shape == (N, TDEC, TX)
    assert bool(jnp.all(jnp.isfinite(mels_hat)))
    assert bool(jnp.all(jnp.isfinite(mags_hat)))
    assert bool(jnp.all(jnp.isfinite(attentions)))
    # exact softmax in the kernel -> attention rows sum to 1
    assert bool(jnp.allclose(jnp.sum(attentions, axis=-1), 1.0, atol=1e-3))

    print("KERNEL_OK")
</pallas_src>

<mosaic_0001>
module attributes {stable_mosaic.version = 11 : i64} {
  func.func @tacotron_kernel(%arg0: memref<2x8x32xf32, #tpu.memory_space<vmem>>, %arg1: memref<2x8x16xf32, #tpu.memory_space<vmem>>, %arg2: memref<32x32xf32, #tpu.memory_space<vmem>>, %arg3: memref<1x32xf32, #tpu.memory_space<vmem>>, %arg4: memref<32x32xf32, #tpu.memory_space<vmem>>, %arg5: memref<1x32xf32, #tpu.memory_space<vmem>>, %arg6: memref<32x192xf32, #tpu.memory_space<vmem>>, %arg7: memref<1x192xf32, #tpu.memory_space<vmem>>, %arg8: memref<32x96xf32, #tpu.memory_space<vmem>>, %arg9: memref<1x96xf32, #tpu.memory_space<vmem>>, %arg10: memref<32x96xf32, #tpu.memory_space<vmem>>, %arg11: memref<1x96xf32, #tpu.memory_space<vmem>>, %arg12: memref<16x32xf32, #tpu.memory_space<vmem>>, %arg13: memref<1x32xf32, #tpu.memory_space<vmem>>, %arg14: memref<32x32xf32, #tpu.memory_space<vmem>>, %arg15: memref<1x32xf32, #tpu.memory_space<vmem>>, %arg16: memref<32x96xf32, #tpu.memory_space<vmem>>, %arg17: memref<1x96xf32, #tpu.memory_space<vmem>>, %arg18: memref<32x96xf32, #tpu.memory_space<vmem>>, %arg19: memref<1x96xf32, #tpu.memory_space<vmem>>, %arg20: memref<32x64xf32, #tpu.memory_space<vmem>>, %arg21: memref<1x64xf32, #tpu.memory_space<vmem>>, %arg22: memref<96x32xf32, #tpu.memory_space<vmem>>, %arg23: memref<1x32xf32, #tpu.memory_space<vmem>>, %arg24: memref<32x96xf32, #tpu.memory_space<vmem>>, %arg25: memref<1x96xf32, #tpu.memory_space<vmem>>, %arg26: memref<32x96xf32, #tpu.memory_space<vmem>>, %arg27: memref<1x96xf32, #tpu.memory_space<vmem>>, %arg28: memref<32x16xf32, #tpu.memory_space<vmem>>, %arg29: memref<1x16xf32, #tpu.memory_space<vmem>>, %arg30: memref<8x32xf32, #tpu.memory_space<vmem>>, %arg31: memref<1x32xf32, #tpu.memory_space<vmem>>, %arg32: memref<32x32xf32, #tpu.memory_space<vmem>>, %arg33: memref<1x32xf32, #tpu.memory_space<vmem>>, %arg34: memref<2x128xf32, #tpu.memory_space<vmem>>, %arg35: memref<2x128xf32, #tpu.memory_space<vmem>>, %arg36: memref<2x512xf32, #tpu.memory_space<vmem>>, %arg37: memref<2x8x32xf32, #tpu.memory_space<vmem>>, %arg38: memref<2x8x32xf32, #tpu.memory_space<vmem>>, %arg39: memref<2x8x32xf32, #tpu.memory_space<vmem>>, %arg40: memref<2x8x32xf32, #tpu.memory_space<vmem>>) attributes {dimension_semantics = [], scalar_prefetch = 0 : i64, scratch_operands = 4 : i64, tpu.core_type = #tpu.core_type<tc>} {
    %c0 = arith.constant 0 : index
    %c0_0 = arith.constant 0 : index
    %c0_1 = arith.constant 0 : index
    %0 = vector.load %arg0[%c0, %c0_0, %c0_1] : memref<2x8x32xf32, #tpu.memory_space<vmem>>, vector<2x8x32xf32>
    %1 = vector.shape_cast %0 : vector<2x8x32xf32> to vector<16x32xf32>
    %c0_2 = arith.constant 0 : index
    %c0_3 = arith.constant 0 : index
    %2 = vector.load %arg2[%c0_2, %c0_3] : memref<32x32xf32, #tpu.memory_space<vmem>>, vector<32x32xf32>
    %3 = arith.truncf %1 : vector<16x32xf32> to vector<16x32xbf16>
    %4 = arith.truncf %2 : vector<32x32xf32> to vector<32x32xbf16>
    %cst = arith.constant dense<0.000000e+00> : vector<16x32xf32>
    %5 = tpu.matmul %3, %4, %cst {dimension_numbers = #tpu.dot_dimension_numbers<[1], [0], [0], [1], [0, 0, 1, 1], [], []>} : vector<16x32xbf16>, vector<32x32xbf16>, vector<16x32xf32> -> vector<16x32xf32>
    %c0_4 = arith.constant 0 : index
    %c0_5 = arith.constant 0 : index
    %6 = vector.load %arg3[%c0_4, %c0_5] : memref<1x32xf32, #tpu.memory_space<vmem>>, vector<1x32xf32>
    %7 = vector.broadcast %6 : vector<1x32xf32> to vector<16x32xf32>
    %8 = arith.addf %5, %7 : vector<16x32xf32>
    %cst_6 = arith.constant 0.000000e+00 : f32
    %9 = vector.broadcast %cst_6 : f32 to vector<16x32xf32>
    %10 = arith.maximumf %8, %9 : vector<16x32xf32>
    %c0_7 = arith.constant 0 : index
    %c0_8 = arith.constant 0 : index
    %11 = vector.load %arg4[%c0_7, %c0_8] : memref<32x32xf32, #tpu.memory_space<vmem>>, vector<32x32xf32>
    %12 = arith.truncf %10 : vector<16x32xf32> to vector<16x32xbf16>
    %13 = arith.truncf %11 : vector<32x32xf32> to vector<32x32xbf16>
    %cst_9 = arith.constant dense<0.000000e+00> : vector<16x32xf32>
    %14 = tpu.matmul %12, %13, %cst_9 {dimension_numbers = #tpu.dot_dimension_numbers<[1], [0], [0], [1], [0, 0, 1, 1], [], []>} : vector<16x32xbf16>, vector<32x32xbf16>, vector<16x32xf32> -> vector<16x32xf32>
    %c0_10 = arith.constant 0 : index
    %c0_11 = arith.constant 0 : index
    %15 = vector.load %arg5[%c0_10, %c0_11] : memref<1x32xf32, #tpu.memory_space<vmem>>, vector<1x32xf32>
    %16 = vector.broadcast %15 : vector<1x32xf32> to vector<16x32xf32>
    %17 = arith.addf %14, %16 : vector<16x32xf32>
    %cst_12 = arith.constant 0.000000e+00 : f32
    %18 = vector.broadcast %cst_12 : f32 to vector<16x32xf32>
    %19 = arith.maximumf %17, %18 : vector<16x32xf32>
    %c0_13 = arith.constant 0 : index
    %c0_14 = arith.constant 0 : index
    %20 = vector.load %arg6[%c0_13, %c0_14] : memref<32x192xf32, #tpu.memory_space<vmem>>, vector<32x192xf32>
    %21 = arith.truncf %19 : vector<16x32xf32> to vector<16x32xbf16>
    %22 = arith.truncf %20 : vector<32x192xf32> to vector<32x192xbf16>
    %cst_15 = arith.constant dense<0.000000e+00> : vector<16x192xf32>
    %23 = tpu.matmul %21, %22, %cst_15 {dimension_numbers = #tpu.dot_dimension_numbers<[1], [0], [0], [1], [0, 0, 1, 1], [], []>} : vector<16x32xbf16>, vector<32x192xbf16>, vector<16x192xf32> -> vector<16x192xf32>
    %c0_16 = arith.constant 0 : index
    %c0_17 = arith.constant 0 : index
    %24 = vector.load %arg7[%c0_16, %c0_17] : memref<1x192xf32, #tpu.memory_space<vmem>>, vector<1x192xf32>
    %25 = vector.broadcast %24 : vector<1x192xf32> to vector<16x192xf32>
    %26 = arith.addf %23, %25 : vector<16x192xf32>
    %27 = vector.extract_strided_slice %26 {offsets = [0, 0], sizes = [16, 96], strides = [1, 1]} : vector<16x192xf32> to vector<16x96xf32>
    %28 = vector.shape_cast %27 : vector<16x96xf32> to vector<2x8x96xf32>
    %29 = vector.extract_strided_slice %26 {offsets = [0, 96], sizes = [16, 96], strides = [1, 1]} : vector<16x192xf32> to vector<16x96xf32>
    %30 = vector.shape_cast %29 : vector<16x96xf32> to vector<2x8x96xf32>
    %c0_18 = arith.constant 0 : index
    %c0_19 = arith.constant 0 : index
    %31 = vector.load %arg8[%c0_18, %c0_19] : memref<32x96xf32, #tpu.memory_space<vmem>>, vector<32x96xf32>
    %c0_20 = arith.constant 0 : index
    %c0_21 = arith.constant 0 : index
    %32 = vector.load %arg10[%c0_20, %c0_21] : memref<32x96xf32, #tpu.memory_space<vmem>>, vector<32x96xf32>
    %c0_22 = arith.constant 0 : index
    %c0_23 = arith.constant 0 : index
    %33 = vector.load %arg9[%c0_22, %c0_23] : memref<1x96xf32, #tpu.memory_space<vmem>>, vector<1x96xf32>
    %34 = vector.shape_cast %33 : vector<1x96xf32> to vector<1x96xf32>
    %35 = vector.broadcast %34 : vector<1x96xf32> to vector<2x96xf32>
    %c0_24 = arith.constant 0 : index
    %c0_25 = arith.constant 0 : index
    %36 = vector.load %arg11[%c0_24, %c0_25] : memref<1x96xf32, #tpu.memory_space<vmem>>, vector<1x96xf32>
    %37 = vector.shape_cast %36 : vector<1x96xf32> to vector<1x96xf32>
    %38 = vector.broadcast %37 : vector<1x96xf32> to vector<2x96xf32>
    %cst_26 = arith.constant 0.000000e+00 : f32
    %39 = vector.broadcast %cst_26 : f32 to vector<2x32xf32>
    %cst_27 = arith.constant 0.000000e+00 : f32
    %40 = vector.broadcast %cst_27 : f32 to vector<2x32xf32>
    %41 = vector.extract_strided_slice %28 {offsets = [0, 0, 0], sizes = [2, 1, 96], strides = [1, 1, 1]} : vector<2x8x96xf32> to vector<2x1x96xf32>
    %42 = vector.shape_cast %41 : vector<2x1x96xf32> to vector<2x96xf32>
    %cst_28 = arith.constant dense<0.000000e+00> : vector<2x96xf32>
    %43 = tpu.matmul %39, %31, %cst_28 {dimension_numbers = #tpu.dot_dimension_numbers<[1], [0], [0], [1], [0, 0, 1, 1], [], []>} : vector<2x32xf32>, vector<32x96xf32>, vector<2x96xf32> -> vector<2x96xf32>
    %44 = arith.addf %43, %35 : vector<2x96xf32>
    %45 = vector.extract_strided_slice %42 {offsets = [0, 0], sizes = [2, 32], strides = [1, 1]} : vector<2x96xf32> to vector<2x32xf32>
    %46 = vector.extract_strided_slice %44 {offsets = [0, 0], sizes = [2, 32], strides = [1, 1]} : vector<2x96xf32> to vector<2x32xf32>
    %47 = arith.addf %45, %46 : vector<2x32xf32>
    %48 = arith.negf %47 : vector<2x32xf32>
    %49 = math.exp %48 : vector<2x32xf32>
    %cst_29 = arith.constant 1.000000e+00 : f32
    %50 = vector.broadcast %cst_29 : f32 to vector<2x32xf32>
    %51 = arith.addf %50, %49 : vector<2x32xf32>
    %52 = arith.divf %50, %51 : vector<2x32xf32>
    %53 = vector.extract_strided_slice %42 {offsets = [0, 32], sizes = [2, 32], strides = [1, 1]} : vector<2x96xf32> to vector<2x32xf32>
    %54 = vector.extract_strided_slice %44 {offsets = [0, 32], sizes = [2, 32], strides = [1, 1]} : vector<2x96xf32> to vector<2x32xf32>
    %55 = arith.addf %53, %54 : vector<2x32xf32>
    %56 = arith.negf %55 : vector<2x32xf32>
    %57 = math.exp %56 : vector<2x32xf32>
    %cst_30 = arith.constant 1.000000e+00 : f32
    %58 = vector.broadcast %cst_30 : f32 to vector<2x32xf32>
    %59 = arith.addf %58, %57 : vector<2x32xf32>
    %60 = arith.divf %58, %59 : vector<2x32xf32>
    %61 = vector.extract_strided_slice %42 {offsets = [0, 64], sizes = [2, 32], strides = [1, 1]} : vector<2x96xf32> to vector<2x32xf32>
    %62 = vector.extract_strided_slice %44 {offsets = [0, 64], sizes = [2, 32], strides = [1, 1]} : vector<2x96xf32> to vector<2x32xf32>
    %63 = arith.mulf %52, %62 : vector<2x32xf32>
    %64 = arith.addf %61, %63 : vector<2x32xf32>
    %65 = math.tanh %64 : vector<2x32xf32>
    %cst_31 = arith.constant 1.000000e+00 : f32
    %66 = vector.broadcast %cst_31 : f32 to vector<2x32xf32>
    %67 = arith.subf %66, %60 : vector<2x32xf32>
    %68 = arith.mulf %67, %65 : vector<2x32xf32>
    %69 = arith.mulf %60, %39 : vector<2x32xf32>
    %70 = arith.addf %68, %69 : vector<2x32xf32>
    %71 = vector.extract_strided_slice %30 {offsets = [0, 7, 0], sizes = [2, 1, 96], strides = [1, 1, 1]} : vector<2x8x96xf32> to vector<2x1x96xf32>
    %72 = vector.shape_cast %71 : vector<2x1x96xf32> to vector<2x96xf32>
    %cst_32 = arith.constant dense<0.000000e+00> : vector<2x96xf32>
    %73 = tpu.matmul %40, %32, %cst_32 {dimension_numbers = #tpu.dot_dimension_numbers<[1], [0], [0], [1], [0, 0, 1, 1], [], []>} : vector<2x32xf32>, vector<32x96xf32>, vector<2x96xf32> -> vector<2x96xf32>
    %74 = arith.addf %73, %38 : vector<2x96xf32>
    %75 = vector.extract_strided_slice %72 {offsets = [0, 0], sizes = [2, 32], strides = [1, 1]} : vector<2x96xf32> to vector<2x32xf32>
    %76 = vector.extract_strided_slice %74 {offsets = [0, 0], sizes = [2, 32], strides = [1, 1]} : vector<2x96xf32> to vector<2x32xf32>
    %77 = arith.addf %75, %76 : vector<2x32xf32>
    %78 = arith.negf %77 : vector<2x32xf32>
    %79 = math.exp %78 : vector<2x32xf32>
    %cst_33 = arith.constant 1.000000e+00 : f32
    %80 = vector.broadcast %cst_33 : f32 to vector<2x32xf32>
    %81 = arith.addf %80, %79 : vector<2x32xf32>
    %82 = arith.divf %80, %81 : vector<2x32xf32>
    %83 = vector.extract_strided_slice %72 {offsets = [0, 32], sizes = [2, 32], strides = [1, 1]} : vector<2x96xf32> to vector<2x32xf32>
    %84 = vector.extract_strided_slice %74 {offsets = [0, 32], sizes = [2, 32], strides = [1, 1]} : vector<2x96xf32> to vector<2x32xf32>
    %85 = arith.addf %83, %84 : vector<2x32xf32>
    %86 = arith.negf %85 : vector<2x32xf32>
    %87 = math.exp %86 : vector<2x32xf32>
    %cst_34 = arith.constant 1.000000e+00 : f32
    %88 = vector.broadcast %cst_34 : f32 to vector<2x32xf32>
    %89 = arith.addf %88, %87 : vector<2x32xf32>
    %90 = arith.divf %88, %89 : vector<2x32xf32>
    %91 = vector.extract_strided_slice %72 {offsets = [0, 64], sizes = [2, 32], strides = [1, 1]} : vector<2x96xf32> to vector<2x32xf32>
    %92 = vector.extract_strided_slice %74 {offsets = [0, 64], sizes = [2, 32], strides = [1, 1]} : vector<2x96xf32> to vector<2x32xf32>
    %93 = arith.mulf %82, %92 : vector<2x32xf32>
    %94 = arith.addf %91, %93 : vector<2x32xf32>
    %95 = math.tanh %94 : vector<2x32xf32>
    %cst_35 = arith.constant 1.000000e+00 : f32
    %96 = vector.broadcast %cst_35 : f32 to vector<2x32xf32>
    %97 = arith.subf %96, %90 : vector<2x32xf32>
    %98 = arith.mulf %97, %95 : vector<2x32xf32>
    %99 = arith.mulf %90, %40 : vector<2x32xf32>
    %100 = arith.addf %98, %99 : vector<2x32xf32>
    %c0_36 = arith.constant 0 : index
    %c0_37 = arith.constant 0 : index
    %c0_38 = arith.constant 0 : index
    %101 = vector.load %arg37[%c0_36, %c0_37, %c0_38] : memref<2x8x32xf32, #tpu.memory_space<vmem>>, vector<2x1x32xf32>
    %102 = vector.shape_cast %101 : vector<2x1x32xf32> to vector<2x32xf32>
    %103 = vector.shape_cast %70 : vector<2x32xf32> to vector<2x1x32xf32>
    tpu.vector_store %arg37[%c0_36, %c0_37, %c0_38], %103 {strides = array<i32>} : memref<2x8x32xf32, #tpu.memory_space<vmem>>, vector<2x1x32xf32>,
    %c0_39 = arith.constant 0 : index
    %c7 = arith.constant 7 : index
    %c0_40 = arith.constant 0 : index
    %104 = vector.load %arg38[%c0_39, %c7, %c0_40] : memref<2x8x32xf32, #tpu.memory_space<vmem>>, vector<2x1x32xf32>
    %105 = vector.shape_cast %104 : vector<2x1x32xf32> to vector<2x32xf32>
    %106 = vector.shape_cast %100 : vector<2x32xf32> to vector<2x1x32xf32>
    tpu.vector_store %arg38[%c0_39, %c7, %c0_40], %106 {strides = array<i32>} : memref<2x8x32xf32, #tpu.memory_space<vmem>>, vector<2x1x32xf32>,
    %107 = vector.extract_strided_slice %28 {offsets = [0, 1, 0], sizes = [2, 1, 96], strides = [1, 1, 1]} : vector<2x8x96xf32> to vector<2x1x96xf32>
    %108 = vector.shape_cast %107 : vector<2x1x96xf32> to vector<2x96xf32>
    %cst_41 = arith.constant dense<0.000000e+00> : vector<2x96xf32>
    %109 = tpu.matmul %70, %31, %cst_41 {dimension_numbers = #tpu.dot_dimension_numbers<[1], [0], [0], [1], [0, 0, 1, 1], [], []>} : vector<2x32xf32>, vector<32x96xf32>, vector<2x96xf32> -> vector<2x96xf32>
    %110 = arith.addf %109, %35 : vector<2x96xf32>
    %111 = vector.extract_strided_slice %108 {offsets = [0, 0], sizes = [2, 32], strides = [1, 1]} : vector<2x96xf32> to vector<2x32xf32>
    %112 = vector.extract_strided_slice %110 {offsets = [0, 0], sizes = [2, 32], strides = [1, 1]} : vector<2x96xf32> to vector<2x32xf32>
    %113 = arith.addf %111, %112 : vector<2x32xf32>
    %114 = arith.negf %113 : vector<2x32xf32>
    %115 = math.exp %114 : vector<2x32xf32>
    %cst_42 = arith.constant 1.000000e+00 : f32
    %116 = vector.broadcast %cst_42 : f32 to vector<2x32xf32>
    %117 = arith.addf %116, %115 : vector<2x32xf32>
    %118 = arith.divf %116, %117 : vector<2x32xf32>
    %119 = vector.extract_strided_slice %108 {offsets = [0, 32], sizes = [2, 32], strides = [1, 1]} : vector<2x96xf32> to vector<2x32xf32>
    %120 = vector.extract_strided_slice %110 {offsets = [0, 32], sizes = [2, 32], strides = [1, 1]} : vector<2x96xf32> to vector<2x32xf32>
    %121 = arith.addf %119, %120 : vector<2x32xf32>
    %122 = arith.negf %121 : vector<2x32xf32>
    %123 = math.exp %122 : vector<2x32xf32>
    %cst_43 = arith.constant 1.000000e+00 : f32
    %124 = vector.broadcast %cst_43 : f32 to vector<2x32xf32>
    %125 = arith.addf %124, %123 : vector<2x32xf32>
    %126 = arith.divf %124, %125 : vector<2x32xf32>
    %127 = vector.extract_strided_slice %108 {offsets = [0, 64], sizes = [2, 32], strides = [1, 1]} : vector<2x96xf32> to vector<2x32xf32>
    %128 = vector.extract_strided_slice %110 {offsets = [0, 64], sizes = [2, 32], strides = [1, 1]} : vector<2x96xf32> to vector<2x32xf32>
    %129 = arith.mulf %118, %128 : vector<2x32xf32>
    %130 = arith.addf %127, %129 : vector<2x32xf32>
    %131 = math.tanh %130 : vector<2x32xf32>
    %cst_44 = arith.constant 1.000000e+00 : f32
    %132 = vector.broadcast %cst_44 : f32 to vector<2x32xf32>
    %133 = arith.subf %132, %126 : vector<2x32xf32>
    %134 = arith.mulf %133, %131 : vector<2x32xf32>
    %135 = arith.mulf %126, %70 : vector<2x32xf32>
    %136 = arith.addf %134, %135 : vector<2x32xf32>
    %137 = vector.extract_strided_slice %30 {offsets = [0, 6, 0], sizes = [2, 1, 96], strides = [1, 1, 1]} : vector<2x8x96xf32> to vector<2x1x96xf32>
    %138 = vector.shape_cast %137 : vector<2x1x96xf32> to vector<2x96xf32>
    %cst_45 = arith.constant dense<0.000000e+00> : vector<2x96xf32>
    %139 = tpu.matmul %100, %32, %cst_45 {dimension_numbers = #tpu.dot_dimension_numbers<[1], [0], [0], [1], [0, 0, 1, 1], [], []>} : vector<2x32xf32>, vector<32x96xf32>, vector<2x96xf32> -> vector<2x96xf32>
    %140 = arith.addf %139, %38 : vector<2x96xf32>
    %141 = vector.extract_strided_slice %138 {offsets = [0, 0], sizes = [2, 32], strides = [1, 1]} : vector<2x96xf32> to vector<2x32xf32>
    %142 = vector.extract_strided_slice %140 {offsets = [0, 0], sizes = [2, 32], strides = [1, 1]} : vector<2x96xf32> to vector<2x32xf32>
    %143 = arith.addf %141, %142 : vector<2x32xf32>
    %144 = arith.negf %143 : vector<2x32xf32>
    %145 = math.exp %144 : vector<2x32xf32>
    %cst_46 = arith.constant 1.000000e+00 : f32
    %146 = vector.broadcast %cst_46 : f32 to vector<2x32xf32>
    %147 = arith.addf %146, %145 : vector<2x32xf32>
    %148 = arith.divf %146, %147 : vector<2x32xf32>
    %149 = vector.extract_strided_slice %138 {offsets = [0, 32], sizes = [2, 32], strides = [1, 1]} : vector<2x96xf32> to vector<2x32xf32>
    %150 = vector.extract_strided_slice %140 {offsets = [0, 32], sizes = [2, 32], strides = [1, 1]} : vector<2x96xf32> to vector<2x32xf32>
    %151 = arith.addf %149, %150 : vector<2x32xf32>
    %152 = arith.negf %151 : vector<2x32xf32>
    %153 = math.exp %152 : vector<2x32xf32>
    %cst_47 = arith.constant 1.000000e+00 : f32
    %154 = vector.broadcast %cst_47 : f32 to vector<2x32xf32>
    %155 = arith.addf %154, %153 : vector<2x32xf32>
    %156 = arith.divf %154, %155 : vector<2x32xf32>
    %157 = vector.extract_strided_slice %138 {offsets = [0, 64], sizes = [2, 32], strides = [1, 1]} : vector<2x96xf32> to vector<2x32xf32>
    %158 = vector.extract_strided_slice %140 {offsets = [0, 64], sizes = [2, 32], strides = [1, 1]} : vector<2x96xf32> to vector<2x32xf32>
    %159 = arith.mulf %148, %158 : vector<2x32xf32>
    %160 = arith.addf %157, %159 : vector<2x32xf32>
    %161 = math.tanh %160 : vector<2x32xf32>
    %cst_48 = arith.constant 1.000000e+00 : f32
    %162 = vector.broadcast %cst_48 : f32 to vector<2x32xf32>
    %163 = arith.subf %162, %156 : vector<2x32xf32>
    %164 = arith.mulf %163, %161 : vector<2x32xf32>
    %165 = arith.mulf %156, %100 : vector<2x32xf32>
    %166 = arith.addf %164, %165 : vector<2x32xf32>
    %c0_49 = arith.constant 0 : index
    %c1 = arith.constant 1 : index
    %c0_50 = arith.constant 0 : index
    %167 = vector.load %arg37[%c0_49, %c1, %c0_50] : memref<2x8x32xf32, #tpu.memory_space<vmem>>, vector<2x1x32xf32>
    %168 = vector.shape_cast %167 : vector<2x1x32xf32> to vector<2x32xf32>
    %169 = vector.shape_cast %136 : vector<2x32xf32> to vector<2x1x32xf32>
    tpu.vector_store %arg37[%c0_49, %c1, %c0_50], %169 {strides = array<i32>} : memref<2x8x32xf32, #tpu.memory_space<vmem>>, vector<2x1x32xf32>,
    %c0_51 = arith.constant 0 : index
    %c6 = arith.constant 6 : index
    %c0_52 = arith.constant 0 : index
    %170 = vector.load %arg38[%c0_51, %c6, %c0_52] : memref<2x8x32xf32, #tpu.memory_space<vmem>>, vector<2x1x32xf32>
    %171 = vector.shape_cast %170 : vector<2x1x32xf32> to vector<2x32xf32>
    %172 = vector.shape_cast %166 : vector<2x32xf32> to vector<2x1x32xf32>
    tpu.vector_store %arg38[%c0_51, %c6, %c0_52], %172 {strides = array<i32>} : memref<2x8x32xf32, #tpu.memory_space<vmem>>, vector<2x1x32xf32>,
    %173 = vector.extract_strided_slice %28 {offsets = [0, 2, 0], sizes = [2, 1, 96], strides = [1, 1, 1]} : vector<2x8x96xf32> to vector<2x1x96xf32>
    %174 = vector.shape_cast %173 : vector<2x1x96xf32> to vector<2x96xf32>
    %cst_53 = arith.constant dense<0.000000e+00> : vector<2x96xf32>
    %175 = tpu.matmul %136, %31, %cst_53 {dimension_numbers = #tpu.dot_dimension_numbers<[1], [0], [0], [1], [0, 0, 1, 1], [], []>} : vector<2x32xf32>, vector<32x96xf32>, vector<2x96xf32> -> vector<2x96xf32>
    %176 = arith.addf %175, %35 : vector<2x96xf32>
    %177 = vector.extract_strided_slice %174 {offsets = [0, 0], sizes = [2, 32], strides = [1, 1]} : vector<2x96xf32> to vector<2x32xf32>
    %178 = vector.extract_strided_slice %176 {offsets = [0, 0], sizes = [2, 32], strides = [1, 1]} : vector<2x96xf32> to vector<2x32xf32>
    %179 = arith.addf %177, %178 : vector<2x32xf32>
    %180 = arith.negf %179 : vector<2x32xf32>
    %181 = math.exp %180 : vector<2x32xf32>
    %cst_54 = arith.constant 1.000000e+00 : f32
    %182 = vector.broadcast %cst_54 : f32 to vector<2x32xf32>
    %183 = arith.addf %182, %181 : vector<2x32xf32>
    %184 = arith.divf %182, %183 : vector<2x32xf32>
    %185 = vector.extract_strided_slice %174 {offsets = [0, 32], sizes = [2, 32], strides = [1, 1]} : vector<2x96xf32> to vector<2x32xf32>
    %186 = vector.extract_strided_slice %176 {offsets = [0, 32], sizes = [2, 32], strides = [1, 1]} : vector<2x96xf32> to vector<2x32xf32>
    %187 = arith.addf %185, %186 : vector<2x32xf32>
    %188 = arith.negf %187 : vector<2x32xf32>
    %189 = math.exp %188 : vector<2x32xf32>
    %cst_55 = arith.constant 1.000000e+00 : f32
    %190 = vector.broadcast %cst_55 : f32 to vector<2x32xf32>
    %191 = arith.addf %190, %189 : vector<2x32xf32>
    %192 = arith.divf %190, %191 : vector<2x32xf32>
    %193 = vector.extract_strided_slice %174 {offsets = [0, 64], sizes = [2, 32], strides = [1, 1]} : vector<2x96xf32> to vector<2x32xf32>
    %194 = vector.extract_strided_slice %176 {offsets = [0, 64], sizes = [2, 32], strides = [1, 1]} : vector<2x96xf32> to vector<2x32xf32>
    %195 = arith.mulf %184, %194 : vector<2x32xf32>
    %196 = arith.addf %193, %195 : vector<2x32xf32>
    %197 = math.tanh %196 : vector<2x32xf32>
    %cst_56 = arith.constant 1.000000e+00 : f32
    %198 = vector.broadcast %cst_56 : f32 to vector<2x32xf32>
    %199 = arith.subf %198, %192 : vector<2x32xf32>
    %200 = arith.mulf %199, %197 : vector<2x32xf32>
    %201 = arith.mulf %192, %136 : vector<2x32xf32>
    %202 = arith.addf %200, %201 : vector<2x32xf32>
    %203 = vector.extract_strided_slice %30 {offsets = [0, 5, 0], sizes = [2, 1, 96], strides = [1, 1, 1]} : vector<2x8x96xf32> to vector<2x1x96xf32>
    %204 = vector.shape_cast %203 : vector<2x1x96xf32> to vector<2x96xf32>
    %cst_57 = arith.constant dense<0.000000e+00> : vector<2x96xf32>
    %205 = tpu.matmul %166, %32, %cst_57 {dimension_numbers = #tpu.dot_dimension_numbers<[1], [0], [0], [1], [0, 0, 1, 1], [], []>} : vector<2x32xf32>, vector<32x96xf32>, vector<2x96xf32> -> vector<2x96xf32>
    %206 = arith.addf %205, %38 : vector<2x96xf32>
    %207 = vector.extract_strided_slice %204 {offsets = [0, 0], sizes = [2, 32], strides = [1, 1]} : vector<2x96xf32> to vector<2x32xf32>
    %208 = vector.extract_strided_slice %206 {offsets = [0, 0], sizes = [2, 32], strides = [1, 1]} : vector<2x96xf32> to vector<2x32xf32>
    %209 = arith.addf %207, %208 : vector<2x32xf32>
    %210 = arith.negf %209 : vector<2x32xf32>
    %211 = math.exp %210 : vector<2x32xf32>
    %cst_58 = arith.constant 1.000000e+00 : f32
    %212 = vector.broadcast %cst_58 : f32 to vector<2x32xf32>
    %213 = arith.addf %212, %211 : vector<2x32xf32>
    %214 = arith.divf %212, %213 : vector<2x32xf32>
    %215 = vector.extract_strided_slice %204 {offsets = [0, 32], sizes = [2, 32], strides = [1, 1]} : vector<2x96xf32> to vector<2x32xf32>
    %216 = vector.extract_strided_slice %206 {offsets = [0, 32], sizes = [2, 32], strides = [1, 1]} : vector<2x96xf32> to vector<2x32xf32>
    %217 = arith.addf %215, %216 : vector<2x32xf32>
    %218 = arith.negf %217 : vector<2x32xf32>
    %219 = math.exp %218 : vector<2x32xf32>
    %cst_59 = arith.constant 1.000000e+00 : f32
    %220 = vector.broadcast %cst_59 : f32 to vector<2x32xf32>
    %221 = arith.addf %220, %219 : vector<2x32xf32>
    %222 = arith.divf %220, %221 : vector<2x32xf32>
    %223 = vector.extract_strided_slice %204 {offsets = [0, 64], sizes = [2, 32], strides = [1, 1]} : vector<2x96xf32> to vector<2x32xf32>
    %224 = vector.extract_strided_slice %206 {offsets = [0, 64], sizes = [2, 32], strides = [1, 1]} : vector<2x96xf32> to vector<2x32xf32>
    %225 = arith.mulf %214, %224 : vector<2x32xf32>
    %226 = arith.addf %223, %225 : vector<2x32xf32>
    %227 = math.tanh %226 : vector<2x32xf32>
    %cst_60 = arith.constant 1.000000e+00 : f32
    %228 = vector.broadcast %cst_60 : f32 to vector<2x32xf32>
    %229 = arith.subf %228, %222 : vector<2x32xf32>
    %230 = arith.mulf %229, %227 : vector<2x32xf32>
    %231 = arith.mulf %222, %166 : vector<2x32xf32>
    %232 = arith.addf %230, %231 : vector<2x32xf32>
    %c0_61 = arith.constant 0 : index
    %c2 = arith.constant 2 : index
    %c0_62 = arith.constant 0 : index
    %233 = vector.load %arg37[%c0_61, %c2, %c0_62] : memref<2x8x32xf32, #tpu.memory_space<vmem>>, vector<2x1x32xf32>
    %234 = vector.shape_cast %233 : vector<2x1x32xf32> to vector<2x32xf32>
    %235 = vector.shape_cast %202 : vector<2x32xf32> to vector<2x1x32xf32>
    tpu.vector_store %arg37[%c0_61, %c2, %c0_62], %235 {strides = array<i32>} : memref<2x8x32xf32, #tpu.memory_space<vmem>>, vector<2x1x32xf32>,
    %c0_63 = arith.constant 0 : index
    %c5 = arith.constant 5 : index
    %c0_64 = arith.constant 0 : index
    %236 = vector.load %arg38[%c0_63, %c5, %c0_64] : memref<2x8x32xf32, #tpu.memory_space<vmem>>, vector<2x1x32xf32>
    %237 = vector.shape_cast %236 : vector<2x1x32xf32> to vector<2x32xf32>
    %238 = vector.shape_cast %232 : vector<2x32xf32> to vector<2x1x32xf32>
    tpu.vector_store %arg38[%c0_63, %c5, %c0_64], %238 {strides = array<i32>} : memref<2x8x32xf32, #tpu.memory_space<vmem>>, vector<2x1x32xf32>,
    %239 = vector.extract_strided_slice %28 {offsets = [0, 3, 0], sizes = [2, 1, 96], strides = [1, 1, 1]} : vector<2x8x96xf32> to vector<2x1x96xf32>
    %240 = vector.shape_cast %239 : vector<2x1x96xf32> to vector<2x96xf32>
    %cst_65 = arith.constant dense<0.000000e+00> : vector<2x96xf32>
    %241 = tpu.matmul %202, %31, %cst_65 {dimension_numbers = #tpu.dot_dimension_numbers<[1], [0], [0], [1], [0, 0, 1, 1], [], []>} : vector<2x32xf32>, vector<32x96xf32>, vector<2x96xf32> -> vector<2x96xf32>
    %242 = arith.addf %241, %35 : vector<2x96xf32>
    %243 = vector.extract_strided_slice %240 {offsets = [0, 0], sizes = [2, 32], strides = [1, 1]} : vector<2x96xf32> to vector<2x32xf32>
    %244 = vector.extract_strided_slice %242 {offsets = [0, 0], sizes = [2, 32], strides = [1, 1]} : vector<2x96xf32> to vector<2x32xf32>
    %245 = arith.addf %243, %244 : vector<2x32xf32>
    %246 = arith.negf %245 : vector<2x32xf32>
    %247 = math.exp %246 : vector<2x32xf32>
    %cst_66 = arith.constant 1.000000e+00 : f32
    %248 = vector.broadcast %cst_66 : f32 to vector<2x32xf32>
    %249 = arith.addf %248, %247 : vector<2x32xf32>
    %250 = arith.divf %248, %249 : vector<2x32xf32>
    %251 = vector.extract_strided_slice %240 {offsets = [0, 32], sizes = [2, 32], strides = [1, 1]} : vector<2x96xf32> to vector<2x32xf32>
    %252 = vector.extract_strided_slice %242 {offsets = [0, 32], sizes = [2, 32], strides = [1, 1]} : vector<2x96xf32> to vector<2x32xf32>
    %253 = arith.addf %251, %252 : vector<2x32xf32>
    %254 = arith.negf %253 : vector<2x32xf32>
    %255 = math.exp %254 : vector<2x32xf32>
    %cst_67 = arith.constant 1.000000e+00 : f32
    %256 = vector.broadcast %cst_67 : f32 to vector<2x32xf32>
    %257 = arith.addf %256, %255 : vector<2x32xf32>
    %258 = arith.divf %256, %257 : vector<2x32xf32>
    %259 = vector.extract_strided_slice %240 {offsets = [0, 64], sizes = [2, 32], strides = [1, 1]} : vector<2x96xf32> to vector<2x32xf32>
    %260 = vector.extract_strided_slice %242 {offsets = [0, 64], sizes = [2, 32], strides = [1, 1]} : vector<2x96xf32> to vector<2x32xf32>
    %261 = arith.mulf %250, %260 : vector<2x32xf32>
    %262 = arith.addf %259, %261 : vector<2x32xf32>
    %263 = math.tanh %262 : vector<2x32xf32>
    %cst_68 = arith.constant 1.000000e+00 : f32
    %264 = vector.broadcast %cst_68 : f32 to vector<2x32xf32>
    %265 = arith.subf %264, %258 : vector<2x32xf32>
    %266 = arith.mulf %265, %263 : vector<2x32xf32>
    %267 = arith.mulf %258, %202 : vector<2x32xf32>
    %268 = arith.addf %266, %267 : vector<2x32xf32>
    %269 = vector.extract_strided_slice %30 {offsets = [0, 4, 0], sizes = [2, 1, 96], strides = [1, 1, 1]} : vector<2x8x96xf32> to vector<2x1x96xf32>
    %270 = vector.shape_cast %269 : vector<2x1x96xf32> to vector<2x96xf32>
    %cst_69 = arith.constant dense<0.000000e+00> : vector<2x96xf32>
    %271 = tpu.matmul %232, %32, %cst_69 {dimension_numbers = #tpu.dot_dimension_numbers<[1], [0], [0], [1], [0, 0, 1, 1], [], []>} : vector<2x32xf32>, vector<32x96xf32>, vector<2x96xf32> -> vector<2x96xf32>
    %272 = arith.addf %271, %38 : vector<2x96xf32>
    %273 = vector.extract_strided_slice %270 {offsets = [0, 0], sizes = [2, 32], strides = [1, 1]} : vector<2x96xf32> to vector<2x32xf32>
    %274 = vector.extract_strided_slice %272 {offsets = [0, 0], sizes = [2, 32], strides = [1, 1]} : vector<2x96xf32> to vector<2x32xf32>
    %275 = arith.addf %273, %274 : vector<2x32xf32>
    %276 = arith.negf %275 : vector<2x32xf32>
    %277 = math.exp %276 : vector<2x32xf32>
    %cst_70 = arith.constant 1.000000e+00 : f32
    %278 = vector.broadcast %cst_70 : f32 to vector<2x32xf32>
    %279 = arith.addf %278, %277 : vector<2x32xf32>
    %280 = arith.divf %278, %279 : vector<2x32xf32>
    %281 = vector.extract_strided_slice %270 {offsets = [0, 32], sizes = [2, 32], strides = [1, 1]} : vector<2x96xf32> to vector<2x32xf32>
    %282 = vector.extract_strided_slice %272 {offsets = [0, 32], sizes = [2, 32], strides = [1, 1]} : vector<2x96xf32> to vector<2x32xf32>
    %283 = arith.addf %281, %282 : vector<2x32xf32>
    %284 = arith.negf %283 : vector<2x32xf32>
    %285 = math.exp %284 : vector<2x32xf32>
    %cst_71 = arith.constant 1.000000e+00 : f32
    %286 = vector.broadcast %cst_71 : f32 to vector<2x32xf32>
    %287 = arith.addf %286, %285 : vector<2x32xf32>
    %288 = arith.divf %286, %287 : vector<2x32xf32>
    %289 = vector.extract_strided_slice %270 {offsets = [0, 64], sizes = [2, 32], strides = [1, 1]} : vector<2x96xf32> to vector<2x32xf32>
    %290 = vector.extract_strided_slice %272 {offsets = [0, 64], sizes = [2, 32], strides = [1, 1]} : vector<2x96xf32> to vector<2x32xf32>
    %291 = arith.mulf %280, %290 : vector<2x32xf32>
    %292 = arith.addf %289, %291 : vector<2x32xf32>
    %293 = math.tanh %292 : vector<2x32xf32>
    %cst_72 = arith.constant 1.000000e+00 : f32
    %294 = vector.broadcast %cst_72 : f32 to vector<2x32xf32>
    %295 = arith.subf %294, %288 : vector<2x32xf32>
    %296 = arith.mulf %295, %293 : vector<2x32xf32>
    %297 = arith.mulf %288, %232 : vector<2x32xf32>
    %298 = arith.addf %296, %297 : vector<2x32xf32>
    %c0_73 = arith.constant 0 : index
    %c3 = arith.constant 3 : index
    %c0_74 = arith.constant 0 : index
    %299 = vector.load %arg37[%c0_73, %c3, %c0_74] : memref<2x8x32xf32, #tpu.memory_space<vmem>>, vector<2x1x32xf32>
    %300 = vector.shape_cast %299 : vector<2x1x32xf32> to vector<2x32xf32>
    %301 = vector.shape_cast %268 : vector<2x32xf32> to vector<2x1x32xf32>
    tpu.vector_store %arg37[%c0_73, %c3, %c0_74], %301 {strides = array<i32>} : memref<2x8x32xf32, #tpu.memory_space<vmem>>, vector<2x1x32xf32>,
    %c0_75 = arith.constant 0 : index
    %c4 = arith.constant 4 : index
    %c0_76 = arith.constant 0 : index
    %302 = vector.load %arg38[%c0_75, %c4, %c0_76] : memref<2x8x32xf32, #tpu.memory_space<vmem>>, vector<2x1x32xf32>
    %303 = vector.shape_cast %302 : vector<2x1x32xf32> to vector<2x32xf32>
    %304 = vector.shape_cast %298 : vector<2x32xf32> to vector<2x1x32xf32>
    tpu.vector_store %arg38[%c0_75, %c4, %c0_76], %304 {strides = array<i32>} : memref<2x8x32xf32, #tpu.memory_space<vmem>>, vector<2x1x32xf32>,
    %305 = vector.extract_strided_slice %28 {offsets = [0, 4, 0], sizes = [2, 1, 96], strides = [1, 1, 1]} : vector<2x8x96xf32> to vector<2x1x96xf32>
    %306 = vector.shape_cast %305 : vector<2x1x96xf32> to vector<2x96xf32>
    %cst_77 = arith.constant dense<0.000000e+00> : vector<2x96xf32>
    %307 = tpu.matmul %268, %31, %cst_77 {dimension_numbers = #tpu.dot_dimension_numbers<[1], [0], [0], [1], [0, 0, 1, 1], [], []>} : vector<2x32xf32>, vector<32x96xf32>, vector<2x96xf32> -> vector<2x96xf32>
    %308 = arith.addf %307, %35 : vector<2x96xf32>
    %309 = vector.extract_strided_slice %306 {offsets = [0, 0], sizes = [2, 32], strides = [1, 1]} : vector<2x96xf32> to vector<2x32xf32>
    %310 = vector.extract_strided_slice %308 {offsets = [0, 0], sizes = [2, 32], strides = [1, 1]} : vector<2x96xf32> to vector<2x32xf32>
    %311 = arith.addf %309, %310 : vector<2x32xf32>
    %312 = arith.negf %311 : vector<2x32xf32>
    %313 = math.exp %312 : vector<2x32xf32>
    %cst_78 = arith.constant 1.000000e+00 : f32
    %314 = vector.broadcast %cst_78 : f32 to vector<2x32xf32>
    %315 = arith.addf %314, %313 : vector<2x32xf32>
    %316 = arith.divf %314, %315 : vector<2x32xf32>
    %317 = vector.extract_strided_slice %306 {offsets = [0, 32], sizes = [2, 32], strides = [1, 1]} : vector<2x96xf32> to vector<2x32xf32>
    %318 = vector.extract_strided_slice %308 {offsets = [0, 32], sizes = [2, 32], strides = [1, 1]} : vector<2x96xf32> to vector<2x32xf32>
    %319 = arith.addf %317, %318 : vector<2x32xf32>
    %320 = arith.negf %319 : vector<2x32xf32>
    %321 = math.exp %320 : vector<2x32xf32>
    %cst_79 = arith.constant 1.000000e+00 : f32
    %322 = vector.broadcast %cst_79 : f32 to vector<2x32xf32>
    %323 = arith.addf %322, %321 : vector<2x32xf32>
    %324 = arith.divf %322, %323 : vector<2x32xf32>
    %325 = vector.extract_strided_slice %306 {offsets = [0, 64], sizes = [2, 32], strides = [1, 1]} : vector<2x96xf32> to vector<2x32xf32>
    %326 = vector.extract_strided_slice %308 {offsets = [0, 64], sizes = [2, 32], strides = [1, 1]} : vector<2x96xf32> to vector<2x32xf32>
    %327 = arith.mulf %316, %326 : vector<2x32xf32>
    %328 = arith.addf %325, %327 : vector<2x32xf32>
    %329 = math.tanh %328 : vector<2x32xf32>
    %cst_80 = arith.constant 1.000000e+00 : f32
    %330 = vector.broadcast %cst_80 : f32 to vector<2x32xf32>
    %331 = arith.subf %330, %324 : vector<2x32xf32>
    %332 = arith.mulf %331, %329 : vector<2x32xf32>
    %333 = arith.mulf %324, %268 : vector<2x32xf32>
    %334 = arith.addf %332, %333 : vector<2x32xf32>
    %335 = vector.extract_strided_slice %30 {offsets = [0, 3, 0], sizes = [2, 1, 96], strides = [1, 1, 1]} : vector<2x8x96xf32> to vector<2x1x96xf32>
    %336 = vector.shape_cast %335 : vector<2x1x96xf32> to vector<2x96xf32>
    %cst_81 = arith.constant dense<0.000000e+00> : vector<2x96xf32>
    %337 = tpu.matmul %298, %32, %cst_81 {dimension_numbers = #tpu.dot_dimension_numbers<[1], [0], [0], [1], [0, 0, 1, 1], [], []>} : vector<2x32xf32>, vector<32x96xf32>, vector<2x96xf32> -> vector<2x96xf32>
    %338 = arith.addf %337, %38 : vector<2x96xf32>
    %339 = vector.extract_strided_slice %336 {offsets = [0, 0], sizes = [2, 32], strides = [1, 1]} : vector<2x96xf32> to vector<2x32xf32>
    %340 = vector.extract_strided_slice %338 {offsets = [0, 0], sizes = [2, 32], strides = [1, 1]} : vector<2x96xf32> to vector<2x32xf32>
    %341 = arith.addf %339, %340 : vector<2x32xf32>
    %342 = arith.negf %341 : vector<2x32xf32>
    %343 = math.exp %342 : vector<2x32xf32>
    %cst_82 = arith.constant 1.000000e+00 : f32
    %344 = vector.broadcast %cst_82 : f32 to vector<2x32xf32>
    %345 = arith.addf %344, %343 : vector<2x32xf32>
    %346 = arith.divf %344, %345 : vector<2x32xf32>
    %347 = vector.extract_strided_slice %336 {offsets = [0, 32], sizes = [2, 32], strides = [1, 1]} : vector<2x96xf32> to vector<2x32xf32>
    %348 = vector.extract_strided_slice %338 {offsets = [0, 32], sizes = [2, 32], strides = [1, 1]} : vector<2x96xf32> to vector<2x32xf32>
    %349 = arith.addf %347, %348 : vector<2x32xf32>
    %350 = arith.negf %349 : vector<2x32xf32>
    %351 = math.exp %350 : vector<2x32xf32>
    %cst_83 = arith.constant 1.000000e+00 : f32
    %352 = vector.broadcast %cst_83 : f32 to vector<2x32xf32>
    %353 = arith.addf %352, %351 : vector<2x32xf32>
    %354 = arith.divf %352, %353 : vector<2x32xf32>
    %355 = vector.extract_strided_slice %336 {offsets = [0, 64], sizes = [2, 32], strides = [1, 1]} : vector<2x96xf32> to vector<2x32xf32>
    %356 = vector.extract_strided_slice %338 {offsets = [0, 64], sizes = [2, 32], strides = [1, 1]} : vector<2x96xf32> to vector<2x32xf32>
    %357 = arith.mulf %346, %356 : vector<2x32xf32>
    %358 = arith.addf %355, %357 : vector<2x32xf32>
    %359 = math.tanh %358 : vector<2x32xf32>
    %cst_84 = arith.constant 1.000000e+00 : f32
    %360 = vector.broadcast %cst_84 : f32 to vector<2x32xf32>
    %361 = arith.subf %360, %354 : vector<2x32xf32>
    %362 = arith.mulf %361, %359 : vector<2x32xf32>
    %363 = arith.mulf %354, %298 : vector<2x32xf32>
    %364 = arith.addf %362, %363 : vector<2x32xf32>
    %c0_85 = arith.constant 0 : index
    %c4_86 = arith.constant 4 : index
    %c0_87 = arith.constant 0 : index
    %365 = vector.load %arg37[%c0_85, %c4_86, %c0_87] : memref<2x8x32xf32, #tpu.memory_space<vmem>>, vector<2x1x32xf32>
    %366 = vector.shape_cast %365 : vector<2x1x32xf32> to vector<2x32xf32>
    %367 = vector.shape_cast %334 : vector<2x32xf32> to vector<2x1x32xf32>
    tpu.vector_store %arg37[%c0_85, %c4_86, %c0_87], %367 {strides = array<i32>} : memref<2x8x32xf32, #tpu.memory_space<vmem>>, vector<2x1x32xf32>,
    %c0_88 = arith.constant 0 : index
    %c3_89 = arith.constant 3 : index
    %c0_90 = arith.constant 0 : index
    %368 = vector.load %arg38[%c0_88, %c3_89, %c0_90] : memref<2x8x32xf32, #tpu.memory_space<vmem>>, vector<2x1x32xf32>
    %369 = vector.shape_cast %368 : vector<2x1x32xf32> to vector<2x32xf32>
    %370 = vector.shape_cast %364 : vector<2x32xf32> to vector<2x1x32xf32>
    tpu.vector_store %arg38[%c0_88, %c3_89, %c0_90], %370 {strides = array<i32>} : memref<2x8x32xf32, #tpu.memory_space<vmem>>, vector<2x1x32xf32>,
    %371 = vector.extract_strided_slice %28 {offsets = [0, 5, 0], sizes = [2, 1, 96], strides = [1, 1, 1]} : vector<2x8x96xf32> to vector<2x1x96xf32>
    %372 = vector.shape_cast %371 : vector<2x1x96xf32> to vector<2x96xf32>
    %cst_91 = arith.constant dense<0.000000e+00> : vector<2x96xf32>
    %373 = tpu.matmul %334, %31, %cst_91 {dimension_numbers = #tpu.dot_dimension_numbers<[1], [0], [0], [1], [0, 0, 1, 1], [], []>} : vector<2x32xf32>, vector<32x96xf32>, vector<2x96xf32> -> vector<2x96xf32>
    %374 = arith.addf %373, %35 : vector<2x96xf32>
    %375 = vector.extract_strided_slice %372 {offsets = [0, 0], sizes = [2, 32], strides = [1, 1]} : vector<2x96xf32> to vector<2x32xf32>
    %376 = vector.extract_strided_slice %374 {offsets = [0, 0], sizes = [2, 32], strides = [1, 1]} : vector<2x96xf32> to vector<2x32xf32>
    %377 = arith.addf %375, %376 : vector<2x32xf32>
    %378 = arith.negf %377 : vector<2x32xf32>
    %379 = math.exp %378 : vector<2x32xf32>
    %cst_92 = arith.constant 1.000000e+00 : f32
    %380 = vector.broadcast %cst_92 : f32 to vector<2x32xf32>
    %381 = arith.addf %380, %379 : vector<2x32xf32>
    %382 = arith.divf %380, %381 : vector<2x32xf32>
    %383 = vector.extract_strided_slice %372 {offsets = [0, 32], sizes = [2, 32], strides = [1, 1]} : vector<2x96xf32> to vector<2x32xf32>
    %384 = vector.extract_strided_slice %374 {offsets = [0, 32], sizes = [2, 32], strides = [1, 1]} : vector<2x96xf32> to vector<2x32xf32>
    %385 = arith.addf %383, %384 : vector<2x32xf32>
    %386 = arith.negf %385 : vector<2x32xf32>
    %387 = math.exp %386 : vector<2x32xf32>
    %cst_93 = arith.constant 1.000000e+00 : f32
    %388 = vector.broadcast %cst_93 : f32 to vector<2x32xf32>
    %389 = arith.addf %388, %387 : vector<2x32xf32>
    %390 = arith.divf %388, %389 : vector<2x32xf32>
    %391 = vector.extract_strided_slice %372 {offsets = [0, 64], sizes = [2, 32], strides = [1, 1]} : vector<2x96xf32> to vector<2x32xf32>
    %392 = vector.extract_strided_slice %374 {offsets = [0, 64], sizes = [2, 32], strides = [1, 1]} : vector<2x96xf32> to vector<2x32xf32>
    %393 = arith.mulf %382, %392 : vector<2x32xf32>
    %394 = arith.addf %391, %393 : vector<2x32xf32>
    %395 = math.tanh %394 : vector<2x32xf32>
    %cst_94 = arith.constant 1.000000e+00 : f32
    %396 = vector.broadcast %cst_94 : f32 to vector<2x32xf32>
    %397 = arith.subf %396, %390 : vector<2x32xf32>
    %398 = arith.mulf %397, %395 : vector<2x32xf32>
    %399 = arith.mulf %390, %334 : vector<2x32xf32>
    %400 = arith.addf %398, %399 : vector<2x32xf32>
    %401 = vector.extract_strided_slice %30 {offsets = [0, 2, 0], sizes = [2, 1, 96], strides = [1, 1, 1]} : vector<2x8x96xf32> to vector<2x1x96xf32>
    %402 = vector.shape_cast %401 : vector<2x1x96xf32> to vector<2x96xf32>
    %cst_95 = arith.constant dense<0.000000e+00> : vector<2x96xf32>
    %403 = tpu.matmul %364, %32, %cst_95 {dimension_numbers = #tpu.dot_dimension_numbers<[1], [0], [0], [1], [0, 0, 1, 1], [], []>} : vector<2x32xf32>, vector<32x96xf32>, vector<2x96xf32> -> vector<2x96xf32>
    %404 = arith.addf %403, %38 : vector<2x96xf32>
    %405 = vector.extract_strided_slice %402 {offsets = [0, 0], sizes = [2, 32], strides = [1, 1]} : vector<2x96xf32> to vector<2x32xf32>
    %406 = vector.extract_strided_slice %404 {offsets = [0, 0], sizes = [2, 32], strides = [1, 1]} : vector<2x96xf32> to vector<2x32xf32>
    %407 = arith.addf %405, %406 : vector<2x32xf32>
    %408 = arith.negf %407 : vector<2x32xf32>
    %409 = math.exp %408 : vector<2x32xf32>
    %cst_96 = arith.constant 1.000000e+00 : f32
    %410 = vector.broadcast %cst_96 : f32 to vector<2x32xf32>
    %411 = arith.addf %410, %409 : vector<2x32xf32>
    %412 = arith.divf %410, %411 : vector<2x32xf32>
    %413 = vector.extract_strided_slice %402 {offsets = [0, 32], sizes = [2, 32], strides = [1, 1]} : vector<2x96xf32> to vector<2x32xf32>
    %414 = vector.extract_strided_slice %404 {offsets = [0, 32], sizes = [2, 32], strides = [1, 1]} : vector<2x96xf32> to vector<2x32xf32>
    %415 = arith.addf %413, %414 : vector<2x32xf32>
    %416 = arith.negf %415 : vector<2x32xf32>
    %417 = math.exp %416 : vector<2x32xf32>
    %cst_97 = arith.constant 1.000000e+00 : f32
    %418 = vector.broadcast %cst_97 : f32 to vector<2x32xf32>
    %419 = arith.addf %418, %417 : vector<2x32xf32>
    %420 = arith.divf %418, %419 : vector<2x32xf32>
    %421 = vector.extract_strided_slice %402 {offsets = [0, 64], sizes = [2, 32], strides = [1, 1]} : vector<2x96xf32> to vector<2x32xf32>
    %422 = vector.extract_strided_slice %404 {offsets = [0, 64], sizes = [2, 32], strides = [1, 1]} : vector<2x96xf32> to vector<2x32xf32>
    %423 = arith.mulf %412, %422 : vector<2x32xf32>
    %424 = arith.addf %421, %423 : vector<2x32xf32>
    %425 = math.tanh %424 : vector<2x32xf32>
    %cst_98 = arith.constant 1.000000e+00 : f32
    %426 = vector.broadcast %cst_98 : f32 to vector<2x32xf32>
    %427 = arith.subf %426, %420 : vector<2x32xf32>
    %428 = arith.mulf %427, %425 : vector<2x32xf32>
    %429 = arith.mulf %420, %364 : vector<2x32xf32>
    %430 = arith.addf %428, %429 : vector<2x32xf32>
    %c0_99 = arith.constant 0 : index
    %c5_100 = arith.constant 5 : index
    %c0_101 = arith.constant 0 : index
    %431 = vector.load %arg37[%c0_99, %c5_100, %c0_101] : memref<2x8x32xf32, #tpu.memory_space<vmem>>, vector<2x1x32xf32>
    %432 = vector.shape_cast %431 : vector<2x1x32xf32> to vector<2x32xf32>
    %433 = vector.shape_cast %400 : vector<2x32xf32> to vector<2x1x32xf32>
    tpu.vector_store %arg37[%c0_99, %c5_100, %c0_101], %433 {strides = array<i32>} : memref<2x8x32xf32, #tpu.memory_space<vmem>>, vector<2x1x32xf32>,
    %c0_102 = arith.constant 0 : index
    %c2_103 = arith.constant 2 : index
    %c0_104 = arith.constant 0 : index
    %434 = vector.load %arg38[%c0_102, %c2_103, %c0_104] : memref<2x8x32xf32, #tpu.memory_space<vmem>>, vector<2x1x32xf32>
    %435 = vector.shape_cast %434 : vector<2x1x32xf32> to vector<2x32xf32>
    %436 = vector.shape_cast %430 : vector<2x32xf32> to vector<2x1x32xf32>
    tpu.vector_store %arg38[%c0_102, %c2_103, %c0_104], %436 {strides = array<i32>} : memref<2x8x32xf32, #tpu.memory_space<vmem>>, vector<2x1x32xf32>,
    %437 = vector.extract_strided_slice %28 {offsets = [0, 6, 0], sizes = [2, 1, 96], strides = [1, 1, 1]} : vector<2x8x96xf32> to vector<2x1x96xf32>
    %438 = vector.shape_cast %437 : vector<2x1x96xf32> to vector<2x96xf32>
    %cst_105 = arith.constant dense<0.000000e+00> : vector<2x96xf32>
    %439 = tpu.matmul %400, %31, %cst_105 {dimension_numbers = #tpu.dot_dimension_numbers<[1], [0], [0], [1], [0, 0, 1, 1], [], []>} : vector<2x32xf32>, vector<32x96xf32>, vector<2x96xf32> -> vector<2x96xf32>
    %440 = arith.addf %439, %35 : vector<2x96xf32>
    %441 = vector.extract_strided_slice %438 {offsets = [0, 0], sizes = [2, 32], strides = [1, 1]} : vector<2x96xf32> to vector<2x32xf32>
    %442 = vector.extract_strided_slice %440 {offsets = [0, 0], sizes = [2, 32], strides = [1, 1]} : vector<2x96xf32> to vector<2x32xf32>
    %443 = arith.addf %441, %442 : vector<2x32xf32>
    %444 = arith.negf %443 : vector<2x32xf32>
    %445 = math.exp %444 : vector<2x32xf32>
    %cst_106 = arith.constant 1.000000e+00 : f32
    %446 = vector.broadcast %cst_106 : f32 to vector<2x32xf32>
    %447 = arith.addf %446, %445 : vector<2x32xf32>
    %448 = arith.divf %446, %447 : vector<2x32xf32>
    %449 = vector.extract_strided_slice %438 {offsets = [0, 32], sizes = [2, 32], strides = [1, 1]} : vector<2x96xf32> to vector<2x32xf32>
    %450 = vector.extract_strided_slice %440 {offsets = [0, 32], sizes = [2, 32], strides = [1, 1]} : vector<2x96xf32> to vector<2x32xf32>
    %451 = arith.addf %449, %450 : vector<2x32xf32>
    %452 = arith.negf %451 : vector<2x32xf32>
    %453 = math.exp %452 : vector<2x32xf32>
    %cst_107 = arith.constant 1.000000e+00 : f32
    %454 = vector.broadcast %cst_107 : f32 to vector<2x32xf32>
    %455 = arith.addf %454, %453 : vector<2x32xf32>
    %456 = arith.divf %454, %455 : vector<2x32xf32>
    %457 = vector.extract_strided_slice %438 {offsets = [0, 64], sizes = [2, 32], strides = [1, 1]} : vector<2x96xf32> to vector<2x32xf32>
    %458 = vector.extract_strided_slice %440 {offsets = [0, 64], sizes = [2, 32], strides = [1, 1]} : vector<2x96xf32> to vector<2x32xf32>
    %459 = arith.mulf %448, %458 : vector<2x32xf32>
    %460 = arith.addf %457, %459 : vector<2x32xf32>
    %461 = math.tanh %460 : vector<2x32xf32>
    %cst_108 = arith.constant 1.000000e+00 : f32
    %462 = vector.broadcast %cst_108 : f32 to vector<2x32xf32>
    %463 = arith.subf %462, %456 : vector<2x32xf32>
    %464 = arith.mulf %463, %461 : vector<2x32xf32>
    %465 = arith.mulf %456, %400 : vector<2x32xf32>
    %466 = arith.addf %464, %465 : vector<2x32xf32>
    %467 = vector.extract_strided_slice %30 {offsets = [0, 1, 0], sizes = [2, 1, 96], strides = [1, 1, 1]} : vector<2x8x96xf32> to vector<2x1x96xf32>
    %468 = vector.shape_cast %467 : vector<2x1x96xf32> to vector<2x96xf32>
    %cst_109 = arith.constant dense<0.000000e+00> : vector<2x96xf32>
    %469 = tpu.matmul %430, %32, %cst_109 {dimension_numbers = #tpu.dot_dimension_numbers<[1], [0], [0], [1], [0, 0, 1, 1], [], []>} : vector<2x32xf32>, vector<32x96xf32>, vector<2x96xf32> -> vector<2x96xf32>
    %470 = arith.addf %469, %38 : vector<2x96xf32>
    %471 = vector.extract_strided_slice %468 {offsets = [0, 0], sizes = [2, 32], strides = [1, 1]} : vector<2x96xf32> to vector<2x32xf32>
    %472 = vector.extract_strided_slice %470 {offsets = [0, 0], sizes = [2, 32], strides = [1, 1]} : vector<2x96xf32> to vector<2x32xf32>
    %473 = arith.addf %471, %472 : vector<2x32xf32>
    %474 = arith.negf %473 : vector<2x32xf32>
    %475 = math.exp %474 : vector<2x32xf32>
    %cst_110 = arith.constant 1.000000e+00 : f32
    %476 = vector.broadcast %cst_110 : f32 to vector<2x32xf32>
    %477 = arith.addf %476, %475 : vector<2x32xf32>
    %478 = arith.divf %476, %477 : vector<2x32xf32>
    %479 = vector.extract_strided_slice %468 {offsets = [0, 32], sizes = [2, 32], strides = [1, 1]} : vector<2x96xf32> to vector<2x32xf32>
    %480 = vector.extract_strided_slice %470 {offsets = [0, 32], sizes = [2, 32], strides = [1, 1]} : vector<2x96xf32> to vector<2x32xf32>
    %481 = arith.addf %479, %480 : vector<2x32xf32>
    %482 = arith.negf %481 : vector<2x32xf32>
    %483 = math.exp %482 : vector<2x32xf32>
    %cst_111 = arith.constant 1.000000e+00 : f32
    %484 = vector.broadcast %cst_111 : f32 to vector<2x32xf32>
    %485 = arith.addf %484, %483 : vector<2x32xf32>
    %486 = arith.divf %484, %485 : vector<2x32xf32>
    %487 = vector.extract_strided_slice %468 {offsets = [0, 64], sizes = [2, 32], strides = [1, 1]} : vector<2x96xf32> to vector<2x32xf32>
    %488 = vector.extract_strided_slice %470 {offsets = [0, 64], sizes = [2, 32], strides = [1, 1]} : vector<2x96xf32> to vector<2x32xf32>
    %489 = arith.mulf %478, %488 : vector<2x32xf32>
    %490 = arith.addf %487, %489 : vector<2x32xf32>
    %491 = math.tanh %490 : vector<2x32xf32>
    %cst_112 = arith.constant 1.000000e+00 : f32
    %492 = vector.broadcast %cst_112 : f32 to vector<2x32xf32>
    %493 = arith.subf %492, %486 : vector<2x32xf32>
    %494 = arith.mulf %493, %491 : vector<2x32xf32>
    %495 = arith.mulf %486, %430 : vector<2x32xf32>
    %496 = arith.addf %494, %495 : vector<2x32xf32>
    %c0_113 = arith.constant 0 : index
    %c6_114 = arith.constant 6 : index
    %c0_115 = arith.constant 0 : index
    %497 = vector.load %arg37[%c0_113, %c6_114, %c0_115] : memref<2x8x32xf32, #tpu.memory_space<vmem>>, vector<2x1x32xf32>
    %498 = vector.shape_cast %497 : vector<2x1x32xf32> to vector<2x32xf32>
    %499 = vector.shape_cast %466 : vector<2x32xf32> to vector<2x1x32xf32>
    tpu.vector_store %arg37[%c0_113, %c6_114, %c0_115], %499 {strides = array<i32>} : memref<2x8x32xf32, #tpu.memory_space<vmem>>, vector<2x1x32xf32>,
    %c0_116 = arith.constant 0 : index
    %c1_117 = arith.constant 1 : index
    %c0_118 = arith.constant 0 : index
    %500 = vector.load %arg38[%c0_116, %c1_117, %c0_118] : memref<2x8x32xf32, #tpu.memory_space<vmem>>, vector<2x1x32xf32>
    %501 = vector.shape_cast %500 : vector<2x1x32xf32> to vector<2x32xf32>
    %502 = vector.shape_cast %496 : vector<2x32xf32> to vector<2x1x32xf32>
    tpu.vector_store %arg38[%c0_116, %c1_117, %c0_118], %502 {strides = array<i32>} : memref<2x8x32xf32, #tpu.memory_space<vmem>>, vector<2x1x32xf32>,
    %503 = vector.extract_strided_slice %28 {offsets = [0, 7, 0], sizes = [2, 1, 96], strides = [1, 1, 1]} : vector<2x8x96xf32> to vector<2x1x96xf32>
    %504 = vector.shape_cast %503 : vector<2x1x96xf32> to vector<2x96xf32>
    %cst_119 = arith.constant dense<0.000000e+00> : vector<2x96xf32>
    %505 = tpu.matmul %466, %31, %cst_119 {dimension_numbers = #tpu.dot_dimension_numbers<[1], [0], [0], [1], [0, 0, 1, 1], [], []>} : vector<2x32xf32>, vector<32x96xf32>, vector<2x96xf32> -> vector<2x96xf32>
    %506 = arith.addf %505, %35 : vector<2x96xf32>
    %507 = vector.extract_strided_slice %504 {offsets = [0, 0], sizes = [2, 32], strides = [1, 1]} : vector<2x96xf32> to vector<2x32xf32>
    %508 = vector.extract_strided_slice %506 {offsets = [0, 0], sizes = [2, 32], strides = [1, 1]} : vector<2x96xf32> to vector<2x32xf32>
    %509 = arith.addf %507, %508 : vector<2x32xf32>
    %510 = arith.negf %509 : vector<2x32xf32>
    %511 = math.exp %510 : vector<2x32xf32>
    %cst_120 = arith.constant 1.000000e+00 : f32
    %512 = vector.broadcast %cst_120 : f32 to vector<2x32xf32>
    %513 = arith.addf %512, %511 : vector<2x32xf32>
    %514 = arith.divf %512, %513 : vector<2x32xf32>
    %515 = vector.extract_strided_slice %504 {offsets = [0, 32], sizes = [2, 32], strides = [1, 1]} : vector<2x96xf32> to vector<2x32xf32>
    %516 = vector.extract_strided_slice %506 {offsets = [0, 32], sizes = [2, 32], strides = [1, 1]} : vector<2x96xf32> to vector<2x32xf32>
    %517 = arith.addf %515, %516 : vector<2x32xf32>
    %518 = arith.negf %517 : vector<2x32xf32>
    %519 = math.exp %518 : vector<2x32xf32>
    %cst_121 = arith.constant 1.000000e+00 : f32
    %520 = vector.broadcast %cst_121 : f32 to vector<2x32xf32>
    %521 = arith.addf %520, %519 : vector<2x32xf32>
    %522 = arith.divf %520, %521 : vector<2x32xf32>
    %523 = vector.extract_strided_slice %504 {offsets = [0, 64], sizes = [2, 32], strides = [1, 1]} : vector<2x96xf32> to vector<2x32xf32>
    %524 = vector.extract_strided_slice %506 {offsets = [0, 64], sizes = [2, 32], strides = [1, 1]} : vector<2x96xf32> to vector<2x32xf32>
    %525 = arith.mulf %514, %524 : vector<2x32xf32>
    %526 = arith.addf %523, %525 : vector<2x32xf32>
    %527 = math.tanh %526 : vector<2x32xf32>
    %cst_122 = arith.constant 1.000000e+00 : f32
    %528 = vector.broadcast %cst_122 : f32 to vector<2x32xf32>
    %529 = arith.subf %528, %522 : vector<2x32xf32>
    %530 = arith.mulf %529, %527 : vector<2x32xf32>
    %531 = arith.mulf %522, %466 : vector<2x32xf32>
    %532 = arith.addf %530, %531 : vector<2x32xf32>
    %533 = vector.extract_strided_slice %30 {offsets = [0, 0, 0], sizes = [2, 1, 96], strides = [1, 1, 1]} : vector<2x8x96xf32> to vector<2x1x96xf32>
    %534 = vector.shape_cast %533 : vector<2x1x96xf32> to vector<2x96xf32>
    %cst_123 = arith.constant dense<0.000000e+00> : vector<2x96xf32>
    %535 = tpu.matmul %496, %32, %cst_123 {dimension_numbers = #tpu.dot_dimension_numbers<[1], [0], [0], [1], [0, 0, 1, 1], [], []>} : vector<2x32xf32>, vector<32x96xf32>, vector<2x96xf32> -> vector<2x96xf32>
    %536 = arith.addf %535, %38 : vector<2x96xf32>
    %537 = vector.extract_strided_slice %534 {offsets = [0, 0], sizes = [2, 32], strides = [1, 1]} : vector<2x96xf32> to vector<2x32xf32>
    %538 = vector.extract_strided_slice %536 {offsets = [0, 0], sizes = [2, 32], strides = [1, 1]} : vector<2x96xf32> to vector<2x32xf32>
    %539 = arith.addf %537, %538 : vector<2x32xf32>
    %540 = arith.negf %539 : vector<2x32xf32>
    %541 = math.exp %540 : vector<2x32xf32>
    %cst_124 = arith.constant 1.000000e+00 : f32
    %542 = vector.broadcast %cst_124 : f32 to vector<2x32xf32>
    %543 = arith.addf %542, %541 : vector<2x32xf32>
    %544 = arith.divf %542, %543 : vector<2x32xf32>
    %545 = vector.extract_strided_slice %534 {offsets = [0, 32], sizes = [2, 32], strides = [1, 1]} : vector<2x96xf32> to vector<2x32xf32>
    %546 = vector.extract_strided_slice %536 {offsets = [0, 32], sizes = [2, 32], strides = [1, 1]} : vector<2x96xf32> to vector<2x32xf32>
    %547 = arith.addf %545, %546 : vector<2x32xf32>
    %548 = arith.negf %547 : vector<2x32xf32>
    %549 = math.exp %548 : vector<2x32xf32>
    %cst_125 = arith.constant 1.000000e+00 : f32
    %550 = vector.broadcast %cst_125 : f32 to vector<2x32xf32>
    %551 = arith.addf %550, %549 : vector<2x32xf32>
    %552 = arith.divf %550, %551 : vector<2x32xf32>
    %553 = vector.extract_strided_slice %534 {offsets = [0, 64], sizes = [2, 32], strides = [1, 1]} : vector<2x96xf32> to vector<2x32xf32>
    %554 = vector.extract_strided_slice %536 {offsets = [0, 64], sizes = [2, 32], strides = [1, 1]} : vector<2x96xf32> to vector<2x32xf32>
    %555 = arith.mulf %544, %554 : vector<2x32xf32>
    %556 = arith.addf %553, %555 : vector<2x32xf32>
    %557 = math.tanh %556 : vector<2x32xf32>
    %cst_126 = arith.constant 1.000000e+00 : f32
    %558 = vector.broadcast %cst_126 : f32 to vector<2x32xf32>
    %559 = arith.subf %558, %552 : vector<2x32xf32>
    %560 = arith.mulf %559, %557 : vector<2x32xf32>
    %561 = arith.mulf %552, %496 : vector<2x32xf32>
    %562 = arith.addf %560, %561 : vector<2x32xf32>
    %c0_127 = arith.constant 0 : index
    %c7_128 = arith.constant 7 : index
    %c0_129 = arith.constant 0 : index
    %563 = vector.load %arg37[%c0_127, %c7_128, %c0_129] : memref<2x8x32xf32, #tpu.memory_space<vmem>>, vector<2x1x32xf32>
    %564 = vector.shape_cast %563 : vector<2x1x32xf32> to vector<2x32xf32>
    %565 = vector.shape_cast %532 : vector<2x32xf32> to vector<2x1x32xf32>
    tpu.vector_store %arg37[%c0_127, %c7_128, %c0_129], %565 {strides = array<i32>} : memref<2x8x32xf32, #tpu.memory_space<vmem>>, vector<2x1x32xf32>,
    %c0_130 = arith.constant 0 : index
    %c0_131 = arith.constant 0 : index
    %c0_132 = arith.constant 0 : index
    %566 = vector.load %arg38[%c0_130, %c0_131, %c0_132] : memref<2x8x32xf32, #tpu.memory_space<vmem>>, vector<2x1x32xf32>
    %567 = vector.shape_cast %566 : vector<2x1x32xf32> to vector<2x32xf32>
    %568 = vector.shape_cast %562 : vector<2x32xf32> to vector<2x1x32xf32>
    tpu.vector_store %arg38[%c0_130, %c0_131, %c0_132], %568 {strides = array<i32>} : memref<2x8x32xf32, #tpu.memory_space<vmem>>, vector<2x1x32xf32>,
    %c0_133 = arith.constant 0 : index
    %c0_134 = arith.constant 0 : index
    %c0_135 = arith.constant 0 : index
    %569 = vector.load %arg37[%c0_133, %c0_134, %c0_135] : memref<2x8x32xf32, #tpu.memory_space<vmem>>, vector<2x8x32xf32>
    %570 = vector.shape_cast %569 : vector<2x8x32xf32> to vector<16x32xf32>
    %c0_136 = arith.constant 0 : index
    %c0_137 = arith.constant 0 : index
    %c0_138 = arith.constant 0 : index
    %571 = vector.load %arg38[%c0_136, %c0_137, %c0_138] : memref<2x8x32xf32, #tpu.memory_space<vmem>>, vector<2x8x32xf32>
    %572 = vector.shape_cast %571 : vector<2x8x32xf32> to vector<16x32xf32>
    %573 = tpu.concatenate %570, %572 in 1 : vector<16x32xf32>, vector<16x32xf32> -> vector<16x64xf32>
    %574 = vector.shape_cast %573 : vector<16x64xf32> to vector<2x8x64xf32>
    %c0_139 = arith.constant 0 : index
    %c0_140 = arith.constant 0 : index
    %c0_141 = arith.constant 0 : index
    %575 = vector.load %arg1[%c0_139, %c0_140, %c0_141] : memref<2x8x16xf32, #tpu.memory_space<vmem>>, vector<2x8x16xf32>
    %576 = vector.shape_cast %575 : vector<2x8x16xf32> to vector<16x16xf32>
    %c0_142 = arith.constant 0 : index
    %c0_143 = arith.constant 0 : index
    %577 = vector.load %arg12[%c0_142, %c0_143] : memref<16x32xf32, #tpu.memory_space<vmem>>, vector<16x32xf32>
    %578 = arith.truncf %576 : vector<16x16xf32> to vector<16x16xbf16>
    %579 = arith.truncf %577 : vector<16x32xf32> to vector<16x32xbf16>
    %cst_144 = arith.constant dense<0.000000e+00> : vector<16x32xf32>
    %580 = tpu.matmul %578, %579, %cst_144 {dimension_numbers = #tpu.dot_dimension_numbers<[1], [0], [0], [1], [0, 0, 1, 1], [], []>} : vector<16x16xbf16>, vector<16x32xbf16>, vector<16x32xf32> -> vector<16x32xf32>
    %c0_145 = arith.constant 0 : index
    %c0_146 = arith.constant 0 : index
    %581 = vector.load %arg13[%c0_145, %c0_146] : memref<1x32xf32, #tpu.memory_space<vmem>>, vector<1x32xf32>
    %582 = vector.broadcast %581 : vector<1x32xf32> to vector<16x32xf32>
    %583 = arith.addf %580, %582 : vector<16x32xf32>
    %cst_147 = arith.constant 0.000000e+00 : f32
    %584 = vector.broadcast %cst_147 : f32 to vector<16x32xf32>
    %585 = arith.maximumf %583, %584 : vector<16x32xf32>
    %c0_148 = arith.constant 0 : index
    %c0_149 = arith.constant 0 : index
    %586 = vector.load %arg14[%c0_148, %c0_149] : memref<32x32xf32, #tpu.memory_space<vmem>>, vector<32x32xf32>
    %587 = arith.truncf %585 : vector<16x32xf32> to vector<16x32xbf16>
    %588 = arith.truncf %586 : vector<32x32xf32> to vector<32x32xbf16>
    %cst_150 = arith.constant dense<0.000000e+00> : vector<16x32xf32>
    %589 = tpu.matmul %587, %588, %cst_150 {dimension_numbers = #tpu.dot_dimension_numbers<[1], [0], [0], [1], [0, 0, 1, 1], [], []>} : vector<16x32xbf16>, vector<32x32xbf16>, vector<16x32xf32> -> vector<16x32xf32>
    %c0_151 = arith.constant 0 : index
    %c0_152 = arith.constant 0 : index
    %590 = vector.load %arg15[%c0_151, %c0_152] : memref<1x32xf32, #tpu.memory_space<vmem>>, vector<1x32xf32>
    %591 = vector.broadcast %590 : vector<1x32xf32> to vector<16x32xf32>
    %592 = arith.addf %589, %591 : vector<16x32xf32>
    %cst_153 = arith.constant 0.000000e+00 : f32
    %593 = vector.broadcast %cst_153 : f32 to vector<16x32xf32>
    %594 = arith.maximumf %592, %593 : vector<16x32xf32>
    %c0_154 = arith.constant 0 : index
    %c0_155 = arith.constant 0 : index
    %595 = vector.load %arg16[%c0_154, %c0_155] : memref<32x96xf32, #tpu.memory_space<vmem>>, vector<32x96xf32>
    %596 = arith.truncf %594 : vector<16x32xf32> to vector<16x32xbf16>
    %597 = arith.truncf %595 : vector<32x96xf32> to vector<32x96xbf16>
    %cst_156 = arith.constant dense<0.000000e+00> : vector<16x96xf32>
    %598 = tpu.matmul %596, %597, %cst_156 {dimension_numbers = #tpu.dot_dimension_numbers<[1], [0], [0], [1], [0, 0, 1, 1], [], []>} : vector<16x32xbf16>, vector<32x96xbf16>, vector<16x96xf32> -> vector<16x96xf32>
    %c0_157 = arith.constant 0 : index
    %c0_158 = arith.constant 0 : index
    %599 = vector.load %arg17[%c0_157, %c0_158] : memref<1x96xf32, #tpu.memory_space<vmem>>, vector<1x96xf32>
    %600 = vector.broadcast %599 : vector<1x96xf32> to vector<16x96xf32>
    %601 = arith.addf %598, %600 : vector<16x96xf32>
    %602 = vector.shape_cast %601 : vector<16x96xf32> to vector<2x8x96xf32>
    %c0_159 = arith.constant 0 : index
    %c0_160 = arith.constant 0 : index
    %603 = vector.load %arg18[%c0_159, %c0_160] : memref<32x96xf32, #tpu.memory_space<vmem>>, vector<32x96xf32>
    %c0_161 = arith.constant 0 : index
    %c0_162 = arith.constant 0 : index
    %604 = vector.load %arg19[%c0_161, %c0_162] : memref<1x96xf32, #tpu.memory_space<vmem>>, vector<1x96xf32>
    %605 = vector.shape_cast %604 : vector<1x96xf32> to vector<1x96xf32>
    %606 = vector.broadcast %605 : vector<1x96xf32> to vector<2x96xf32>
    %cst_163 = arith.constant 0.000000e+00 : f32
    %607 = vector.broadcast %cst_163 : f32 to vector<2x32xf32>
    %608 = vector.extract_strided_slice %602 {offsets = [0, 0, 0], sizes = [2, 1, 96], strides = [1, 1, 1]} : vector<2x8x96xf32> to vector<2x1x96xf32>
    %609 = vector.shape_cast %608 : vector<2x1x96xf32> to vector<2x96xf32>
    %cst_164 = arith.constant dense<0.000000e+00> : vector<2x96xf32>
    %610 = tpu.matmul %607, %603, %cst_164 {dimension_numbers = #tpu.dot_dimension_numbers<[1], [0], [0], [1], [0, 0, 1, 1], [], []>} : vector<2x32xf32>, vector<32x96xf32>, vector<2x96xf32> -> vector<2x96xf32>
    %611 = arith.addf %610, %606 : vector<2x96xf32>
    %612 = vector.extract_strided_slice %609 {offsets = [0, 0], sizes = [2, 32], strides = [1, 1]} : vector<2x96xf32> to vector<2x32xf32>
    %613 = vector.extract_strided_slice %611 {offsets = [0, 0], sizes = [2, 32], strides = [1, 1]} : vector<2x96xf32> to vector<2x32xf32>
    %614 = arith.addf %612, %613 : vector<2x32xf32>
    %615 = arith.negf %614 : vector<2x32xf32>
    %616 = math.exp %615 : vector<2x32xf32>
    %cst_165 = arith.constant 1.000000e+00 : f32
    %617 = vector.broadcast %cst_165 : f32 to vector<2x32xf32>
    %618 = arith.addf %617, %616 : vector<2x32xf32>
    %619 = arith.divf %617, %618 : vector<2x32xf32>
    %620 = vector.extract_strided_slice %609 {offsets = [0, 32], sizes = [2, 32], strides = [1, 1]} : vector<2x96xf32> to vector<2x32xf32>
    %621 = vector.extract_strided_slice %611 {offsets = [0, 32], sizes = [2, 32], strides = [1, 1]} : vector<2x96xf32> to vector<2x32xf32>
    %622 = arith.addf %620, %621 : vector<2x32xf32>
    %623 = arith.negf %622 : vector<2x32xf32>
    %624 = math.exp %623 : vector<2x32xf32>
    %cst_166 = arith.constant 1.000000e+00 : f32
    %625 = vector.broadcast %cst_166 : f32 to vector<2x32xf32>
    %626 = arith.addf %625, %624 : vector<2x32xf32>
    %627 = arith.divf %625, %626 : vector<2x32xf32>
    %628 = vector.extract_strided_slice %609 {offsets = [0, 64], sizes = [2, 32], strides = [1, 1]} : vector<2x96xf32> to vector<2x32xf32>
    %629 = vector.extract_strided_slice %611 {offsets = [0, 64], sizes = [2, 32], strides = [1, 1]} : vector<2x96xf32> to vector<2x32xf32>
    %630 = arith.mulf %619, %629 : vector<2x32xf32>
    %631 = arith.addf %628, %630 : vector<2x32xf32>
    %632 = math.tanh %631 : vector<2x32xf32>
    %cst_167 = arith.constant 1.000000e+00 : f32
    %633 = vector.broadcast %cst_167 : f32 to vector<2x32xf32>
    %634 = arith.subf %633, %627 : vector<2x32xf32>
    %635 = arith.mulf %634, %632 : vector<2x32xf32>
    %636 = arith.mulf %627, %607 : vector<2x32xf32>
    %637 = arith.addf %635, %636 : vector<2x32xf32>
    %c0_168 = arith.constant 0 : index
    %c0_169 = arith.constant 0 : index
    %c0_170 = arith.constant 0 : index
    %638 = vector.load %arg39[%c0_168, %c0_169, %c0_170] : memref<2x8x32xf32, #tpu.memory_space<vmem>>, vector<2x1x32xf32>
    %639 = vector.shape_cast %638 : vector<2x1x32xf32> to vector<2x32xf32>
    %640 = vector.shape_cast %637 : vector<2x32xf32> to vector<2x1x32xf32>
    tpu.vector_store %arg39[%c0_168, %c0_169, %c0_170], %640 {strides = array<i32>} : memref<2x8x32xf32, #tpu.memory_space<vmem>>, vector<2x1x32xf32>,
    %641 = vector.extract_strided_slice %602 {offsets = [0, 1, 0], sizes = [2, 1, 96], strides = [1, 1, 1]} : vector<2x8x96xf32> to vector<2x1x96xf32>
    %642 = vector.shape_cast %641 : vector<2x1x96xf32> to vector<2x96xf32>
    %cst_171 = arith.constant dense<0.000000e+00> : vector<2x96xf32>
    %643 = tpu.matmul %637, %603, %cst_171 {dimension_numbers = #tpu.dot_dimension_numbers<[1], [0], [0], [1], [0, 0, 1, 1], [], []>} : vector<2x32xf32>, vector<32x96xf32>, vector<2x96xf32> -> vector<2x96xf32>
    %644 = arith.addf %643, %606 : vector<2x96xf32>
    %645 = vector.extract_strided_slice %642 {offsets = [0, 0], sizes = [2, 32], strides = [1, 1]} : vector<2x96xf32> to vector<2x32xf32>
    %646 = vector.extract_strided_slice %644 {offsets = [0, 0], sizes = [2, 32], strides = [1, 1]} : vector<2x96xf32> to vector<2x32xf32>
    %647 = arith.addf %645, %646 : vector<2x32xf32>
    %648 = arith.negf %647 : vector<2x32xf32>
    %649 = math.exp %648 : vector<2x32xf32>
    %cst_172 = arith.constant 1.000000e+00 : f32
    %650 = vector.broadcast %cst_172 : f32 to vector<2x32xf32>
    %651 = arith.addf %650, %649 : vector<2x32xf32>
    %652 = arith.divf %650, %651 : vector<2x32xf32>
    %653 = vector.extract_strided_slice %642 {offsets = [0, 32], sizes = [2, 32], strides = [1, 1]} : vector<2x96xf32> to vector<2x32xf32>
    %654 = vector.extract_strided_slice %644 {offsets = [0, 32], sizes = [2, 32], strides = [1, 1]} : vector<2x96xf32> to vector<2x32xf32>
    %655 = arith.addf %653, %654 : vector<2x32xf32>
    %656 = arith.negf %655 : vector<2x32xf32>
    %657 = math.exp %656 : vector<2x32xf32>
    %cst_173 = arith.constant 1.000000e+00 : f32
    %658 = vector.broadcast %cst_173 : f32 to vector<2x32xf32>
    %659 = arith.addf %658, %657 : vector<2x32xf32>
    %660 = arith.divf %658, %659 : vector<2x32xf32>
    %661 = vector.extract_strided_slice %642 {offsets = [0, 64], sizes = [2, 32], strides = [1, 1]} : vector<2x96xf32> to vector<2x32xf32>
    %662 = vector.extract_strided_slice %644 {offsets = [0, 64], sizes = [2, 32], strides = [1, 1]} : vector<2x96xf32> to vector<2x32xf32>
    %663 = arith.mulf %652, %662 : vector<2x32xf32>
    %664 = arith.addf %661, %663 : vector<2x32xf32>
    %665 = math.tanh %664 : vector<2x32xf32>
    %cst_174 = arith.constant 1.000000e+00 : f32
    %666 = vector.broadcast %cst_174 : f32 to vector<2x32xf32>
    %667 = arith.subf %666, %660 : vector<2x32xf32>
    %668 = arith.mulf %667, %665 : vector<2x32xf32>
    %669 = arith.mulf %660, %637 : vector<2x32xf32>
    %670 = arith.addf %668, %669 : vector<2x32xf32>
    %c0_175 = arith.constant 0 : index
    %c1_176 = arith.constant 1 : index
    %c0_177 = arith.constant 0 : index
    %671 = vector.load %arg39[%c0_175, %c1_176, %c0_177] : memref<2x8x32xf32, #tpu.memory_space<vmem>>, vector<2x1x32xf32>
    %672 = vector.shape_cast %671 : vector<2x1x32xf32> to vector<2x32xf32>
    %673 = vector.shape_cast %670 : vector<2x32xf32> to vector<2x1x32xf32>
    tpu.vector_store %arg39[%c0_175, %c1_176, %c0_177], %673 {strides = array<i32>} : memref<2x8x32xf32, #tpu.memory_space<vmem>>, vector<2x1x32xf32>,
    %674 = vector.extract_strided_slice %602 {offsets = [0, 2, 0], sizes = [2, 1, 96], strides = [1, 1, 1]} : vector<2x8x96xf32> to vector<2x1x96xf32>
    %675 = vector.shape_cast %674 : vector<2x1x96xf32> to vector<2x96xf32>
    %cst_178 = arith.constant dense<0.000000e+00> : vector<2x96xf32>
    %676 = tpu.matmul %670, %603, %cst_178 {dimension_numbers = #tpu.dot_dimension_numbers<[1], [0], [0], [1], [0, 0, 1, 1], [], []>} : vector<2x32xf32>, vector<32x96xf32>, vector<2x96xf32> -> vector<2x96xf32>
    %677 = arith.addf %676, %606 : vector<2x96xf32>
    %678 = vector.extract_strided_slice %675 {offsets = [0, 0], sizes = [2, 32], strides = [1, 1]} : vector<2x96xf32> to vector<2x32xf32>
    %679 = vector.extract_strided_slice %677 {offsets = [0, 0], sizes = [2, 32], strides = [1, 1]} : vector<2x96xf32> to vector<2x32xf32>
    %680 = arith.addf %678, %679 : vector<2x32xf32>
    %681 = arith.negf %680 : vector<2x32xf32>
    %682 = math.exp %681 : vector<2x32xf32>
    %cst_179 = arith.constant 1.000000e+00 : f32
    %683 = vector.broadcast %cst_179 : f32 to vector<2x32xf32>
    %684 = arith.addf %683, %682 : vector<2x32xf32>
    %685 = arith.divf %683, %684 : vector<2x32xf32>
    %686 = vector.extract_strided_slice %675 {offsets = [0, 32], sizes = [2, 32], strides = [1, 1]} : vector<2x96xf32> to vector<2x32xf32>
    %687 = vector.extract_strided_slice %677 {offsets = [0, 32], sizes = [2, 32], strides = [1, 1]} : vector<2x96xf32> to vector<2x32xf32>
    %688 = arith.addf %686, %687 : vector<2x32xf32>
    %689 = arith.negf %688 : vector<2x32xf32>
    %690 = math.exp %689 : vector<2x32xf32>
    %cst_180 = arith.constant 1.000000e+00 : f32
    %691 = vector.broadcast %cst_180 : f32 to vector<2x32xf32>
    %692 = arith.addf %691, %690 : vector<2x32xf32>
    %693 = arith.divf %691, %692 : vector<2x32xf32>
    %694 = vector.extract_strided_slice %675 {offsets = [0, 64], sizes = [2, 32], strides = [1, 1]} : vector<2x96xf32> to vector<2x32xf32>
    %695 = vector.extract_strided_slice %677 {offsets = [0, 64], sizes = [2, 32], strides = [1, 1]} : vector<2x96xf32> to vector<2x32xf32>
    %696 = arith.mulf %685, %695 : vector<2x32xf32>
    %697 = arith.addf %694, %696 : vector<2x32xf32>
    %698 = math.tanh %697 : vector<2x32xf32>
    %cst_181 = arith.constant 1.000000e+00 : f32
    %699 = vector.broadcast %cst_181 : f32 to vector<2x32xf32>
    %700 = arith.subf %699, %693 : vector<2x32xf32>
    %701 = arith.mulf %700, %698 : vector<2x32xf32>
    %702 = arith.mulf %693, %670 : vector<2x32xf32>
    %703 = arith.addf %701, %702 : vector<2x32xf32>
    %c0_182 = arith.constant 0 : index
    %c2_183 = arith.constant 2 : index
    %c0_184 = arith.constant 0 : index
    %704 = vector.load %arg39[%c0_182, %c2_183, %c0_184] : memref<2x8x32xf32, #tpu.memory_space<vmem>>, vector<2x1x32xf32>
    %705 = vector.shape_cast %704 : vector<2x1x32xf32> to vector<2x32xf32>
    %706 = vector.shape_cast %703 : vector<2x32xf32> to vector<2x1x32xf32>
    tpu.vector_store %arg39[%c0_182, %c2_183, %c0_184], %706 {strides = array<i32>} : memref<2x8x32xf32, #tpu.memory_space<vmem>>, vector<2x1x32xf32>,
    %707 = vector.extract_strided_slice %602 {offsets = [0, 3, 0], sizes = [2, 1, 96], strides = [1, 1, 1]} : vector<2x8x96xf32> to vector<2x1x96xf32>
    %708 = vector.shape_cast %707 : vector<2x1x96xf32> to vector<2x96xf32>
    %cst_185 = arith.constant dense<0.000000e+00> : vector<2x96xf32>
    %709 = tpu.matmul %703, %603, %cst_185 {dimension_numbers = #tpu.dot_dimension_numbers<[1], [0], [0], [1], [0, 0, 1, 1], [], []>} : vector<2x32xf32>, vector<32x96xf32>, vector<2x96xf32> -> vector<2x96xf32>
    %710 = arith.addf %709, %606 : vector<2x96xf32>
    %711 = vector.extract_strided_slice %708 {offsets = [0, 0], sizes = [2, 32], strides = [1, 1]} : vector<2x96xf32> to vector<2x32xf32>
    %712 = vector.extract_strided_slice %710 {offsets = [0, 0], sizes = [2, 32], strides = [1, 1]} : vector<2x96xf32> to vector<2x32xf32>
    %713 = arith.addf %711, %712 : vector<2x32xf32>
    %714 = arith.negf %713 : vector<2x32xf32>
    %715 = math.exp %714 : vector<2x32xf32>
    %cst_186 = arith.constant 1.000000e+00 : f32
    %716 = vector.broadcast %cst_186 : f32 to vector<2x32xf32>
    %717 = arith.addf %716, %715 : vector<2x32xf32>
    %718 = arith.divf %716, %717 : vector<2x32xf32>
    %719 = vector.extract_strided_slice %708 {offsets = [0, 32], sizes = [2, 32], strides = [1, 1]} : vector<2x96xf32> to vector<2x32xf32>
    %720 = vector.extract_strided_slice %710 {offsets = [0, 32], sizes = [2, 32], strides = [1, 1]} : vector<2x96xf32> to vector<2x32xf32>
    %721 = arith.addf %719, %720 : vector<2x32xf32>
    %722 = arith.negf %721 : vector<2x32xf32>
    %723 = math.exp %722 : vector<2x32xf32>
    %cst_187 = arith.constant 1.000000e+00 : f32
    %724 = vector.broadcast %cst_187 : f32 to vector<2x32xf32>
    %725 = arith.addf %724, %723 : vector<2x32xf32>
    %726 = arith.divf %724, %725 : vector<2x32xf32>
    %727 = vector.extract_strided_slice %708 {offsets = [0, 64], sizes = [2, 32], strides = [1, 1]} : vector<2x96xf32> to vector<2x32xf32>
    %728 = vector.extract_strided_slice %710 {offsets = [0, 64], sizes = [2, 32], strides = [1, 1]} : vector<2x96xf32> to vector<2x32xf32>
    %729 = arith.mulf %718, %728 : vector<2x32xf32>
    %730 = arith.addf %727, %729 : vector<2x32xf32>
    %731 = math.tanh %730 : vector<2x32xf32>
    %cst_188 = arith.constant 1.000000e+00 : f32
    %732 = vector.broadcast %cst_188 : f32 to vector<2x32xf32>
    %733 = arith.subf %732, %726 : vector<2x32xf32>
    %734 = arith.mulf %733, %731 : vector<2x32xf32>
    %735 = arith.mulf %726, %703 : vector<2x32xf32>
    %736 = arith.addf %734, %735 : vector<2x32xf32>
    %c0_189 = arith.constant 0 : index
    %c3_190 = arith.constant 3 : index
    %c0_191 = arith.constant 0 : index
    %737 = vector.load %arg39[%c0_189, %c3_190, %c0_191] : memref<2x8x32xf32, #tpu.memory_space<vmem>>, vector<2x1x32xf32>
    %738 = vector.shape_cast %737 : vector<2x1x32xf32> to vector<2x32xf32>
    %739 = vector.shape_cast %736 : vector<2x32xf32> to vector<2x1x32xf32>
    tpu.vector_store %arg39[%c0_189, %c3_190, %c0_191], %739 {strides = array<i32>} : memref<2x8x32xf32, #tpu.memory_space<vmem>>, vector<2x1x32xf32>,
    %740 = vector.extract_strided_slice %602 {offsets = [0, 4, 0], sizes = [2, 1, 96], strides = [1, 1, 1]} : vector<2x8x96xf32> to vector<2x1x96xf32>
    %741 = vector.shape_cast %740 : vector<2x1x96xf32> to vector<2x96xf32>
    %cst_192 = arith.constant dense<0.000000e+00> : vector<2x96xf32>
    %742 = tpu.matmul %736, %603, %cst_192 {dimension_numbers = #tpu.dot_dimension_numbers<[1], [0], [0], [1], [0, 0, 1, 1], [], []>} : vector<2x32xf32>, vector<32x96xf32>, vector<2x96xf32> -> vector<2x96xf32>
    %743 = arith.addf %742, %606 : vector<2x96xf32>
    %744 = vector.extract_strided_slice %741 {offsets = [0, 0], sizes = [2, 32], strides = [1, 1]} : vector<2x96xf32> to vector<2x32xf32>
    %745 = vector.extract_strided_slice %743 {offsets = [0, 0], sizes = [2, 32], strides = [1, 1]} : vector<2x96xf32> to vector<2x32xf32>
    %746 = arith.addf %744, %745 : vector<2x32xf32>
    %747 = arith.negf %746 : vector<2x32xf32>
    %748 = math.exp %747 : vector<2x32xf32>
    %cst_193 = arith.constant 1.000000e+00 : f32
    %749 = vector.broadcast %cst_193 : f32 to vector<2x32xf32>
    %750 = arith.addf %749, %748 : vector<2x32xf32>
    %751 = arith.divf %749, %750 : vector<2x32xf32>
    %752 = vector.extract_strided_slice %741 {offsets = [0, 32], sizes = [2, 32], strides = [1, 1]} : vector<2x96xf32> to vector<2x32xf32>
    %753 = vector.extract_strided_slice %743 {offsets = [0, 32], sizes = [2, 32], strides = [1, 1]} : vector<2x96xf32> to vector<2x32xf32>
    %754 = arith.addf %752, %753 : vector<2x32xf32>
    %755 = arith.negf %754 : vector<2x32xf32>
    %756 = math.exp %755 : vector<2x32xf32>
    %cst_194 = arith.constant 1.000000e+00 : f32
    %757 = vector.broadcast %cst_194 : f32 to vector<2x32xf32>
    %758 = arith.addf %757, %756 : vector<2x32xf32>
    %759 = arith.divf %757, %758 : vector<2x32xf32>
    %760 = vector.extract_strided_slice %741 {offsets = [0, 64], sizes = [2, 32], strides = [1, 1]} : vector<2x96xf32> to vector<2x32xf32>
    %761 = vector.extract_strided_slice %743 {offsets = [0, 64], sizes = [2, 32], strides = [1, 1]} : vector<2x96xf32> to vector<2x32xf32>
    %762 = arith.mulf %751, %761 : vector<2x32xf32>
    %763 = arith.addf %760, %762 : vector<2x32xf32>
    %764 = math.tanh %763 : vector<2x32xf32>
    %cst_195 = arith.constant 1.000000e+00 : f32
    %765 = vector.broadcast %cst_195 : f32 to vector<2x32xf32>
    %766 = arith.subf %765, %759 : vector<2x32xf32>
    %767 = arith.mulf %766, %764 : vector<2x32xf32>
    %768 = arith.mulf %759, %736 : vector<2x32xf32>
    %769 = arith.addf %767, %768 : vector<2x32xf32>
    %c0_196 = arith.constant 0 : index
    %c4_197 = arith.constant 4 : index
    %c0_198 = arith.constant 0 : index
    %770 = vector.load %arg39[%c0_196, %c4_197, %c0_198] : memref<2x8x32xf32, #tpu.memory_space<vmem>>, vector<2x1x32xf32>
    %771 = vector.shape_cast %770 : vector<2x1x32xf32> to vector<2x32xf32>
    %772 = vector.shape_cast %769 : vector<2x32xf32> to vector<2x1x32xf32>
    tpu.vector_store %arg39[%c0_196, %c4_197, %c0_198], %772 {strides = array<i32>} : memref<2x8x32xf32, #tpu.memory_space<vmem>>, vector<2x1x32xf32>,
    %773 = vector.extract_strided_slice %602 {offsets = [0, 5, 0], sizes = [2, 1, 96], strides = [1, 1, 1]} : vector<2x8x96xf32> to vector<2x1x96xf32>
    %774 = vector.shape_cast %773 : vector<2x1x96xf32> to vector<2x96xf32>
    %cst_199 = arith.constant dense<0.000000e+00> : vector<2x96xf32>
    %775 = tpu.matmul %769, %603, %cst_199 {dimension_numbers = #tpu.dot_dimension_numbers<[1], [0], [0], [1], [0, 0, 1, 1], [], []>} : vector<2x32xf32>, vector<32x96xf32>, vector<2x96xf32> -> vector<2x96xf32>
    %776 = arith.addf %775, %606 : vector<2x96xf32>
    %777 = vector.extract_strided_slice %774 {offsets = [0, 0], sizes = [2, 32], strides = [1, 1]} : vector<2x96xf32> to vector<2x32xf32>
    %778 = vector.extract_strided_slice %776 {offsets = [0, 0], sizes = [2, 32], strides = [1, 1]} : vector<2x96xf32> to vector<2x32xf32>
    %779 = arith.addf %777, %778 : vector<2x32xf32>
    %780 = arith.negf %779 : vector<2x32xf32>
    %781 = math.exp %780 : vector<2x32xf32>
    %cst_200 = arith.constant 1.000000e+00 : f32
    %782 = vector.broadcast %cst_200 : f32 to vector<2x32xf32>
    %783 = arith.addf %782, %781 : vector<2x32xf32>
    %784 = arith.divf %782, %783 : vector<2x32xf32>
    %785 = vector.extract_strided_slice %774 {offsets = [0, 32], sizes = [2, 32], strides = [1, 1]} : vector<2x96xf32> to vector<2x32xf32>
    %786 = vector.extract_strided_slice %776 {offsets = [0, 32], sizes = [2, 32], strides = [1, 1]} : vector<2x96xf32> to vector<2x32xf32>
    %787 = arith.addf %785, %786 : vector<2x32xf32>
    %788 = arith.negf %787 : vector<2x32xf32>
    %789 = math.exp %788 : vector<2x32xf32>
    %cst_201 = arith.constant 1.000000e+00 : f32
    %790 = vector.broadcast %cst_201 : f32 to vector<2x32xf32>
    %791 = arith.addf %790, %789 : vector<2x32xf32>
    %792 = arith.divf %790, %791 : vector<2x32xf32>
    %793 = vector.extract_strided_slice %774 {offsets = [0, 64], sizes = [2, 32], strides = [1, 1]} : vector<2x96xf32> to vector<2x32xf32>
    %794 = vector.extract_strided_slice %776 {offsets = [0, 64], sizes = [2, 32], strides = [1, 1]} : vector<2x96xf32> to vector<2x32xf32>
    %795 = arith.mulf %784, %794 : vector<2x32xf32>
    %796 = arith.addf %793, %795 : vector<2x32xf32>
    %797 = math.tanh %796 : vector<2x32xf32>
    %cst_202 = arith.constant 1.000000e+00 : f32
    %798 = vector.broadcast %cst_202 : f32 to vector<2x32xf32>
    %799 = arith.subf %798, %792 : vector<2x32xf32>
    %800 = arith.mulf %799, %797 : vector<2x32xf32>
    %801 = arith.mulf %792, %769 : vector<2x32xf32>
    %802 = arith.addf %800, %801 : vector<2x32xf32>
    %c0_203 = arith.constant 0 : index
    %c5_204 = arith.constant 5 : index
    %c0_205 = arith.constant 0 : index
    %803 = vector.load %arg39[%c0_203, %c5_204, %c0_205] : memref<2x8x32xf32, #tpu.memory_space<vmem>>, vector<2x1x32xf32>
    %804 = vector.shape_cast %803 : vector<2x1x32xf32> to vector<2x32xf32>
    %805 = vector.shape_cast %802 : vector<2x32xf32> to vector<2x1x32xf32>
    tpu.vector_store %arg39[%c0_203, %c5_204, %c0_205], %805 {strides = array<i32>} : memref<2x8x32xf32, #tpu.memory_space<vmem>>, vector<2x1x32xf32>,
    %806 = vector.extract_strided_slice %602 {offsets = [0, 6, 0], sizes = [2, 1, 96], strides = [1, 1, 1]} : vector<2x8x96xf32> to vector<2x1x96xf32>
    %807 = vector.shape_cast %806 : vector<2x1x96xf32> to vector<2x96xf32>
    %cst_206 = arith.constant dense<0.000000e+00> : vector<2x96xf32>
    %808 = tpu.matmul %802, %603, %cst_206 {dimension_numbers = #tpu.dot_dimension_numbers<[1], [0], [0], [1], [0, 0, 1, 1], [], []>} : vector<2x32xf32>, vector<32x96xf32>, vector<2x96xf32> -> vector<2x96xf32>
    %809 = arith.addf %808, %606 : vector<2x96xf32>
    %810 = vector.extract_strided_slice %807 {offsets = [0, 0], sizes = [2, 32], strides = [1, 1]} : vector<2x96xf32> to vector<2x32xf32>
    %811 = vector.extract_strided_slice %809 {offsets = [0, 0], sizes = [2, 32], strides = [1, 1]} : vector<2x96xf32> to vector<2x32xf32>
    %812 = arith.addf %810, %811 : vector<2x32xf32>
    %813 = arith.negf %812 : vector<2x32xf32>
    %814 = math.exp %813 : vector<2x32xf32>
    %cst_207 = arith.constant 1.000000e+00 : f32
    %815 = vector.broadcast %cst_207 : f32 to vector<2x32xf32>
    %816 = arith.addf %815, %814 : vector<2x32xf32>
    %817 = arith.divf %815, %816 : vector<2x32xf32>
    %818 = vector.extract_strided_slice %807 {offsets = [0, 32], sizes = [2, 32], strides = [1, 1]} : vector<2x96xf32> to vector<2x32xf32>
    %819 = vector.extract_strided_slice %809 {offsets = [0, 32], sizes = [2, 32], strides = [1, 1]} : vector<2x96xf32> to vector<2x32xf32>
    %820 = arith.addf %818, %819 : vector<2x32xf32>
    %821 = arith.negf %820 : vector<2x32xf32>
    %822 = math.exp %821 : vector<2x32xf32>
    %cst_208 = arith.constant 1.000000e+00 : f32
    %823 = vector.broadcast %cst_208 : f32 to vector<2x32xf32>
    %824 = arith.addf %823, %822 : vector<2x32xf32>
    %825 = arith.divf %823, %824 : vector<2x32xf32>
    %826 = vector.extract_strided_slice %807 {offsets = [0, 64], sizes = [2, 32], strides = [1, 1]} : vector<2x96xf32> to vector<2x32xf32>
    %827 = vector.extract_strided_slice %809 {offsets = [0, 64], sizes = [2, 32], strides = [1, 1]} : vector<2x96xf32> to vector<2x32xf32>
    %828 = arith.mulf %817, %827 : vector<2x32xf32>
    %829 = arith.addf %826, %828 : vector<2x32xf32>
    %830 = math.tanh %829 : vector<2x32xf32>
    %cst_209 = arith.constant 1.000000e+00 : f32
    %831 = vector.broadcast %cst_209 : f32 to vector<2x32xf32>
    %832 = arith.subf %831, %825 : vector<2x32xf32>
    %833 = arith.mulf %832, %830 : vector<2x32xf32>
    %834 = arith.mulf %825, %802 : vector<2x32xf32>
    %835 = arith.addf %833, %834 : vector<2x32xf32>
    %c0_210 = arith.constant 0 : index
    %c6_211 = arith.constant 6 : index
    %c0_212 = arith.constant 0 : index
    %836 = vector.load %arg39[%c0_210, %c6_211, %c0_212] : memref<2x8x32xf32, #tpu.memory_space<vmem>>, vector<2x1x32xf32>
    %837 = vector.shape_cast %836 : vector<2x1x32xf32> to vector<2x32xf32>
    %838 = vector.shape_cast %835 : vector<2x32xf32> to vector<2x1x32xf32>
    tpu.vector_store %arg39[%c0_210, %c6_211, %c0_212], %838 {strides = array<i32>} : memref<2x8x32xf32, #tpu.memory_space<vmem>>, vector<2x1x32xf32>,
    %839 = vector.extract_strided_slice %602 {offsets = [0, 7, 0], sizes = [2, 1, 96], strides = [1, 1, 1]} : vector<2x8x96xf32> to vector<2x1x96xf32>
    %840 = vector.shape_cast %839 : vector<2x1x96xf32> to vector<2x96xf32>
    %cst_213 = arith.constant dense<0.000000e+00> : vector<2x96xf32>
    %841 = tpu.matmul %835, %603, %cst_213 {dimension_numbers = #tpu.dot_dimension_numbers<[1], [0], [0], [1], [0, 0, 1, 1], [], []>} : vector<2x32xf32>, vector<32x96xf32>, vector<2x96xf32> -> vector<2x96xf32>
    %842 = arith.addf %841, %606 : vector<2x96xf32>
    %843 = vector.extract_strided_slice %840 {offsets = [0, 0], sizes = [2, 32], strides = [1, 1]} : vector<2x96xf32> to vector<2x32xf32>
    %844 = vector.extract_strided_slice %842 {offsets = [0, 0], sizes = [2, 32], strides = [1, 1]} : vector<2x96xf32> to vector<2x32xf32>
    %845 = arith.addf %843, %844 : vector<2x32xf32>
    %846 = arith.negf %845 : vector<2x32xf32>
    %847 = math.exp %846 : vector<2x32xf32>
    %cst_214 = arith.constant 1.000000e+00 : f32
    %848 = vector.broadcast %cst_214 : f32 to vector<2x32xf32>
    %849 = arith.addf %848, %847 : vector<2x32xf32>
    %850 = arith.divf %848, %849 : vector<2x32xf32>
    %851 = vector.extract_strided_slice %840 {offsets = [0, 32], sizes = [2, 32], strides = [1, 1]} : vector<2x96xf32> to vector<2x32xf32>
    %852 = vector.extract_strided_slice %842 {offsets = [0, 32], sizes = [2, 32], strides = [1, 1]} : vector<2x96xf32> to vector<2x32xf32>
    %853 = arith.addf %851, %852 : vector<2x32xf32>
    %854 = arith.negf %853 : vector<2x32xf32>
    %855 = math.exp %854 : vector<2x32xf32>
    %cst_215 = arith.constant 1.000000e+00 : f32
    %856 = vector.broadcast %cst_215 : f32 to vector<2x32xf32>
    %857 = arith.addf %856, %855 : vector<2x32xf32>
    %858 = arith.divf %856, %857 : vector<2x32xf32>
    %859 = vector.extract_strided_slice %840 {offsets = [0, 64], sizes = [2, 32], strides = [1, 1]} : vector<2x96xf32> to vector<2x32xf32>
    %860 = vector.extract_strided_slice %842 {offsets = [0, 64], sizes = [2, 32], strides = [1, 1]} : vector<2x96xf32> to vector<2x32xf32>
    %861 = arith.mulf %850, %860 : vector<2x32xf32>
    %862 = arith.addf %859, %861 : vector<2x32xf32>
    %863 = math.tanh %862 : vector<2x32xf32>
    %cst_216 = arith.constant 1.000000e+00 : f32
    %864 = vector.broadcast %cst_216 : f32 to vector<2x32xf32>
    %865 = arith.subf %864, %858 : vector<2x32xf32>
    %866 = arith.mulf %865, %863 : vector<2x32xf32>
    %867 = arith.mulf %858, %835 : vector<2x32xf32>
    %868 = arith.addf %866, %867 : vector<2x32xf32>
    %c0_217 = arith.constant 0 : index
    %c7_218 = arith.constant 7 : index
    %c0_219 = arith.constant 0 : index
    %869 = vector.load %arg39[%c0_217, %c7_218, %c0_219] : memref<2x8x32xf32, #tpu.memory_space<vmem>>, vector<2x1x32xf32>
    %870 = vector.shape_cast %869 : vector<2x1x32xf32> to vector<2x32xf32>
    %871 = vector.shape_cast %868 : vector<2x32xf32> to vector<2x1x32xf32>
    tpu.vector_store %arg39[%c0_217, %c7_218, %c0_219], %871 {strides = array<i32>} : memref<2x8x32xf32, #tpu.memory_space<vmem>>, vector<2x1x32xf32>,
    %c0_220 = arith.constant 0 : index
    %c0_221 = arith.constant 0 : index
    %c0_222 = arith.constant 0 : index
    %872 = vector.load %arg39[%c0_220, %c0_221, %c0_222] : memref<2x8x32xf32, #tpu.memory_space<vmem>>, vector<2x8x32xf32>
    %873 = vector.shape_cast %872 : vector<2x8x32xf32> to vector<16x32xf32>
    %c0_223 = arith.constant 0 : index
    %c0_224 = arith.constant 0 : index
    %874 = vector.load %arg20[%c0_223, %c0_224] : memref<32x64xf32, #tpu.memory_space<vmem>>, vector<32x64xf32>
    %875 = arith.truncf %873 : vector<16x32xf32> to vector<16x32xbf16>
    %876 = arith.truncf %874 : vector<32x64xf32> to vector<32x64xbf16>
    %cst_225 = arith.constant dense<0.000000e+00> : vector<16x64xf32>
    %877 = tpu.matmul %875, %876, %cst_225 {dimension_numbers = #tpu.dot_dimension_numbers<[1], [0], [0], [1], [0, 0, 1, 1], [], []>} : vector<16x32xbf16>, vector<32x64xbf16>, vector<16x64xf32> -> vector<16x64xf32>
    %c0_226 = arith.constant 0 : index
    %c0_227 = arith.constant 0 : index
    %878 = vector.load %arg21[%c0_226, %c0_227] : memref<1x64xf32, #tpu.memory_space<vmem>>, vector<1x64xf32>
    %879 = vector.broadcast %878 : vector<1x64xf32> to vector<16x64xf32>
    %880 = arith.addf %877, %879 : vector<16x64xf32>
    %881 = vector.shape_cast %880 : vector<16x64xf32> to vector<2x8x64xf32>
    %882 = arith.truncf %881 : vector<2x8x64xf32> to vector<2x8x64xbf16>
    %883 = arith.truncf %574 : vector<2x8x64xf32> to vector<2x8x64xbf16>
    "tpu.trace_start"() <{level = 10 : i32, message = "nqh,nth->nqt"}> : () -> ()
    %cst_228 = arith.constant dense<0.000000e+00> : vector<2x8x8xf32>
    %884 = tpu.matmul %882, %883, %cst_228 {dimension_numbers = #tpu.dot_dimension_numbers<[2], [2], [1], [1], [0, 0, 0, 1, 1, 1], [0], [0]>} : vector<2x8x64xbf16>, vector<2x8x64xbf16>, vector<2x8x8xf32> -> vector<2x8x8xf32>
    "tpu.trace_stop"() : () -> ()
    %cst_229 = arith.constant dense<0xFF800000> : vector<2x8xf32>
    %885 = vector.multi_reduction <maximumf>, %884, %cst_229 [2] : vector<2x8x8xf32> to vector<2x8xf32>
    %886 = vector.shape_cast %885 : vector<2x8xf32> to vector<2x8x1xf32>
    %887 = vector.broadcast %886 : vector<2x8x1xf32> to vector<2x8x8xf32>
    %888 = arith.subf %884, %887 : vector<2x8x8xf32>
    %889 = math.exp %888 : vector<2x8x8xf32>
    %cst_230 = arith.constant dense<0.000000e+00> : vector<2x8xf32>
    %890 = vector.multi_reduction <add>, %889, %cst_230 [2] : vector<2x8x8xf32> to vector<2x8xf32>
    %891 = vector.shape_cast %890 : vector<2x8xf32> to vector<2x8x1xf32>
    %892 = vector.broadcast %891 : vector<2x8x1xf32> to vector<2x8x8xf32>
    %893 = arith.divf %889, %892 : vector<2x8x8xf32>
    %894 = arith.truncf %893 : vector<2x8x8xf32> to vector<2x8x8xbf16>
    %895 = arith.truncf %574 : vector<2x8x64xf32> to vector<2x8x64xbf16>
    "tpu.trace_start"() <{level = 10 : i32, message = "nqt,nth->nqh"}> : () -> ()
    %cst_231 = arith.constant dense<0.000000e+00> : vector<2x8x64xf32>
    %896 = tpu.matmul %894, %895, %cst_231 {dimension_numbers = #tpu.dot_dimension_numbers<[2], [1], [1], [2], [0, 0, 0, 1, 1, 2], [0], [0]>} : vector<2x8x8xbf16>, vector<2x8x64xbf16>, vector<2x8x64xf32> -> vector<2x8x64xf32>
    "tpu.trace_stop"() : () -> ()
    %897 = vector.shape_cast %896 : vector<2x8x64xf32> to vector<16x64xf32>
    %898 = tpu.concatenate %873, %897 in 1 : vector<16x32xf32>, vector<16x64xf32> -> vector<16x96xf32>
    %c0_232 = arith.constant 0 : index
    %c0_233 = arith.constant 0 : index
    %899 = vector.load %arg22[%c0_232, %c0_233] : memref<96x32xf32, #tpu.memory_space<vmem>>, vector<96x32xf32>
    %900 = arith.truncf %898 : vector<16x96xf32> to vector<16x96xbf16>
    %901 = arith.truncf %899 : vector<96x32xf32> to vector<96x32xbf16>
    %cst_234 = arith.constant dense<0.000000e+00> : vector<16x32xf32>
    %902 = tpu.matmul %900, %901, %cst_234 {dimension_numbers = #tpu.dot_dimension_numbers<[1], [0], [0], [1], [0, 0, 1, 1], [], []>} : vector<16x96xbf16>, vector<96x32xbf16>, vector<16x32xf32> -> vector<16x32xf32>
    %c0_235 = arith.constant 0 : index
    %c0_236 = arith.constant 0 : index
    %903 = vector.load %arg23[%c0_235, %c0_236] : memref<1x32xf32, #tpu.memory_space<vmem>>, vector<1x32xf32>
    %904 = vector.broadcast %903 : vector<1x32xf32> to vector<16x32xf32>
    %905 = arith.addf %902, %904 : vector<16x32xf32>
    %c0_237 = arith.constant 0 : index
    %c0_238 = arith.constant 0 : index
    %906 = vector.load %arg24[%c0_237, %c0_238] : memref<32x96xf32, #tpu.memory_space<vmem>>, vector<32x96xf32>
    %907 = arith.truncf %905 : vector<16x32xf32> to vector<16x32xbf16>
    %908 = arith.truncf %906 : vector<32x96xf32> to vector<32x96xbf16>
    %cst_239 = arith.constant dense<0.000000e+00> : vector<16x96xf32>
    %909 = tpu.matmul %907, %908, %cst_239 {dimension_numbers = #tpu.dot_dimension_numbers<[1], [0], [0], [1], [0, 0, 1, 1], [], []>} : vector<16x32xbf16>, vector<32x96xbf16>, vector<16x96xf32> -> vector<16x96xf32>
    %c0_240 = arith.constant 0 : index
    %c0_241 = arith.constant 0 : index
    %910 = vector.load %arg25[%c0_240, %c0_241] : memref<1x96xf32, #tpu.memory_space<vmem>>, vector<1x96xf32>
    %911 = vector.broadcast %910 : vector<1x96xf32> to vector<16x96xf32>
    %912 = arith.addf %909, %911 : vector<16x96xf32>
    %913 = vector.shape_cast %912 : vector<16x96xf32> to vector<2x8x96xf32>
    %c0_242 = arith.constant 0 : index
    %c0_243 = arith.constant 0 : index
    %914 = vector.load %arg26[%c0_242, %c0_243] : memref<32x96xf32, #tpu.memory_space<vmem>>, vector<32x96xf32>
    %c0_244 = arith.constant 0 : index
    %c0_245 = arith.constant 0 : index
    %915 = vector.load %arg27[%c0_244, %c0_245] : memref<1x96xf32, #tpu.memory_space<vmem>>, vector<1x96xf32>
    %916 = vector.shape_cast %915 : vector<1x96xf32> to vector<1x96xf32>
    %917 = vector.broadcast %916 : vector<1x96xf32> to vector<2x96xf32>
    %cst_246 = arith.constant 0.000000e+00 : f32
    %918 = vector.broadcast %cst_246 : f32 to vector<2x32xf32>
    %919 = vector.extract_strided_slice %913 {offsets = [0, 0, 0], sizes = [2, 1, 96], strides = [1, 1, 1]} : vector<2x8x96xf32> to vector<2x1x96xf32>
    %920 = vector.shape_cast %919 : vector<2x1x96xf32> to vector<2x96xf32>
    %cst_247 = arith.constant dense<0.000000e+00> : vector<2x96xf32>
    %921 = tpu.matmul %918, %914, %cst_247 {dimension_numbers = #tpu.dot_dimension_numbers<[1], [0], [0], [1], [0, 0, 1, 1], [], []>} : vector<2x32xf32>, vector<32x96xf32>, vector<2x96xf32> -> vector<2x96xf32>
    %922 = arith.addf %921, %917 : vector<2x96xf32>
    %923 = vector.extract_strided_slice %920 {offsets = [0, 0], sizes = [2, 32], strides = [1, 1]} : vector<2x96xf32> to vector<2x32xf32>
    %924 = vector.extract_strided_slice %922 {offsets = [0, 0], sizes = [2, 32], strides = [1, 1]} : vector<2x96xf32> to vector<2x32xf32>
    %925 = arith.addf %923, %924 : vector<2x32xf32>
    %926 = arith.negf %925 : vector<2x32xf32>
    %927 = math.exp %926 : vector<2x32xf32>
    %cst_248 = arith.constant 1.000000e+00 : f32
    %928 = vector.broadcast %cst_248 : f32 to vector<2x32xf32>
    %929 = arith.addf %928, %927 : vector<2x32xf32>
    %930 = arith.divf %928, %929 : vector<2x32xf32>
    %931 = vector.extract_strided_slice %920 {offsets = [0, 32], sizes = [2, 32], strides = [1, 1]} : vector<2x96xf32> to vector<2x32xf32>
    %932 = vector.extract_strided_slice %922 {offsets = [0, 32], sizes = [2, 32], strides = [1, 1]} : vector<2x96xf32> to vector<2x32xf32>
    %933 = arith.addf %931, %932 : vector<2x32xf32>
    %934 = arith.negf %933 : vector<2x32xf32>
    %935 = math.exp %934 : vector<2x32xf32>
    %cst_249 = arith.constant 1.000000e+00 : f32
    %936 = vector.broadcast %cst_249 : f32 to vector<2x32xf32>
    %937 = arith.addf %936, %935 : vector<2x32xf32>
    %938 = arith.divf %936, %937 : vector<2x32xf32>
    %939 = vector.extract_strided_slice %920 {offsets = [0, 64], sizes = [2, 32], strides = [1, 1]} : vector<2x96xf32> to vector<2x32xf32>
    %940 = vector.extract_strided_slice %922 {offsets = [0, 64], sizes = [2, 32], strides = [1, 1]} : vector<2x96xf32> to vector<2x32xf32>
    %941 = arith.mulf %930, %940 : vector<2x32xf32>
    %942 = arith.addf %939, %941 : vector<2x32xf32>
    %943 = math.tanh %942 : vector<2x32xf32>
    %cst_250 = arith.constant 1.000000e+00 : f32
    %944 = vector.broadcast %cst_250 : f32 to vector<2x32xf32>
    %945 = arith.subf %944, %938 : vector<2x32xf32>
    %946 = arith.mulf %945, %943 : vector<2x32xf32>
    %947 = arith.mulf %938, %918 : vector<2x32xf32>
    %948 = arith.addf %946, %947 : vector<2x32xf32>
    %c0_251 = arith.constant 0 : index
    %c0_252 = arith.constant 0 : index
    %c0_253 = arith.constant 0 : index
    %949 = vector.load %arg40[%c0_251, %c0_252, %c0_253] : memref<2x8x32xf32, #tpu.memory_space<vmem>>, vector<2x1x32xf32>
    %950 = vector.shape_cast %949 : vector<2x1x32xf32> to vector<2x32xf32>
    %951 = vector.shape_cast %948 : vector<2x32xf32> to vector<2x1x32xf32>
    tpu.vector_store %arg40[%c0_251, %c0_252, %c0_253], %951 {strides = array<i32>} : memref<2x8x32xf32, #tpu.memory_space<vmem>>, vector<2x1x32xf32>,
    %952 = vector.extract_strided_slice %913 {offsets = [0, 1, 0], sizes = [2, 1, 96], strides = [1, 1, 1]} : vector<2x8x96xf32> to vector<2x1x96xf32>
    %953 = vector.shape_cast %952 : vector<2x1x96xf32> to vector<2x96xf32>
    %cst_254 = arith.constant dense<0.000000e+00> : vector<2x96xf32>
    %954 = tpu.matmul %948, %914, %cst_254 {dimension_numbers = #tpu.dot_dimension_numbers<[1], [0], [0], [1], [0, 0, 1, 1], [], []>} : vector<2x32xf32>, vector<32x96xf32>, vector<2x96xf32> -> vector<2x96xf32>
    %955 = arith.addf %954, %917 : vector<2x96xf32>
    %956 = vector.extract_strided_slice %953 {offsets = [0, 0], sizes = [2, 32], strides = [1, 1]} : vector<2x96xf32> to vector<2x32xf32>
    %957 = vector.extract_strided_slice %955 {offsets = [0, 0], sizes = [2, 32], strides = [1, 1]} : vector<2x96xf32> to vector<2x32xf32>
    %958 = arith.addf %956, %957 : vector<2x32xf32>
    %959 = arith.negf %958 : vector<2x32xf32>
    %960 = math.exp %959 : vector<2x32xf32>
    %cst_255 = arith.constant 1.000000e+00 : f32
    %961 = vector.broadcast %cst_255 : f32 to vector<2x32xf32>
    %962 = arith.addf %961, %960 : vector<2x32xf32>
    %963 = arith.divf %961, %962 : vector<2x32xf32>
    %964 = vector.extract_strided_slice %953 {offsets = [0, 32], sizes = [2, 32], strides = [1, 1]} : vector<2x96xf32> to vector<2x32xf32>
    %965 = vector.extract_strided_slice %955 {offsets = [0, 32], sizes = [2, 32], strides = [1, 1]} : vector<2x96xf32> to vector<2x32xf32>
    %966 = arith.addf %964, %965 : vector<2x32xf32>
    %967 = arith.negf %966 : vector<2x32xf32>
    %968 = math.exp %967 : vector<2x32xf32>
    %cst_256 = arith.constant 1.000000e+00 : f32
    %969 = vector.broadcast %cst_256 : f32 to vector<2x32xf32>
    %970 = arith.addf %969, %968 : vector<2x32xf32>
    %971 = arith.divf %969, %970 : vector<2x32xf32>
    %972 = vector.extract_strided_slice %953 {offsets = [0, 64], sizes = [2, 32], strides = [1, 1]} : vector<2x96xf32> to vector<2x32xf32>
    %973 = vector.extract_strided_slice %955 {offsets = [0, 64], sizes = [2, 32], strides = [1, 1]} : vector<2x96xf32> to vector<2x32xf32>
    %974 = arith.mulf %963, %973 : vector<2x32xf32>
    %975 = arith.addf %972, %974 : vector<2x32xf32>
    %976 = math.tanh %975 : vector<2x32xf32>
    %cst_257 = arith.constant 1.000000e+00 : f32
    %977 = vector.broadcast %cst_257 : f32 to vector<2x32xf32>
    %978 = arith.subf %977, %971 : vector<2x32xf32>
    %979 = arith.mulf %978, %976 : vector<2x32xf32>
    %980 = arith.mulf %971, %948 : vector<2x32xf32>
    %981 = arith.addf %979, %980 : vector<2x32xf32>
    %c0_258 = arith.constant 0 : index
    %c1_259 = arith.constant 1 : index
    %c0_260 = arith.constant 0 : index
    %982 = vector.load %arg40[%c0_258, %c1_259, %c0_260] : memref<2x8x32xf32, #tpu.memory_space<vmem>>, vector<2x1x32xf32>
    %983 = vector.shape_cast %982 : vector<2x1x32xf32> to vector<2x32xf32>
    %984 = vector.shape_cast %981 : vector<2x32xf32> to vector<2x1x32xf32>
    tpu.vector_store %arg40[%c0_258, %c1_259, %c0_260], %984 {strides = array<i32>} : memref<2x8x32xf32, #tpu.memory_space<vmem>>, vector<2x1x32xf32>,
    %985 = vector.extract_strided_slice %913 {offsets = [0, 2, 0], sizes = [2, 1, 96], strides = [1, 1, 1]} : vector<2x8x96xf32> to vector<2x1x96xf32>
    %986 = vector.shape_cast %985 : vector<2x1x96xf32> to vector<2x96xf32>
    %cst_261 = arith.constant dense<0.000000e+00> : vector<2x96xf32>
    %987 = tpu.matmul %981, %914, %cst_261 {dimension_numbers = #tpu.dot_dimension_numbers<[1], [0], [0], [1], [0, 0, 1, 1], [], []>} : vector<2x32xf32>, vector<32x96xf32>, vector<2x96xf32> -> vector<2x96xf32>
    %988 = arith.addf %987, %917 : vector<2x96xf32>
    %989 = vector.extract_strided_slice %986 {offsets = [0, 0], sizes = [2, 32], strides = [1, 1]} : vector<2x96xf32> to vector<2x32xf32>
    %990 = vector.extract_strided_slice %988 {offsets = [0, 0], sizes = [2, 32], strides = [1, 1]} : vector<2x96xf32> to vector<2x32xf32>
    %991 = arith.addf %989, %990 : vector<2x32xf32>
    %992 = arith.negf %991 : vector<2x32xf32>
    %993 = math.exp %992 : vector<2x32xf32>
    %cst_262 = arith.constant 1.000000e+00 : f32
    %994 = vector.broadcast %cst_262 : f32 to vector<2x32xf32>
    %995 = arith.addf %994, %993 : vector<2x32xf32>
    %996 = arith.divf %994, %995 : vector<2x32xf32>
    %997 = vector.extract_strided_slice %986 {offsets = [0, 32], sizes = [2, 32], strides = [1, 1]} : vector<2x96xf32> to vector<2x32xf32>
    %998 = vector.extract_strided_slice %988 {offsets = [0, 32], sizes = [2, 32], strides = [1, 1]} : vector<2x96xf32> to vector<2x32xf32>
    %999 = arith.addf %997, %998 : vector<2x32xf32>
    %1000 = arith.negf %999 : vector<2x32xf32>
    %1001 = math.exp %1000 : vector<2x32xf32>
    %cst_263 = arith.constant 1.000000e+00 : f32
    %1002 = vector.broadcast %cst_263 : f32 to vector<2x32xf32>
    %1003 = arith.addf %1002, %1001 : vector<2x32xf32>
    %1004 = arith.divf %1002, %1003 : vector<2x32xf32>
    %1005 = vector.extract_strided_slice %986 {offsets = [0, 64], sizes = [2, 32], strides = [1, 1]} : vector<2x96xf32> to vector<2x32xf32>
    %1006 = vector.extract_strided_slice %988 {offsets = [0, 64], sizes = [2, 32], strides = [1, 1]} : vector<2x96xf32> to vector<2x32xf32>
    %1007 = arith.mulf %996, %1006 : vector<2x32xf32>
    %1008 = arith.addf %1005, %1007 : vector<2x32xf32>
    %1009 = math.tanh %1008 : vector<2x32xf32>
    %cst_264 = arith.constant 1.000000e+00 : f32
    %1010 = vector.broadcast %cst_264 : f32 to vector<2x32xf32>
    %1011 = arith.subf %1010, %1004 : vector<2x32xf32>
    %1012 = arith.mulf %1011, %1009 : vector<2x32xf32>
    %1013 = arith.mulf %1004, %981 : vector<2x32xf32>
    %1014 = arith.addf %1012, %1013 : vector<2x32xf32>
    %c0_265 = arith.constant 0 : index
    %c2_266 = arith.constant 2 : index
    %c0_267 = arith.constant 0 : index
    %1015 = vector.load %arg40[%c0_265, %c2_266, %c0_267] : memref<2x8x32xf32, #tpu.memory_space<vmem>>, vector<2x1x32xf32>
    %1016 = vector.shape_cast %1015 : vector<2x1x32xf32> to vector<2x32xf32>
    %1017 = vector.shape_cast %1014 : vector<2x32xf32> to vector<2x1x32xf32>
    tpu.vector_store %arg40[%c0_265, %c2_266, %c0_267], %1017 {strides = array<i32>} : memref<2x8x32xf32, #tpu.memory_space<vmem>>, vector<2x1x32xf32>,
    %1018 = vector.extract_strided_slice %913 {offsets = [0, 3, 0], sizes = [2, 1, 96], strides = [1, 1, 1]} : vector<2x8x96xf32> to vector<2x1x96xf32>
    %1019 = vector.shape_cast %1018 : vector<2x1x96xf32> to vector<2x96xf32>
    %cst_268 = arith.constant dense<0.000000e+00> : vector<2x96xf32>
    %1020 = tpu.matmul %1014, %914, %cst_268 {dimension_numbers = #tpu.dot_dimension_numbers<[1], [0], [0], [1], [0, 0, 1, 1], [], []>} : vector<2x32xf32>, vector<32x96xf32>, vector<2x96xf32> -> vector<2x96xf32>
    %1021 = arith.addf %1020, %917 : vector<2x96xf32>
    %1022 = vector.extract_strided_slice %1019 {offsets = [0, 0], sizes = [2, 32], strides = [1, 1]} : vector<2x96xf32> to vector<2x32xf32>
    %1023 = vector.extract_strided_slice %1021 {offsets = [0, 0], sizes = [2, 32], strides = [1, 1]} : vector<2x96xf32> to vector<2x32xf32>
    %1024 = arith.addf %1022, %1023 : vector<2x32xf32>
    %1025 = arith.negf %1024 : vector<2x32xf32>
    %1026 = math.exp %1025 : vector<2x32xf32>
    %cst_269 = arith.constant 1.000000e+00 : f32
    %1027 = vector.broadcast %cst_269 : f32 to vector<2x32xf32>
    %1028 = arith.addf %1027, %1026 : vector<2x32xf32>
    %1029 = arith.divf %1027, %1028 : vector<2x32xf32>
    %1030 = vector.extract_strided_slice %1019 {offsets = [0, 32], sizes = [2, 32], strides = [1, 1]} : vector<2x96xf32> to vector<2x32xf32>
    %1031 = vector.extract_strided_slice %1021 {offsets = [0, 32], sizes = [2, 32], strides = [1, 1]} : vector<2x96xf32> to vector<2x32xf32>
    %1032 = arith.addf %1030, %1031 : vector<2x32xf32>
    %1033 = arith.negf %1032 : vector<2x32xf32>
    %1034 = math.exp %1033 : vector<2x32xf32>
    %cst_270 = arith.constant 1.000000e+00 : f32
    %1035 = vector.broadcast %cst_270 : f32 to vector<2x32xf32>
    %1036 = arith.addf %1035, %1034 : vector<2x32xf32>
    %1037 = arith.divf %1035, %1036 : vector<2x32xf32>
    %1038 = vector.extract_strided_slice %1019 {offsets = [0, 64], sizes = [2, 32], strides = [1, 1]} : vector<2x96xf32> to vector<2x32xf32>
    %1039 = vector.extract_strided_slice %1021 {offsets = [0, 64], sizes = [2, 32], strides = [1, 1]} : vector<2x96xf32> to vector<2x32xf32>
    %1040 = arith.mulf %1029, %1039 : vector<2x32xf32>
    %1041 = arith.addf %1038, %1040 : vector<2x32xf32>
    %1042 = math.tanh %1041 : vector<2x32xf32>
    %cst_271 = arith.constant 1.000000e+00 : f32
    %1043 = vector.broadcast %cst_271 : f32 to vector<2x32xf32>
    %1044 = arith.subf %1043, %1037 : vector<2x32xf32>
    %1045 = arith.mulf %1044, %1042 : vector<2x32xf32>
    %1046 = arith.mulf %1037, %1014 : vector<2x32xf32>
    %1047 = arith.addf %1045, %1046 : vector<2x32xf32>
    %c0_272 = arith.constant 0 : index
    %c3_273 = arith.constant 3 : index
    %c0_274 = arith.constant 0 : index
    %1048 = vector.load %arg40[%c0_272, %c3_273, %c0_274] : memref<2x8x32xf32, #tpu.memory_space<vmem>>, vector<2x1x32xf32>
    %1049 = vector.shape_cast %1048 : vector<2x1x32xf32> to vector<2x32xf32>
    %1050 = vector.shape_cast %1047 : vector<2x32xf32> to vector<2x1x32xf32>
    tpu.vector_store %arg40[%c0_272, %c3_273, %c0_274], %1050 {strides = array<i32>} : memref<2x8x32xf32, #tpu.memory_space<vmem>>, vector<2x1x32xf32>,
    %1051 = vector.extract_strided_slice %913 {offsets = [0, 4, 0], sizes = [2, 1, 96], strides = [1, 1, 1]} : vector<2x8x96xf32> to vector<2x1x96xf32>
    %1052 = vector.shape_cast %1051 : vector<2x1x96xf32> to vector<2x96xf32>
    %cst_275 = arith.constant dense<0.000000e+00> : vector<2x96xf32>
    %1053 = tpu.matmul %1047, %914, %cst_275 {dimension_numbers = #tpu.dot_dimension_numbers<[1], [0], [0], [1], [0, 0, 1, 1], [], []>} : vector<2x32xf32>, vector<32x96xf32>, vector<2x96xf32> -> vector<2x96xf32>
    %1054 = arith.addf %1053, %917 : vector<2x96xf32>
    %1055 = vector.extract_strided_slice %1052 {offsets = [0, 0], sizes = [2, 32], strides = [1, 1]} : vector<2x96xf32> to vector<2x32xf32>
    %1056 = vector.extract_strided_slice %1054 {offsets = [0, 0], sizes = [2, 32], strides = [1, 1]} : vector<2x96xf32> to vector<2x32xf32>
    %1057 = arith.addf %1055, %1056 : vector<2x32xf32>
    %1058 = arith.negf %1057 : vector<2x32xf32>
    %1059 = math.exp %1058 : vector<2x32xf32>
    %cst_276 = arith.constant 1.000000e+00 : f32
    %1060 = vector.broadcast %cst_276 : f32 to vector<2x32xf32>
    %1061 = arith.addf %1060, %1059 : vector<2x32xf32>
    %1062 = arith.divf %1060, %1061 : vector<2x32xf32>
    %1063 = vector.extract_strided_slice %1052 {offsets = [0, 32], sizes = [2, 32], strides = [1, 1]} : vector<2x96xf32> to vector<2x32xf32>
    %1064 = vector.extract_strided_slice %1054 {offsets = [0, 32], sizes = [2, 32], strides = [1, 1]} : vector<2x96xf32> to vector<2x32xf32>
    %1065 = arith.addf %1063, %1064 : vector<2x32xf32>
    %1066 = arith.negf %1065 : vector<2x32xf32>
    %1067 = math.exp %1066 : vector<2x32xf32>
    %cst_277 = arith.constant 1.000000e+00 : f32
    %1068 = vector.broadcast %cst_277 : f32 to vector<2x32xf32>
    %1069 = arith.addf %1068, %1067 : vector<2x32xf32>
    %1070 = arith.divf %1068, %1069 : vector<2x32xf32>
    %1071 = vector.extract_strided_slice %1052 {offsets = [0, 64], sizes = [2, 32], strides = [1, 1]} : vector<2x96xf32> to vector<2x32xf32>
    %1072 = vector.extract_strided_slice %1054 {offsets = [0, 64], sizes = [2, 32], strides = [1, 1]} : vector<2x96xf32> to vector<2x32xf32>
    %1073 = arith.mulf %1062, %1072 : vector<2x32xf32>
    %1074 = arith.addf %1071, %1073 : vector<2x32xf32>
    %1075 = math.tanh %1074 : vector<2x32xf32>
    %cst_278 = arith.constant 1.000000e+00 : f32
    %1076 = vector.broadcast %cst_278 : f32 to vector<2x32xf32>
    %1077 = arith.subf %1076, %1070 : vector<2x32xf32>
    %1078 = arith.mulf %1077, %1075 : vector<2x32xf32>
    %1079 = arith.mulf %1070, %1047 : vector<2x32xf32>
    %1080 = arith.addf %1078, %1079 : vector<2x32xf32>
    %c0_279 = arith.constant 0 : index
    %c4_280 = arith.constant 4 : index
    %c0_281 = arith.constant 0 : index
    %1081 = vector.load %arg40[%c0_279, %c4_280, %c0_281] : memref<2x8x32xf32, #tpu.memory_space<vmem>>, vector<2x1x32xf32>
    %1082 = vector.shape_cast %1081 : vector<2x1x32xf32> to vector<2x32xf32>
    %1083 = vector.shape_cast %1080 : vector<2x32xf32> to vector<2x1x32xf32>
    tpu.vector_store %arg40[%c0_279, %c4_280, %c0_281], %1083 {strides = array<i32>} : memref<2x8x32xf32, #tpu.memory_space<vmem>>, vector<2x1x32xf32>,
    %1084 = vector.extract_strided_slice %913 {offsets = [0, 5, 0], sizes = [2, 1, 96], strides = [1, 1, 1]} : vector<2x8x96xf32> to vector<2x1x96xf32>
    %1085 = vector.shape_cast %1084 : vector<2x1x96xf32> to vector<2x96xf32>
    %cst_282 = arith.constant dense<0.000000e+00> : vector<2x96xf32>
    %1086 = tpu.matmul %1080, %914, %cst_282 {dimension_numbers = #tpu.dot_dimension_numbers<[1], [0], [0], [1], [0, 0, 1, 1], [], []>} : vector<2x32xf32>, vector<32x96xf32>, vector<2x96xf32> -> vector<2x96xf32>
    %1087 = arith.addf %1086, %917 : vector<2x96xf32>
    %1088 = vector.extract_strided_slice %1085 {offsets = [0, 0], sizes = [2, 32], strides = [1, 1]} : vector<2x96xf32> to vector<2x32xf32>
    %1089 = vector.extract_strided_slice %1087 {offsets = [0, 0], sizes = [2, 32], strides = [1, 1]} : vector<2x96xf32> to vector<2x32xf32>
    %1090 = arith.addf %1088, %1089 : vector<2x32xf32>
    %1091 = arith.negf %1090 : vector<2x32xf32>
    %1092 = math.exp %1091 : vector<2x32xf32>
    %cst_283 = arith.constant 1.000000e+00 : f32
    %1093 = vector.broadcast %cst_283 : f32 to vector<2x32xf32>
    %1094 = arith.addf %1093, %1092 : vector<2x32xf32>
    %1095 = arith.divf %1093, %1094 : vector<2x32xf32>
    %1096 = vector.extract_strided_slice %1085 {offsets = [0, 32], sizes = [2, 32], strides = [1, 1]} : vector<2x96xf32> to vector<2x32xf32>
    %1097 = vector.extract_strided_slice %1087 {offsets = [0, 32], sizes = [2, 32], strides = [1, 1]} : vector<2x96xf32> to vector<2x32xf32>
    %1098 = arith.addf %1096, %1097 : vector<2x32xf32>
    %1099 = arith.negf %1098 : vector<2x32xf32>
    %1100 = math.exp %1099 : vector<2x32xf32>
    %cst_284 = arith.constant 1.000000e+00 : f32
    %1101 = vector.broadcast %cst_284 : f32 to vector<2x32xf32>
    %1102 = arith.addf %1101, %1100 : vector<2x32xf32>
    %1103 = arith.divf %1101, %1102 : vector<2x32xf32>
    %1104 = vector.extract_strided_slice %1085 {offsets = [0, 64], sizes = [2, 32], strides = [1, 1]} : vector<2x96xf32> to vector<2x32xf32>
    %1105 = vector.extract_strided_slice %1087 {offsets = [0, 64], sizes = [2, 32], strides = [1, 1]} : vector<2x96xf32> to vector<2x32xf32>
    %1106 = arith.mulf %1095, %1105 : vector<2x32xf32>
    %1107 = arith.addf %1104, %1106 : vector<2x32xf32>
    %1108 = math.tanh %1107 : vector<2x32xf32>
    %cst_285 = arith.constant 1.000000e+00 : f32
    %1109 = vector.broadcast %cst_285 : f32 to vector<2x32xf32>
    %1110 = arith.subf %1109, %1103 : vector<2x32xf32>
    %1111 = arith.mulf %1110, %1108 : vector<2x32xf32>
    %1112 = arith.mulf %1103, %1080 : vector<2x32xf32>
    %1113 = arith.addf %1111, %1112 : vector<2x32xf32>
    %c0_286 = arith.constant 0 : index
    %c5_287 = arith.constant 5 : index
    %c0_288 = arith.constant 0 : index
    %1114 = vector.load %arg40[%c0_286, %c5_287, %c0_288] : memref<2x8x32xf32, #tpu.memory_space<vmem>>, vector<2x1x32xf32>
    %1115 = vector.shape_cast %1114 : vector<2x1x32xf32> to vector<2x32xf32>
    %1116 = vector.shape_cast %1113 : vector<2x32xf32> to vector<2x1x32xf32>
    tpu.vector_store %arg40[%c0_286, %c5_287, %c0_288], %1116 {strides = array<i32>} : memref<2x8x32xf32, #tpu.memory_space<vmem>>, vector<2x1x32xf32>,
    %1117 = vector.extract_strided_slice %913 {offsets = [0, 6, 0], sizes = [2, 1, 96], strides = [1, 1, 1]} : vector<2x8x96xf32> to vector<2x1x96xf32>
    %1118 = vector.shape_cast %1117 : vector<2x1x96xf32> to vector<2x96xf32>
    %cst_289 = arith.constant dense<0.000000e+00> : vector<2x96xf32>
    %1119 = tpu.matmul %1113, %914, %cst_289 {dimension_numbers = #tpu.dot_dimension_numbers<[1], [0], [0], [1], [0, 0, 1, 1], [], []>} : vector<2x32xf32>, vector<32x96xf32>, vector<2x96xf32> -> vector<2x96xf32>
    %1120 = arith.addf %1119, %917 : vector<2x96xf32>
    %1121 = vector.extract_strided_slice %1118 {offsets = [0, 0], sizes = [2, 32], strides = [1, 1]} : vector<2x96xf32> to vector<2x32xf32>
    %1122 = vector.extract_strided_slice %1120 {offsets = [0, 0], sizes = [2, 32], strides = [1, 1]} : vector<2x96xf32> to vector<2x32xf32>
    %1123 = arith.addf %1121, %1122 : vector<2x32xf32>
    %1124 = arith.negf %1123 : vector<2x32xf32>
    %1125 = math.exp %1124 : vector<2x32xf32>
    %cst_290 = arith.constant 1.000000e+00 : f32
    %1126 = vector.broadcast %cst_290 : f32 to vector<2x32xf32>
    %1127 = arith.addf %1126, %1125 : vector<2x32xf32>
    %1128 = arith.divf %1126, %1127 : vector<2x32xf32>
    %1129 = vector.extract_strided_slice %1118 {offsets = [0, 32], sizes = [2, 32], strides = [1, 1]} : vector<2x96xf32> to vector<2x32xf32>
    %1130 = vector.extract_strided_slice %1120 {offsets = [0, 32], sizes = [2, 32], strides = [1, 1]} : vector<2x96xf32> to vector<2x32xf32>
    %1131 = arith.addf %1129, %1130 : vector<2x32xf32>
    %1132 = arith.negf %1131 : vector<2x32xf32>
    %1133 = math.exp %1132 : vector<2x32xf32>
    %cst_291 = arith.constant 1.000000e+00 : f32
    %1134 = vector.broadcast %cst_291 : f32 to vector<2x32xf32>
    %1135 = arith.addf %1134, %1133 : vector<2x32xf32>
    %1136 = arith.divf %1134, %1135 : vector<2x32xf32>
    %1137 = vector.extract_strided_slice %1118 {offsets = [0, 64], sizes = [2, 32], strides = [1, 1]} : vector<2x96xf32> to vector<2x32xf32>
    %1138 = vector.extract_strided_slice %1120 {offsets = [0, 64], sizes = [2, 32], strides = [1, 1]} : vector<2x96xf32> to vector<2x32xf32>
    %1139 = arith.mulf %1128, %1138 : vector<2x32xf32>
    %1140 = arith.addf %1137, %1139 : vector<2x32xf32>
    %1141 = math.tanh %1140 : vector<2x32xf32>
    %cst_292 = arith.constant 1.000000e+00 : f32
    %1142 = vector.broadcast %cst_292 : f32 to vector<2x32xf32>
    %1143 = arith.subf %1142, %1136 : vector<2x32xf32>
    %1144 = arith.mulf %1143, %1141 : vector<2x32xf32>
    %1145 = arith.mulf %1136, %1113 : vector<2x32xf32>
    %1146 = arith.addf %1144, %1145 : vector<2x32xf32>
    %c0_293 = arith.constant 0 : index
    %c6_294 = arith.constant 6 : index
    %c0_295 = arith.constant 0 : index
    %1147 = vector.load %arg40[%c0_293, %c6_294, %c0_295] : memref<2x8x32xf32, #tpu.memory_space<vmem>>, vector<2x1x32xf32>
    %1148 = vector.shape_cast %1147 : vector<2x1x32xf32> to vector<2x32xf32>
    %1149 = vector.shape_cast %1146 : vector<2x32xf32> to vector<2x1x32xf32>
    tpu.vector_store %arg40[%c0_293, %c6_294, %c0_295], %1149 {strides = array<i32>} : memref<2x8x32xf32, #tpu.memory_space<vmem>>, vector<2x1x32xf32>,
    %1150 = vector.extract_strided_slice %913 {offsets = [0, 7, 0], sizes = [2, 1, 96], strides = [1, 1, 1]} : vector<2x8x96xf32> to vector<2x1x96xf32>
    %1151 = vector.shape_cast %1150 : vector<2x1x96xf32> to vector<2x96xf32>
    %cst_296 = arith.constant dense<0.000000e+00> : vector<2x96xf32>
    %1152 = tpu.matmul %1146, %914, %cst_296 {dimension_numbers = #tpu.dot_dimension_numbers<[1], [0], [0], [1], [0, 0, 1, 1], [], []>} : vector<2x32xf32>, vector<32x96xf32>, vector<2x96xf32> -> vector<2x96xf32>
    %1153 = arith.addf %1152, %917 : vector<2x96xf32>
    %1154 = vector.extract_strided_slice %1151 {offsets = [0, 0], sizes = [2, 32], strides = [1, 1]} : vector<2x96xf32> to vector<2x32xf32>
    %1155 = vector.extract_strided_slice %1153 {offsets = [0, 0], sizes = [2, 32], strides = [1, 1]} : vector<2x96xf32> to vector<2x32xf32>
    %1156 = arith.addf %1154, %1155 : vector<2x32xf32>
    %1157 = arith.negf %1156 : vector<2x32xf32>
    %1158 = math.exp %1157 : vector<2x32xf32>
    %cst_297 = arith.constant 1.000000e+00 : f32
    %1159 = vector.broadcast %cst_297 : f32 to vector<2x32xf32>
    %1160 = arith.addf %1159, %1158 : vector<2x32xf32>
    %1161 = arith.divf %1159, %1160 : vector<2x32xf32>
    %1162 = vector.extract_strided_slice %1151 {offsets = [0, 32], sizes = [2, 32], strides = [1, 1]} : vector<2x96xf32> to vector<2x32xf32>
    %1163 = vector.extract_strided_slice %1153 {offsets = [0, 32], sizes = [2, 32], strides = [1, 1]} : vector<2x96xf32> to vector<2x32xf32>
    %1164 = arith.addf %1162, %1163 : vector<2x32xf32>
    %1165 = arith.negf %1164 : vector<2x32xf32>
    %1166 = math.exp %1165 : vector<2x32xf32>
    %cst_298 = arith.constant 1.000000e+00 : f32
    %1167 = vector.broadcast %cst_298 : f32 to vector<2x32xf32>
    %1168 = arith.addf %1167, %1166 : vector<2x32xf32>
    %1169 = arith.divf %1167, %1168 : vector<2x32xf32>
    %1170 = vector.extract_strided_slice %1151 {offsets = [0, 64], sizes = [2, 32], strides = [1, 1]} : vector<2x96xf32> to vector<2x32xf32>
    %1171 = vector.extract_strided_slice %1153 {offsets = [0, 64], sizes = [2, 32], strides = [1, 1]} : vector<2x96xf32> to vector<2x32xf32>
    %1172 = arith.mulf %1161, %1171 : vector<2x32xf32>
    %1173 = arith.addf %1170, %1172 : vector<2x32xf32>
    %1174 = math.tanh %1173 : vector<2x32xf32>
    %cst_299 = arith.constant 1.000000e+00 : f32
    %1175 = vector.broadcast %cst_299 : f32 to vector<2x32xf32>
    %1176 = arith.subf %1175, %1169 : vector<2x32xf32>
    %1177 = arith.mulf %1176, %1174 : vector<2x32xf32>
    %1178 = arith.mulf %1169, %1146 : vector<2x32xf32>
    %1179 = arith.addf %1177, %1178 : vector<2x32xf32>
    %c0_300 = arith.constant 0 : index
    %c7_301 = arith.constant 7 : index
    %c0_302 = arith.constant 0 : index
    %1180 = vector.load %arg40[%c0_300, %c7_301, %c0_302] : memref<2x8x32xf32, #tpu.memory_space<vmem>>, vector<2x1x32xf32>
    %1181 = vector.shape_cast %1180 : vector<2x1x32xf32> to vector<2x32xf32>
    %1182 = vector.shape_cast %1179 : vector<2x32xf32> to vector<2x1x32xf32>
    tpu.vector_store %arg40[%c0_300, %c7_301, %c0_302], %1182 {strides = array<i32>} : memref<2x8x32xf32, #tpu.memory_space<vmem>>, vector<2x1x32xf32>,
    %c0_303 = arith.constant 0 : index
    %c0_304 = arith.constant 0 : index
    %c0_305 = arith.constant 0 : index
    %1183 = vector.load %arg40[%c0_303, %c0_304, %c0_305] : memref<2x8x32xf32, #tpu.memory_space<vmem>>, vector<2x8x32xf32>
    %1184 = vector.shape_cast %1183 : vector<2x8x32xf32> to vector<16x32xf32>
    %c0_306 = arith.constant 0 : index
    %c0_307 = arith.constant 0 : index
    %1185 = vector.load %arg28[%c0_306, %c0_307] : memref<32x16xf32, #tpu.memory_space<vmem>>, vector<32x16xf32>
    %1186 = arith.truncf %1184 : vector<16x32xf32> to vector<16x32xbf16>
    %1187 = arith.truncf %1185 : vector<32x16xf32> to vector<32x16xbf16>
    %cst_308 = arith.constant dense<0.000000e+00> : vector<16x16xf32>
    %1188 = tpu.matmul %1186, %1187, %cst_308 {dimension_numbers = #tpu.dot_dimension_numbers<[1], [0], [0], [1], [0, 0, 1, 1], [], []>} : vector<16x32xbf16>, vector<32x16xbf16>, vector<16x16xf32> -> vector<16x16xf32>
    %c0_309 = arith.constant 0 : index
    %c0_310 = arith.constant 0 : index
    %1189 = vector.load %arg29[%c0_309, %c0_310] : memref<1x16xf32, #tpu.memory_space<vmem>>, vector<1x16xf32>
    %1190 = vector.broadcast %1189 : vector<1x16xf32> to vector<16x16xf32>
    %1191 = arith.addf %1188, %1190 : vector<16x16xf32>
    %1192 = vector.shape_cast %1191 : vector<16x16xf32> to vector<2x8x16xf32>
    %1193 = vector.extract_strided_slice %1192 {offsets = [0, 0, 0], sizes = [2, 1, 16], strides = [1, 1, 1]} : vector<2x8x16xf32> to vector<2x1x16xf32>
    %1194 = vector.shape_cast %1193 : vector<2x1x16xf32> to vector<2x16xf32>
    %1195 = vector.extract_strided_slice %1192 {offsets = [0, 1, 0], sizes = [2, 1, 16], strides = [1, 1, 1]} : vector<2x8x16xf32> to vector<2x1x16xf32>
    %1196 = vector.shape_cast %1195 : vector<2x1x16xf32> to vector<2x16xf32>
    %1197 = vector.extract_strided_slice %1192 {offsets = [0, 2, 0], sizes = [2, 1, 16], strides = [1, 1, 1]} : vector<2x8x16xf32> to vector<2x1x16xf32>
    %1198 = vector.shape_cast %1197 : vector<2x1x16xf32> to vector<2x16xf32>
    %1199 = vector.extract_strided_slice %1192 {offsets = [0, 3, 0], sizes = [2, 1, 16], strides = [1, 1, 1]} : vector<2x8x16xf32> to vector<2x1x16xf32>
    %1200 = vector.shape_cast %1199 : vector<2x1x16xf32> to vector<2x16xf32>
    %1201 = vector.extract_strided_slice %1192 {offsets = [0, 4, 0], sizes = [2, 1, 16], strides = [1, 1, 1]} : vector<2x8x16xf32> to vector<2x1x16xf32>
    %1202 = vector.shape_cast %1201 : vector<2x1x16xf32> to vector<2x16xf32>
    %1203 = vector.extract_strided_slice %1192 {offsets = [0, 5, 0], sizes = [2, 1, 16], strides = [1, 1, 1]} : vector<2x8x16xf32> to vector<2x1x16xf32>
    %1204 = vector.shape_cast %1203 : vector<2x1x16xf32> to vector<2x16xf32>
    %1205 = vector.extract_strided_slice %1192 {offsets = [0, 6, 0], sizes = [2, 1, 16], strides = [1, 1, 1]} : vector<2x8x16xf32> to vector<2x1x16xf32>
    %1206 = vector.shape_cast %1205 : vector<2x1x16xf32> to vector<2x16xf32>
    %1207 = vector.extract_strided_slice %1192 {offsets = [0, 7, 0], sizes = [2, 1, 16], strides = [1, 1, 1]} : vector<2x8x16xf32> to vector<2x1x16xf32>
    %1208 = vector.shape_cast %1207 : vector<2x1x16xf32> to vector<2x16xf32>
    %1209 = tpu.concatenate %1194, %1196, %1198, %1200, %1202, %1204, %1206, %1208 in 1 : vector<2x16xf32>, vector<2x16xf32>, vector<2x16xf32>, vector<2x16xf32>, vector<2x16xf32>, vector<2x16xf32>, vector<2x16xf32>, vector<2x16xf32> -> vector<2x128xf32>
    %c0_311 = arith.constant 0 : index
    %c0_312 = arith.constant 0 : index
    %1210 = vector.load %arg34[%c0_311, %c0_312] : memref<2x128xf32, #tpu.memory_space<vmem>>, vector<2x128xf32>
    tpu.vector_store %arg34[%c0_311, %c0_312], %1209 {strides = array<i32>} : memref<2x128xf32, #tpu.memory_space<vmem>>, vector<2x128xf32>,
    %1211 = vector.extract_strided_slice %893 {offsets = [0, 0, 0], sizes = [2, 1, 8], strides = [1, 1, 1]} : vector<2x8x8xf32> to vector<2x1x8xf32>
    %1212 = vector.shape_cast %1211 : vector<2x1x8xf32> to vector<2x8xf32>
    %1213 = vector.extract_strided_slice %893 {offsets = [0, 1, 0], sizes = [2, 1, 8], strides = [1, 1, 1]} : vector<2x8x8xf32> to vector<2x1x8xf32>
    %1214 = vector.shape_cast %1213 : vector<2x1x8xf32> to vector<2x8xf32>
    %1215 = vector.extract_strided_slice %893 {offsets = [0, 2, 0], sizes = [2, 1, 8], strides = [1, 1, 1]} : vector<2x8x8xf32> to vector<2x1x8xf32>
    %1216 = vector.shape_cast %1215 : vector<2x1x8xf32> to vector<2x8xf32>
    %1217 = vector.extract_strided_slice %893 {offsets = [0, 3, 0], sizes = [2, 1, 8], strides = [1, 1, 1]} : vector<2x8x8xf32> to vector<2x1x8xf32>
    %1218 = vector.shape_cast %1217 : vector<2x1x8xf32> to vector<2x8xf32>
    %1219 = vector.extract_strided_slice %893 {offsets = [0, 4, 0], sizes = [2, 1, 8], strides = [1, 1, 1]} : vector<2x8x8xf32> to vector<2x1x8xf32>
    %1220 = vector.shape_cast %1219 : vector<2x1x8xf32> to vector<2x8xf32>
    %1221 = vector.extract_strided_slice %893 {offsets = [0, 5, 0], sizes = [2, 1, 8], strides = [1, 1, 1]} : vector<2x8x8xf32> to vector<2x1x8xf32>
    %1222 = vector.shape_cast %1221 : vector<2x1x8xf32> to vector<2x8xf32>
    %1223 = vector.extract_strided_slice %893 {offsets = [0, 6, 0], sizes = [2, 1, 8], strides = [1, 1, 1]} : vector<2x8x8xf32> to vector<2x1x8xf32>
    %1224 = vector.shape_cast %1223 : vector<2x1x8xf32> to vector<2x8xf32>
    %1225 = vector.extract_strided_slice %893 {offsets = [0, 7, 0], sizes = [2, 1, 8], strides = [1, 1, 1]} : vector<2x8x8xf32> to vector<2x1x8xf32>
    %1226 = vector.shape_cast %1225 : vector<2x1x8xf32> to vector<2x8xf32>
    %1227 = tpu.concatenate %1212, %1214, %1216, %1218, %1220, %1222, %1224, %1226 in 1 : vector<2x8xf32>, vector<2x8xf32>, vector<2x8xf32>, vector<2x8xf32>, vector<2x8xf32>, vector<2x8xf32>, vector<2x8xf32>, vector<2x8xf32> -> vector<2x64xf32>
    %cst_313 = arith.constant 0.000000e+00 : f32
    %1228 = vector.broadcast %cst_313 : f32 to vector<2x64xf32>
    %1229 = tpu.concatenate %1227, %1228 in 1 : vector<2x64xf32>, vector<2x64xf32> -> vector<2x128xf32>
    %c0_314 = arith.constant 0 : index
    %c0_315 = arith.constant 0 : index
    %1230 = vector.load %arg35[%c0_314, %c0_315] : memref<2x128xf32, #tpu.memory_space<vmem>>, vector<2x128xf32>
    tpu.vector_store %arg35[%c0_314, %c0_315], %1229 {strides = array<i32>} : memref<2x128xf32, #tpu.memory_space<vmem>>, vector<2x128xf32>,
    %1231 = vector.extract_strided_slice %1191 {offsets = [0, 0], sizes = [16, 8], strides = [1, 1]} : vector<16x16xf32> to vector<16x8xf32>
    %c0_316 = arith.constant 0 : index
    %c0_317 = arith.constant 0 : index
    %1232 = vector.load %arg30[%c0_316, %c0_317] : memref<8x32xf32, #tpu.memory_space<vmem>>, vector<8x32xf32>
    %1233 = arith.truncf %1231 : vector<16x8xf32> to vector<16x8xbf16>
    %1234 = arith.truncf %1232 : vector<8x32xf32> to vector<8x32xbf16>
    %cst_318 = arith.constant dense<0.000000e+00> : vector<16x32xf32>
    %1235 = tpu.matmul %1233, %1234, %cst_318 {dimension_numbers = #tpu.dot_dimension_numbers<[1], [0], [0], [1], [0, 0, 1, 1], [], []>} : vector<16x8xbf16>, vector<8x32xbf16>, vector<16x32xf32> -> vector<16x32xf32>
    %c0_319 = arith.constant 0 : index
    %c0_320 = arith.constant 0 : index
    %1236 = vector.load %arg31[%c0_319, %c0_320] : memref<1x32xf32, #tpu.memory_space<vmem>>, vector<1x32xf32>
    %1237 = vector.broadcast %1236 : vector<1x32xf32> to vector<16x32xf32>
    %1238 = arith.addf %1235, %1237 : vector<16x32xf32>
    %cst_321 = arith.constant 0.000000e+00 : f32
    %1239 = vector.broadcast %cst_321 : f32 to vector<16x32xf32>
    %1240 = arith.maximumf %1238, %1239 : vector<16x32xf32>
    %c0_322 = arith.constant 0 : index
    %c0_323 = arith.constant 0 : index
    %1241 = vector.load %arg32[%c0_322, %c0_323] : memref<32x32xf32, #tpu.memory_space<vmem>>, vector<32x32xf32>
    %1242 = arith.truncf %1240 : vector<16x32xf32> to vector<16x32xbf16>
    %1243 = arith.truncf %1241 : vector<32x32xf32> to vector<32x32xbf16>
    %cst_324 = arith.constant dense<0.000000e+00> : vector<16x32xf32>
    %1244 = tpu.matmul %1242, %1243, %cst_324 {dimension_numbers = #tpu.dot_dimension_numbers<[1], [0], [0], [1], [0, 0, 1, 1], [], []>} : vector<16x32xbf16>, vector<32x32xbf16>, vector<16x32xf32> -> vector<16x32xf32>
    %c0_325 = arith.constant 0 : index
    %c0_326 = arith.constant 0 : index
    %1245 = vector.load %arg33[%c0_325, %c0_326] : memref<1x32xf32, #tpu.memory_space<vmem>>, vector<1x32xf32>
    %1246 = vector.broadcast %1245 : vector<1x32xf32> to vector<16x32xf32>
    %1247 = arith.addf %1244, %1246 : vector<16x32xf32>
    %1248 = vector.extract_strided_slice %1191 {offsets = [0, 8], sizes = [16, 8], strides = [1, 1]} : vector<16x16xf32> to vector<16x8xf32>
    %c0_327 = arith.constant 0 : index
    %c0_328 = arith.constant 0 : index
    %1249 = vector.load %arg30[%c0_327, %c0_328] : memref<8x32xf32, #tpu.memory_space<vmem>>, vector<8x32xf32>
    %1250 = arith.truncf %1248 : vector<16x8xf32> to vector<16x8xbf16>
    %1251 = arith.truncf %1249 : vector<8x32xf32> to vector<8x32xbf16>
    %cst_329 = arith.constant dense<0.000000e+00> : vector<16x32xf32>
    %1252 = tpu.matmul %1250, %1251, %cst_329 {dimension_numbers = #tpu.dot_dimension_numbers<[1], [0], [0], [1], [0, 0, 1, 1], [], []>} : vector<16x8xbf16>, vector<8x32xbf16>, vector<16x32xf32> -> vector<16x32xf32>
    %c0_330 = arith.constant 0 : index
    %c0_331 = arith.constant 0 : index
    %1253 = vector.load %arg31[%c0_330, %c0_331] : memref<1x32xf32, #tpu.memory_space<vmem>>, vector<1x32xf32>
    %1254 = vector.broadcast %1253 : vector<1x32xf32> to vector<16x32xf32>
    %1255 = arith.addf %1252, %1254 : vector<16x32xf32>
    %cst_332 = arith.constant 0.000000e+00 : f32
    %1256 = vector.broadcast %cst_332 : f32 to vector<16x32xf32>
    %1257 = arith.maximumf %1255, %1256 : vector<16x32xf32>
    %c0_333 = arith.constant 0 : index
    %c0_334 = arith.constant 0 : index
    %1258 = vector.load %arg32[%c0_333, %c0_334] : memref<32x32xf32, #tpu.memory_space<vmem>>, vector<32x32xf32>
    %1259 = arith.truncf %1257 : vector<16x32xf32> to vector<16x32xbf16>
    %1260 = arith.truncf %1258 : vector<32x32xf32> to vector<32x32xbf16>
    %cst_335 = arith.constant dense<0.000000e+00> : vector<16x32xf32>
    %1261 = tpu.matmul %1259, %1260, %cst_335 {dimension_numbers = #tpu.dot_dimension_numbers<[1], [0], [0], [1], [0, 0, 1, 1], [], []>} : vector<16x32xbf16>, vector<32x32xbf16>, vector<16x32xf32> -> vector<16x32xf32>
    %c0_336 = arith.constant 0 : index
    %c0_337 = arith.constant 0 : index
    %1262 = vector.load %arg33[%c0_336, %c0_337] : memref<1x32xf32, #tpu.memory_space<vmem>>, vector<1x32xf32>
    %1263 = vector.broadcast %1262 : vector<1x32xf32> to vector<16x32xf32>
    %1264 = arith.addf %1261, %1263 : vector<16x32xf32>
    %1265 = tpu.concatenate %1247, %1264 in 1 : vector<16x32xf32>, vector<16x32xf32> -> vector<16x64xf32>
    %1266 = vector.shape_cast %1265 : vector<16x64xf32> to vector<2x8x64xf32>
    %1267 = vector.extract_strided_slice %1266 {offsets = [0, 0, 0], sizes = [2, 1, 64], strides = [1, 1, 1]} : vector<2x8x64xf32> to vector<2x1x64xf32>
    %1268 = vector.shape_cast %1267 : vector<2x1x64xf32> to vector<2x64xf32>
    %1269 = vector.extract_strided_slice %1266 {offsets = [0, 1, 0], sizes = [2, 1, 64], strides = [1, 1, 1]} : vector<2x8x64xf32> to vector<2x1x64xf32>
    %1270 = vector.shape_cast %1269 : vector<2x1x64xf32> to vector<2x64xf32>
    %1271 = vector.extract_strided_slice %1266 {offsets = [0, 2, 0], sizes = [2, 1, 64], strides = [1, 1, 1]} : vector<2x8x64xf32> to vector<2x1x64xf32>
    %1272 = vector.shape_cast %1271 : vector<2x1x64xf32> to vector<2x64xf32>
    %1273 = vector.extract_strided_slice %1266 {offsets = [0, 3, 0], sizes = [2, 1, 64], strides = [1, 1, 1]} : vector<2x8x64xf32> to vector<2x1x64xf32>
    %1274 = vector.shape_cast %1273 : vector<2x1x64xf32> to vector<2x64xf32>
    %1275 = vector.extract_strided_slice %1266 {offsets = [0, 4, 0], sizes = [2, 1, 64], strides = [1, 1, 1]} : vector<2x8x64xf32> to vector<2x1x64xf32>
    %1276 = vector.shape_cast %1275 : vector<2x1x64xf32> to vector<2x64xf32>
    %1277 = vector.extract_strided_slice %1266 {offsets = [0, 5, 0], sizes = [2, 1, 64], strides = [1, 1, 1]} : vector<2x8x64xf32> to vector<2x1x64xf32>
    %1278 = vector.shape_cast %1277 : vector<2x1x64xf32> to vector<2x64xf32>
    %1279 = vector.extract_strided_slice %1266 {offsets = [0, 6, 0], sizes = [2, 1, 64], strides = [1, 1, 1]} : vector<2x8x64xf32> to vector<2x1x64xf32>
    %1280 = vector.shape_cast %1279 : vector<2x1x64xf32> to vector<2x64xf32>
    %1281 = vector.extract_strided_slice %1266 {offsets = [0, 7, 0], sizes = [2, 1, 64], strides = [1, 1, 1]} : vector<2x8x64xf32> to vector<2x1x64xf32>
    %1282 = vector.shape_cast %1281 : vector<2x1x64xf32> to vector<2x64xf32>
    %1283 = tpu.concatenate %1268, %1270, %1272, %1274, %1276, %1278, %1280, %1282 in 1 : vector<2x64xf32>, vector<2x64xf32>, vector<2x64xf32>, vector<2x64xf32>, vector<2x64xf32>, vector<2x64xf32>, vector<2x64xf32>, vector<2x64xf32> -> vector<2x512xf32>
    %c0_338 = arith.constant 0 : index
    %c0_339 = arith.constant 0 : index
    %1284 = vector.load %arg36[%c0_338, %c0_339] : memref<2x512xf32, #tpu.memory_space<vmem>>, vector<2x512xf32>
    tpu.vector_store %arg36[%c0_338, %c0_339], %1283 {strides = array<i32>} : memref<2x512xf32, #tpu.memory_space<vmem>>, vector<2x512xf32>,
    return
  }
}

</mosaic_0001>

<bundles_post_ra>
// kernel: tacotron_forward.1
= control target key start
LH: loop header
LB: loop body
LE: loop exit
PB: predicated region body
PF: predicated region fallthrough
CT: control target
= control target key end

     0   :  { %s8402_s6 = smov 1   ;;  %s8403_s10 = smov 2   ;;  %s10164_s0 = inlined_call_operand.smem [shape: u32[37], index: -1, kind: input, shape index: {}] }
   0x1   :  { %s8482_s5 = sld [smem:[%s10164_s0]]   ;;  %s8404_s14 = smov 3  }
   0x2   :  { %s8487_s9 = sld [smem:[%s10164_s0 + %s8402_s6]]   ;;  %s8405_s18 = smov 4  }
   0x3   :  { %s8492_s13 = sld [smem:[%s10164_s0 + %s8403_s10]]   ;;  %s8406_s22 = smov 5  }
   0x4   :  { %s8497_s17 = sld [smem:[%s10164_s0 + %s8404_s14]]   ;;  %s8407_s26 = smov 6  }
   0x5   :  { %s8502_s21 = sld [smem:[%s10164_s0 + %s8405_s18]]   ;;  %s8408_s30 = smov 7  }
   0x6   :  { %s8507_s25 = sld [smem:[%s10164_s0 + %s8406_s22]]   ;;  %s8409_s4 = smov 8  }
   0x7   :  { %10184 = sst [smem:[#allocation44_spill]] %s8482_s5  ;;  %s8410_s10 = smov 9  }
   0x8   :  { %10185 = sst [smem:[#allocation45_spill]] %s8487_s9  ;;  %s8411_s15 = smov 10  }
   0x9   :  { %10186 = sst [smem:[#allocation46_spill]] %s8492_s13  ;;  %s8412_s20 = smov 11  }
   0xa   :  { %s8512_s29 = sld [smem:[%s10164_s0 + %s8407_s26]]   ;;  %s8413_s26 = smov 12  }
   0xb   :  { %10187 = sst [smem:[#allocation47_spill]] %s8502_s21  ;;  %s8414_s1 = smov 13  }
   0xc   :  { %s8517_s3 = sld [smem:[%s10164_s0 + %s8408_s30]]   ;;  %s8415_s7 = smov 14  }
   0xd   :  { %s8522_s8 = sld [smem:[%s10164_s0 + %s8409_s4]]   ;;  %s8417_s22 = smov 16  }
   0xe   :  { %s8527_s14 = sld [smem:[%s10164_s0 + %s8410_s10]]   ;;  %s8418_s28 = smov 17  }
   0xf   :  { %s8532_s19 = sld [smem:[%s10164_s0 + %s8411_s15]]   ;;  %s8416_s15 = smov 15  }
  0x10   :  { %10188 = sst [smem:[#allocation48_spill]] %s8512_s29 }
  0x11   :  { %s8537_s24 = sld [smem:[%s10164_s0 + %s8412_s20]]  }
  0x12   :  { %s8542_s30 = sld [smem:[%s10164_s0 + %s8413_s26]]  }
  0x13   :  { %10189 = sst [smem:[#allocation49_spill]] %s8522_s8 }
  0x14   :  { %s8547_s6 = sld [smem:[%s10164_s0 + %s8414_s1]]  }
  0x15   :  { %10190 = sst [smem:[#allocation50_spill]] %s8532_s19 }
  0x16   :  { %s8552_s12 = sld [smem:[%s10164_s0 + %s8415_s7]]   ;;  %s8419_s7 = smov 18  }
  0x17   :  { %s8557_s20 = sld [smem:[%s10164_s0 + %s8416_s15]]   ;;  %s8420_s15 = smov 19  }
  0x18   :  { %s8562_s27 = sld [smem:[%s10164_s0 + %s8417_s22]]   ;;  %s8421_s22 = smov 20  }
  0x19   :  { %s8567_s4 = sld [smem:[%s10164_s0 + %s8418_s28]]   ;;  %s8422_s28 = smov 21  }
  0x1a   :  { %s8577_s9 = sld [smem:[%s10164_s0 + %s8420_s15]]   ;;  %s8424_s15 = smov 23  }
  0x1b   :  { %s8587_s19 = sld [smem:[%s10164_s0 + %s8422_s28]]   ;;  %s8426_s28 = smov 25  }
  0x1c   :  { %10191 = sst [smem:[#allocation51_spill]] %s8552_s12 }
  0x1d   :  { %s8572_s12 = sld [smem:[%s10164_s0 + %s8419_s7]]   ;;  %s8423_s7 = smov 22  }
  0x1e   :  { %10192 = sst [smem:[#allocation52_spill]] %s8562_s27 }
  0x1f   :  { %s8582_s27 = sld [smem:[%s10164_s0 + %s8421_s22]]   ;;  %s8425_s22 = smov 24  }
  0x20   :  { %s8597_s29 = sld [smem:[%s10164_s0 + %s8424_s15]]   ;;  %s8428_s15 = smov 27  }
  0x21   :  { %s8607_s8 = sld [smem:[%s10164_s0 + %s8426_s28]]   ;;  %s8430_s28 = smov 29  }
  0x22   :  { %s8617_s21 = sld [smem:[%s10164_s0 + %s8428_s15]]   ;;  %s8432_s15 = smov 31  }
  0x23   :  { %10193 = sst [smem:[#allocation53_spill]] %s8572_s12 }
  0x24   :  { %s8592_s12 = sld [smem:[%s10164_s0 + %s8423_s7]]   ;;  %s8427_s7 = smov 26  }
  0x25   :  { %10194 = sst [smem:[#allocation54_spill]] %s8582_s27 }
  0x26   :  { %s8602_s27 = sld [smem:[%s10164_s0 + %s8425_s22]]   ;;  %s8429_s22 = smov 28  }
  0x27   :  { %10197 = sst [smem:[#allocation57_spill]] %s8607_s8 }
  0x28   :  { %s8627_s5 = sld [smem:[%s10164_s0 + %s8430_s28]]   ;;  %s8434_s28 = smov 33  }
  0x29   :  { %s8637_s13 = sld [smem:[%s10164_s0 + %s8432_s15]]   ;;  %s8436_s15 = smov 35  }
  0x2a   :  { %10195 = sst [smem:[#allocation55_spill]] %s8592_s12 }
  0x2b   :  { %s8612_s12 = sld [smem:[%s10164_s0 + %s8427_s7]]   ;;  %s8431_s7 = smov 30  }
  0x2c   :  { %10196 = sst [smem:[#allocation56_spill]] %s8602_s27 }
  0x2d   :  { %s8622_s27 = sld [smem:[%s10164_s0 + %s8429_s22]]   ;;  %s8433_s22 = smov 32  }
  0x2e   :  { %10200 = sst [smem:[#allocation60_spill]] %s8627_s5 }
  0x2f   :  { %10201 = sst [smem:[#allocation61_spill]] %s8637_s13 }
  0x30   :  { %s8647_s5 = sld [smem:[%s10164_s0 + %s8434_s28]]  }
  0x31   :  { %10198 = sst [smem:[#allocation58_spill]] %s8612_s12 }
  0x32   :  { %s8632_s12 = sld [smem:[%s10164_s0 + %s8431_s7]]   ;;  %s8435_s7 = smov 34  }
  0x33   :  { %10199 = sst [smem:[#allocation59_spill]] %s8622_s27 }
  0x34   :  { %s8642_s27 = sld [smem:[%s10164_s0 + %s8433_s22]]   ;;  %s8437_s22 = smov 36  }
  0x35   :  { %s8652_s8 = sld [smem:[%s10164_s0 + %s8435_s7]]  }
  0x36   :  { %s8657_s13 = sld [smem:[%s10164_s0 + %s8436_s15]]  }
  0x3a   :  { %10202 = sst [smem:[#allocation62_spill]] %s8642_s27 }
  0x3b   :  { %s8662_s27 = sld [smem:[%s10164_s0 + %s8437_s22]]  }
  0x3c   :  { %79 = vsyncpa [#allocation7], 0 }
  0x3d   :  { %80 = vsyncpa [#allocation9], 0 }
  0x3e   :  { %81 = vsyncpa [#allocation12], 0 }
  0x3f   :  { %82 = vsyncpa [#allocation15], 0 }
  0x40   :  { %83 = vsyncpa [#allocation18], 0 }
  0x41   :  { %84 = vsyncpa [#allocation21], 0 }
  0x42   :  { %85 = vsyncpa [#allocation24], 0 }
  0x43   :  { %86 = vsyncpa [#allocation27], 0 }
  0x44   :  { %87 = vsyncpa [#allocation30], 0 }
  0x45   :  { %88 = vsyncpa [#allocation33], 0  ;;  %s8438_s28 = smov [#allocation8]   ;;  %s8439_s2 = smov [#allocation11]  }
  0x46   :  { %s113_s1 = sshll.u32 %s8438_s28, 4  ;;  %s137_s7 = sshll.u32 %s8439_s2, 4  ;;  %s114_s1 = int_to_ptr.vmem [resolvable:$true] %s113_s1  ;;  %s138_s7 = int_to_ptr.vmem [resolvable:$true] %s137_s7 }
  0x47   :  { %s7986_s0 = scalar_lea.hbm %s8507_s25, 16 }
  0x48   :  { %p7987_p0 = scmp.ne.s32.totalorder %s8507_s25, %s7986_s0  ;;  %p7990_p1 = scmp.lt.u32.totalorder %s7986_s0, %s8507_s25 }
  0x4a   :  { %p7992_p2 = pnand %p7990_p1, %p7987_p0 }
  0x4c   :  { %7995 = shalt.err (!%p7992_p2)
}
  0x4d   :  { %s7996_s10 = scalar_lea.vmem %s114_s1, 16  ;;  %s8000_s11 = scalar_lea.vmem %s114_s1, 32 }
  0x4e   :  { %p7997_p3 = scmp.ne.s32.totalorder %s114_s1, %s7996_s10  ;;  %p8001_p4 = scmp.lt.s32.totalorder %s114_s1, %s114_s1 }
  0x4f   :  { %p8002_p5 = scmp.lt.s32.totalorder %s8000_s11, %s7996_s10 }
  0x51   :  { %p8003_p6 = por %p8002_p5, %p8001_p4 }
  0x53   :  { %p8004_p7 = pnand %p8003_p6, %p7997_p3 }
  0x55   :  { %8007 = shalt.err (!%p8004_p7)
}
  0x56   :  { %116 = dma.hbm_to_vmem [thread:$0]  %s8507_s25, 16, %s114_s1, [#allocation9]  }
  0x57   :  { %s8008_s15 = scalar_lea.hbm %s8527_s14, 16 }
  0x58   :  { %p8009_p8 = scmp.ne.s32.totalorder %s8527_s14, %s8008_s15  ;;  %p8012_p9 = scmp.lt.u32.totalorder %s8008_s15, %s8527_s14 }
  0x5a   :  { %p8014_p10 = pnand %p8012_p9, %p8009_p8 }
  0x5c   :  { %8017 = shalt.err (!%p8014_p10)
}
  0x5d   :  { %s8018_s16 = scalar_lea.vmem %s138_s7, 16  ;;  %s8022_s18 = scalar_lea.vmem %s138_s7, 32 }
  0x5e   :  { %p8019_p11 = scmp.ne.s32.totalorder %s138_s7, %s8018_s16  ;;  %p8023_p12 = scmp.lt.s32.totalorder %s138_s7, %s138_s7 }
  0x5f   :  { %p8024_p13 = scmp.lt.s32.totalorder %s8022_s18, %s8018_s16 }
  0x61   :  { %p8025_p0 = por %p8024_p13, %p8023_p12 }
  0x63   :  { %p8026_p1 = pnand %p8025_p0, %p8019_p11 }
  0x65   :  { %8029 = shalt.err (!%p8026_p1)
}
  0x66   :  { %140 = dma.hbm_to_vmem [thread:$0]  %s8527_s14, 16, %s138_s7, [#allocation12]  }
  0x67   :  { %s8440_s22 = smov [#allocation14]   ;;  %s8030_s23 = scalar_lea.hbm %s8542_s30, 256 }
  0x68   :  { %s158_s25 = sshll.u32 %s8440_s22, 4  ;;  %p8031_p2 = scmp.ne.s32.totalorder %s8542_s30, %s8030_s23  ;;  %s159_s25 = int_to_ptr.vmem [resolvable:$true] %s158_s25 }
  0x69   :  { %p8034_p3 = scmp.lt.u32.totalorder %s8030_s23, %s8542_s30 }
  0x6b   :  { %p8036_p4 = pnand %p8034_p3, %p8031_p2 }
  0x6d   :  { %8039 = shalt.err (!%p8036_p4)
}
  0x6e   :  { %s8040_s26 = scalar_lea.vmem %s159_s25, 256  ;;  %p8045_p6 = scmp.lt.s32.totalorder %s159_s25, %s159_s25 }
  0x6f   :  { %p8041_p5 = scmp.ne.s32.totalorder %s159_s25, %s8040_s26  ;;  %p8046_p7 = scmp.lt.s32.totalorder %s8040_s26, %s8040_s26 }
  0x71   :  { %p8047_p8 = por %p8046_p7, %p8045_p6 }
  0x73   :  { %p8048_p9 = pnand %p8047_p8, %p8041_p5 }
  0x75   :  { %8051 = shalt.err (!%p8048_p9)
}
  0x76   :  { %s8441_s28 = smov 128   ;;  %s8442_s14 = smov 8  }
  0x77   :  { %164 = dma.hbm_to_vmem [thread:$0]  %s8542_s30, 256, %s159_s25, [#allocation15], %s8441_s28, %s8441_s28, %s8442_s14  }
  0x78   :  { %s8443_s1 = smov [#allocation17]   ;;  %s8444_s7 = smov [#allocation20]  }
  0x79   :  { %s183_s2 = sshll.u32 %s8443_s1, 4  ;;  %s207_s0 = sshll.u32 %s8444_s7, 4  ;;  %s184_s2 = int_to_ptr.vmem [resolvable:$true] %s183_s2  ;;  %s208_s0 = int_to_ptr.vmem [resolvable:$true] %s207_s0 }
  0x7a   :  { %s8052_s10 = scalar_lea.hbm %s8557_s20, 16 }
  0x7b   :  { %p8053_p10 = scmp.ne.s32.totalorder %s8557_s20, %s8052_s10  ;;  %p8056_p11 = scmp.lt.u32.totalorder %s8052_s10, %s8557_s20 }
  0x7d   :  { %p8058_p12 = pnand %p8056_p11, %p8053_p10 }
  0x7f   :  { %8061 = shalt.err (!%p8058_p12)
}
  0x80   :  { %s8062_s11 = scalar_lea.vmem %s184_s2, 16  ;;  %s8066_s15 = scalar_lea.vmem %s184_s2, 32 }
  0x81   :  { %p8063_p13 = scmp.ne.s32.totalorder %s184_s2, %s8062_s11  ;;  %p8067_p0 = scmp.lt.s32.totalorder %s184_s2, %s184_s2 }
  0x82   :  { %p8068_p1 = scmp.lt.s32.totalorder %s8066_s15, %s8062_s11 }
  0x84   :  { %p8069_p2 = por %p8068_p1, %p8067_p0 }
  0x86   :  { %p8070_p3 = pnand %p8069_p2, %p8063_p13 }
  0x88   :  { %8073 = shalt.err (!%p8070_p3)
}
  0x89   :  { %186 = dma.hbm_to_vmem [thread:$0]  %s8557_s20, 16, %s184_s2, [#allocation18]  }
  0x8a   :  { %s8074_s30 = scalar_lea.hbm %s8577_s9, 16 }
  0x8b   :  { %p8075_p4 = scmp.ne.s32.totalorder %s8577_s9, %s8074_s30  ;;  %p8078_p5 = scmp.lt.u32.totalorder %s8074_s30, %s8577_s9 }
  0x8d   :  { %p8080_p6 = pnand %p8078_p5, %p8075_p4 }
  0x8f   :  { %8083 = shalt.err (!%p8080_p6)
}
  0x90   :  { %s8084_s16 = scalar_lea.vmem %s208_s0, 16  ;;  %s8088_s18 = scalar_lea.vmem %s208_s0, 32 }
  0x91   :  { %p8085_p7 = scmp.ne.s32.totalorder %s208_s0, %s8084_s16  ;;  %p8089_p8 = scmp.lt.s32.totalorder %s208_s0, %s208_s0 }
  0x92   :  { %p8090_p9 = scmp.lt.s32.totalorder %s8088_s18, %s8084_s16 }
  0x94   :  { %p8091_p10 = por %p8090_p9, %p8089_p8 }
  0x96   :  { %p8092_p11 = pnand %p8091_p10, %p8085_p7 }
  0x98   :  { %8095 = shalt.err (!%p8092_p11)
}
  0x99   :  { %210 = dma.hbm_to_vmem [thread:$0]  %s8577_s9, 16, %s208_s0, [#allocation21]  }
  0x9a   :  { %s8445_s20 = smov [#allocation23]   ;;  %s8446_s25 = smov [#allocation26]  }
  0x9b   :  { %s231_s22 = sshll.u32 %s8445_s20, 4  ;;  %s255_s23 = sshll.u32 %s8446_s25, 4  ;;  %s232_s22 = int_to_ptr.vmem [resolvable:$true] %s231_s22  ;;  %s256_s23 = int_to_ptr.vmem [resolvable:$true] %s255_s23 }
  0x9c   :  { %s8096_s26 = scalar_lea.hbm %s8597_s29, 16 }
  0x9d   :  { %p8097_p12 = scmp.ne.s32.totalorder %s8597_s29, %s8096_s26  ;;  %p8100_p13 = scmp.lt.u32.totalorder %s8096_s26, %s8597_s29 }
  0x9f   :  { %p8102_p0 = pnand %p8100_p13, %p8097_p12 }
  0xa1   :  { %8105 = shalt.err (!%p8102_p0)
}
  0xa2   :  { %s8106_s28 = scalar_lea.vmem %s232_s22, 16  ;;  %s8110_s1 = scalar_lea.vmem %s232_s22, 32 }
  0xa3   :  { %p8107_p1 = scmp.ne.s32.totalorder %s232_s22, %s8106_s28  ;;  %p8111_p2 = scmp.lt.s32.totalorder %s232_s22, %s232_s22 }
  0xa4   :  { %p8112_p3 = scmp.lt.s32.totalorder %s8110_s1, %s8106_s28 }
  0xa6   :  { %p8113_p4 = por %p8112_p3, %p8111_p2 }
  0xa8   :  { %p8114_p5 = pnand %p8113_p4, %p8107_p1 }
  0xaa   :  { %8117 = shalt.err (!%p8114_p5)
}
  0xab   :  { %234 = dma.hbm_to_vmem [thread:$0]  %s8597_s29, 16, %s232_s22, [#allocation24]  }
  0xac   :  { %s8118_s9 = scalar_lea.hbm %s8617_s21, 16 }
  0xad   :  { %p8119_p6 = scmp.ne.s32.totalorder %s8617_s21, %s8118_s9  ;;  %p8122_p7 = scmp.lt.u32.totalorder %s8118_s9, %s8617_s21 }
  0xaf   :  { %p8124_p8 = pnand %p8122_p7, %p8119_p6 }
  0xb1   :  { %8127 = shalt.err (!%p8124_p8)
}
  0xb2   :  { %s8128_s2 = scalar_lea.vmem %s256_s23, 16  ;;  %s8132_s7 = scalar_lea.vmem %s256_s23, 32 }
  0xb3   :  { %p8129_p9 = scmp.ne.s32.totalorder %s256_s23, %s8128_s2  ;;  %p8133_p10 = scmp.lt.s32.totalorder %s256_s23, %s256_s23 }
  0xb4   :  { %p8134_p11 = scmp.lt.s32.totalorder %s8132_s7, %s8128_s2 }
  0xb6   :  { %p8135_p12 = por %p8134_p11, %p8133_p10 }
  0xb8   :  { %p8136_p13 = pnand %p8135_p12, %p8129_p9 }
  0xba   :  { %8139 = shalt.err (!%p8136_p13)
}
  0xbb   :  { %258 = dma.hbm_to_vmem [thread:$0]  %s8617_s21, 16, %s256_s23, [#allocation27]  }
  0xbc   :  { %s8447_s29 = smov [#allocation29]   ;;  %s8448_s10 = smov [#allocation6]  }
  0xbd   :  { %s277_s0 = sshll.u32 %s8447_s29, 4  ;;  %s101_s11 = sshll.u32 %s8448_s10, 4  ;;  %s278_s0 = int_to_ptr.vmem [resolvable:$true] %s277_s0  ;;  %s102_s11 = int_to_ptr.vmem [resolvable:$true] %s101_s11 }
  0xbe   :  { %s8140_s15 = scalar_lea.hbm %s8632_s12, 128 }
  0xbf   :  { %p8141_p0 = scmp.ne.s32.totalorder %s8632_s12, %s8140_s15  ;;  %p8144_p1 = scmp.lt.u32.totalorder %s8140_s15, %s8632_s12 }
  0xc1   :  { %p8146_p2 = pnand %p8144_p1, %p8141_p0 }
  0xc3   :  { %8149 = shalt.err (!%p8146_p2)
}
  0xc4   :  { %s8150_s30 = scalar_lea.vmem %s278_s0, 128  ;;  %p8155_p4 = scmp.lt.s32.totalorder %s278_s0, %s278_s0 }
  0xc5   :  { %p8151_p3 = scmp.ne.s32.totalorder %s278_s0, %s8150_s30  ;;  %p8156_p5 = scmp.lt.s32.totalorder %s8150_s30, %s8150_s30 }
  0xc7   :  { %p8157_p6 = por %p8156_p5, %p8155_p4 }
  0xc9   :  { %p8158_p7 = pnand %p8157_p6, %p8151_p3 }
  0xcb   :  { %8161 = shalt.err (!%p8158_p7)
}
  0xcc   :  { %280 = dma.hbm_to_vmem [thread:$0]  %s8632_s12, 128, %s278_s0, [#allocation30]  }
  0xcd   :  { %s8162_s21 = scalar_lea.hbm %s8497_s17, 16 }
  0xce   :  { %p8163_p8 = scmp.ne.s32.totalorder %s8497_s17, %s8162_s21  ;;  %p8166_p9 = scmp.lt.u32.totalorder %s8162_s21, %s8497_s17 }
  0xd0   :  { %p8168_p10 = pnand %p8166_p9, %p8163_p8 }
  0xd2   :  { %8171 = shalt.err (!%p8168_p10)
}
  0xd3   :  { %s8172_s16 = scalar_lea.vmem %s102_s11, 16  ;;  %s8176_s18 = scalar_lea.vmem %s102_s11, 32 }
  0xd4   :  { %p8173_p11 = scmp.ne.s32.totalorder %s102_s11, %s8172_s16  ;;  %p8177_p12 = scmp.lt.s32.totalorder %s102_s11, %s102_s11 }
  0xd5   :  { %p8178_p13 = scmp.lt.s32.totalorder %s8176_s18, %s8172_s16 }
  0xd7   :  { %p8179_p0 = por %p8178_p13, %p8177_p12 }
  0xd9   :  { %p8180_p1 = pnand %p8179_p0, %p8173_p11 }
  0xdb   :  { %8183 = shalt.err (!%p8180_p1)
}
  0xdc   :  { %104 = dma.hbm_to_vmem [thread:$0]  %s8497_s17, 16, %s102_s11, [#allocation7]  }
  0xdd   :  { %s8449_s12 = smov [#allocation10]   ;;  %s8450_s22 = smov [#allocation13]  }
  0xde   :  { %s125_s20 = sshll.u32 %s8449_s12, 4  ;;  %s149_s25 = sshll.u32 %s8450_s22, 4  ;;  %s126_s20 = int_to_ptr.vmem [resolvable:$true] %s125_s20  ;;  %s150_s25 = int_to_ptr.vmem [resolvable:$true] %s149_s25 }
  0xdf   :  { %s8184_s23 = scalar_lea.hbm %s8517_s3, 32 }
  0xe0   :  { %p8185_p2 = scmp.ne.s32.totalorder %s8517_s3, %s8184_s23  ;;  %p8188_p3 = scmp.lt.u32.totalorder %s8184_s23, %s8517_s3 }
  0xe2   :  { %p8190_p4 = pnand %p8188_p3, %p8185_p2 }
  0xe4   :  { %8193 = shalt.err (!%p8190_p4)
}
  0xe5   :  { %s8194_s26 = scalar_lea.vmem %s126_s20, 32  ;;  %p8199_p6 = scmp.lt.s32.totalorder %s126_s20, %s126_s20 }
  0xe6   :  { %p8195_p5 = scmp.ne.s32.totalorder %s126_s20, %s8194_s26  ;;  %p8200_p7 = scmp.lt.s32.totalorder %s8194_s26, %s8194_s26 }
  0xe8   :  { %p8201_p8 = por %p8200_p7, %p8199_p6 }
  0xea   :  { %p8202_p9 = pnand %p8201_p8, %p8195_p5 }
  0xec   :  { %8205 = shalt.err (!%p8202_p9)
}
  0xed   :  { %128 = dma.hbm_to_vmem [thread:$0]  %s8517_s3, 32, %s126_s20, [#allocation9]  }
  0xee   :  { %s8206_s17 = scalar_lea.hbm %s8537_s24, 16 }
  0xef   :  { %p8207_p10 = scmp.ne.s32.totalorder %s8537_s24, %s8206_s17  ;;  %p8210_p11 = scmp.lt.u32.totalorder %s8206_s17, %s8537_s24 }
  0xf1   :  { %p8212_p12 = pnand %p8210_p11, %p8207_p10 }
  0xf3   :  { %8215 = shalt.err (!%p8212_p12)
}
  0xf4   :  { %s8216_s28 = scalar_lea.vmem %s150_s25, 16  ;;  %s8220_s1 = scalar_lea.vmem %s150_s25, 32 }
  0xf5   :  { %p8217_p13 = scmp.ne.s32.totalorder %s150_s25, %s8216_s28  ;;  %p8221_p0 = scmp.lt.s32.totalorder %s150_s25, %s150_s25 }
  0xf6   :  { %p8222_p1 = scmp.lt.s32.totalorder %s8220_s1, %s8216_s28 }
  0xf8   :  { %p8223_p2 = por %p8222_p1, %p8221_p0 }
  0xfa   :  { %p8224_p3 = pnand %p8223_p2, %p8217_p13 }
  0xfc   :  { %8227 = shalt.err (!%p8224_p3)
}
  0xfd   :  { %152 = dma.hbm_to_vmem [thread:$0]  %s8537_s24, 16, %s150_s25, [#allocation12]  }
  0xfe   :  { %s8451_s3 = smov [#allocation16]   ;;  %s8452_s2 = smov [#allocation19]  }
  0xff   :  { %s171_s9 = sshll.u32 %s8451_s3, 4  ;;  %s195_s7 = sshll.u32 %s8452_s2, 4  ;;  %s172_s9 = int_to_ptr.vmem [resolvable:$true] %s171_s9  ;;  %s196_s7 = int_to_ptr.vmem [resolvable:$true] %s195_s7 }
 0x100   :  { %s8228_s29 = scalar_lea.hbm %s8547_s6, 16 }
 0x101   :  { %p8229_p4 = scmp.ne.s32.totalorder %s8547_s6, %s8228_s29  ;;  %p8232_p5 = scmp.lt.u32.totalorder %s8228_s29, %s8547_s6 }
 0x103   :  { %p8234_p6 = pnand %p8232_p5, %p8229_p4 }
 0x105   :  { %8237 = shalt.err (!%p8234_p6)
}
 0x106   :  { %s8238_s0 = scalar_lea.vmem %s172_s9, 16  ;;  %s8242_s10 = scalar_lea.vmem %s172_s9, 32 }
 0x107   :  { %p8239_p7 = scmp.ne.s32.totalorder %s172_s9, %s8238_s0  ;;  %p8243_p8 = scmp.lt.s32.totalorder %s172_s9, %s172_s9 }
 0x108   :  { %p8244_p9 = scmp.lt.s32.totalorder %s8242_s10, %s8238_s0 }
 0x10a   :  { %p8245_p10 = por %p8244_p9, %p8243_p8 }
 0x10c   :  { %p8246_p11 = pnand %p8245_p10, %p8239_p7 }
 0x10e   :  { %8249 = shalt.err (!%p8246_p11)
}
 0x10f   :  { %174 = dma.hbm_to_vmem [thread:$0]  %s8547_s6, 16, %s172_s9, [#allocation15]  }
 0x110   :  { %s8250_s24 = scalar_lea.hbm %s8567_s4, 16 }
 0x111   :  { %p8251_p12 = scmp.ne.s32.totalorder %s8567_s4, %s8250_s24  ;;  %p8254_p13 = scmp.lt.u32.totalorder %s8250_s24, %s8567_s4 }
 0x113   :  { %p8256_p0 = pnand %p8254_p13, %p8251_p12 }
 0x115   :  { %8259 = shalt.err (!%p8256_p0)
}
 0x116   :  { %s8260_s11 = scalar_lea.vmem %s196_s7, 16  ;;  %s8264_s15 = scalar_lea.vmem %s196_s7, 32 }
 0x117   :  { %p8261_p1 = scmp.ne.s32.totalorder %s196_s7, %s8260_s11  ;;  %p8265_p2 = scmp.lt.s32.totalorder %s196_s7, %s196_s7 }
 0x118   :  { %p8266_p3 = scmp.lt.s32.totalorder %s8264_s15, %s8260_s11 }
 0x11a   :  { %p8267_p4 = por %p8266_p3, %p8265_p2 }
 0x11c   :  { %p8268_p5 = pnand %p8267_p4, %p8261_p1 }
 0x11e   :  { %8271 = shalt.err (!%p8268_p5)
}
 0x11f   :  { %198 = dma.hbm_to_vmem [thread:$0]  %s8567_s4, 16, %s196_s7, [#allocation18]  }
 0x120   :  { %s8453_s6 = smov [#allocation22]   ;;  %s8454_s21 = smov [#allocation25]  }
 0x121   :  { %s219_s30 = sshll.u32 %s8453_s6, 4  ;;  %s243_s16 = sshll.u32 %s8454_s21, 4  ;;  %s220_s30 = int_to_ptr.vmem [resolvable:$true] %s219_s30  ;;  %s244_s16 = int_to_ptr.vmem [resolvable:$true] %s243_s16 }
 0x122   :  { %s8272_s18 = scalar_lea.hbm %s8587_s19, 16 }
 0x123   :  { %p8273_p6 = scmp.ne.s32.totalorder %s8587_s19, %s8272_s18  ;;  %p8276_p7 = scmp.lt.u32.totalorder %s8272_s18, %s8587_s19 }
 0x125   :  { %p8278_p8 = pnand %p8276_p7, %p8273_p6 }
 0x127   :  { %8281 = shalt.err (!%p8278_p8)
}
 0x128   :  { %s8282_s12 = scalar_lea.vmem %s220_s30, 16  ;;  %s8286_s20 = scalar_lea.vmem %s220_s30, 32 }
 0x129   :  { %p8283_p9 = scmp.ne.s32.totalorder %s220_s30, %s8282_s12  ;;  %p8287_p10 = scmp.lt.s32.totalorder %s220_s30, %s220_s30 }
 0x12a   :  { %p8288_p11 = scmp.lt.s32.totalorder %s8286_s20, %s8282_s12 }
 0x12c   :  { %p8289_p12 = por %p8288_p11, %p8287_p10 }
 0x12e   :  { %p8290_p13 = pnand %p8289_p12, %p8283_p9 }
 0x130   :  { %8293 = shalt.err (!%p8290_p13)
}
 0x131   :  { %s10203_s4 = sld [smem:[#allocation57_spill]] }
 0x132   :  { %222 = dma.hbm_to_vmem [thread:$0]  %s8587_s19, 16, %s220_s30, [#allocation21]  }
 0x137   :  { %s8294_s22 = scalar_lea.hbm %s10203_s4, 16 }
 0x138   :  { %p8295_p0 = scmp.ne.s32.totalorder %s10203_s4, %s8294_s22  ;;  %p8298_p1 = scmp.lt.u32.totalorder %s8294_s22, %s10203_s4 }
 0x13a   :  { %p8300_p2 = pnand %p8298_p1, %p8295_p0 }
 0x13c   :  { %8303 = shalt.err (!%p8300_p2)
}
 0x13d   :  { %s8304_s25 = scalar_lea.vmem %s244_s16, 16  ;;  %s8308_s23 = scalar_lea.vmem %s244_s16, 32 }
 0x13e   :  { %p8305_p3 = scmp.ne.s32.totalorder %s244_s16, %s8304_s25  ;;  %p8309_p4 = scmp.lt.s32.totalorder %s244_s16, %s244_s16 }
 0x13f   :  { %p8310_p5 = scmp.lt.s32.totalorder %s8308_s23, %s8304_s25 }
 0x141   :  { %p8311_p6 = por %p8310_p5, %p8309_p4 }
 0x143   :  { %p8312_p7 = pnand %p8311_p6, %p8305_p3 }
 0x145   :  { %8315 = shalt.err (!%p8312_p7)
}
 0x146   :  { %s10204_s26 = sld [smem:[#allocation60_spill]]  ;;  %s8455_s19 = smov [#allocation28]  }
 0x147   :  { %246 = dma.hbm_to_vmem [thread:$0]  %s10203_s4, 16, %s244_s16, [#allocation24]  }
 0x148   :  { %s267_s17 = sshll.u32 %s8455_s19, 4  ;;  %s8456_s28 = smov [#allocation31]   ;;  %s268_s17 = int_to_ptr.vmem [resolvable:$true] %s267_s17 }
 0x149   :  { %s287_s1 = sshll.u32 %s8456_s28, 4  ;;  %s288_s1 = int_to_ptr.vmem [resolvable:$true] %s287_s1 }
 0x14c   :  { %s8316_s3 = scalar_lea.hbm %s10204_s26, 16 }
 0x14d   :  { %p8317_p8 = scmp.ne.s32.totalorder %s10204_s26, %s8316_s3  ;;  %p8320_p9 = scmp.lt.u32.totalorder %s8316_s3, %s10204_s26 }
 0x14f   :  { %p8322_p10 = pnand %p8320_p9, %p8317_p8 }
 0x151   :  { %8325 = shalt.err (!%p8322_p10)
}
 0x152   :  { %s8326_s9 = scalar_lea.vmem %s268_s17, 16  ;;  %s8330_s2 = scalar_lea.vmem %s268_s17, 32 }
 0x153   :  { %p8327_p11 = scmp.ne.s32.totalorder %s268_s17, %s8326_s9  ;;  %p8331_p12 = scmp.lt.s32.totalorder %s268_s17, %s268_s17 }
 0x154   :  { %p8332_p13 = scmp.lt.s32.totalorder %s8330_s2, %s8326_s9 }
 0x156   :  { %p8333_p0 = por %p8332_p13, %p8331_p12 }
 0x158   :  { %p8334_p1 = pnand %p8333_p0, %p8327_p11 }
 0x15a   :  { %8337 = shalt.err (!%p8334_p1)
}
 0x15b   :  { %s10205_s7 = sld [smem:[#allocation61_spill]] }
 0x15c   :  { %270 = dma.hbm_to_vmem [thread:$0]  %s10204_s26, 16, %s268_s17, [#allocation27]  }
 0x161   :  { %s8338_s29 = scalar_lea.hbm %s10205_s7, 16 }
 0x162   :  { %p8339_p2 = scmp.ne.s32.totalorder %s10205_s7, %s8338_s29  ;;  %p8342_p3 = scmp.lt.u32.totalorder %s8338_s29, %s10205_s7 }
 0x164   :  { %p8344_p4 = pnand %p8342_p3, %p8339_p2 }
 0x166   :  { %8347 = shalt.err (!%p8344_p4)
}
 0x167   :  { %s8348_s0 = scalar_lea.vmem %s288_s1, 16  ;;  %s8352_s10 = scalar_lea.vmem %s288_s1, 32 }
 0x168   :  { %p8349_p5 = scmp.ne.s32.totalorder %s288_s1, %s8348_s0  ;;  %p8353_p6 = scmp.lt.s32.totalorder %s288_s1, %s288_s1 }
 0x169   :  { %p8354_p7 = scmp.lt.s32.totalorder %s8352_s10, %s8348_s0 }
 0x16b   :  { %p8355_p8 = por %p8354_p7, %p8353_p6 }
 0x16d   :  { %p8356_p9 = pnand %p8355_p8, %p8349_p5 }
 0x16f   :  { %8359 = shalt.err (!%p8356_p9)
}
 0x170   :  { %290 = dma.hbm_to_vmem [thread:$0]  %s10205_s7, 16, %s288_s1, [#allocation30]  }
 0x171   :  { %s8457_s24 = smov [#allocation32]   ;;  %s8360_s15 = scalar_lea.hbm %s8647_s5, 16 }
 0x172   :  { %s299_s11 = sshll.u32 %s8457_s24, 4  ;;  %p8361_p10 = scmp.ne.s32.totalorder %s8647_s5, %s8360_s15  ;;  %s300_s11 = int_to_ptr.vmem [resolvable:$true] %s299_s11 }
 0x173   :  { %p8364_p11 = scmp.lt.u32.totalorder %s8360_s15, %s8647_s5 }
 0x175   :  { %p8366_p12 = pnand %p8364_p11, %p8361_p10 }
 0x177   :  { %8369 = shalt.err (!%p8366_p12)
}
 0x178   :  { %s8370_s6 = scalar_lea.vmem %s300_s11, 16  ;;  %s8374_s30 = scalar_lea.vmem %s300_s11, 32 }
 0x179   :  { %p8371_p13 = scmp.ne.s32.totalorder %s300_s11, %s8370_s6  ;;  %p8375_p0 = scmp.lt.s32.totalorder %s300_s11, %s300_s11 }
 0x17a   :  { %p8376_p1 = scmp.lt.s32.totalorder %s8374_s30, %s8370_s6 }
 0x17c   :  { %p8377_p2 = por %p8376_p1, %p8375_p0 }
 0x17e   :  { %p8378_p3 = pnand %p8377_p2, %p8371_p13 }
 0x180   :  { %8381 = shalt.err (!%p8378_p3)
}
 0x181   :  { %302 = dma.hbm_to_vmem [thread:$0]  %s8647_s5, 16, %s300_s11, [#allocation33]  }
 0x182   :  { %8382 = dma.done.wait [#allocation7], 16  }
 0x183   :  { %8383 = vsyncadd [#allocation7], 4294967280 }
 0x184   :  { %8384 = dma.done.wait [#allocation9], 48  }
 0x185   :  { %8385 = vsyncadd [#allocation9], 4294967248 }
 0x186   :  { %8386 = dma.done.wait [#allocation12], 32  }
 0x187   :  { %8387 = vsyncadd [#allocation12], 4294967264 }
 0x188   :  { %8388 = dma.done.wait [#allocation15], 272  }
 0x189   :  { %8389 = vsyncadd [#allocation15], 4294967024 }
 0x18a   :  { %8390 = dma.done.wait [#allocation18], 32  }
 0x18b   :  { %8391 = vsyncadd [#allocation18], 4294967264 }
 0x18c   :  { %8392 = dma.done.wait [#allocation21], 32  }
 0x18d   :  { %8393 = vsyncadd [#allocation21], 4294967264 }
 0x18e   :  { %8394 = dma.done.wait [#allocation24], 32  }
 0x18f   :  { %8395 = vsyncadd [#allocation24], 4294967264 }
 0x190   :  { %8396 = dma.done.wait [#allocation27], 32  }
 0x191   :  { %8397 = vsyncadd [#allocation27], 4294967264 }
 0x192   :  { %8398 = dma.done.wait [#allocation30], 144  }
 0x193   :  { %8399 = vsyncadd [#allocation30], 4294967152 }
 0x194   :  { %8400 = dma.done.wait [#allocation33], 16  }
 0x195   :  { %8401 = vsyncadd [#allocation33], 4294967280  ;;  %s10206_s5 = sld [smem:[#allocation46_spill]]  ;;  %s10207_s21 = sld [smem:[#allocation44_spill]]  ;;  %v8458_v0 = vmov 0.0   ;;  %vm8459_vm0 = vmmov 0   ;;  %v496_v61 = vlaneseq }
 0x196   :  { %6770 = vmatprep.subr.bf16.mxu0 %v8458_v0  ;;  %6774 = vmatprep.mubr.msk.bf16.mxu0 %vm8459_vm0, %v8458_v0  ;;  %s10208_s16 = sld [smem:[#allocation47_spill]]  ;;  %vm374_vm1 = vcmask 261120   ;;  %s10209_s18 = sld [smem:[#allocation49_spill]]  ;;  %v8460_v16 = vmov 0.0|0.0   ;;  %v6421_v17 = vld [vmem:[#allocation6] ss:$0 sm:$0xff] }
 0x197   :  { %6778 = vmatprep.subr.bf16.mxu1 %v8458_v0  ;;  %6782 = vmatprep.mubr.msk.bf16.mxu1 %vm8459_vm0, %v8458_v0  ;;  %s10210_s12 = sld [smem:[#allocation48_spill]]  ;;  %v8461_v45 = vmov 0   ;;  %v6423_v46 = vld [vmem:[#allocation8] ss:$0 sm:$0xff]  ;;  %v8788_v55 = vld [vmem:[#allocation11] ss:$0 sm:$0xff] }
 0x198   :  { %s8462_s20 = smov 64   ;;  %v8796_v62 = vshrl.u32 %v496_v61, 7  ;;  %s8463_s4 = smov 96   ;;  %vm859_vm2 = vcmask 1041409   ;;  %vm855_vm3 = vcmask 261127   ;;  %vm1157_vm4 = vcmask 260102  }
 0x199   :  { %s10211_s22 = sld [smem:[#allocation50_spill]]  ;;  %s8464_s25 = smov 32   ;;  %vm1460_vm5 = vcmask 259077   ;;  %vm1764_vm6 = vcmask 258052   ;;  %vm1761_vm7 = vcmask 257027   ;;  %vm1457_vm8 = vcmask 256002  }
 0x19a   :  { %v498_v63 = vsub.s32 0, %v8796_v62  ;;  %s10212_s23 = sld [smem:[#allocation45_spill]]  ;;  %s10213_s26 = sld [smem:[#allocation51_spill]]  ;;  %vm2997_vm9 = vcmask 130048   ;;  %vm1154_vm10 = vcmask 254977   ;;  %vm852_vm11 = vcmask 253952  }
 0x19b   :  { %v360_v1 = vld [vmem:[%s10206_s5] sm:$0xff]  ;;  %v361_v2 = vld [vmem:[%s10206_s5 + $0x8] sm:$0xff]  ;;  %v362_v3 = vld [vmem:[%s10206_s5 + $0x10] sm:$0xff]  ;;  %s10214_s19 = sld [smem:[#allocation53_spill]]  ;;  %s10215_s17 = sld [smem:[#allocation52_spill]]  ;;  %vm4389_vm12 = vcmask 523264  }
 0x19c   :  { %v365_v4 = vpack.c.bf16 %v361_v2, %v360_v1  ;;  %v363_v5 = vld [vmem:[%s10206_s5 + $0x18] sm:$0xff]  ;;  %v358_v7 = vld [vmem:[%s10207_s21] sm:$0xff]  ;;  %v359_v8 = vld [vmem:[%s10207_s21 + $0x8] sm:$0xff]  ;;  %s10216_s28 = sld [smem:[#allocation54_spill]]  ;;  %vm4510_vm13 = vcmask 1043456   ;;  %vm4482_vm14 = vcmask 64512  }
 0x19d   :  { %v366_v6 = vpack.c.bf16 %v363_v5, %v362_v3  ;;  %v364_v9 = vpack.c.bf16 %v359_v8, %v358_v7  ;;  %v421_v10 = vld [vmem:[%s10208_s16] sm:$0xff]  ;;  %v422_v11 = vld [vmem:[%s10208_s16 + $0x8] sm:$0xff]  ;;  %v423_v13 = vld [vmem:[%s10208_s16 + $0x10] sm:$0xff]  ;;  %v502_v3 = vsub.s32 1, %v8796_v62  ;;  %s10217_s1 = sld [smem:[#allocation55_spill]]  ;;  %s10218_s3 = sld [smem:[#allocation56_spill]] }
 0x19e   :  { %6771 = vmatpush3.bf16.msra.mxu0 %v365_v4  ;;  %v426_v12 = vpack.c.bf16 %v422_v11, %v421_v10  ;;  %v424_v14 = vld [vmem:[%s10208_s16 + $0x18] sm:$0xff]  ;;  %v552_v24 = vld [vmem:[%s10209_s18] sm:$0xff]  ;;  %v553_v25 = vld [vmem:[%s10209_s18 + $0x8] sm:$0xff]  ;;  %s10219_s9 = sld [smem:[#allocation58_spill]]  ;;  %vm4634_vm15 = vcmask 785408   ;;  %s10220_s2 = sld [smem:[#allocation59_spill]] }
 0x19f   :  { %6772 = vmatprep.subr.bf16.mxu0 %v8458_v0  ;;  %v427_v15 = vpack.c.bf16 %v424_v14, %v423_v13  ;;  %v8759_v28 = vpack.c.bf16 %v553_v25, %v552_v24  ;;  %v554_v30 = vld [vmem:[%s10209_s18 + $0x10] sm:$0xff]  ;;  %v555_v31 = vld [vmem:[%s10209_s18 + $0x18] sm:$0xff]  ;;  %v482_v33 = vld [vmem:[%s10210_s12 + $0x8] sm:$0xff]  ;;  %s10221_s7 = sld [smem:[#allocation62_spill]]  ;;  %s8465_s29 = smov 120  }
 0x1a0   :  { %6779 = vmatpush3.bf16.msra.mxu1 %v426_v12  ;;  %v8765_v32 = vpack.c.bf16 %v555_v31, %v554_v30  ;;  %v484_v34 = vld [vmem:[%s10210_s12 + $0x18] sm:$0xff]  ;;  %v481_v36 = vld [vmem:[%s10210_s12] sm:$0xff]  ;;  %v483_v37 = vld [vmem:[%s10210_s12 + $0x10] sm:$0xff]  ;;  %s8466_s0 = smov 16   ;;  %s8467_s10 = smov 24  }
 0x1a1   :  { %6780 = vmatprep.subr.bf16.mxu1 %v8458_v0  ;;  %v491_v35 = vpack.c.bf16 %v484_v34, %v482_v33  ;;  %v490_v38 = vpack.c.bf16 %v483_v37, %v481_v36  ;;  %v486_v39 = vld [vmem:[%s10210_s12 + $0x28] sm:$0xff]  ;;  %v488_v40 = vld [vmem:[%s10210_s12 + $0x38] sm:$0xff]  ;;  %v485_v42 = vld [vmem:[%s10210_s12 + $0x20] sm:$0xff]  ;;  %s8468_s24 = smov 48   ;;  %s8470_s11 = smov 80  }
 0x1a2   :  { %6773 = vmatpush3.bf16.msra.mxu0 %v366_v6  ;;  %v493_v41 = vpack.c.bf16 %v488_v40, %v486_v39  ;;  %v487_v43 = vld [vmem:[%s10210_s12 + $0x30] sm:$0xff]  ;;  %v494_v1 = vld [vmem:[#allocation10] sm:$0x3]  ;;  %s8471_s15 = smov 112   ;;  %s8472_s6 = smov 56  }
 0x1a3   :  { %509 = vmatprep.subr.bf16.mxu0 %v491_v35  ;;  %v492_v44 = vpack.c.bf16 %v487_v43, %v485_v42  ;;  %v499_v2 = vrot.slane %v494_v1, %v498_v63  ;;  %v8804_v7 = vrot.slane %v494_v1, %v502_v3 }
 0x1a4   :  { %6781 = vmatpush3.bf16.msra.mxu1 %v427_v15 }
 0x1a5   :  { %6775 = vmatmul.mubr.msk.bf16.vlgmr.msra.gmra.mrb[0].mxu0 %vm374_vm1, %v364_v9  ;;  %7252 = vmatprep.subr.bf16.mxu1 %v8460_v16 }
 0x1a6   :  { %510 = vmatpush1.bf16.msra.mxu0 %v490_v38  ;;  %541 = vmatprep.mubr.bf16.mxu0 %v8461_v45 }
 0x1a7   :  { %511 = vmatprep.subr.bf16.mxu0 %v493_v41 }
 0x1aa   :  { %512 = vmatpush1.bf16.msra.mxu0 %v492_v44 }
 0x1ab   :  { %7258 = vmatprep.subr.bf16.mxu0 %v8460_v16 }
 0x278   :  { %v412_v18 = vpop.f32.mrb[0].mxu0 }
 0x279   :  { %v413_v19 = vadd.f32 %v6421_v17, %v412_v18  ;;  %v6776_v20 = vpop.f32.mrb[1].mxu0 }
 0x27a   :  { %v415_v21 = vpop.f32.mrb[2].mxu0 }
 0x27b   :  { %v416_v22 = vadd.f32 %v6421_v17, %v415_v21  ;;  %v6777_v23 = vpop.f32.mrb[3].mxu0  ;;  %v419_v26 = vmax.f32 %v413_v19, 0.0 }
 0x27d   :  { %v420_v27 = vmax.f32 %v416_v22, 0.0 }
 0x27f   :  { %v425_v29 = vpack.c.bf16 %v420_v27, %v419_v26 }
 0x281   :  { %6783 = vmatmul.mubr.msk.bf16.vlgmr.msra.gmra.mrb[0].mxu1 %vm374_vm1, %v425_v29 }
 0x282   :  { %7254 = vmatpush3.bf16.msra.mxu1 %v8759_v28  ;;  %6794 = vmatprep.mubr.msk.f32.mxu1 %vm8459_vm0, %v8458_v0 }
 0x283   :  { %7255 = vmatprep.subr.bf16.mxu1 %v8460_v16 }
 0x286   :  { %7257 = vmatpush3.bf16.msra.mxu1 %v8765_v32 }
 0x287   :  { %7264 = vmatprep.subr.bf16.mxu1 %v8460_v16 }
 0x289   :  { %6795 = vmatmul.mubr.f32.vlgmr.msra.gmra.mrb[4].mxu1 %v8458_v0 }
 0x28a   :  { %7266 = vmatpush3.bf16.msra.mxu1 %v8759_v28  ;;  %6816 = vmatprep.mubr.msk.f32.mxu1 %vm8459_vm0, %v8458_v0 }
 0x28b   :  { %7267 = vmatprep.subr.bf16.mxu1 %v8460_v16 }
 0x28e   :  { %7269 = vmatpush3.bf16.msra.mxu1 %v8765_v32 }
 0x28f   :  { %7276 = vmatprep.subr.bf16.mxu1 %v8460_v16 }
 0x354   :  { %v472_v47 = vpop.f32.mrb[0].mxu1 }
 0x355   :  { %v473_v48 = vadd.f32 %v6423_v46, %v472_v47  ;;  %v6784_v49 = vpop.f32.mrb[1].mxu1 }
 0x356   :  { %v475_v50 = vpop.f32.mrb[2].mxu1  ;;  %v557_v49 = vld [vmem:[%s10211_s22 + $0x8] sm:$0xff] }
 0x357   :  { %v476_v51 = vadd.f32 %v6423_v46, %v475_v50  ;;  %v6785_v52 = vpop.f32.mrb[3].mxu1  ;;  %v479_v53 = vmax.f32 %v473_v48, 0.0  ;;  %v556_v48 = vld [vmem:[%s10211_s22] sm:$0xff]  ;;  %v558_v50 = vld [vmem:[%s10211_s22 + $0x10] sm:$0xff] }
 0x358   :  { %v559_v52 = vld [vmem:[%s10211_s22 + $0x18] sm:$0xff] }
 0x359   :  { %v480_v54 = vmax.f32 %v476_v51, 0.0  ;;  %v8839_v51 = vpack.c.bf16 %v557_v49, %v556_v48 }
 0x35b   :  { %v489_v56 = vpack.c.bf16 %v480_v54, %v479_v53  ;;  %v8843_v53 = vpack.c.bf16 %v559_v52, %v558_v50 }
 0x35c   :  { %v643_v57 = vpop.f32.mrb[4].mxu1 }
 0x35d   :  { %6425 = vmatmul.mubr.msk.bf16.vlgmr.msra.gmra.mrb[4].mxu0 %vm374_vm1, %v489_v56  ;;  %v644_v58 = vadd.f32 %v8788_v55, %v643_v57  ;;  %v6796_v59 = vpop.f32.mrb[5].mxu1 }
 0x35e   :  { %6805 = vmatprep.mubr.msk.f32.mxu0 %vm8459_vm0, %v8458_v0  ;;  %7260 = vmatpush3.bf16.msra.mxu0 %v8839_v51 }
 0x35f   :  { %v648_v60 = vrot.slane %v644_v58, 1  ;;  %7261 = vmatprep.subr.bf16.mxu0 %v8460_v16 }
 0x361   :  { %667 = vrot.lane.b32.xlu0 %v648_v60, %s8462_s20 }
 0x362   :  { %7263 = vmatpush3.bf16.msra.mxu0 %v8843_v53 }
 0x363   :  { %7270 = vmatprep.subr.bf16.mxu0 %v8460_v16 }
 0x365   :  { %665 = vrot.lane.b32.xlu0 %v644_v58, %s8462_s20  ;;  %6806 = vmatmul.mubr.f32.vlgmr.msra.gmra.mrb[8].mxu0 %v8458_v0 }
 0x366   :  { %7272 = vmatpush3.bf16.msra.mxu0 %v8839_v51  ;;  %6827 = vmatprep.mubr.msk.f32.mxu0 %vm8459_vm0, %v8458_v0 }
 0x367   :  { %7273 = vmatprep.subr.bf16.mxu0 %v8460_v16 }
 0x36a   :  { %7275 = vmatpush3.bf16.msra.mxu0 %v8843_v53 }
 0x36b   :  { %7282 = vmatprep.subr.bf16.mxu0 %v8460_v16 }
 0x3d3   :  { %v668_v21 = vpop.permute.xlu0 %667 }
 0x3d7   :  { %v666_v25 = vpop.permute.xlu0 %665 }
 0x430   :  { %v543_v4 = vpop.f32.mrb[4].mxu0 }
 0x431   :  { %v8800_v5 = vadd.f32 %v543_v4, %v499_v2  ;;  %v8802_v6 = vpop.f32.mrb[5].mxu0 }
 0x432   :  { %v547_v8 = vpop.f32.mrb[6].mxu0 }
 0x433   :  { %v8806_v9 = vadd.f32 %v547_v8, %v499_v2  ;;  %v549_v10 = vpop.f32.mrb[7].mxu0  ;;  %v651_v11 = vadd.f32 %v644_v58, %v8800_v5 }
 0x434   :  { %v8810_v12 = vadd.f32 %v549_v10, %v8804_v7 }
 0x435   :  { %v6428_v13 = vmul.f32 -1.442695, %v651_v11  ;;  %v652_v14 = vadd.f32 %v648_v60, %v8806_v9 }
 0x437   :  { %7526 = vpow2.f32 %v6428_v13  ;;  %v6429_v15 = vmul.f32 -1.442695, %v652_v14 }
 0x438   :  { %v767_v8 = vpop.f32.mrb[8].mxu0 }
 0x439   :  { %7528 = vpow2.f32 %v6429_v15  ;;  %v6807_v10 = vpop.f32.mrb[9].mxu0 }
 0x441   :  { %v7527_v17 = vpop.eup %7526 }
 0x442   :  { %v659_v19 = vadd.f32 1.0, %v7527_v17 }
 0x443   :  { %v7529_v18 = vpop.eup %7528 }
 0x444   :  { %v660_v20 = vadd.f32 1.0, %v7529_v18 }
 0x446   :  { %7530 = vrcp.f32 %v660_v20 }
 0x447   :  { %7532 = vrcp.f32 %v659_v19 }
 0x450   :  { %v7531_v22 = vpop.eup %7530 }
 0x451   :  { %v672_v23 = vmul.f32 %v7531_v22, %v668_v21  ;;  %v7533_v24 = vpop.eup %7532  ;;  %v686_v35 = vsub.f32 1.0, %v7531_v22  ;;  %v698_v37 = vmul.f32 0.0, %v7531_v22 }
 0x452   :  { %v671_v26 = vmul.f32 %v7533_v24, %v666_v25  ;;  %v685_v40 = vsub.f32 1.0, %v7533_v24  ;;  %v697_v42 = vmul.f32 0.0, %v7533_v24 }
 0x453   :  { %677 = vrot.lane.b32.xlu1 %v672_v23, %s8462_s20  ;;  %v8864_v23 = vld [vmem:[#allocation13] ss:$0 sm:$0xff] }
 0x454   :  { %v768_v24 = vadd.f32 %v8864_v23, %v767_v8 }
 0x457   :  { %675 = vrot.lane.b32.xlu1 %v671_v26, %s8462_s20  ;;  %v773_v26 = vrot.slane %v768_v24, 2 }
 0x4c5   :  { %v678_v27 = vpop.permute.xlu1 %677 }
 0x4c6   :  { %v682_v29 = vadd.f32 %v678_v27, %v8806_v9 }
 0x4c8   :  { %7534 = vtanh.f32 %v682_v29  ;;  %v772_v29 = vrot.slane %v768_v24, 1 }
 0x4c9   :  { %v676_v30 = vpop.permute.xlu1 %675 }
 0x4ca   :  { %v681_v31 = vadd.f32 %v676_v30, %v8800_v5 }
 0x4cc   :  { %7536 = vtanh.f32 %v681_v31 }
 0x4d2   :  { %v7535_v33 = vpop.eup %7534 }
 0x4d3   :  { %691 = vrot.lane.b32.xlu0 %v7535_v33, %s8463_s4 }
 0x4d6   :  { %v7537_v34 = vpop.eup %7536 }
 0x4d7   :  { %689 = vrot.lane.b32.xlu1 %v7537_v34, %s8463_s4 }
 0x545   :  { %v692_v36 = vpop.permute.xlu0 %691 }
 0x546   :  { %v696_v38 = vmul.f32 %v692_v36, %v686_v35 }
 0x548   :  { %v8819_v39 = vadd.f32 %v698_v37, %v696_v38 }
 0x549   :  { %v690_v41 = vpop.permute.xlu1 %689 }
 0x54a   :  { %v695_v43 = vmul.f32 %v690_v41, %v685_v40  ;;  %v858_v44 = vrot.slane %v8819_v39, 7 }
 0x54c   :  { %v8822_v45 = vadd.f32 %v697_v42, %v695_v43 }
 0x54e   :  { %v860_v46 = vsel %vm859_vm2, %v858_v44, %v8822_v45  ;;  %v985_v33 = vrot.slane %v8822_v45, 7 }
 0x54f   :  { %861 = vrot.lane.b32.xlu0 %v860_v46, %s8463_s4 }
 0x5c1   :  { %v862_v47 = vpop.permute.xlu0 %861 }
 0x5c2   :  { %6817 = vmatmul.mubr.msk.f32.vlgmr.msra.gmra.mrb[6].mxu1 %vm374_vm1, %v862_v47 }
 0x5c3   :  { %7278 = vmatpush3.bf16.msra.mxu1 %v8759_v28  ;;  %6838 = vmatprep.mubr.msk.f32.mxu1 %vm8459_vm0, %v8458_v0 }
 0x5c4   :  { %7279 = vmatprep.subr.bf16.mxu1 %v8460_v16 }
 0x5c7   :  { %7281 = vmatpush3.bf16.msra.mxu1 %v8765_v32 }
 0x5c8   :  { %7288 = vmatprep.subr.bf16.mxu1 %v8460_v16 }
 0x695   :  { %v931_v54 = vpop.f32.mrb[6].mxu1 }
 0x696   :  { %v932_v56 = vadd.f32 %v8788_v55, %v931_v54  ;;  %v6818_v57 = vpop.f32.mrb[7].mxu1 }
 0x698   :  { %955 = vrot.lane.b32.xlu0 %v932_v56, %s8462_s20  ;;  %v936_v58 = vrot.slane %v932_v56, 7  ;;  %v940_v59 = vadd.f32 %v932_v56, %v8806_v9 }
 0x69a   :  { %953 = vrot.lane.b32.xlu1 %v936_v58, %s8462_s20  ;;  %v939_v60 = vadd.f32 %v936_v58, %v8800_v5  ;;  %v6436_v61 = vmul.f32 -1.442695, %v940_v59 }
 0x69c   :  { %v6435_v63 = vmul.f32 -1.442695, %v939_v60  ;;  %7538 = vpow2.f32 %v6436_v61 }
 0x69e   :  { %7540 = vpow2.f32 %v6435_v63 }
 0x6a6   :  { %v7539_v1 = vpop.eup %7538 }
 0x6a7   :  { %v948_v3 = vadd.f32 1.0, %v7539_v1 }
 0x6a8   :  { %v7541_v2 = vpop.eup %7540 }
 0x6a9   :  { %v947_v4 = vadd.f32 1.0, %v7541_v2  ;;  %7542 = vrcp.f32 %v948_v3 }
 0x6ab   :  { %7544 = vrcp.f32 %v947_v4  ;;  %v8897_v4 = vadd.f32 %v8802_v6, %v8804_v7 }
 0x6b3   :  { %v7543_v11 = vpop.eup %7542 }
 0x6b4   :  { %v974_v34 = vsub.f32 1.0, %v7543_v11  ;;  %v989_v41 = vmul.f32 %v7543_v11, %v858_v44 }
 0x6b5   :  { %v7545_v15 = vpop.eup %7544 }
 0x6b6   :  { %v973_v31 = vsub.f32 1.0, %v7545_v15  ;;  %v988_v36 = vmul.f32 %v7545_v15, %v985_v33 }
 0x70a   :  { %v956_v13 = vpop.permute.xlu0 %955 }
 0x70b   :  { %v960_v14 = vmul.f32 %v7543_v11, %v956_v13 }
 0x70c   :  { %v954_v17 = vpop.permute.xlu1 %953 }
 0x70d   :  { %v959_v18 = vmul.f32 %v7545_v15, %v954_v17  ;;  %965 = vrot.lane.b32.xlu0 %v960_v14, %s8462_s20 }
 0x70f   :  { %963 = vrot.lane.b32.xlu1 %v959_v18, %s8462_s20 }
 0x77f   :  { %v966_v19 = vpop.permute.xlu0 %965 }
 0x780   :  { %v970_v20 = vadd.f32 %v966_v19, %v8806_v9 }
 0x781   :  { %v964_v21 = vpop.permute.xlu1 %963 }
 0x782   :  { %7546 = vtanh.f32 %v970_v20  ;;  %v969_v22 = vadd.f32 %v964_v21, %v8800_v5 }
 0x784   :  { %7548 = vtanh.f32 %v969_v22 }
 0x78c   :  { %v7547_v25 = vpop.eup %7546 }
 0x78d   :  { %979 = vrot.lane.b32.xlu0 %v7547_v25, %s8463_s4 }
 0x78e   :  { %v7549_v27 = vpop.eup %7548 }
 0x78f   :  { %977 = vrot.lane.b32.xlu1 %v7549_v27, %s8463_s4 }
 0x791   :  { %776 = vrot.lane.b32.xlu0 %v773_v26, %s8463_s4 }
 0x793   :  { %774 = vrot.lane.b32.xlu1 %v772_v29, %s8463_s4 }
 0x795   :  { %808 = vrot.lane.b32.xlu0 %v772_v29, %s8464_s25 }
 0x7ff   :  { %v980_v30 = vpop.permute.xlu0 %979 }
 0x800   :  { %v984_v38 = vmul.f32 %v980_v30, %v974_v34 }
 0x801   :  { %v978_v35 = vpop.permute.xlu1 %977 }
 0x802   :  { %v983_v37 = vmul.f32 %v978_v35, %v973_v31  ;;  %v8878_v46 = vadd.f32 %v989_v41, %v984_v38 }
 0x803   :  { %v777_v44 = vpop.permute.xlu0 %776 }
 0x804   :  { %v8873_v40 = vadd.f32 %v988_v36, %v983_v37  ;;  %v781_v58 = vadd.f32 %v777_v44, %v8806_v9 }
 0x805   :  { %v775_v42 = vpop.permute.xlu1 %774 }
 0x806   :  { %v780_v43 = vadd.f32 %v775_v42, %v8800_v5  ;;  %v1160_v47 = vrot.slane %v8873_v40, 1  ;;  %v6431_v59 = vmul.f32 -1.442695, %v781_v58  ;;  %v794_v13 = vadd.f32 %v775_v42, %v8897_v4 }
 0x807   :  { %v809_v54 = vpop.permute.xlu0 %808 }
 0x808   :  { %v6430_v48 = vmul.f32 -1.442695, %v780_v43  ;;  %v1161_v49 = vsel %vm859_vm2, %v8878_v46, %v1160_v47  ;;  %v6432_v14 = vmul.f32 -1.442695, %v794_v13 }
 0x809   :  { %1162 = vrot.lane.b32.xlu1 %v1161_v49, %s8463_s4 }
 0x80a   :  { %7550 = vpow2.f32 %v6430_v48 }
 0x80d   :  { %810 = vrot.lane.b32.xlu1 %v773_v26, %s8464_s25  ;;  %v795_v26 = vadd.f32 %v777_v44, %v8810_v12 }
 0x80f   :  { %v6433_v31 = vmul.f32 -1.442695, %v795_v26 }
 0x814   :  { %v7551_v50 = vpop.eup %7550 }
 0x815   :  { %v788_v52 = vadd.f32 1.0, %v7551_v50 }
 0x817   :  { %7552 = vrcp.f32 %v788_v52 }
 0x818   :  { %7554 = vpow2.f32 %v6431_v59 }
 0x821   :  { %v7553_v56 = vpop.eup %7552 }
 0x822   :  { %v814_v57 = vmul.f32 %v7553_v56, %v809_v54  ;;  %v7555_v60 = vpop.eup %7554 }
 0x823   :  { %v789_v61 = vadd.f32 1.0, %v7555_v60 }
 0x824   :  { %818 = vrot.lane.b32.xlu0 %v814_v57, %s8462_s20 }
 0x825   :  { %7556 = vrcp.f32 %v789_v61 }
 0x82f   :  { %v7557_v1 = vpop.eup %7556 }
 0x87b   :  { %v1163_v63 = vpop.permute.xlu1 %1162 }
 0x87c   :  { %6839 = vmatmul.mubr.msk.f32.vlgmr.msra.gmra.mrb[8].mxu1 %vm374_vm1, %v1163_v63 }
 0x87d   :  { %7290 = vmatpush3.bf16.msra.mxu1 %v8759_v28  ;;  %6860 = vmatprep.mubr.msk.f32.mxu1 %vm8459_vm0, %v8458_v0 }
 0x87e   :  { %7291 = vmatprep.subr.bf16.mxu1 %v8460_v16 }
 0x87f   :  { %v811_v2 = vpop.permute.xlu1 %810 }
 0x880   :  { %v815_v3 = vmul.f32 %v7557_v1, %v811_v2 }
 0x881   :  { %7293 = vmatpush3.bf16.msra.mxu1 %v8765_v32 }
 0x882   :  { %820 = vrot.lane.b32.xlu1 %v815_v3, %s8462_s20  ;;  %7300 = vmatprep.subr.bf16.mxu1 %v8460_v16 }
 0x896   :  { %v819_v8 = vpop.permute.xlu0 %818 }
 0x897   :  { %v824_v10 = vadd.f32 %v819_v8, %v8897_v4 }
 0x899   :  { %7558 = vtanh.f32 %v824_v10 }
 0x89a   :  { %7560 = vpow2.f32 %v6432_v14 }
 0x8a3   :  { %v7559_v11 = vpop.eup %7558 }
 0x8a4   :  { %832 = vrot.lane.b32.xlu0 %v7559_v11, %s8463_s4  ;;  %v7561_v18 = vpop.eup %7560 }
 0x8a5   :  { %v802_v6 = vadd.f32 1.0, %v7561_v18 }
 0x8f4   :  { %v821_v15 = vpop.permute.xlu1 %820 }
 0x8f5   :  { %v825_v17 = vadd.f32 %v821_v15, %v8810_v12 }
 0x8f7   :  { %7562 = vtanh.f32 %v825_v17 }
 0x8f8   :  { %7564 = vrcp.f32 %v802_v6 }
 0x8f9   :  { %7566 = vpow2.f32 %v6433_v31 }
 0x901   :  { %v7563_v19 = vpop.eup %7562 }
 0x902   :  { %834 = vrot.lane.b32.xlu1 %v7563_v19, %s8463_s4  ;;  %v7565_v7 = vpop.eup %7564 }
 0x903   :  { %v828_v20 = vsub.f32 1.0, %v7565_v7  ;;  %v840_v22 = vmul.f32 0.0, %v7565_v7  ;;  %v7567_v35 = vpop.eup %7566 }
 0x904   :  { %v803_v36 = vadd.f32 1.0, %v7567_v35 }
 0x906   :  { %7568 = vrcp.f32 %v803_v36 }
 0x910   :  { %v7569_v37 = vpop.eup %7568 }
 0x911   :  { %v829_v38 = vsub.f32 1.0, %v7569_v37  ;;  %v841_v42 = vmul.f32 0.0, %v7569_v37 }
 0x916   :  { %v833_v21 = vpop.permute.xlu0 %832 }
 0x917   :  { %v838_v24 = vmul.f32 %v833_v21, %v828_v20 }
 0x919   :  { %v8904_v25 = vadd.f32 %v840_v22, %v838_v24  ;;  %v1288_v22 = vrot.slane %v8878_v46, 7 }
 0x91b   :  { %856 = vst.msk [vmem:[#allocation3] sm:$0x80] %vm855_vm3, %v8904_v25  ;;  %v994_v48 = vrot.slane %v8904_v25, 7 }
 0x94f   :  { %v1232_v27 = vpop.f32.mrb[8].mxu1 }
 0x950   :  { %v1233_v29 = vadd.f32 %v8788_v55, %v1232_v27  ;;  %v6840_v30 = vpop.f32.mrb[9].mxu1  ;;  %v1287_v27 = vrot.slane %v8873_v40, 7 }
 0x952   :  { %v1237_v33 = vrot.slane %v1233_v29, 6  ;;  %v1238_v34 = vrot.slane %v1233_v29, 7 }
 0x954   :  { %1257 = vrot.lane.b32.xlu1 %v1238_v34, %s8462_s20  ;;  %1255 = vrot.lane.b32.xlu0 %v1237_v33, %s8462_s20  ;;  %v1241_v52 = vadd.f32 %v1237_v33, %v8800_v5  ;;  %v1242_v44 = vadd.f32 %v1238_v34, %v8806_v9 }
 0x956   :  { %v6443_v54 = vmul.f32 -1.442695, %v1241_v52  ;;  %v6444_v56 = vmul.f32 -1.442695, %v1242_v44 }
 0x958   :  { %7570 = vpow2.f32 %v6443_v54 }
 0x959   :  { %7572 = vpow2.f32 %v6444_v56 }
 0x962   :  { %v7571_v57 = vpop.eup %7570 }
 0x963   :  { %v7573_v58 = vpop.eup %7572  ;;  %v1249_v59 = vadd.f32 1.0, %v7571_v57 }
 0x964   :  { %v1250_v60 = vadd.f32 1.0, %v7573_v58 }
 0x965   :  { %7574 = vrcp.f32 %v1249_v59 }
 0x966   :  { %7576 = vrcp.f32 %v1250_v60 }
 0x96f   :  { %v7575_v61 = vpop.eup %7574 }
 0x970   :  { %v7577_v63 = vpop.eup %7576  ;;  %v1275_v26 = vsub.f32 1.0, %v7575_v61  ;;  %v1291_v33 = vmul.f32 %v7575_v61, %v1287_v27 }
 0x971   :  { %v1276_v21 = vsub.f32 1.0, %v7577_v63  ;;  %v1292_v29 = vmul.f32 %v7577_v63, %v1288_v22 }
 0x974   :  { %v835_v41 = vpop.permute.xlu1 %834 }
 0x975   :  { %v839_v43 = vmul.f32 %v835_v41, %v829_v38 }
 0x977   :  { %v8912_v47 = vadd.f32 %v841_v42, %v839_v43 }
 0x979   :  { %857 = vst.msk [vmem:[#allocation3 + $0x8] sm:$0x80] %vm855_vm3, %v8912_v47  ;;  %v995_v49 = vrot.slane %v8912_v47, 6  ;;  %v1139_v27 = vrot.slane %v8912_v47, 1 }
 0x97b   :  { %v996_v50 = vsel %vm859_vm2, %v995_v49, %v994_v48 }
 0x97c   :  { %6828 = vmatmul.mubr.msk.f32.vlgmr.msra.gmra.mrb[10].mxu0 %vm374_vm1, %v996_v50 }
 0x97d   :  { %7284 = vmatpush3.bf16.msra.mxu0 %v8839_v51  ;;  %6849 = vmatprep.mubr.msk.f32.mxu0 %vm8459_vm0, %v8458_v0 }
 0x97e   :  { %7285 = vmatprep.subr.bf16.mxu0 %v8460_v16 }
 0x981   :  { %7287 = vmatpush3.bf16.msra.mxu0 %v8843_v53 }
 0x982   :  { %7294 = vmatprep.subr.bf16.mxu0 %v8460_v16 }
 0x9c6   :  { %v1258_v1 = vpop.permute.xlu1 %1257  ;;  %v1256_v2 = vpop.permute.xlu0 %1255 }
 0x9c7   :  { %v1262_v3 = vmul.f32 %v7577_v63, %v1258_v1  ;;  %v1261_v8 = vmul.f32 %v7575_v61, %v1256_v2 }
 0x9c9   :  { %1267 = vrot.lane.b32.xlu1 %v1262_v3, %s8462_s20  ;;  %1265 = vrot.lane.b32.xlu0 %v1261_v8, %s8462_s20 }
 0xa3b   :  { %v1268_v10 = vpop.permute.xlu1 %1267  ;;  %v1266_v11 = vpop.permute.xlu0 %1265 }
 0xa3c   :  { %v1272_v13 = vadd.f32 %v1268_v10, %v8806_v9  ;;  %v1271_v14 = vadd.f32 %v1266_v11, %v8800_v5 }
 0xa3e   :  { %7578 = vtanh.f32 %v1272_v13 }
 0xa3f   :  { %7580 = vtanh.f32 %v1271_v14 }
 0xa48   :  { %v7579_v15 = vpop.eup %7578 }
 0xa49   :  { %v7581_v17 = vpop.eup %7580  ;;  %1281 = vrot.lane.b32.xlu1 %v7579_v15, %s8463_s4 }
 0xa4a   :  { %1279 = vrot.lane.b32.xlu0 %v7581_v17, %s8463_s4 }
 0xa4f   :  { %v1065_v18 = vpop.f32.mrb[10].mxu0 }
 0xa50   :  { %v1066_v19 = vadd.f32 %v8864_v23, %v1065_v18  ;;  %v6829_v6 = vpop.f32.mrb[11].mxu0 }
 0xa52   :  { %v1070_v7 = vrot.slane %v1066_v19, 2  ;;  %v1071_v20 = vrot.slane %v1066_v19, 3 }
 0xa54   :  { %1074 = vrot.lane.b32.xlu1 %v1071_v20, %s8463_s4  ;;  %1072 = vrot.lane.b32.xlu0 %v1070_v7, %s8463_s4 }
 0xa58   :  { %1108 = vrot.lane.b32.xlu1 %v1071_v20, %s8464_s25  ;;  %1106 = vrot.lane.b32.xlu0 %v1070_v7, %s8464_s25 }
 0xabb   :  { %v1282_v24 = vpop.permute.xlu1 %1281 }
 0xabc   :  { %v1286_v30 = vmul.f32 %v1282_v24, %v1276_v21  ;;  %v1280_v31 = vpop.permute.xlu0 %1279 }
 0xabd   :  { %v1285_v34 = vmul.f32 %v1280_v31, %v1275_v26  ;;  %v1138_v31 = vrot.slane %v8904_v25, 1 }
 0xabe   :  { %v8941_v35 = vadd.f32 %v1292_v29, %v1286_v30 }
 0xabf   :  { %v8943_v36 = vadd.f32 %v1291_v33, %v1285_v34 }
 0xac0   :  { %v1464_v37 = vrot.slane %v8941_v35, 1 }
 0xac1   :  { %v1463_v38 = vrot.slane %v8943_v36, 2 }
 0xac3   :  { %v1465_v41 = vsel %vm859_vm2, %v1464_v37, %v1463_v38 }
 0xac4   :  { %1466 = vrot.lane.b32.xlu0 %v1465_v41, %s8463_s4 }
 0xac6   :  { %v1075_v42 = vpop.permute.xlu1 %1074  ;;  %v1073_v43 = vpop.permute.xlu0 %1072 }
 0xac7   :  { %v1079_v48 = vadd.f32 %v1075_v42, %v8806_v9  ;;  %v1078_v49 = vadd.f32 %v1073_v43, %v8800_v5  ;;  %v1093_v15 = vadd.f32 %v1075_v42, %v8810_v12  ;;  %v1092_v17 = vadd.f32 %v1073_v43, %v8897_v4 }
 0xac9   :  { %v6439_v50 = vmul.f32 -1.442695, %v1079_v48  ;;  %v6438_v52 = vmul.f32 -1.442695, %v1078_v49  ;;  %v6441_v18 = vmul.f32 -1.442695, %v1093_v15 }
 0xaca   :  { %v1109_v59 = vpop.permute.xlu1 %1108  ;;  %v1107_v63 = vpop.permute.xlu0 %1106  ;;  %v6440_v19 = vmul.f32 -1.442695, %v1092_v17 }
 0xacb   :  { %7582 = vpow2.f32 %v6439_v50 }
 0xacc   :  { %7584 = vpow2.f32 %v6438_v52 }
 0xad5   :  { %v7583_v44 = vpop.eup %7582 }
 0xad6   :  { %v1087_v54 = vadd.f32 1.0, %v7583_v44  ;;  %v7585_v56 = vpop.eup %7584 }
 0xad7   :  { %v1086_v57 = vadd.f32 1.0, %v7585_v56 }
 0xad8   :  { %7586 = vrcp.f32 %v1087_v54 }
 0xad9   :  { %7588 = vrcp.f32 %v1086_v57 }
 0xae2   :  { %v7587_v58 = vpop.eup %7586 }
 0xae3   :  { %v1113_v60 = vmul.f32 %v7587_v58, %v1109_v59  ;;  %v7589_v61 = vpop.eup %7588 }
 0xae4   :  { %v1112_v1 = vmul.f32 %v7589_v61, %v1107_v63 }
 0xae5   :  { %1118 = vrot.lane.b32.xlu0 %v1113_v60, %s8462_s20 }
 0xae6   :  { %1116 = vrot.lane.b32.xlu1 %v1112_v1, %s8462_s20 }
 0xb36   :  { %v1467_v2 = vpop.permute.xlu0 %1466 }
 0xb37   :  { %6861 = vmatmul.mubr.msk.f32.vlgmr.msra.gmra.mrb[10].mxu1 %vm374_vm1, %v1467_v2 }
 0xb38   :  { %7302 = vmatpush3.bf16.msra.mxu1 %v8759_v28  ;;  %6882 = vmatprep.mubr.msk.f32.mxu1 %vm8459_vm0, %v8458_v0 }
 0xb39   :  { %7303 = vmatprep.subr.bf16.mxu1 %v8460_v16 }
 0xb3c   :  { %7305 = vmatpush3.bf16.msra.mxu1 %v8765_v32 }
 0xb3d   :  { %7312 = vmatprep.subr.bf16.mxu1 %v8460_v16 }
 0xb57   :  { %v1119_v3 = vpop.permute.xlu0 %1118 }
 0xb58   :  { %v1123_v8 = vadd.f32 %v1119_v3, %v8810_v12  ;;  %v1117_v10 = vpop.permute.xlu1 %1116 }
 0xb59   :  { %v1122_v11 = vadd.f32 %v1117_v10, %v8897_v4 }
 0xb5a   :  { %7590 = vtanh.f32 %v1123_v8 }
 0xb5b   :  { %7592 = vtanh.f32 %v1122_v11 }
 0xb5c   :  { %7594 = vpow2.f32 %v6441_v18 }
 0xb5d   :  { %7596 = vpow2.f32 %v6440_v19 }
 0xb64   :  { %v7591_v13 = vpop.eup %7590 }
 0xb65   :  { %1132 = vrot.lane.b32.xlu0 %v7591_v13, %s8463_s4  ;;  %v7593_v14 = vpop.eup %7592 }
 0xb66   :  { %1130 = vrot.lane.b32.xlu1 %v7593_v14, %s8463_s4  ;;  %v7595_v6 = vpop.eup %7594 }
 0xb67   :  { %v7597_v7 = vpop.eup %7596  ;;  %v1101_v20 = vadd.f32 1.0, %v7595_v6 }
 0xb68   :  { %v1100_v21 = vadd.f32 1.0, %v7597_v7 }
 0xb69   :  { %7598 = vrcp.f32 %v1101_v20 }
 0xb6a   :  { %7600 = vrcp.f32 %v1100_v21 }
 0xb73   :  { %v7599_v22 = vpop.eup %7598 }
 0xb74   :  { %v7601_v24 = vpop.eup %7600  ;;  %v1127_v26 = vsub.f32 1.0, %v7599_v22  ;;  %v1143_v33 = vmul.f32 %v7599_v22, %v1139_v27 }
 0xb75   :  { %v1126_v30 = vsub.f32 1.0, %v7601_v24  ;;  %v1142_v38 = vmul.f32 %v7601_v24, %v1138_v31 }
 0xbd7   :  { %v1133_v29 = vpop.permute.xlu0 %1132 }
 0xbd8   :  { %v1137_v34 = vmul.f32 %v1133_v29, %v1127_v26  ;;  %v1131_v37 = vpop.permute.xlu1 %1130 }
 0xbd9   :  { %v1136_v41 = vmul.f32 %v1131_v37, %v1126_v30 }
 0xbda   :  { %v8968_v42 = vadd.f32 %v1143_v33, %v1137_v34 }
 0xbdb   :  { %v8970_v43 = vadd.f32 %v1142_v38, %v1136_v41 }
 0xbdc   :  { %1159 = vst.msk [vmem:[#allocation3 + $0x8] sm:$0x40] %vm1157_vm4, %v8968_v42  ;;  %v1298_v48 = vrot.slane %v8968_v42, 5 }
 0xbdd   :  { %1158 = vst.msk [vmem:[#allocation3] sm:$0x40] %vm1157_vm4, %v8970_v43  ;;  %v1297_v25 = vrot.slane %v8970_v43, 6 }
 0xbdf   :  { %v1299_v47 = vsel %vm859_vm2, %v1298_v48, %v1297_v25  ;;  %v1592_v25 = vrot.slane %v8941_v35, 7 }
 0xbe0   :  { %6850 = vmatmul.mubr.msk.f32.vlgmr.msra.gmra.mrb[12].mxu0 %vm374_vm1, %v1299_v47 }
 0xbe1   :  { %7296 = vmatpush3.bf16.msra.mxu0 %v8839_v51  ;;  %6871 = vmatprep.mubr.msk.f32.mxu0 %vm8459_vm0, %v8458_v0 }
 0xbe2   :  { %7297 = vmatprep.subr.bf16.mxu0 %v8460_v16 }
 0xbe5   :  { %7299 = vmatpush3.bf16.msra.mxu0 %v8843_v53 }
 0xbe6   :  { %7306 = vmatprep.subr.bf16.mxu0 %v8460_v16 }
 0xc0a   :  { %v1536_v49 = vpop.f32.mrb[10].mxu1 }
 0xc0b   :  { %v1537_v50 = vadd.f32 %v8788_v55, %v1536_v49  ;;  %v6862_v52 = vpop.f32.mrb[11].mxu1 }
 0xc0d   :  { %v1541_v44 = vrot.slane %v1537_v50, 5  ;;  %v1542_v54 = vrot.slane %v1537_v50, 6  ;;  %v1591_v50 = vrot.slane %v8943_v36, 7 }
 0xc0f   :  { %1561 = vrot.lane.b32.xlu0 %v1542_v54, %s8462_s20  ;;  %1559 = vrot.lane.b32.xlu1 %v1541_v44, %s8462_s20  ;;  %v1545_v56 = vadd.f32 %v1541_v44, %v8800_v5  ;;  %v1546_v57 = vadd.f32 %v1542_v54, %v8806_v9 }
 0xc11   :  { %v6451_v58 = vmul.f32 -1.442695, %v1545_v56  ;;  %v6452_v59 = vmul.f32 -1.442695, %v1546_v57 }
 0xc13   :  { %7602 = vpow2.f32 %v6451_v58 }
 0xc14   :  { %7604 = vpow2.f32 %v6452_v59 }
 0xc1d   :  { %v7603_v60 = vpop.eup %7602 }
 0xc1e   :  { %v7605_v61 = vpop.eup %7604  ;;  %v1553_v63 = vadd.f32 1.0, %v7603_v60 }
 0xc1f   :  { %v1554_v1 = vadd.f32 1.0, %v7605_v61 }
 0xc20   :  { %7606 = vrcp.f32 %v1553_v63 }
 0xc21   :  { %7608 = vrcp.f32 %v1554_v1 }
 0xc2a   :  { %v7607_v2 = vpop.eup %7606 }
 0xc2b   :  { %v7609_v3 = vpop.eup %7608  ;;  %v1579_v49 = vsub.f32 1.0, %v7607_v2  ;;  %v1595_v56 = vmul.f32 %v7607_v2, %v1591_v50 }
 0xc2c   :  { %v1580_v48 = vsub.f32 1.0, %v7609_v3  ;;  %v1596_v52 = vmul.f32 %v7609_v3, %v1592_v25 }
 0xc81   :  { %v1562_v8 = vpop.permute.xlu0 %1561  ;;  %v1560_v10 = vpop.permute.xlu1 %1559 }
 0xc82   :  { %v1566_v11 = vmul.f32 %v7609_v3, %v1562_v8  ;;  %v1565_v13 = vmul.f32 %v7607_v2, %v1560_v10 }
 0xc84   :  { %1571 = vrot.lane.b32.xlu0 %v1566_v11, %s8462_s20  ;;  %1569 = vrot.lane.b32.xlu1 %v1565_v13, %s8462_s20 }
 0xcb3   :  { %v1368_v14 = vpop.f32.mrb[12].mxu0 }
 0xcb4   :  { %v1369_v15 = vadd.f32 %v8864_v23, %v1368_v14  ;;  %v6851_v17 = vpop.f32.mrb[13].mxu0 }
 0xcb6   :  { %v1373_v18 = vrot.slane %v1369_v15, 3  ;;  %v1374_v19 = vrot.slane %v1369_v15, 4 }
 0xcb8   :  { %1377 = vrot.lane.b32.xlu0 %v1374_v19, %s8463_s4  ;;  %1375 = vrot.lane.b32.xlu1 %v1373_v18, %s8463_s4 }
 0xcf6   :  { %v1572_v6 = vpop.permute.xlu0 %1571  ;;  %v1570_v7 = vpop.permute.xlu1 %1569 }
 0xcf7   :  { %v1576_v20 = vadd.f32 %v1572_v6, %v8806_v9  ;;  %v1575_v21 = vadd.f32 %v1570_v7, %v8800_v5 }
 0xcf9   :  { %7610 = vtanh.f32 %v1576_v20 }
 0xcfa   :  { %7612 = vtanh.f32 %v1575_v21 }
 0xd03   :  { %v7611_v22 = vpop.eup %7610 }
 0xd04   :  { %v7613_v24 = vpop.eup %7612  ;;  %1585 = vrot.lane.b32.xlu0 %v7611_v22, %s8463_s4 }
 0xd05   :  { %1583 = vrot.lane.b32.xlu1 %v7613_v24, %s8463_s4 }
 0xd08   :  { %1411 = vrot.lane.b32.xlu0 %v1374_v19, %s8464_s25 }
 0xd09   :  { %1409 = vrot.lane.b32.xlu1 %v1373_v18, %s8464_s25 }
 0xd2a   :  { %v1376_v26 = vpop.permute.xlu1 %1375  ;;  %v1378_v29 = vpop.permute.xlu0 %1377 }
 0xd2b   :  { %v1381_v27 = vadd.f32 %v1376_v26, %v8800_v5  ;;  %v1382_v31 = vadd.f32 %v1378_v29, %v8806_v9  ;;  %v1395_v7 = vadd.f32 %v1376_v26, %v8897_v4  ;;  %v1396_v21 = vadd.f32 %v1378_v29, %v8810_v12 }
 0xd2d   :  { %v6446_v30 = vmul.f32 -1.442695, %v1381_v27  ;;  %v6447_v33 = vmul.f32 -1.442695, %v1382_v31  ;;  %v6448_v20 = vmul.f32 -1.442695, %v1395_v7 }
 0xd2e   :  { %v6449_v22 = vmul.f32 -1.442695, %v1396_v21 }
 0xd2f   :  { %7614 = vpow2.f32 %v6446_v30 }
 0xd30   :  { %7616 = vpow2.f32 %v6447_v33 }
 0xd39   :  { %v7615_v34 = vpop.eup %7614 }
 0xd3a   :  { %v1389_v37 = vadd.f32 1.0, %v7615_v34  ;;  %v7617_v38 = vpop.eup %7616 }
 0xd3b   :  { %v1390_v41 = vadd.f32 1.0, %v7617_v38 }
 0xd3c   :  { %7618 = vrcp.f32 %v1389_v37  ;;  %v1441_v37 = vrot.slane %v8970_v43, 1 }
 0xd3d   :  { %7620 = vrcp.f32 %v1390_v41 }
 0xd46   :  { %v7619_v60 = vpop.eup %7618 }
 0xd47   :  { %v7621_v2 = vpop.eup %7620 }
 0xd76   :  { %v1586_v47 = vpop.permute.xlu0 %1585 }
 0xd77   :  { %v1590_v44 = vmul.f32 %v1586_v47, %v1580_v48  ;;  %v1584_v54 = vpop.permute.xlu1 %1583  ;;  %v1442_v47 = vrot.slane %v8968_v42, 1 }
 0xd78   :  { %v1589_v57 = vmul.f32 %v1584_v54, %v1579_v49 }
 0xd79   :  { %v9006_v58 = vadd.f32 %v1596_v52, %v1590_v44 }
 0xd7a   :  { %v9008_v59 = vadd.f32 %v1595_v56, %v1589_v57  ;;  %v1412_v10 = vpop.permute.xlu0 %1411 }
 0xd7b   :  { %v1410_v61 = vpop.permute.xlu1 %1409  ;;  %v1768_v63 = vrot.slane %v9006_v58, 2  ;;  %v1416_v11 = vmul.f32 %v7621_v2, %v1412_v10 }
 0xd7c   :  { %v1415_v1 = vmul.f32 %v7619_v60, %v1410_v61  ;;  %v1767_v8 = vrot.slane %v9008_v59, 3 }
 0xd7e   :  { %1419 = vrot.lane.b32.xlu0 %v1415_v1, %s8462_s20  ;;  %v1769_v3 = vsel %vm859_vm2, %v1768_v63, %v1767_v8 }
 0xd7f   :  { %1770 = vrot.lane.b32.xlu1 %v1769_v3, %s8463_s4 }
 0xd83   :  { %1421 = vrot.lane.b32.xlu1 %v1416_v11, %s8462_s20 }
 0xdf0   :  { %v1420_v13 = vpop.permute.xlu0 %1419 }
 0xdf1   :  { %v1425_v14 = vadd.f32 %v1420_v13, %v8897_v4  ;;  %v1771_v15 = vpop.permute.xlu1 %1770 }
 0xdf2   :  { %6883 = vmatmul.mubr.msk.f32.vlgmr.msra.gmra.mrb[12].mxu1 %vm374_vm1, %v1771_v15 }
 0xdf3   :  { %7622 = vtanh.f32 %v1425_v14  ;;  %7314 = vmatpush3.bf16.msra.mxu1 %v8759_v28  ;;  %6904 = vmatprep.mubr.msk.f32.mxu1 %vm8459_vm0, %v8458_v0 }
 0xdf4   :  { %7315 = vmatprep.subr.bf16.mxu1 %v8460_v16 }
 0xdf5   :  { %v1422_v17 = vpop.permute.xlu1 %1421 }
 0xdf6   :  { %v1426_v18 = vadd.f32 %v1422_v17, %v8810_v12 }
 0xdf7   :  { %7317 = vmatpush3.bf16.msra.mxu1 %v8765_v32 }
 0xdf8   :  { %7624 = vtanh.f32 %v1426_v18  ;;  %7324 = vmatprep.subr.bf16.mxu1 %v8460_v16 }
 0xdf9   :  { %7626 = vpow2.f32 %v6448_v20 }
 0xdfa   :  { %7628 = vpow2.f32 %v6449_v22 }
 0xdfd   :  { %v7623_v19 = vpop.eup %7622 }
 0xdfe   :  { %1433 = vrot.lane.b32.xlu0 %v7623_v19, %s8463_s4 }
 0xe02   :  { %v7625_v6 = vpop.eup %7624 }
 0xe03   :  { %1435 = vrot.lane.b32.xlu1 %v7625_v6, %s8463_s4  ;;  %v7627_v24 = vpop.eup %7626 }
 0xe04   :  { %v1403_v27 = vadd.f32 1.0, %v7627_v24  ;;  %v7629_v30 = vpop.eup %7628 }
 0xe05   :  { %v1404_v31 = vadd.f32 1.0, %v7629_v30 }
 0xe06   :  { %7630 = vrcp.f32 %v1403_v27 }
 0xe07   :  { %7632 = vrcp.f32 %v1404_v31 }
 0xe10   :  { %v7631_v33 = vpop.eup %7630 }
 0xe11   :  { %v1429_v34 = vsub.f32 1.0, %v7631_v33  ;;  %v7633_v41 = vpop.eup %7632  ;;  %v1445_v48 = vmul.f32 %v7631_v33, %v1441_v37 }
 0xe12   :  { %v1430_v29 = vsub.f32 1.0, %v7633_v41  ;;  %v1446_v50 = vmul.f32 %v7633_v41, %v1442_v47 }
 0xe70   :  { %v1434_v38 = vpop.permute.xlu0 %1433 }
 0xe71   :  { %v1439_v26 = vmul.f32 %v1434_v38, %v1429_v34 }
 0xe73   :  { %v9030_v25 = vadd.f32 %v1445_v48, %v1439_v26 }
 0xe75   :  { %1461 = vst.msk [vmem:[#allocation3] sm:$0x20] %vm1460_vm5, %v9030_v25  ;;  %v1436_v49 = vpop.permute.xlu1 %1435  ;;  %v1601_v43 = vrot.slane %v9030_v25, 5 }
 0xe76   :  { %v1440_v52 = vmul.f32 %v1436_v49, %v1430_v29 }
 0xe78   :  { %v9035_v44 = vadd.f32 %v1446_v50, %v1440_v52 }
 0xe7a   :  { %1462 = vst.msk [vmem:[#allocation3 + $0x8] sm:$0x20] %vm1460_vm5, %v9035_v44  ;;  %v1602_v54 = vrot.slane %v9035_v44, 4 }
 0xe7c   :  { %v1603_v56 = vsel %vm859_vm2, %v1602_v54, %v1601_v43 }
 0xe7d   :  { %6872 = vmatmul.mubr.msk.f32.vlgmr.msra.gmra.mrb[14].mxu0 %vm374_vm1, %v1603_v56 }
 0xe7e   :  { %7308 = vmatpush3.bf16.msra.mxu0 %v8839_v51  ;;  %6893 = vmatprep.mubr.msk.f32.mxu0 %vm8459_vm0, %v8458_v0 }
 0xe7f   :  { %7309 = vmatprep.subr.bf16.mxu0 %v8460_v16 }
 0xe82   :  { %7311 = vmatpush3.bf16.msra.mxu0 %v8843_v53 }
 0xe83   :  { %7318 = vmatprep.subr.bf16.mxu0 %v8460_v16 }
 0xec5   :  { %v1840_v42 = vpop.f32.mrb[12].mxu1 }
 0xec6   :  { %v1841_v57 = vadd.f32 %v8788_v55, %v1840_v42  ;;  %v6884_v60 = vpop.f32.mrb[13].mxu1 }
 0xec8   :  { %v1845_v61 = vrot.slane %v1841_v57, 4  ;;  %v1846_v63 = vrot.slane %v1841_v57, 5 }
 0xeca   :  { %1865 = vrot.lane.b32.xlu1 %v1846_v63, %s8462_s20  ;;  %1863 = vrot.lane.b32.xlu0 %v1845_v61, %s8462_s20  ;;  %v1849_v1 = vadd.f32 %v1845_v61, %v8800_v5  ;;  %v1850_v8 = vadd.f32 %v1846_v63, %v8806_v9  ;;  %v1896_v63 = vrot.slane %v9006_v58, 7 }
 0xecc   :  { %v6459_v10 = vmul.f32 -1.442695, %v1849_v1  ;;  %v6460_v3 = vmul.f32 -1.442695, %v1850_v8 }
 0xece   :  { %7634 = vpow2.f32 %v6459_v10  ;;  %v1895_v10 = vrot.slane %v9008_v59, 7 }
 0xecf   :  { %7636 = vpow2.f32 %v6460_v3 }
 0xed8   :  { %v7635_v2 = vpop.eup %7634 }
 0xed9   :  { %v7637_v11 = vpop.eup %7636  ;;  %v1857_v13 = vadd.f32 1.0, %v7635_v2 }
 0xeda   :  { %v1858_v14 = vadd.f32 1.0, %v7637_v11 }
 0xedb   :  { %7638 = vrcp.f32 %v1857_v13 }
 0xedc   :  { %7640 = vrcp.f32 %v1858_v14 }
 0xee5   :  { %v7639_v55 = vpop.eup %7638 }
 0xee6   :  { %v7641_v15 = vpop.eup %7640  ;;  %v1883_v8 = vsub.f32 1.0, %v7639_v55  ;;  %v1899_v13 = vmul.f32 %v7639_v55, %v1895_v10 }
 0xee7   :  { %v1884_v61 = vsub.f32 1.0, %v7641_v15  ;;  %v1900_v3 = vmul.f32 %v7641_v15, %v1896_v63 }
 0xf3c   :  { %v1866_v17 = vpop.permute.xlu1 %1865  ;;  %v1864_v18 = vpop.permute.xlu0 %1863 }
 0xf3d   :  { %v1870_v19 = vmul.f32 %v7641_v15, %v1866_v17  ;;  %v1869_v6 = vmul.f32 %v7639_v55, %v1864_v18 }
 0xf3f   :  { %1875 = vrot.lane.b32.xlu1 %v1870_v19, %s8462_s20  ;;  %1873 = vrot.lane.b32.xlu0 %v1869_v6, %s8462_s20 }
 0xf50   :  { %v1672_v7 = vpop.f32.mrb[14].mxu0 }
 0xf51   :  { %v1673_v20 = vadd.f32 %v8864_v23, %v1672_v7  ;;  %v6873_v21 = vpop.f32.mrb[15].mxu0 }
 0xf53   :  { %v1677_v22 = vrot.slane %v1673_v20, 4  ;;  %v1678_v24 = vrot.slane %v1673_v20, 5 }
 0xf55   :  { %1681 = vrot.lane.b32.xlu1 %v1678_v24, %s8463_s4  ;;  %1679 = vrot.lane.b32.xlu0 %v1677_v22, %s8463_s4 }
 0xf59   :  { %1715 = vrot.lane.b32.xlu1 %v1678_v24, %s8464_s25  ;;  %1713 = vrot.lane.b32.xlu0 %v1677_v22, %s8464_s25 }
 0xfb1   :  { %v1876_v27 = vpop.permute.xlu1 %1875  ;;  %v1874_v30 = vpop.permute.xlu0 %1873 }
 0xfb2   :  { %v1880_v31 = vadd.f32 %v1876_v27, %v8806_v9  ;;  %v1879_v33 = vadd.f32 %v1874_v30, %v8800_v5 }
 0xfb4   :  { %7642 = vtanh.f32 %v1880_v31 }
 0xfb5   :  { %7644 = vtanh.f32 %v1879_v33 }
 0xfbe   :  { %v7643_v23 = vpop.eup %7642 }
 0xfbf   :  { %v7645_v34 = vpop.eup %7644  ;;  %1889 = vrot.lane.b32.xlu1 %v7643_v23, %s8463_s4 }
 0xfc0   :  { %1887 = vrot.lane.b32.xlu0 %v7645_v34, %s8463_s4 }
 0xfc7   :  { %v1682_v37 = vpop.permute.xlu1 %1681  ;;  %v1680_v38 = vpop.permute.xlu0 %1679 }
 0xfc8   :  { %v1686_v41 = vadd.f32 %v1682_v37, %v8806_v9  ;;  %v1685_v48 = vadd.f32 %v1680_v38, %v8800_v5  ;;  %v1700_v30 = vadd.f32 %v1682_v37, %v8810_v12  ;;  %v1699_v31 = vadd.f32 %v1680_v38, %v8897_v4 }
 0xfc9   :  { %v1746_v37 = vrot.slane %v9035_v44, 1  ;;  %v1745_v38 = vrot.slane %v9030_v25, 1 }
 0xfca   :  { %v6455_v26 = vmul.f32 -1.442695, %v1686_v41  ;;  %v6454_v29 = vmul.f32 -1.442695, %v1685_v48  ;;  %v6457_v33 = vmul.f32 -1.442695, %v1700_v30 }
 0xfcb   :  { %v1716_v54 = vpop.permute.xlu1 %1715  ;;  %v1714_v57 = vpop.permute.xlu0 %1713  ;;  %v6456_v23 = vmul.f32 -1.442695, %v1699_v31 }
 0xfcc   :  { %7646 = vpow2.f32 %v6455_v26 }
 0xfcd   :  { %7648 = vpow2.f32 %v6454_v29 }
 0xfd6   :  { %v7647_v47 = vpop.eup %7646 }
 0xfd7   :  { %v1694_v49 = vadd.f32 1.0, %v7647_v47  ;;  %v7649_v50 = vpop.eup %7648 }
 0xfd8   :  { %v1693_v52 = vadd.f32 1.0, %v7649_v50 }
 0xfd9   :  { %7650 = vrcp.f32 %v1694_v49 }
 0xfda   :  { %7652 = vrcp.f32 %v1693_v52 }
 0xfe3   :  { %v7651_v43 = vpop.eup %7650 }
 0xfe4   :  { %v1720_v56 = vmul.f32 %v7651_v43, %v1716_v54  ;;  %v7653_v42 = vpop.eup %7652 }
 0xfe5   :  { %v1719_v60 = vmul.f32 %v7653_v42, %v1714_v57 }
 0xfe6   :  { %1725 = vrot.lane.b32.xlu1 %v1720_v56, %s8462_s20 }
 0xfe7   :  { %1723 = vrot.lane.b32.xlu0 %v1719_v60, %s8462_s20 }
0x1031   :  { %v1890_v1 = vpop.permute.xlu1 %1889 }
0x1032   :  { %v1894_v2 = vmul.f32 %v1890_v1, %v1884_v61  ;;  %v1888_v11 = vpop.permute.xlu0 %1887 }
0x1033   :  { %v1893_v14 = vmul.f32 %v1888_v11, %v1883_v8  ;;  %v9112_v8 = vld [vmem:[#allocation11] ss:$0 sm:$0xff] }
0x1034   :  { %v9071_v17 = vadd.f32 %v1900_v3, %v1894_v2 }
0x1035   :  { %v9073_v18 = vadd.f32 %v1899_v13, %v1893_v14  ;;  %v9117_v14 = vld [vmem:[#allocation13] ss:$0 sm:$0xff] }
0x1036   :  { %v2070_v19 = vrot.slane %v9071_v17, 3 }
0x1037   :  { %v2069_v6 = vrot.slane %v9073_v18, 4 }
0x1039   :  { %v2071_v7 = vsel %vm859_vm2, %v2070_v19, %v2069_v6 }
0x103a   :  { %2072 = vrot.lane.b32.xlu0 %v2071_v7, %s8463_s4 }
0x1058   :  { %v1726_v20 = vpop.permute.xlu1 %1725 }
0x1059   :  { %v1730_v21 = vadd.f32 %v1726_v20, %v8810_v12  ;;  %v1724_v15 = vpop.permute.xlu0 %1723 }
0x105a   :  { %v1729_v55 = vadd.f32 %v1724_v15, %v8897_v4 }
0x105b   :  { %7654 = vtanh.f32 %v1730_v21 }
0x105c   :  { %7656 = vtanh.f32 %v1729_v55 }
0x105d   :  { %7658 = vpow2.f32 %v6457_v33 }
0x105e   :  { %7660 = vpow2.f32 %v6456_v23 }
0x1065   :  { %v7655_v22 = vpop.eup %7654 }
0x1066   :  { %1739 = vrot.lane.b32.xlu0 %v7655_v22, %s8463_s4  ;;  %v7657_v24 = vpop.eup %7656 }
0x1067   :  { %1737 = vrot.lane.b32.xlu1 %v7657_v24, %s8463_s4  ;;  %v7659_v34 = vpop.eup %7658 }
0x1068   :  { %v7661_v41 = vpop.eup %7660  ;;  %v1708_v48 = vadd.f32 1.0, %v7659_v34 }
0x1069   :  { %v1707_v26 = vadd.f32 1.0, %v7661_v41 }
0x106a   :  { %7662 = vrcp.f32 %v1708_v48 }
0x106b   :  { %7664 = vrcp.f32 %v1707_v26 }
0x1074   :  { %v7663_v29 = vpop.eup %7662 }
0x1075   :  { %v7665_v47 = vpop.eup %7664  ;;  %v1734_v49 = vsub.f32 1.0, %v7663_v29  ;;  %v1750_v43 = vmul.f32 %v7663_v29, %v1746_v37 }
0x1076   :  { %v1733_v52 = vsub.f32 1.0, %v7665_v47  ;;  %v1749_v42 = vmul.f32 %v7665_v47, %v1745_v38 }
0x10ac   :  { %v2073_v27 = vpop.permute.xlu0 %2072 }
0x10ad   :  { %6905 = vmatmul.mubr.msk.f32.vlgmr.msra.gmra.mrb[14].mxu1 %vm374_vm1, %v2073_v27 }
0x10ae   :  { %7326 = vmatpush3.bf16.msra.mxu1 %v8759_v28  ;;  %6926 = vmatprep.mubr.msk.f32.mxu1 %vm8459_vm0, %v8458_v0 }
0x10af   :  { %7327 = vmatprep.subr.bf16.mxu1 %v8460_v16 }
0x10b2   :  { %7329 = vmatpush3.bf16.msra.mxu1 %v8765_v32 }
0x10b3   :  { %7336 = vmatprep.subr.bf16.mxu1 %v8460_v16 }
0x10d8   :  { %v1740_v50 = vpop.permute.xlu0 %1739 }
0x10d9   :  { %v1744_v54 = vmul.f32 %v1740_v50, %v1734_v49  ;;  %v1738_v56 = vpop.permute.xlu1 %1737 }
0x10da   :  { %v1743_v57 = vmul.f32 %v1738_v56, %v1733_v52 }
0x10db   :  { %v9094_v60 = vadd.f32 %v1750_v43, %v1744_v54 }
0x10dc   :  { %v9096_v61 = vadd.f32 %v1749_v42, %v1743_v57 }
0x10dd   :  { %1766 = vst.msk [vmem:[#allocation3 + $0x8] sm:$0x10] %vm1764_vm6, %v9094_v60  ;;  %v1906_v63 = vrot.slane %v9094_v60, 3 }
0x10de   :  { %1765 = vst.msk [vmem:[#allocation3] sm:$0x10] %vm1764_vm6, %v9096_v61  ;;  %v1905_v25 = vrot.slane %v9096_v61, 4 }
0x10e0   :  { %v1907_v44 = vsel %vm859_vm2, %v1906_v63, %v1905_v25 }
0x10e1   :  { %6894 = vmatmul.mubr.msk.f32.vlgmr.msra.gmra.mrb[16].mxu0 %vm374_vm1, %v1907_v44 }
0x10e2   :  { %7320 = vmatpush3.bf16.msra.mxu0 %v8839_v51  ;;  %6915 = vmatprep.mubr.msk.f32.mxu0 %vm8459_vm0, %v8458_v0 }
0x10e3   :  { %7321 = vmatprep.subr.bf16.mxu0 %v8460_v16 }
0x10e6   :  { %7323 = vmatpush3.bf16.msra.mxu0 %v8843_v53 }
0x10e7   :  { %7330 = vmatprep.subr.bf16.mxu0 %v8460_v16 }
0x1180   :  { %v2142_v1 = vpop.f32.mrb[14].mxu1 }
0x1181   :  { %v2143_v10 = vadd.f32 %v9112_v8, %v2142_v1  ;;  %v6906_v3 = vpop.f32.mrb[15].mxu1 }
0x1183   :  { %v2147_v2 = vrot.slane %v2143_v10, 3  ;;  %v2148_v11 = vrot.slane %v2143_v10, 4 }
0x1185   :  { %2167 = vrot.lane.b32.xlu0 %v2148_v11, %s8462_s20  ;;  %2165 = vrot.lane.b32.xlu1 %v2147_v2, %s8462_s20  ;;  %v2151_v21 = vadd.f32 %v2147_v2, %v8800_v5  ;;  %v2152_v15 = vadd.f32 %v2148_v11, %v8806_v9 }
0x1187   :  { %v6467_v55 = vmul.f32 -1.442695, %v2151_v21  ;;  %v6468_v22 = vmul.f32 -1.442695, %v2152_v15  ;;  %v2197_v15 = vrot.slane %v9073_v18, 7 }
0x1189   :  { %7666 = vpow2.f32 %v6467_v55 }
0x118a   :  { %7668 = vpow2.f32 %v6468_v22 }
0x1193   :  { %v7667_v24 = vpop.eup %7666 }
0x1194   :  { %v7669_v27 = vpop.eup %7668  ;;  %v2159_v30 = vadd.f32 1.0, %v7667_v24 }
0x1195   :  { %v2160_v31 = vadd.f32 1.0, %v7669_v27 }
0x1196   :  { %7670 = vrcp.f32 %v2159_v30 }
0x1197   :  { %7672 = vrcp.f32 %v2160_v31 }
0x11a0   :  { %v7671_v33 = vpop.eup %7670 }
0x11a1   :  { %v7673_v23 = vpop.eup %7672  ;;  %v2185_v21 = vsub.f32 1.0, %v7671_v33  ;;  %v2201_v27 = vmul.f32 %v7671_v33, %v2197_v15 }
0x11b4   :  { %v1976_v13 = vpop.f32.mrb[16].mxu0 }
0x11b5   :  { %v1977_v19 = vadd.f32 %v9117_v14, %v1976_v13  ;;  %v6895_v6 = vpop.f32.mrb[17].mxu0 }
0x11b6   :  { %v2186_v6 = vsub.f32 1.0, %v7673_v23 }
0x11b7   :  { %v1981_v7 = vrot.slane %v1977_v19, 5  ;;  %v1982_v20 = vrot.slane %v1977_v19, 6 }
0x11b9   :  { %1985 = vrot.lane.b32.xlu0 %v1982_v20, %s8463_s4  ;;  %1983 = vrot.lane.b32.xlu1 %v1981_v7, %s8463_s4 }
0x11f7   :  { %v2168_v34 = vpop.permute.xlu0 %2167  ;;  %v2166_v41 = vpop.permute.xlu1 %2165 }
0x11f8   :  { %v2172_v48 = vmul.f32 %v7673_v23, %v2168_v34  ;;  %v2171_v26 = vmul.f32 %v7671_v33, %v2166_v41 }
0x11fa   :  { %2177 = vrot.lane.b32.xlu0 %v2172_v48, %s8462_s20  ;;  %2175 = vrot.lane.b32.xlu1 %v2171_v26, %s8462_s20 }
0x11fe   :  { %2019 = vrot.lane.b32.xlu0 %v1982_v20, %s8464_s25  ;;  %2017 = vrot.lane.b32.xlu1 %v1981_v7, %s8464_s25  ;;  %v2198_v7 = vrot.slane %v9071_v17, 7 }
0x1200   :  { %v2202_v55 = vmul.f32 %v7673_v23, %v2198_v7 }
0x122b   :  { %v1986_v29 = vpop.permute.xlu0 %1985  ;;  %v1984_v47 = vpop.permute.xlu1 %1983 }
0x122c   :  { %v1990_v49 = vadd.f32 %v1986_v29, %v8806_v9  ;;  %v1989_v37 = vadd.f32 %v1984_v47, %v8800_v5 }
0x122e   :  { %v6463_v50 = vmul.f32 -1.442695, %v1990_v49  ;;  %v6462_v52 = vmul.f32 -1.442695, %v1989_v37 }
0x1230   :  { %7674 = vpow2.f32 %v6463_v50 }
0x1231   :  { %7676 = vpow2.f32 %v6462_v52 }
0x123a   :  { %v7675_v38 = vpop.eup %7674 }
0x123b   :  { %v7677_v43 = vpop.eup %7676  ;;  %v1998_v42 = vadd.f32 1.0, %v7675_v38  ;;  %v2004_v38 = vadd.f32 %v1986_v29, %v8810_v12 }
0x123c   :  { %v1997_v25 = vadd.f32 1.0, %v7677_v43  ;;  %v2003_v43 = vadd.f32 %v1984_v47, %v8897_v4 }
0x126c   :  { %v2178_v54 = vpop.permute.xlu0 %2177  ;;  %v2176_v56 = vpop.permute.xlu1 %2175 }
0x126d   :  { %v2182_v57 = vadd.f32 %v2178_v54, %v8806_v9  ;;  %v2181_v63 = vadd.f32 %v2176_v56, %v8800_v5  ;;  %v6465_v54 = vmul.f32 -1.442695, %v2004_v38  ;;  %v6464_v56 = vmul.f32 -1.442695, %v2003_v43 }
0x126f   :  { %7678 = vtanh.f32 %v2182_v57 }
0x1270   :  { %7680 = vtanh.f32 %v2181_v63  ;;  %v2020_v1 = vpop.permute.xlu0 %2019  ;;  %v2018_v3 = vpop.permute.xlu1 %2017 }
0x1271   :  { %7682 = vrcp.f32 %v1998_v42 }
0x1272   :  { %7684 = vrcp.f32 %v1997_v25 }
0x1279   :  { %v7679_v44 = vpop.eup %7678 }
0x127a   :  { %v7681_v10 = vpop.eup %7680  ;;  %2191 = vrot.lane.b32.xlu0 %v7679_v44, %s8463_s4 }
0x127b   :  { %v7683_v2 = vpop.eup %7682  ;;  %2189 = vrot.lane.b32.xlu1 %v7681_v10, %s8463_s4  ;;  %v2050_v10 = vrot.slane %v9094_v60, 1 }
0x127c   :  { %v7685_v11 = vpop.eup %7684  ;;  %v2024_v13 = vmul.f32 %v7683_v2, %v2020_v1  ;;  %v2049_v2 = vrot.slane %v9096_v61, 1 }
0x127d   :  { %v2023_v19 = vmul.f32 %v7685_v11, %v2018_v3 }
0x127e   :  { %2029 = vrot.lane.b32.xlu0 %v2024_v13, %s8462_s20 }
0x127f   :  { %2027 = vrot.lane.b32.xlu1 %v2023_v19, %s8462_s20 }
0x12ec   :  { %v2192_v20 = vpop.permute.xlu0 %2191 }
0x12ed   :  { %v2196_v22 = vmul.f32 %v2192_v20, %v2186_v6  ;;  %v2190_v24 = vpop.permute.xlu1 %2189 }
0x12ee   :  { %v2195_v30 = vmul.f32 %v2190_v24, %v2185_v21 }
0x12ef   :  { %v9138_v31 = vadd.f32 %v2202_v55, %v2196_v22 }
0x12f0   :  { %v9140_v34 = vadd.f32 %v2201_v27, %v2195_v30  ;;  %v2030_v41 = vpop.permute.xlu0 %2029 }
0x12f1   :  { %v2034_v48 = vadd.f32 %v2030_v41, %v8810_v12  ;;  %v2028_v26 = vpop.permute.xlu1 %2027  ;;  %v2372_v49 = vrot.slane %v9138_v31, 4 }
0x12f2   :  { %v2033_v37 = vadd.f32 %v2028_v26, %v8897_v4  ;;  %v2371_v50 = vrot.slane %v9140_v34, 5 }
0x12f3   :  { %7686 = vtanh.f32 %v2034_v48 }
0x12f4   :  { %7688 = vtanh.f32 %v2033_v37  ;;  %v2373_v23 = vsel %vm859_vm2, %v2372_v49, %v2371_v50 }
0x12f5   :  { %2374 = vrot.lane.b32.xlu1 %v2373_v23, %s8463_s4  ;;  %7690 = vpow2.f32 %v6465_v54 }
0x12f6   :  { %7692 = vpow2.f32 %v6464_v56 }
0x12fd   :  { %v7687_v33 = vpop.eup %7686 }
0x12fe   :  { %v7689_v52 = vpop.eup %7688  ;;  %2043 = vrot.lane.b32.xlu1 %v7687_v33, %s8463_s4 }
0x12ff   :  { %2041 = vrot.lane.b32.xlu0 %v7689_v52, %s8463_s4  ;;  %v7691_v42 = vpop.eup %7690 }
0x1300   :  { %v7693_v57 = vpop.eup %7692  ;;  %v2012_v63 = vadd.f32 1.0, %v7691_v42 }
0x1301   :  { %v2011_v25 = vadd.f32 1.0, %v7693_v57 }
0x1302   :  { %7694 = vrcp.f32 %v2012_v63 }
0x1303   :  { %7696 = vrcp.f32 %v2011_v25 }
0x130c   :  { %v7695_v29 = vpop.eup %7694 }
0x130d   :  { %v7697_v47 = vpop.eup %7696  ;;  %v2038_v1 = vsub.f32 1.0, %v7695_v29 }
0x130e   :  { %v2037_v3 = vsub.f32 1.0, %v7697_v47  ;;  %v2053_v6 = vmul.f32 %v7697_v47, %v2049_v2 }
0x1367   :  { %v2375_v44 = vpop.permute.xlu1 %2374 }
0x1368   :  { %6927 = vmatmul.mubr.msk.f32.vlgmr.msra.gmra.mrb[16].mxu1 %vm374_vm1, %v2375_v44 }
0x1369   :  { %7338 = vmatpush3.bf16.msra.mxu1 %v8759_v28  ;;  %6948 = vmatprep.mubr.msk.f32.mxu1 %vm8459_vm0, %v8458_v0  ;;  %v2054_v28 = vmul.f32 %v7695_v29, %v2050_v10 }
0x136a   :  { %7339 = vmatprep.subr.bf16.mxu1 %v8460_v16 }
0x136d   :  { %7341 = vmatpush3.bf16.msra.mxu1 %v8765_v32 }
0x136e   :  { %6962 = vmatprep.subr.bf16.mxu1 %v8458_v0 }
0x1370   :  { %v2044_v11 = vpop.permute.xlu1 %2043 }
0x1371   :  { %v2042_v13 = vpop.permute.xlu0 %2041  ;;  %v2048_v19 = vmul.f32 %v2044_v11, %v2038_v1 }
0x1372   :  { %v2047_v7 = vmul.f32 %v2042_v13, %v2037_v3 }
0x1373   :  { %v9161_v20 = vadd.f32 %v2054_v28, %v2048_v19 }
0x1374   :  { %v9163_v21 = vadd.f32 %v2053_v6, %v2047_v7 }
0x1375   :  { %2068 = vst.msk [vmem:[#allocation3 + $0x8] sm:$0x8] %vm1761_vm7, %v9161_v20  ;;  %v2208_v32 = vrot.slane %v9161_v20, 2 }
0x1376   :  { %2067 = vst.msk [vmem:[#allocation3] sm:$0x8] %vm1761_vm7, %v9163_v21  ;;  %v2207_v60 = vrot.slane %v9163_v21, 3 }
0x1378   :  { %v2209_v61 = vsel %vm859_vm2, %v2208_v32, %v2207_v60 }
0x1379   :  { %6916 = vmatmul.mubr.msk.f32.vlgmr.msra.gmra.mrb[18].mxu0 %vm374_vm1, %v2209_v61 }
0x137a   :  { %7332 = vmatpush3.bf16.msra.mxu0 %v8839_v51  ;;  %6937 = vmatprep.mubr.msk.f32.mxu0 %vm8459_vm0, %v8458_v0 }
0x137b   :  { %7333 = vmatprep.subr.bf16.mxu0 %v8460_v16 }
0x137e   :  { %7335 = vmatpush3.bf16.msra.mxu0 %v8843_v53 }
0x137f   :  { %7342 = vmatprep.subr.bf16.mxu0 %v8460_v16 }
0x143b   :  { %v2444_v15 = vpop.f32.mrb[16].mxu1 }
0x143c   :  { %v2445_v55 = vadd.f32 %v9112_v8, %v2444_v15  ;;  %v6928_v22 = vpop.f32.mrb[17].mxu1 }
0x143e   :  { %v2449_v24 = vrot.slane %v2445_v55, 2  ;;  %v2450_v27 = vrot.slane %v2445_v55, 3 }
0x1440   :  { %2469 = vrot.lane.b32.xlu1 %v2450_v27, %s8462_s20  ;;  %2467 = vrot.lane.b32.xlu0 %v2449_v24, %s8462_s20  ;;  %v2453_v8 = vadd.f32 %v2449_v24, %v8800_v5  ;;  %v2454_v37 = vadd.f32 %v2450_v27, %v8806_v9 }
0x1442   :  { %v6475_v50 = vmul.f32 -1.442695, %v2453_v8  ;;  %v6476_v23 = vmul.f32 -1.442695, %v2454_v37 }
0x1444   :  { %7698 = vpow2.f32 %v6475_v50 }
0x1445   :  { %7700 = vpow2.f32 %v6476_v23  ;;  %v2500_v23 = vrot.slane %v9138_v31, 7 }
0x144c   :  { %v2278_v30 = vpop.f32.mrb[18].mxu0 }
0x144d   :  { %v2279_v41 = vadd.f32 %v9117_v14, %v2278_v30  ;;  %v6917_v48 = vpop.f32.mrb[19].mxu0 }
0x144e   :  { %v7699_v33 = vpop.eup %7698 }
0x144f   :  { %v2283_v26 = vrot.slane %v2279_v41, 6  ;;  %v2284_v49 = vrot.slane %v2279_v41, 7  ;;  %v7701_v52 = vpop.eup %7700  ;;  %v2461_v38 = vadd.f32 1.0, %v7699_v33 }
0x1450   :  { %v2462_v43 = vadd.f32 1.0, %v7701_v52 }
0x1451   :  { %2287 = vrot.lane.b32.xlu1 %v2284_v49, %s8463_s4  ;;  %2285 = vrot.lane.b32.xlu0 %v2283_v26, %s8463_s4  ;;  %7702 = vrcp.f32 %v2461_v38  ;;  %v2499_v38 = vrot.slane %v9140_v34, 7 }
0x1452   :  { %7704 = vrcp.f32 %v2462_v43 }
0x1455   :  { %2321 = vrot.lane.b32.xlu1 %v2284_v49, %s8464_s25  ;;  %2319 = vrot.lane.b32.xlu0 %v2283_v26, %s8464_s25 }
0x145b   :  { %v7703_v54 = vpop.eup %7702 }
0x145c   :  { %v7705_v56 = vpop.eup %7704  ;;  %v2487_v52 = vsub.f32 1.0, %v7703_v54 }
0x145d   :  { %v2488_v50 = vsub.f32 1.0, %v7705_v56  ;;  %v2504_v43 = vmul.f32 %v7705_v56, %v2500_v23  ;;  %v2984_v23 = vld [vmem:[%s10212_s23] sm:$0xff] }
0x14b2   :  { %v2470_v42 = vpop.permute.xlu1 %2469  ;;  %v2468_v57 = vpop.permute.xlu0 %2467 }
0x14b3   :  { %v2474_v63 = vmul.f32 %v7705_v56, %v2470_v42  ;;  %v2473_v25 = vmul.f32 %v7703_v54, %v2468_v57 }
0x14b5   :  { %2479 = vrot.lane.b32.xlu1 %v2474_v63, %s8462_s20  ;;  %2477 = vrot.lane.b32.xlu0 %v2473_v25, %s8462_s20  ;;  %v2503_v63 = vmul.f32 %v7703_v54, %v2499_v38 }
0x14c3   :  { %v2288_v44 = vpop.permute.xlu1 %2287  ;;  %v2286_v29 = vpop.permute.xlu0 %2285 }
0x14c4   :  { %v2292_v47 = vadd.f32 %v2288_v44, %v8806_v9  ;;  %v2291_v1 = vadd.f32 %v2286_v29, %v8800_v5 }
0x14c6   :  { %v6471_v10 = vmul.f32 -1.442695, %v2292_v47  ;;  %v6470_v3 = vmul.f32 -1.442695, %v2291_v1 }
0x14c7   :  { %v2322_v6 = vpop.permute.xlu1 %2321  ;;  %v2320_v60 = vpop.permute.xlu0 %2319 }
0x14c8   :  { %7706 = vpow2.f32 %v6471_v10 }
0x14c9   :  { %7708 = vpow2.f32 %v6470_v3  ;;  %v2306_v3 = vadd.f32 %v2288_v44, %v8810_v12 }
0x14cb   :  { %v6473_v56 = vmul.f32 -1.442695, %v2306_v3  ;;  %v3047_v3 = vld [vmem:[%s10213_s26 + $0x18] sm:$0xff] }
0x14d2   :  { %v7707_v2 = vpop.eup %7706 }
0x14d3   :  { %v2300_v11 = vadd.f32 1.0, %v7707_v2  ;;  %v7709_v13 = vpop.eup %7708 }
0x14d4   :  { %v2299_v28 = vadd.f32 1.0, %v7709_v13 }
0x14d5   :  { %7710 = vrcp.f32 %v2300_v11  ;;  %v2305_v11 = vadd.f32 %v2286_v29, %v8897_v4 }
0x14d6   :  { %7712 = vrcp.f32 %v2299_v28 }
0x14d7   :  { %v6472_v28 = vmul.f32 -1.442695, %v2305_v11 }
0x14df   :  { %v7711_v19 = vpop.eup %7710 }
0x14e0   :  { %v2326_v7 = vmul.f32 %v7711_v19, %v2322_v6  ;;  %v7713_v32 = vpop.eup %7712 }
0x14e1   :  { %v2325_v61 = vmul.f32 %v7713_v32, %v2320_v60 }
0x14e2   :  { %2331 = vrot.lane.b32.xlu1 %v2326_v7, %s8462_s20 }
0x14e3   :  { %2329 = vrot.lane.b32.xlu0 %v2325_v61, %s8462_s20  ;;  %v2352_v61 = vrot.slane %v9161_v20, 1 }
0x1527   :  { %v2480_v15 = vpop.permute.xlu1 %2479  ;;  %v2478_v55 = vpop.permute.xlu0 %2477 }
0x1528   :  { %v2484_v22 = vadd.f32 %v2480_v15, %v8806_v9  ;;  %v2483_v24 = vadd.f32 %v2478_v55, %v8800_v5 }
0x152a   :  { %7714 = vtanh.f32 %v2484_v22 }
0x152b   :  { %7716 = vtanh.f32 %v2483_v24  ;;  %v2351_v24 = vrot.slane %v9163_v21, 1 }
0x1534   :  { %v7715_v27 = vpop.eup %7714 }
0x1535   :  { %v7717_v30 = vpop.eup %7716  ;;  %2493 = vrot.lane.b32.xlu1 %v7715_v27, %s8463_s4 }
0x1536   :  { %2491 = vrot.lane.b32.xlu0 %v7717_v30, %s8463_s4 }
0x1554   :  { %v2332_v41 = vpop.permute.xlu1 %2331 }
0x1555   :  { %v2336_v48 = vadd.f32 %v2332_v41, %v8810_v12  ;;  %v2330_v26 = vpop.permute.xlu0 %2329 }
0x1556   :  { %v2335_v49 = vadd.f32 %v2330_v26, %v8897_v4 }
0x1557   :  { %7718 = vtanh.f32 %v2336_v48 }
0x1558   :  { %7720 = vtanh.f32 %v2335_v49 }
0x1559   :  { %7722 = vpow2.f32 %v6473_v56 }
0x155a   :  { %7724 = vpow2.f32 %v6472_v28 }
0x1561   :  { %v7719_v8 = vpop.eup %7718 }
0x1562   :  { %2345 = vrot.lane.b32.xlu1 %v7719_v8, %s8463_s4  ;;  %v7721_v37 = vpop.eup %7720  ;;  %v2986_v8 = vld [vmem:[#allocation14] sm:$0xff] }
0x1563   :  { %2343 = vrot.lane.b32.xlu0 %v7721_v37, %s8463_s4  ;;  %v7723_v54 = vpop.eup %7722  ;;  %v2987_v37 = vld [vmem:[#allocation14 + $0x8] sm:$0xff] }
0x1564   :  { %v7725_v19 = vpop.eup %7724  ;;  %v2314_v6 = vadd.f32 1.0, %v7723_v54 }
0x1565   :  { %v2313_v7 = vadd.f32 1.0, %v7725_v19 }
0x1566   :  { %7726 = vrcp.f32 %v2314_v6 }
0x1567   :  { %7728 = vrcp.f32 %v2313_v7 }
0x1570   :  { %v7727_v32 = vpop.eup %7726 }
0x1571   :  { %v7729_v44 = vpop.eup %7728  ;;  %v2340_v60 = vsub.f32 1.0, %v7727_v32  ;;  %v2356_v15 = vmul.f32 %v7727_v32, %v2352_v61 }
0x1572   :  { %v2339_v22 = vsub.f32 1.0, %v7729_v44  ;;  %v2355_v41 = vmul.f32 %v7729_v44, %v2351_v24 }
0x15a7   :  { %v2494_v33 = vpop.permute.xlu1 %2493 }
0x15a8   :  { %v2498_v42 = vmul.f32 %v2494_v33, %v2488_v50  ;;  %v2492_v57 = vpop.permute.xlu0 %2491  ;;  %v2989_v50 = vpack.c.bf16 %v2987_v37, %v2986_v8  ;;  %v2985_v33 = vld [vmem:[%s10212_s23 + $0x8] sm:$0xff] }
0x15a9   :  { %v2497_v25 = vmul.f32 %v2492_v57, %v2487_v52  ;;  %v2988_v38 = vpack.c.bf16 %v2985_v33, %v2984_v23  ;;  %v3044_v57 = vld [vmem:[%s10213_s26] sm:$0xff] }
0x15aa   :  { %v9205_v47 = vadd.f32 %v2504_v43, %v2498_v42 }
0x15ab   :  { %v9207_v1 = vadd.f32 %v2503_v63, %v2497_v25  ;;  %v3045_v63 = vld [vmem:[%s10213_s26 + $0x8] sm:$0xff] }
0x15ac   :  { %v2672_v10 = vrot.slane %v9205_v47, 5  ;;  %v3049_v25 = vpack.c.bf16 %v3045_v63, %v3044_v57 }
0x15ad   :  { %v2671_v2 = vrot.slane %v9207_v1, 6 }
0x15af   :  { %v2673_v13 = vsel %vm859_vm2, %v2672_v10, %v2671_v2  ;;  %v3046_v10 = vld [vmem:[%s10213_s26 + $0x10] sm:$0xff] }
0x15b0   :  { %2674 = vrot.lane.b32.xlu0 %v2673_v13, %s8463_s4  ;;  %v3050_v2 = vpack.c.bf16 %v3047_v3, %v3046_v10  ;;  %v6490_v13 = vld [vmem:[#allocation16] ss:$0 sm:$0xff] }
0x15d4   :  { %v2346_v29 = vpop.permute.xlu1 %2345 }
0x15d5   :  { %v2350_v55 = vmul.f32 %v2346_v29, %v2340_v60  ;;  %v2344_v27 = vpop.permute.xlu0 %2343 }
0x15d6   :  { %v2349_v48 = vmul.f32 %v2344_v27, %v2339_v22 }
0x15d7   :  { %v9217_v30 = vadd.f32 %v2356_v15, %v2350_v55 }
0x15d8   :  { %v9222_v20 = vadd.f32 %v2355_v41, %v2349_v48 }
0x15d9   :  { %2370 = vst.msk [vmem:[#allocation3 + $0x8] sm:$0x4] %vm1457_vm8, %v9217_v30  ;;  %v2510_v26 = vrot.slane %v9217_v30, 1 }
0x15da   :  { %2369 = vst.msk [vmem:[#allocation3] sm:$0x4] %vm1457_vm8, %v9222_v20  ;;  %v2509_v21 = vrot.slane %v9222_v20, 2 }
0x15dc   :  { %v2511_v49 = vsel %vm859_vm2, %v2510_v26, %v2509_v21 }
0x15dd   :  { %6938 = vmatmul.mubr.msk.f32.vlgmr.msra.gmra.mrb[20].mxu0 %vm374_vm1, %v2511_v49 }
0x15de   :  { %7344 = vmatpush3.bf16.msra.mxu0 %v8839_v51  ;;  %6959 = vmatprep.mubr.msk.f32.mxu0 %vm8459_vm0, %v8458_v0 }
0x15df   :  { %7345 = vmatprep.subr.bf16.mxu0 %v8460_v16 }
0x15e2   :  { %7347 = vmatpush3.bf16.msra.mxu0 %v8843_v53 }
0x15e3   :  { %6976 = vmatprep.subr.bf16.mxu0 %v8458_v0 }
0x1622   :  { %v2675_v52 = vpop.permute.xlu0 %2674 }
0x1623   :  { %6949 = vmatmul.mubr.msk.f32.vlgmr.msra.gmra.mrb[18].mxu1 %vm374_vm1, %v2675_v52  ;;  %v3162_v52 = vld [vmem:[%s10214_s19] sm:$0xff] }
0x1624   :  { %6963 = vmatpush3.bf16.msra.mxu1 %v2989_v50  ;;  %6964 = vmatprep.mubr.msk.bf16.mxu1 %vm8459_vm0, %v8458_v0 }
0x1625   :  { %6968 = vmatprep.subr.bf16.mxu1 %v8458_v0 }
0x1627   :  { %6965 = vmatmul.mubr.msk.bf16.vlgmr.msra.gmra.mrb[20].mxu1 %vm2997_vm9, %v2988_v38  ;;  %v3163_v38 = vld [vmem:[%s10214_s19 + $0x8] sm:$0xff] }
0x1628   :  { %6972 = vmatprep.mubr.msk.bf16.mxu1 %vm8459_vm0, %v8458_v0  ;;  %6969 = vmatpush3.bf16.msra.mxu1 %v3049_v25 }
0x1629   :  { %6970 = vmatprep.subr.bf16.mxu1 %v8458_v0 }
0x162c   :  { %6971 = vmatpush3.bf16.msra.mxu1 %v3050_v2 }
0x162d   :  { %7348 = vmatprep.subr.bf16.mxu1 %v8460_v16 }
0x16b0   :  { %v2580_v51 = vpop.f32.mrb[20].mxu0 }
0x16b1   :  { %v2581_v53 = vadd.f32 %v9117_v14, %v2580_v51  ;;  %v6939_v43 = vpop.f32.mrb[21].mxu0  ;;  %v3164_v51 = vld [vmem:[%s10214_s19 + $0x10] sm:$0xff] }
0x16b2   :  { %v3165_v43 = vld [vmem:[%s10214_s19 + $0x18] sm:$0xff] }
0x16b3   :  { %2588 = vrot.lane.b32.xlu0 %v2581_v53, %s8463_s4  ;;  %v2585_v42 = vrot.slane %v2581_v53, 7 }
0x16b5   :  { %2586 = vrot.lane.b32.xlu1 %v2585_v42, %s8463_s4 }
0x16b7   :  { %2622 = vrot.lane.b32.xlu0 %v2581_v53, %s8464_s25  ;;  %v9269_v53 = vpack.c.bf16 %v3163_v38, %v3162_v52 }
0x16b9   :  { %2620 = vrot.lane.b32.xlu1 %v2585_v42, %s8464_s25  ;;  %v9273_v42 = vpack.c.bf16 %v3165_v43, %v3164_v51  ;;  %v2652_v43 = vrot.slane %v9222_v20, 1  ;;  %v3106_v20 = vld [vmem:[%s10215_s17 + $0x10] sm:$0xff] }
0x16f6   :  { %v9257_v14 = vpop.f32.mrb[18].mxu1 }
0x16f7   :  { %v6950_v11 = vpop.f32.mrb[19].mxu1 }
0x16f8   :  { %v6492_v11 = vld [vmem:[#allocation17] ss:$0 sm:$0xff] }
0x16fa   :  { %v3035_v56 = vpop.f32.mrb[20].mxu1 }
0x16fb   :  { %v3036_v28 = vadd.f32 %v6490_v13, %v3035_v56  ;;  %v6966_v54 = vpop.f32.mrb[21].mxu1 }
0x16fc   :  { %v3038_v19 = vpop.f32.mrb[22].mxu1 }
0x16fd   :  { %v3042_v6 = vmax.f32 %v3036_v28, 0.0  ;;  %v3039_v7 = vadd.f32 %v6490_v13, %v3038_v19  ;;  %v6967_v32 = vpop.f32.mrb[23].mxu1 }
0x16ff   :  { %v3043_v44 = vmax.f32 %v3039_v7, 0.0 }
0x1701   :  { %v3048_v60 = vpack.c.bf16 %v3043_v44, %v3042_v6 }
0x1703   :  { %6973 = vmatmul.mubr.msk.bf16.vlgmr.msra.gmra.mrb[24].mxu1 %vm374_vm1, %v3048_v60 }
0x1704   :  { %6992 = vmatprep.mubr.msk.f32.mxu1 %vm8459_vm0, %v8458_v0  ;;  %7350 = vmatpush3.bf16.msra.mxu1 %v9269_v53 }
0x1705   :  { %7351 = vmatprep.subr.bf16.mxu1 %v8460_v16 }
0x1708   :  { %7353 = vmatpush3.bf16.msra.mxu1 %v9273_v42 }
0x1709   :  { %7360 = vmatprep.subr.bf16.mxu1 %v8460_v16 }
0x170b   :  { %6993 = vmatmul.mubr.f32.vlgmr.msra.gmra.mrb[28].mxu1 %v8458_v0 }
0x170c   :  { %7362 = vmatpush3.bf16.msra.mxu1 %v9269_v53  ;;  %7014 = vmatprep.mubr.msk.f32.mxu1 %vm8459_vm0, %v8458_v0 }
0x170d   :  { %7363 = vmatprep.subr.bf16.mxu1 %v8460_v16 }
0x1710   :  { %7365 = vmatpush3.bf16.msra.mxu1 %v9273_v42 }
0x1711   :  { %7372 = vmatprep.subr.bf16.mxu1 %v8460_v16 }
0x1725   :  { %v2589_v61 = vpop.permute.xlu0 %2588 }
0x1726   :  { %v2593_v29 = vadd.f32 %v2589_v61, %v8806_v9  ;;  %v2607_v60 = vadd.f32 %v2589_v61, %v8810_v12 }
0x1727   :  { %v2587_v15 = vpop.permute.xlu1 %2586 }
0x1728   :  { %v6479_v55 = vmul.f32 -1.442695, %v2593_v29  ;;  %v2592_v22 = vadd.f32 %v2587_v15, %v8800_v5  ;;  %v2606_v29 = vadd.f32 %v2587_v15, %v8897_v4 }
0x1729   :  { %v2623_v8 = vpop.permute.xlu0 %2622 }
0x172a   :  { %7730 = vpow2.f32 %v6479_v55  ;;  %v6478_v24 = vmul.f32 -1.442695, %v2592_v22  ;;  %v6481_v55 = vmul.f32 -1.442695, %v2607_v60  ;;  %v6480_v22 = vmul.f32 -1.442695, %v2606_v29 }
0x172b   :  { %v2621_v23 = vpop.permute.xlu1 %2620 }
0x172c   :  { %7732 = vpow2.f32 %v6478_v24 }
0x1734   :  { %v7731_v27 = vpop.eup %7730 }
0x1735   :  { %v2601_v41 = vadd.f32 1.0, %v7731_v27  ;;  %v9291_v27 = vld [vmem:[#allocation20] ss:$0 sm:$0xff] }
0x1736   :  { %v7733_v48 = vpop.eup %7732 }
0x1737   :  { %7734 = vrcp.f32 %v2601_v41  ;;  %v2600_v21 = vadd.f32 1.0, %v7733_v48 }
0x1739   :  { %7736 = vrcp.f32 %v2600_v21 }
0x1741   :  { %v7735_v49 = vpop.eup %7734 }
0x1742   :  { %v2627_v37 = vmul.f32 %v7735_v49, %v2623_v8 }
0x1743   :  { %v7737_v50 = vpop.eup %7736 }
0x1744   :  { %v2626_v33 = vmul.f32 %v7737_v50, %v2621_v23  ;;  %2632 = vrot.lane.b32.xlu0 %v2627_v37, %s8462_s20 }
0x1746   :  { %2630 = vrot.lane.b32.xlu1 %v2626_v33, %s8462_s20 }
0x17b6   :  { %v2633_v57 = vpop.permute.xlu0 %2632 }
0x17b7   :  { %v2637_v63 = vadd.f32 %v2633_v57, %v8810_v12 }
0x17b8   :  { %v2631_v25 = vpop.permute.xlu1 %2630 }
0x17b9   :  { %7738 = vtanh.f32 %v2637_v63  ;;  %v2636_v10 = vadd.f32 %v2631_v25, %v8897_v4 }
0x17bb   :  { %7740 = vtanh.f32 %v2636_v10 }
0x17bc   :  { %7742 = vpow2.f32 %v6481_v55 }
0x17bd   :  { %7744 = vpow2.f32 %v6480_v22 }
0x17c3   :  { %v7739_v3 = vpop.eup %7738 }
0x17c4   :  { %2646 = vrot.lane.b32.xlu0 %v7739_v3, %s8463_s4  ;;  %v3104_v3 = vld [vmem:[%s10215_s17] sm:$0xff] }
0x17c5   :  { %v7741_v2 = vpop.eup %7740 }
0x17c6   :  { %2644 = vrot.lane.b32.xlu1 %v7741_v2, %s8463_s4  ;;  %v7743_v24 = vpop.eup %7742  ;;  %v3105_v2 = vld [vmem:[%s10215_s17 + $0x8] sm:$0xff] }
0x17c7   :  { %v7745_v41 = vpop.eup %7744  ;;  %v2615_v21 = vadd.f32 1.0, %v7743_v24 }
0x17c8   :  { %v2614_v37 = vadd.f32 1.0, %v7745_v41 }
0x17c9   :  { %7746 = vrcp.f32 %v2615_v21 }
0x17ca   :  { %7748 = vrcp.f32 %v2614_v37 }
0x17d3   :  { %v7747_v61 = vpop.eup %7746 }
0x17d4   :  { %v7749_v15 = vpop.eup %7748  ;;  %v2641_v23 = vsub.f32 1.0, %v7747_v61  ;;  %v2656_v52 = vmul.f32 %v7747_v61, %v2510_v26  ;;  %v3109_v26 = vpack.c.bf16 %v3105_v2, %v3104_v3 }
0x17d5   :  { %v2640_v51 = vsub.f32 1.0, %v7749_v15  ;;  %v2655_v25 = vmul.f32 %v7749_v15, %v2652_v43 }
0x17d6   :  { %v3095_v13 = vpop.f32.mrb[24].mxu1 }
0x17d7   :  { %v3096_v56 = vadd.f32 %v6492_v11, %v3095_v13  ;;  %v6974_v28 = vpop.f32.mrb[25].mxu1  ;;  %v3107_v13 = vld [vmem:[%s10215_s17 + $0x18] sm:$0xff] }
0x17d8   :  { %v3098_v54 = vpop.f32.mrb[26].mxu1  ;;  %v3110_v28 = vpack.c.bf16 %v3107_v13, %v3106_v20 }
0x17d9   :  { %v3102_v19 = vmax.f32 %v3096_v56, 0.0  ;;  %v3099_v6 = vadd.f32 %v6492_v11, %v3098_v54  ;;  %v6975_v7 = vpop.f32.mrb[27].mxu1 }
0x17db   :  { %v3103_v32 = vmax.f32 %v3099_v6, 0.0  ;;  %v6494_v6 = vld [vmem:[#allocation19] ss:$0 sm:$0xff] }
0x17dd   :  { %v3108_v44 = vpack.c.bf16 %v3103_v32, %v3102_v19 }
0x17de   :  { %v3239_v48 = vpop.f32.mrb[28].mxu1 }
0x17df   :  { %v3240_v49 = vadd.f32 %v9291_v27, %v3239_v48  ;;  %v6994_v8 = vpop.f32.mrb[29].mxu1 }
0x17e1   :  { %v3244_v50 = vrot.slane %v3240_v49, 1  ;;  %3261 = vrot.lane.b32.xlu0 %v3240_v49, %s8462_s20 }
0x17e3   :  { %3263 = vrot.lane.b32.xlu1 %v3244_v50, %s8462_s20 }
0x1836   :  { %v2647_v33 = vpop.permute.xlu0 %2646 }
0x1837   :  { %v2651_v38 = vmul.f32 %v2647_v33, %v2641_v23 }
0x1838   :  { %v2645_v57 = vpop.permute.xlu1 %2644 }
0x1839   :  { %v9299_v63 = vadd.f32 %v2656_v52, %v2651_v38  ;;  %v2650_v10 = vmul.f32 %v2645_v57, %v2640_v51 }
0x183b   :  { %2670 = vst.msk [vmem:[#allocation3 + $0x8] sm:$0x2] %vm1154_vm10, %v9299_v63  ;;  %v9305_v11 = vadd.f32 %v2655_v25, %v2650_v10 }
0x183d   :  { %2669 = vst.msk [vmem:[#allocation3] sm:$0x2] %vm1154_vm10, %v9305_v11  ;;  %v2809_v30 = vrot.slane %v9305_v11, 1 }
0x183f   :  { %v2810_v56 = vsel %vm859_vm2, %v9299_v63, %v2809_v30 }
0x1840   :  { %6960 = vmatmul.mubr.msk.f32.vlgmr.msra.gmra.mrb[22].mxu0 %vm374_vm1, %v2810_v56 }
0x1841   :  { %6977 = vmatpush3.bf16.msra.mxu0 %v3109_v26  ;;  %6980 = vmatprep.mubr.msk.bf16.mxu0 %vm8459_vm0, %v8458_v0 }
0x1842   :  { %6978 = vmatprep.subr.bf16.mxu0 %v8458_v0 }
0x1845   :  { %6979 = vmatpush3.bf16.msra.mxu0 %v3110_v28 }
0x1846   :  { %7354 = vmatprep.subr.bf16.mxu0 %v8460_v16 }
0x1848   :  { %6981 = vmatmul.mubr.msk.bf16.vlgmr.msra.gmra.mrb[24].mxu0 %vm374_vm1, %v3108_v44 }
0x1849   :  { %7356 = vmatpush3.bf16.msra.mxu0 %v9269_v53  ;;  %7003 = vmatprep.mubr.msk.f32.mxu0 %vm8459_vm0, %v8458_v0 }
0x184a   :  { %7357 = vmatprep.subr.bf16.mxu0 %v8460_v16 }
0x184d   :  { %7359 = vmatpush3.bf16.msra.mxu0 %v9273_v42 }
0x184e   :  { %7366 = vmatprep.subr.bf16.mxu0 %v8460_v16 }
0x1853   :  { %v3262_v15 = vpop.permute.xlu0 %3261 }
0x1855   :  { %v3264_v33 = vpop.permute.xlu1 %3263 }
0x1913   :  { %v9328_v54 = vpop.f32.mrb[22].mxu0 }
0x1914   :  { %v6961_v19 = vpop.f32.mrb[23].mxu0 }
0x191b   :  { %v3155_v7 = vpop.f32.mrb[24].mxu0 }
0x191c   :  { %v9330_v32 = vadd.f32 %v6494_v6, %v3155_v7  ;;  %v6982_v60 = vpop.f32.mrb[25].mxu0 }
0x191d   :  { %v3158_v44 = vpop.f32.mrb[26].mxu0 }
0x191e   :  { %v9332_v29 = vadd.f32 %v6494_v6, %v3158_v44  ;;  %v6983_v55 = vpop.f32.mrb[27].mxu0  ;;  %v3247_v22 = vadd.f32 %v3240_v49, %v9330_v32 }
0x1920   :  { %v6497_v24 = vmul.f32 -1.442695, %v3247_v22  ;;  %v3248_v41 = vadd.f32 %v3244_v50, %v9332_v29 }
0x1922   :  { %7750 = vpow2.f32 %v6497_v24  ;;  %v6498_v48 = vmul.f32 -1.442695, %v3248_v41 }
0x1924   :  { %7752 = vpow2.f32 %v6498_v48 }
0x192c   :  { %v7751_v21 = vpop.eup %7750 }
0x192d   :  { %v3255_v8 = vadd.f32 1.0, %v7751_v21 }
0x192e   :  { %v7753_v37 = vpop.eup %7752 }
0x192f   :  { %7754 = vrcp.f32 %v3255_v8  ;;  %v3256_v61 = vadd.f32 1.0, %v7753_v37 }
0x1931   :  { %7756 = vrcp.f32 %v3256_v61 }
0x1939   :  { %v7755_v23 = vpop.eup %7754 }
0x193a   :  { %v3267_v52 = vmul.f32 %v7755_v23, %v3262_v15  ;;  %v3281_v2 = vsub.f32 1.0, %v7755_v23  ;;  %v3293_v19 = vmul.f32 0.0, %v7755_v23 }
0x193b   :  { %v7757_v38 = vpop.eup %7756 }
0x193c   :  { %v3268_v51 = vmul.f32 %v7757_v38, %v3264_v33  ;;  %3271 = vrot.lane.b32.xlu0 %v3267_v52, %s8462_s20  ;;  %v3282_v26 = vsub.f32 1.0, %v7757_v38  ;;  %v3294_v56 = vmul.f32 0.0, %v7757_v38 }
0x193e   :  { %3273 = vrot.lane.b32.xlu1 %v3268_v51, %s8462_s20 }
0x19ae   :  { %v3272_v49 = vpop.permute.xlu0 %3271 }
0x19af   :  { %v3277_v50 = vadd.f32 %v3272_v49, %v9330_v32 }
0x19b0   :  { %v3274_v43 = vpop.permute.xlu1 %3273 }
0x19b1   :  { %7758 = vtanh.f32 %v3277_v50  ;;  %v3278_v57 = vadd.f32 %v3274_v43, %v9332_v29 }
0x19b3   :  { %7760 = vtanh.f32 %v3278_v57 }
0x19bb   :  { %v7759_v25 = vpop.eup %7758 }
0x19bc   :  { %3285 = vrot.lane.b32.xlu0 %v7759_v25, %s8463_s4 }
0x19bd   :  { %v7761_v10 = vpop.eup %7760 }
0x19be   :  { %3287 = vrot.lane.b32.xlu1 %v7761_v10, %s8463_s4 }
0x1a2e   :  { %v3286_v3 = vpop.permute.xlu0 %3285 }
0x1a2f   :  { %v3291_v13 = vmul.f32 %v3286_v3, %v3281_v2 }
0x1a30   :  { %v3288_v20 = vpop.permute.xlu1 %3287 }
0x1a31   :  { %v3292_v28 = vmul.f32 %v3288_v20, %v3282_v26  ;;  %v9344_v7 = vadd.f32 %v3293_v19, %v3291_v13 }
0x1a33   :  { %v9342_v6 = vadd.f32 %v3294_v56, %v3292_v28  ;;  %v3433_v19 = vrot.slane %v9344_v7, 7 }
0x1a35   :  { %v3307_v60 = vrot.slane %v9342_v6, 7 }
0x1a37   :  { %v3308_v44 = vsel %vm859_vm2, %v3307_v60, %v9344_v7 }
0x1a38   :  { %3309 = vrot.lane.b32.xlu1 %v3308_v44, %s8463_s4 }
0x1aaa   :  { %v3310_v55 = vpop.permute.xlu1 %3309 }
0x1aab   :  { %7004 = vmatmul.mubr.msk.f32.vlgmr.msra.gmra.mrb[28].mxu0 %vm374_vm1, %v3310_v55 }
0x1aac   :  { %7368 = vmatpush3.bf16.msra.mxu0 %v9269_v53  ;;  %7025 = vmatprep.mubr.msk.f32.mxu0 %vm8459_vm0, %v8458_v0 }
0x1aad   :  { %7369 = vmatprep.subr.bf16.mxu0 %v8460_v16 }
0x1ab0   :  { %7371 = vmatpush3.bf16.msra.mxu0 %v9273_v42 }
0x1ab1   :  { %7378 = vmatprep.subr.bf16.mxu0 %v8460_v16 }
0x1b7e   :  { %v3379_v22 = vpop.f32.mrb[28].mxu0 }
0x1b7f   :  { %v3380_v24 = vadd.f32 %v9291_v27, %v3379_v22  ;;  %v7005_v41 = vpop.f32.mrb[29].mxu0 }
0x1b81   :  { %v3384_v48 = vrot.slane %v3380_v24, 7  ;;  %3403 = vrot.lane.b32.xlu1 %v3380_v24, %s8462_s20  ;;  %v3388_v21 = vadd.f32 %v3380_v24, %v9332_v29 }
0x1b83   :  { %3401 = vrot.lane.b32.xlu0 %v3384_v48, %s8462_s20  ;;  %v3387_v8 = vadd.f32 %v3384_v48, %v9330_v32  ;;  %v6501_v37 = vmul.f32 -1.442695, %v3388_v21 }
0x1b85   :  { %v6500_v61 = vmul.f32 -1.442695, %v3387_v8  ;;  %7762 = vpow2.f32 %v6501_v37 }
0x1b87   :  { %7764 = vpow2.f32 %v6500_v61 }
0x1b8f   :  { %v7763_v15 = vpop.eup %7762 }
0x1b90   :  { %v3396_v33 = vadd.f32 1.0, %v7763_v15 }
0x1b91   :  { %v7765_v23 = vpop.eup %7764 }
0x1b92   :  { %v3395_v52 = vadd.f32 1.0, %v7765_v23  ;;  %7766 = vrcp.f32 %v3396_v33 }
0x1b94   :  { %7768 = vrcp.f32 %v3395_v52 }
0x1b9c   :  { %v7767_v38 = vpop.eup %7766 }
0x1b9d   :  { %v3422_v56 = vsub.f32 1.0, %v7767_v38  ;;  %v3437_v41 = vmul.f32 %v7767_v38, %v3307_v60 }
0x1b9e   :  { %v7769_v50 = vpop.eup %7768 }
0x1b9f   :  { %v3421_v28 = vsub.f32 1.0, %v7769_v50  ;;  %v3436_v22 = vmul.f32 %v7769_v50, %v3433_v19 }
0x1bf3   :  { %v3404_v51 = vpop.permute.xlu1 %3403 }
0x1bf4   :  { %v3408_v49 = vmul.f32 %v7767_v38, %v3404_v51 }
0x1bf5   :  { %v3402_v43 = vpop.permute.xlu0 %3401 }
0x1bf6   :  { %v3407_v57 = vmul.f32 %v7769_v50, %v3402_v43  ;;  %3413 = vrot.lane.b32.xlu1 %v3408_v49, %s8462_s20 }
0x1bf8   :  { %3411 = vrot.lane.b32.xlu0 %v3407_v57, %s8462_s20 }
0x1c68   :  { %v3414_v25 = vpop.permute.xlu1 %3413 }
0x1c69   :  { %v3418_v10 = vadd.f32 %v3414_v25, %v9332_v29 }
0x1c6a   :  { %v3412_v3 = vpop.permute.xlu0 %3411 }
0x1c6b   :  { %7770 = vtanh.f32 %v3418_v10  ;;  %v3417_v2 = vadd.f32 %v3412_v3, %v9330_v32 }
0x1c6d   :  { %7772 = vtanh.f32 %v3417_v2 }
0x1c75   :  { %v7771_v26 = vpop.eup %7770 }
0x1c76   :  { %3427 = vrot.lane.b32.xlu1 %v7771_v26, %s8463_s4 }
0x1c77   :  { %v7773_v20 = vpop.eup %7772 }
0x1c78   :  { %3425 = vrot.lane.b32.xlu0 %v7773_v20, %s8463_s4 }
0x1ce8   :  { %v3428_v13 = vpop.permute.xlu1 %3427 }
0x1ce9   :  { %v3432_v55 = vmul.f32 %v3428_v13, %v3422_v56 }
0x1cea   :  { %v3426_v44 = vpop.permute.xlu0 %3425 }
0x1ceb   :  { %v3431_v24 = vmul.f32 %v3426_v44, %v3421_v28  ;;  %v9371_v21 = vadd.f32 %v3437_v41, %v3432_v55 }
0x1ced   :  { %v9369_v48 = vadd.f32 %v3436_v22, %v3431_v24 }
0x1cef   :  { %v3450_v8 = vrot.slane %v9369_v48, 1 }
0x1cf1   :  { %v3451_v37 = vsel %vm859_vm2, %v9371_v21, %v3450_v8  ;;  %v3578_v8 = vrot.slane %v9371_v21, 7 }
0x1cf2   :  { %3452 = vrot.lane.b32.xlu0 %v3451_v37, %s8463_s4 }
0x1d64   :  { %v3453_v61 = vpop.permute.xlu0 %3452 }
0x1d65   :  { %7015 = vmatmul.mubr.msk.f32.vlgmr.msra.gmra.mrb[30].mxu1 %vm374_vm1, %v3453_v61 }
0x1d66   :  { %7374 = vmatpush3.bf16.msra.mxu1 %v9269_v53  ;;  %7036 = vmatprep.mubr.msk.f32.mxu1 %vm8459_vm0, %v8458_v0 }
0x1d67   :  { %7375 = vmatprep.subr.bf16.mxu1 %v8460_v16 }
0x1d6a   :  { %7377 = vmatpush3.bf16.msra.mxu1 %v9273_v42 }
0x1d6b   :  { %7384 = vmatprep.subr.bf16.mxu1 %v8460_v16 }
0x1e38   :  { %v3522_v60 = vpop.f32.mrb[30].mxu1 }
0x1e39   :  { %v3523_v15 = vadd.f32 %v9291_v27, %v3522_v60  ;;  %v7016_v23 = vpop.f32.mrb[31].mxu1  ;;  %v3577_v60 = vrot.slane %v9369_v48, 7 }
0x1e3b   :  { %v3527_v33 = vrot.slane %v3523_v15, 6  ;;  %v3528_v52 = vrot.slane %v3523_v15, 7 }
0x1e3d   :  { %3547 = vrot.lane.b32.xlu0 %v3528_v52, %s8462_s20  ;;  %3545 = vrot.lane.b32.xlu1 %v3527_v33, %s8462_s20  ;;  %v3531_v38 = vadd.f32 %v3527_v33, %v9330_v32  ;;  %v3532_v51 = vadd.f32 %v3528_v52, %v9332_v29 }
0x1e3f   :  { %v6503_v49 = vmul.f32 -1.442695, %v3531_v38  ;;  %v6504_v50 = vmul.f32 -1.442695, %v3532_v51 }
0x1e41   :  { %7774 = vpow2.f32 %v6503_v49 }
0x1e42   :  { %7776 = vpow2.f32 %v6504_v50 }
0x1e4b   :  { %v7775_v43 = vpop.eup %7774 }
0x1e4c   :  { %v7777_v57 = vpop.eup %7776  ;;  %v3539_v25 = vadd.f32 1.0, %v7775_v43 }
0x1e4d   :  { %v3540_v10 = vadd.f32 1.0, %v7777_v57 }
0x1e4e   :  { %7778 = vrcp.f32 %v3539_v25 }
0x1e4f   :  { %7780 = vrcp.f32 %v3540_v10 }
0x1e58   :  { %v7779_v3 = vpop.eup %7778 }
0x1e59   :  { %v7781_v2 = vpop.eup %7780  ;;  %v3565_v61 = vsub.f32 1.0, %v7779_v3  ;;  %v3581_v52 = vmul.f32 %v7779_v3, %v3577_v60 }
0x1e5a   :  { %v3566_v41 = vsub.f32 1.0, %v7781_v2  ;;  %v3582_v15 = vmul.f32 %v7781_v2, %v3578_v8 }
0x1eaf   :  { %v3548_v26 = vpop.permute.xlu0 %3547  ;;  %v3546_v20 = vpop.permute.xlu1 %3545 }
0x1eb0   :  { %v3552_v13 = vmul.f32 %v7781_v2, %v3548_v26  ;;  %v3551_v56 = vmul.f32 %v7779_v3, %v3546_v20 }
0x1eb2   :  { %3557 = vrot.lane.b32.xlu0 %v3552_v13, %s8462_s20  ;;  %3555 = vrot.lane.b32.xlu1 %v3551_v56, %s8462_s20 }
0x1f24   :  { %v3558_v28 = vpop.permute.xlu0 %3557  ;;  %v3556_v19 = vpop.permute.xlu1 %3555 }
0x1f25   :  { %v3562_v44 = vadd.f32 %v3558_v28, %v9332_v29  ;;  %v3561_v55 = vadd.f32 %v3556_v19, %v9330_v32 }
0x1f27   :  { %7782 = vtanh.f32 %v3562_v44 }
0x1f28   :  { %7784 = vtanh.f32 %v3561_v55 }
0x1f31   :  { %v7783_v22 = vpop.eup %7782 }
0x1f32   :  { %v7785_v24 = vpop.eup %7784  ;;  %3571 = vrot.lane.b32.xlu0 %v7783_v22, %s8463_s4 }
0x1f33   :  { %3569 = vrot.lane.b32.xlu1 %v7785_v24, %s8463_s4 }
0x1fa4   :  { %v3572_v37 = vpop.permute.xlu0 %3571 }
0x1fa5   :  { %v3576_v23 = vmul.f32 %v3572_v37, %v3566_v41  ;;  %v3570_v33 = vpop.permute.xlu1 %3569 }
0x1fa6   :  { %v3575_v38 = vmul.f32 %v3570_v33, %v3565_v61 }
0x1fa7   :  { %v9397_v51 = vadd.f32 %v3582_v15, %v3576_v23 }
0x1fa8   :  { %v9399_v49 = vadd.f32 %v3581_v52, %v3575_v38 }
0x1fa9   :  { %v3596_v50 = vrot.slane %v9397_v51, 1 }
0x1faa   :  { %v3595_v43 = vrot.slane %v9399_v49, 2 }
0x1fac   :  { %v3597_v57 = vsel %vm859_vm2, %v3596_v50, %v3595_v43 }
0x1fad   :  { %3598 = vrot.lane.b32.xlu1 %v3597_v57, %s8463_s4 }
0x201f   :  { %v3599_v25 = vpop.permute.xlu1 %3598 }
0x2020   :  { %7026 = vmatmul.mubr.msk.f32.vlgmr.msra.gmra.mrb[30].mxu0 %vm374_vm1, %v3599_v25  ;;  %v3724_v25 = vrot.slane %v9397_v51, 7 }
0x2021   :  { %7380 = vmatpush3.bf16.msra.mxu0 %v9269_v53  ;;  %7047 = vmatprep.mubr.msk.f32.mxu0 %vm8459_vm0, %v8458_v0 }
0x2022   :  { %7381 = vmatprep.subr.bf16.mxu0 %v8460_v16 }
0x2025   :  { %7383 = vmatpush3.bf16.msra.mxu0 %v9273_v42 }
0x2026   :  { %7390 = vmatprep.subr.bf16.mxu0 %v8460_v16 }
0x20f3   :  { %v3668_v10 = vpop.f32.mrb[30].mxu0 }
0x20f4   :  { %v3669_v3 = vadd.f32 %v9291_v27, %v3668_v10  ;;  %v7027_v2 = vpop.f32.mrb[31].mxu0 }
0x20f5   :  { %v3723_v2 = vrot.slane %v9399_v49, 7 }
0x20f6   :  { %v3673_v26 = vrot.slane %v3669_v3, 5  ;;  %v3674_v20 = vrot.slane %v3669_v3, 6 }
0x20f8   :  { %3693 = vrot.lane.b32.xlu1 %v3674_v20, %s8462_s20  ;;  %3691 = vrot.lane.b32.xlu0 %v3673_v26, %s8462_s20  ;;  %v3677_v13 = vadd.f32 %v3673_v26, %v9330_v32  ;;  %v3678_v56 = vadd.f32 %v3674_v20, %v9332_v29 }
0x20fa   :  { %v6506_v28 = vmul.f32 -1.442695, %v3677_v13  ;;  %v6507_v19 = vmul.f32 -1.442695, %v3678_v56 }
0x20fc   :  { %7786 = vpow2.f32 %v6506_v28 }
0x20fd   :  { %7788 = vpow2.f32 %v6507_v19 }
0x2106   :  { %v7787_v44 = vpop.eup %7786 }
0x2107   :  { %v7789_v55 = vpop.eup %7788  ;;  %v3685_v22 = vadd.f32 1.0, %v7787_v44 }
0x2108   :  { %v3686_v24 = vadd.f32 1.0, %v7789_v55 }
0x2109   :  { %7790 = vrcp.f32 %v3685_v22 }
0x210a   :  { %7792 = vrcp.f32 %v3686_v24 }
0x2113   :  { %v7791_v41 = vpop.eup %7790 }
0x2114   :  { %v7793_v8 = vpop.eup %7792  ;;  %v3711_v3 = vsub.f32 1.0, %v7791_v41  ;;  %v3727_v56 = vmul.f32 %v7791_v41, %v3723_v2 }
0x2115   :  { %v3712_v57 = vsub.f32 1.0, %v7793_v8  ;;  %v3728_v26 = vmul.f32 %v7793_v8, %v3724_v25 }
0x216a   :  { %v3694_v37 = vpop.permute.xlu1 %3693  ;;  %v3692_v61 = vpop.permute.xlu0 %3691 }
0x216b   :  { %v3698_v60 = vmul.f32 %v7793_v8, %v3694_v37  ;;  %v3697_v15 = vmul.f32 %v7791_v41, %v3692_v61 }
0x216d   :  { %3703 = vrot.lane.b32.xlu1 %v3698_v60, %s8462_s20  ;;  %3701 = vrot.lane.b32.xlu0 %v3697_v15, %s8462_s20 }
0x21df   :  { %v3704_v23 = vpop.permute.xlu1 %3703  ;;  %v3702_v33 = vpop.permute.xlu0 %3701 }
0x21e0   :  { %v3708_v52 = vadd.f32 %v3704_v23, %v9332_v29  ;;  %v3707_v38 = vadd.f32 %v3702_v33, %v9330_v32 }
0x21e2   :  { %7794 = vtanh.f32 %v3708_v52 }
0x21e3   :  { %7796 = vtanh.f32 %v3707_v38 }
0x21ec   :  { %v7795_v50 = vpop.eup %7794 }
0x21ed   :  { %v7797_v43 = vpop.eup %7796  ;;  %3717 = vrot.lane.b32.xlu1 %v7795_v50, %s8463_s4 }
0x21ee   :  { %3715 = vrot.lane.b32.xlu0 %v7797_v43, %s8463_s4 }
0x225f   :  { %v3718_v10 = vpop.permute.xlu1 %3717 }
0x2260   :  { %v3722_v20 = vmul.f32 %v3718_v10, %v3712_v57  ;;  %v3716_v13 = vpop.permute.xlu0 %3715 }
0x2261   :  { %v3721_v28 = vmul.f32 %v3716_v13, %v3711_v3 }
0x2262   :  { %v9425_v19 = vadd.f32 %v3728_v26, %v3722_v20 }
0x2263   :  { %v9427_v44 = vadd.f32 %v3727_v56, %v3721_v28 }
0x2264   :  { %v3742_v55 = vrot.slane %v9425_v19, 2 }
0x2265   :  { %v3741_v22 = vrot.slane %v9427_v44, 3 }
0x2267   :  { %v3743_v24 = vsel %vm859_vm2, %v3742_v55, %v3741_v22 }
0x2268   :  { %3744 = vrot.lane.b32.xlu0 %v3743_v24, %s8463_s4 }
0x22da   :  { %v3745_v37 = vpop.permute.xlu0 %3744 }
0x22db   :  { %7037 = vmatmul.mubr.msk.f32.vlgmr.msra.gmra.mrb[32].mxu1 %vm374_vm1, %v3745_v37 }
0x22dc   :  { %7386 = vmatpush3.bf16.msra.mxu1 %v9269_v53  ;;  %7058 = vmatprep.mubr.msk.f32.mxu1 %vm8459_vm0, %v8458_v0 }
0x22dd   :  { %7387 = vmatprep.subr.bf16.mxu1 %v8460_v16 }
0x22e0   :  { %7389 = vmatpush3.bf16.msra.mxu1 %v9273_v42 }
0x22e1   :  { %7072 = vmatprep.subr.bf16.mxu1 %v8458_v0 }
0x23ae   :  { %v3814_v41 = vpop.f32.mrb[32].mxu1 }
0x23af   :  { %v3815_v8 = vadd.f32 %v9291_v27, %v3814_v41  ;;  %v7038_v61 = vpop.f32.mrb[33].mxu1 }
0x23b1   :  { %v3819_v60 = vrot.slane %v3815_v8, 4  ;;  %v3820_v15 = vrot.slane %v3815_v8, 5  ;;  %v3870_v8 = vrot.slane %v9425_v19, 7 }
0x23b3   :  { %3839 = vrot.lane.b32.xlu0 %v3820_v15, %s8462_s20  ;;  %3837 = vrot.lane.b32.xlu1 %v3819_v60, %s8462_s20  ;;  %v3823_v23 = vadd.f32 %v3819_v60, %v9330_v32  ;;  %v3824_v33 = vadd.f32 %v3820_v15, %v9332_v29  ;;  %v3869_v15 = vrot.slane %v9427_v44, 7 }
0x23b5   :  { %v6509_v52 = vmul.f32 -1.442695, %v3823_v23  ;;  %v6510_v38 = vmul.f32 -1.442695, %v3824_v33 }
0x23b7   :  { %7798 = vpow2.f32 %v6509_v52 }
0x23b8   :  { %7800 = vpow2.f32 %v6510_v38 }
0x23c1   :  { %v7799_v50 = vpop.eup %7798 }
0x23c2   :  { %v7801_v43 = vpop.eup %7800  ;;  %v3831_v57 = vadd.f32 1.0, %v7799_v50 }
0x23c3   :  { %v3832_v25 = vadd.f32 1.0, %v7801_v43 }
0x23c4   :  { %7802 = vrcp.f32 %v3831_v57 }
0x23c5   :  { %7804 = vrcp.f32 %v3832_v25 }
0x23ce   :  { %v7803_v10 = vpop.eup %7802 }
0x23cf   :  { %v7805_v3 = vpop.eup %7804  ;;  %v3857_v60 = vsub.f32 1.0, %v7803_v10  ;;  %v3873_v38 = vmul.f32 %v7803_v10, %v3869_v15 }
0x23d0   :  { %v3858_v41 = vsub.f32 1.0, %v7805_v3  ;;  %v3874_v23 = vmul.f32 %v7805_v3, %v3870_v8 }
0x2425   :  { %v3840_v2 = vpop.permute.xlu0 %3839  ;;  %v3838_v26 = vpop.permute.xlu1 %3837 }
0x2426   :  { %v3844_v20 = vmul.f32 %v7805_v3, %v3840_v2  ;;  %v3843_v13 = vmul.f32 %v7803_v10, %v3838_v26 }
0x2428   :  { %3849 = vrot.lane.b32.xlu0 %v3844_v20, %s8462_s20  ;;  %3847 = vrot.lane.b32.xlu1 %v3843_v13, %s8462_s20 }
0x249a   :  { %v3850_v56 = vpop.permute.xlu0 %3849  ;;  %v3848_v28 = vpop.permute.xlu1 %3847 }
0x249b   :  { %v3854_v55 = vadd.f32 %v3850_v56, %v9332_v29  ;;  %v3853_v22 = vadd.f32 %v3848_v28, %v9330_v32 }
0x249d   :  { %7806 = vtanh.f32 %v3854_v55 }
0x249e   :  { %7808 = vtanh.f32 %v3853_v22 }
0x24a7   :  { %v7807_v24 = vpop.eup %7806 }
0x24a8   :  { %v7809_v37 = vpop.eup %7808  ;;  %3863 = vrot.lane.b32.xlu0 %v7807_v24, %s8463_s4 }
0x24a9   :  { %3861 = vrot.lane.b32.xlu1 %v7809_v37, %s8463_s4 }
0x251a   :  { %v3864_v61 = vpop.permute.xlu0 %3863 }
0x251b   :  { %v3868_v33 = vmul.f32 %v3864_v61, %v3858_v41  ;;  %v3862_v52 = vpop.permute.xlu1 %3861 }
0x251c   :  { %v3867_v50 = vmul.f32 %v3862_v52, %v3857_v60 }
0x251d   :  { %v9453_v43 = vadd.f32 %v3874_v23, %v3868_v33 }
0x251e   :  { %v9455_v57 = vadd.f32 %v3873_v38, %v3867_v50 }
0x251f   :  { %v3888_v25 = vrot.slane %v9453_v43, 3 }
0x2520   :  { %v3887_v2 = vrot.slane %v9455_v57, 4 }
0x2522   :  { %v3889_v26 = vsel %vm859_vm2, %v3888_v25, %v3887_v2 }
0x2523   :  { %3890 = vrot.lane.b32.xlu1 %v3889_v26, %s8463_s4 }
0x2595   :  { %v3891_v20 = vpop.permute.xlu1 %3890 }
0x2596   :  { %7048 = vmatmul.mubr.msk.f32.vlgmr.msra.gmra.mrb[32].mxu0 %vm374_vm1, %v3891_v20 }
0x2597   :  { %7392 = vmatpush3.bf16.msra.mxu0 %v9269_v53  ;;  %7069 = vmatprep.mubr.msk.f32.mxu0 %vm8459_vm0, %v8458_v0 }
0x2598   :  { %7393 = vmatprep.subr.bf16.mxu0 %v8460_v16 }
0x259b   :  { %7395 = vmatpush3.bf16.msra.mxu0 %v9273_v42 }
0x259c   :  { %7080 = vmatprep.subr.bf16.mxu0 %v8458_v0 }
0x2669   :  { %v3960_v10 = vpop.f32.mrb[32].mxu0 }
0x266a   :  { %v3961_v3 = vadd.f32 %v9291_v27, %v3960_v10  ;;  %v7049_v13 = vpop.f32.mrb[33].mxu0 }
0x266c   :  { %v3965_v56 = vrot.slane %v3961_v3, 3  ;;  %v3966_v28 = vrot.slane %v3961_v3, 4  ;;  %v4016_v3 = vrot.slane %v9453_v43, 7 }
0x266e   :  { %3985 = vrot.lane.b32.xlu1 %v3966_v28, %s8462_s20  ;;  %3983 = vrot.lane.b32.xlu0 %v3965_v56, %s8462_s20  ;;  %v3969_v53 = vadd.f32 %v3965_v56, %v9330_v32  ;;  %v3970_v55 = vadd.f32 %v3966_v28, %v9332_v29  ;;  %v4015_v28 = vrot.slane %v9455_v57, 7 }
0x2670   :  { %v6512_v22 = vmul.f32 -1.442695, %v3969_v53  ;;  %v6513_v24 = vmul.f32 -1.442695, %v3970_v55 }
0x2672   :  { %7810 = vpow2.f32 %v6512_v22 }
0x2673   :  { %7812 = vpow2.f32 %v6513_v24 }
0x267c   :  { %v7811_v42 = vpop.eup %7810 }
0x267d   :  { %v7813_v37 = vpop.eup %7812  ;;  %v3977_v41 = vadd.f32 1.0, %v7811_v42 }
0x267e   :  { %v3978_v8 = vadd.f32 1.0, %v7813_v37 }
0x267f   :  { %7814 = vrcp.f32 %v3977_v41 }
0x2680   :  { %7816 = vrcp.f32 %v3978_v8 }
0x2689   :  { %v7815_v61 = vpop.eup %7814 }
0x268a   :  { %v7817_v60 = vpop.eup %7816  ;;  %v4003_v56 = vsub.f32 1.0, %v7815_v61  ;;  %v4019_v24 = vmul.f32 %v7815_v61, %v4015_v28 }
0x268b   :  { %v4004_v10 = vsub.f32 1.0, %v7817_v60  ;;  %v4020_v53 = vmul.f32 %v7817_v60, %v4016_v3 }
0x26e0   :  { %v3986_v15 = vpop.permute.xlu1 %3985  ;;  %v3984_v23 = vpop.permute.xlu0 %3983 }
0x26e1   :  { %v3990_v33 = vmul.f32 %v7817_v60, %v3986_v15  ;;  %v3989_v52 = vmul.f32 %v7815_v61, %v3984_v23 }
0x26e3   :  { %3995 = vrot.lane.b32.xlu1 %v3990_v33, %s8462_s20  ;;  %3993 = vrot.lane.b32.xlu0 %v3989_v52, %s8462_s20 }
0x2755   :  { %v3996_v38 = vpop.permute.xlu1 %3995  ;;  %v3994_v50 = vpop.permute.xlu0 %3993 }
0x2756   :  { %v4000_v25 = vadd.f32 %v3996_v38, %v9332_v29  ;;  %v3999_v2 = vadd.f32 %v3994_v50, %v9330_v32 }
0x2758   :  { %7818 = vtanh.f32 %v4000_v25 }
0x2759   :  { %7820 = vtanh.f32 %v3999_v2 }
0x2762   :  { %v7819_v26 = vpop.eup %7818 }
0x2763   :  { %v7821_v20 = vpop.eup %7820  ;;  %4009 = vrot.lane.b32.xlu1 %v7819_v26, %s8463_s4 }
0x2764   :  { %4007 = vrot.lane.b32.xlu0 %v7821_v20, %s8463_s4 }
0x27d5   :  { %v4010_v13 = vpop.permute.xlu1 %4009 }
0x27d6   :  { %v4014_v55 = vmul.f32 %v4010_v13, %v4004_v10  ;;  %v4008_v22 = vpop.permute.xlu0 %4007 }
0x27d7   :  { %v4013_v42 = vmul.f32 %v4008_v22, %v4003_v56 }
0x27d8   :  { %v9481_v37 = vadd.f32 %v4020_v53, %v4014_v55 }
0x27d9   :  { %v9483_v41 = vadd.f32 %v4019_v24, %v4013_v42 }
0x27da   :  { %v4034_v8 = vrot.slane %v9481_v37, 4 }
0x27db   :  { %v4033_v15 = vrot.slane %v9483_v41, 5 }
0x27dd   :  { %v4035_v23 = vsel %vm859_vm2, %v4034_v8, %v4033_v15 }
0x27de   :  { %4036 = vrot.lane.b32.xlu0 %v4035_v23, %s8463_s4 }
0x2850   :  { %v4037_v33 = vpop.permute.xlu0 %4036 }
0x2851   :  { %7059 = vmatmul.mubr.msk.f32.vlgmr.msra.gmra.mrb[34].mxu1 %vm374_vm1, %v4037_v33 }
0x2852   :  { %7076 = vmatprep.mubr.msk.bf16.mxu1 %vm8459_vm0, %v8458_v0 }
0x2924   :  { %v4106_v61 = vpop.f32.mrb[34].mxu1 }
0x2925   :  { %v4107_v60 = vadd.f32 %v9291_v27, %v4106_v61  ;;  %v7060_v52 = vpop.f32.mrb[35].mxu1 }
0x2927   :  { %v4111_v38 = vrot.slane %v4107_v60, 2  ;;  %v4112_v50 = vrot.slane %v4107_v60, 3 }
0x2929   :  { %4131 = vrot.lane.b32.xlu0 %v4112_v50, %s8462_s20  ;;  %4129 = vrot.lane.b32.xlu1 %v4111_v38, %s8462_s20  ;;  %v4115_v25 = vadd.f32 %v4111_v38, %v9330_v32  ;;  %v4116_v2 = vadd.f32 %v4112_v50, %v9332_v29  ;;  %v4162_v38 = vrot.slane %v9481_v37, 7 }
0x292b   :  { %v6515_v26 = vmul.f32 -1.442695, %v4115_v25  ;;  %v6516_v20 = vmul.f32 -1.442695, %v4116_v2  ;;  %v4161_v2 = vrot.slane %v9483_v41, 7 }
0x292d   :  { %7822 = vpow2.f32 %v6515_v26 }
0x292e   :  { %7824 = vpow2.f32 %v6516_v20 }
0x2937   :  { %v7823_v10 = vpop.eup %7822 }
0x2938   :  { %v7825_v3 = vpop.eup %7824  ;;  %v4123_v13 = vadd.f32 1.0, %v7823_v10 }
0x2939   :  { %v4124_v56 = vadd.f32 1.0, %v7825_v3 }
0x293a   :  { %7826 = vrcp.f32 %v4123_v13 }
0x293b   :  { %7828 = vrcp.f32 %v4124_v56 }
0x2944   :  { %v7827_v28 = vpop.eup %7826 }
0x2945   :  { %v7829_v53 = vpop.eup %7828  ;;  %v4149_v25 = vsub.f32 1.0, %v7827_v28  ;;  %v4165_v3 = vmul.f32 %v7827_v28, %v4161_v2 }
0x2946   :  { %v4150_v52 = vsub.f32 1.0, %v7829_v53  ;;  %v4166_v26 = vmul.f32 %v7829_v53, %v4162_v38 }
0x299b   :  { %v4132_v55 = vpop.permute.xlu0 %4131  ;;  %v4130_v22 = vpop.permute.xlu1 %4129 }
0x299c   :  { %v4136_v24 = vmul.f32 %v7829_v53, %v4132_v55  ;;  %v4135_v42 = vmul.f32 %v7827_v28, %v4130_v22 }
0x299e   :  { %4141 = vrot.lane.b32.xlu0 %v4136_v24, %s8462_s20  ;;  %4139 = vrot.lane.b32.xlu1 %v4135_v42, %s8462_s20 }
0x2a10   :  { %v4142_v8 = vpop.permute.xlu0 %4141  ;;  %v4140_v15 = vpop.permute.xlu1 %4139 }
0x2a11   :  { %v4146_v23 = vadd.f32 %v4142_v8, %v9332_v29  ;;  %v4145_v33 = vadd.f32 %v4140_v15, %v9330_v32 }
0x2a13   :  { %7830 = vtanh.f32 %v4146_v23 }
0x2a14   :  { %7832 = vtanh.f32 %v4145_v33 }
0x2a1d   :  { %v7831_v61 = vpop.eup %7830 }
0x2a1e   :  { %v7833_v60 = vpop.eup %7832  ;;  %4155 = vrot.lane.b32.xlu0 %v7831_v61, %s8463_s4 }
0x2a1f   :  { %4153 = vrot.lane.b32.xlu1 %v7833_v60, %s8463_s4 }
0x2a90   :  { %v4156_v50 = vpop.permute.xlu0 %4155 }
0x2a91   :  { %v4160_v20 = vmul.f32 %v4156_v50, %v4150_v52  ;;  %v4154_v10 = vpop.permute.xlu1 %4153 }
0x2a92   :  { %v4159_v13 = vmul.f32 %v4154_v10, %v4149_v25 }
0x2a93   :  { %v9505_v56 = vadd.f32 %v4166_v26, %v4160_v20 }
0x2a94   :  { %v9507_v55 = vadd.f32 %v4165_v3, %v4159_v13 }
0x2a95   :  { %v4180_v22 = vrot.slane %v9505_v56, 5 }
0x2a96   :  { %v4179_v24 = vrot.slane %v9507_v55, 6 }
0x2a98   :  { %v4181_v42 = vsel %vm859_vm2, %v4180_v22, %v4179_v24 }
0x2a99   :  { %4182 = vrot.lane.b32.xlu1 %v4181_v42, %s8463_s4 }
0x2b0b   :  { %v4183_v8 = vpop.permute.xlu1 %4182 }
0x2b0c   :  { %7070 = vmatmul.mubr.msk.f32.vlgmr.msra.gmra.mrb[34].mxu0 %vm374_vm1, %v4183_v8 }
0x2b0d   :  { %7082 = vmatprep.mubr.msk.bf16.mxu0 %vm8459_vm0, %v8458_v0 }
0x2bdf   :  { %v4252_v28 = vpop.f32.mrb[34].mxu0 }
0x2be0   :  { %v4253_v53 = vadd.f32 %v9291_v27, %v4252_v28  ;;  %v7071_v15 = vpop.f32.mrb[35].mxu0 }
0x2be2   :  { %v4257_v23 = vrot.slane %v4253_v53, 1  ;;  %v4258_v33 = vrot.slane %v4253_v53, 2  ;;  %v7984_v53 = vld [vmem:[#allocation13] ss:$0 sm:$0xff] }
0x2be3   :  { %v9526_v15 = vadd.f32 %v7984_v53, %v9328_v54  ;;  %v4327_v54 = vld [vmem:[%s10216_s28] sm:$0xff] }
0x2be4   :  { %4277 = vrot.lane.b32.xlu1 %v4258_v33, %s8462_s20  ;;  %4275 = vrot.lane.b32.xlu0 %v4257_v23, %s8462_s20  ;;  %v4261_v61 = vadd.f32 %v4257_v23, %v9330_v32  ;;  %v4262_v60 = vadd.f32 %v4258_v33, %v9332_v29 }
0x2be6   :  { %v6518_v52 = vmul.f32 -1.442695, %v4261_v61  ;;  %v6519_v38 = vmul.f32 -1.442695, %v4262_v60  ;;  %v2884_v61 = vrot.slane %v9526_v15, 1 }
0x2be8   :  { %7834 = vpow2.f32 %v6518_v52  ;;  %v7985_v52 = vld [vmem:[#allocation11] ss:$0 sm:$0xff] }
0x2be9   :  { %7836 = vpow2.f32 %v6519_v38  ;;  %v2745_v38 = vadd.f32 %v7985_v52, %v9257_v14 }
0x2bf2   :  { %v7835_v50 = vpop.eup %7834 }
0x2bf3   :  { %v7837_v25 = vpop.eup %7836  ;;  %v4269_v2 = vadd.f32 1.0, %v7835_v50 }
0x2bf4   :  { %v4270_v26 = vadd.f32 1.0, %v7837_v25 }
0x2bf5   :  { %7838 = vrcp.f32 %v4269_v2 }
0x2bf6   :  { %7840 = vrcp.f32 %v4270_v26  ;;  %v2749_v26 = vrot.slane %v2745_v38, 1 }
0x2bff   :  { %v7839_v27 = vpop.eup %7838 }
0x2c00   :  { %v7841_v20 = vpop.eup %7840 }
0x2c56   :  { %v4278_v10 = vpop.permute.xlu1 %4277  ;;  %v4276_v3 = vpop.permute.xlu0 %4275 }
0x2c57   :  { %v4282_v13 = vmul.f32 %v7841_v20, %v4278_v10  ;;  %v4281_v22 = vmul.f32 %v7839_v27, %v4276_v3 }
0x2c59   :  { %4287 = vrot.lane.b32.xlu1 %v4282_v13, %s8462_s20  ;;  %4285 = vrot.lane.b32.xlu0 %v4281_v22, %s8462_s20 }
0x2ccb   :  { %v4288_v24 = vpop.permute.xlu1 %4287  ;;  %v4286_v42 = vpop.permute.xlu0 %4285 }
0x2ccc   :  { %v4292_v8 = vadd.f32 %v4288_v24, %v9332_v29  ;;  %v4291_v28 = vadd.f32 %v4286_v42, %v9330_v32  ;;  %v4328_v32 = vld [vmem:[%s10216_s28 + $0x8] sm:$0xff] }
0x2ccd   :  { %v4332_v29 = vpack.c.bf16 %v4328_v32, %v4327_v54 }
0x2cce   :  { %7842 = vtanh.f32 %v4292_v8 }
0x2ccf   :  { %7844 = vtanh.f32 %v4291_v28  ;;  %7073 = vmatpush3.bf16.msra.mxu1 %v4332_v29 }
0x2cd0   :  { %7074 = vmatprep.subr.bf16.mxu1 %v8458_v0 }
0x2cd8   :  { %v7843_v23 = vpop.eup %7842 }
0x2cd9   :  { %v7845_v33 = vpop.eup %7844  ;;  %4301 = vrot.lane.b32.xlu1 %v7843_v23, %s8463_s4 }
0x2cda   :  { %4299 = vrot.lane.b32.xlu0 %v7845_v33, %s8463_s4 }
0x2cdd   :  { %2887 = vrot.lane.b32.xlu1 %v2884_v61, %s8463_s4 }
0x2cde   :  { %2885 = vrot.lane.b32.xlu0 %v9526_v15, %s8463_s4 }
0x2ce1   :  { %3301 = vrot.lane.b32.xlu1 %v9342_v6, %s8463_s4  ;;  %v4296_v6 = vsub.f32 1.0, %v7841_v20 }
0x2ce2   :  { %3299 = vrot.lane.b32.xlu0 %v9344_v7, %s8463_s4  ;;  %v4308_v7 = vrot.slane %v9505_v56, 7 }
0x2ce5   :  { %3444 = vrot.lane.b32.xlu1 %v9371_v21, %s8463_s4  ;;  %v4330_v21 = vld [vmem:[%s10216_s28 + $0x18] sm:$0xff] }
0x2ce6   :  { %3442 = vrot.lane.b32.xlu0 %v9369_v48, %s8463_s4  ;;  %v4329_v48 = vld [vmem:[%s10216_s28 + $0x10] sm:$0xff] }
0x2ce9   :  { %3589 = vrot.lane.b32.xlu1 %v9397_v51, %s8463_s4 }
0x2cea   :  { %3587 = vrot.lane.b32.xlu0 %v9399_v49, %s8463_s4  ;;  %v4295_v49 = vsub.f32 1.0, %v7839_v27 }
0x2ced   :  { %3735 = vrot.lane.b32.xlu1 %v9425_v19, %s8463_s4  ;;  %v4307_v19 = vrot.slane %v9507_v55, 7 }
0x2cee   :  { %3733 = vrot.lane.b32.xlu0 %v9427_v44, %s8463_s4  ;;  %v4333_v44 = vpack.c.bf16 %v4330_v21, %v4329_v48 }
0x2cf0   :  { %7075 = vmatpush3.bf16.msra.mxu1 %v4333_v44 }
0x2cf1   :  { %3881 = vrot.lane.b32.xlu1 %v9453_v43, %s8463_s4  ;;  %v4312_v43 = vmul.f32 %v7841_v20, %v4308_v7  ;;  %7086 = vmatprep.subr.bf16.mxu1 %v8458_v0 }
0x2cf2   :  { %3879 = vrot.lane.b32.xlu0 %v9455_v57, %s8463_s4 }
0x2cf5   :  { %4027 = vrot.lane.b32.xlu1 %v9481_v37, %s8463_s4 }
0x2cf6   :  { %4025 = vrot.lane.b32.xlu0 %v9483_v41, %s8463_s4  ;;  %v4311_v41 = vmul.f32 %v7839_v27, %v4307_v19 }
0x2cf9   :  { %4173 = vrot.lane.b32.xlu1 %v9505_v56, %s8463_s4 }
0x2cfa   :  { %4171 = vrot.lane.b32.xlu0 %v9507_v55, %s8463_s4  ;;  %v2750_v55 = vrot.slane %v2745_v38, 2 }
0x2cfc   :  { %v2754_v33 = vadd.f32 %v2750_v55, %v8806_v9 }
0x2cfe   :  { %v6484_v54 = vmul.f32 -1.442695, %v2754_v33 }
0x2d00   :  { %7846 = vpow2.f32 %v6484_v54 }
0x2d0a   :  { %v7847_v21 = vpop.eup %7846 }
0x2d4b   :  { %v4302_v51 = vpop.permute.xlu1 %4301 }
0x2d4c   :  { %v4306_v57 = vmul.f32 %v4302_v51, %v4296_v6  ;;  %v4300_v37 = vpop.permute.xlu0 %4299 }
0x2d4d   :  { %v4305_v60 = vmul.f32 %v4300_v37, %v4295_v49  ;;  %v2762_v49 = vadd.f32 1.0, %v7847_v21 }
0x2d4e   :  { %v4314_v50 = vadd.f32 %v4312_v43, %v4306_v57 }
0x2d4f   :  { %v4313_v56 = vadd.f32 %v4311_v41, %v4305_v60  ;;  %v9571_v25 = vpop.permute.xlu1 %2887 }
0x2d50   :  { %v9573_v2 = vpop.permute.xlu0 %2885  ;;  %4319 = vrot.lane.b32.xlu1 %v4314_v50, %s8463_s4  ;;  %v2892_v32 = vadd.f32 %v9571_v25, %v8806_v9 }
0x2d51   :  { %4317 = vrot.lane.b32.xlu0 %v4313_v56, %s8463_s4  ;;  %v2891_v6 = vadd.f32 %v9573_v2, %v8800_v5 }
0x2d52   :  { %v6487_v7 = vmul.f32 -1.442695, %v2892_v32 }
0x2d53   :  { %v3302_v27 = vpop.permute.xlu1 %3301  ;;  %v6486_v48 = vmul.f32 -1.442695, %v2891_v6 }
0x2d54   :  { %3306 = vst.msk [vmem:[#allocation4 + $0x8] sm:$0x1] %vm852_vm11, %v3302_v27  ;;  %v3300_v20 = vpop.permute.xlu0 %3299  ;;  %2769 = vrot.lane.b32.xlu1 %v2750_v55, %s8462_s20 }
0x2d55   :  { %3305 = vst.msk [vmem:[#allocation4] sm:$0x1] %vm852_vm11, %v3300_v20  ;;  %2767 = vrot.lane.b32.xlu0 %v2749_v26, %s8462_s20 }
0x2d57   :  { %v3445_v14 = vpop.permute.xlu1 %3444 }
0x2d58   :  { %3449 = vst.msk [vmem:[#allocation4 + $0x8] sm:$0x2] %vm1154_vm10, %v3445_v14  ;;  %v3443_v10 = vpop.permute.xlu0 %3442  ;;  %2921 = vrot.lane.b32.xlu1 %v2884_v61, %s8464_s25  ;;  %v2753_v61 = vadd.f32 %v2749_v26, %v8800_v5 }
0x2d59   :  { %3448 = vst.msk [vmem:[#allocation4] sm:$0x2] %vm1154_vm10, %v3443_v10  ;;  %2919 = vrot.lane.b32.xlu0 %v9526_v15, %s8464_s25 }
0x2d5a   :  { %v6483_v29 = vmul.f32 -1.442695, %v2753_v61 }
0x2d5b   :  { %v3590_v3 = vpop.permute.xlu1 %3589 }
0x2d5c   :  { %3594 = vst.msk [vmem:[#allocation4 + $0x8] sm:$0x4] %vm1457_vm8, %v3590_v3  ;;  %v3588_v13 = vpop.permute.xlu0 %3587  ;;  %7848 = vpow2.f32 %v6483_v29 }
0x2d5d   :  { %3593 = vst.msk [vmem:[#allocation4] sm:$0x4] %vm1457_vm8, %v3588_v13  ;;  %7850 = vpow2.f32 %v6487_v7  ;;  %v2799_v7 = vrot.slane %v9207_v1, 7 }
0x2d5e   :  { %7852 = vpow2.f32 %v6486_v48 }
0x2d5f   :  { %v3736_v22 = vpop.permute.xlu1 %3735  ;;  %7854 = vrcp.f32 %v2762_v49 }
0x2d60   :  { %3740 = vst.msk [vmem:[#allocation4 + $0x8] sm:$0x8] %vm1761_vm7, %v3736_v22  ;;  %v3734_v24 = vpop.permute.xlu0 %3733 }
0x2d61   :  { %3739 = vst.msk [vmem:[#allocation4] sm:$0x8] %vm1761_vm7, %v3734_v24 }
0x2d63   :  { %v3882_v42 = vpop.permute.xlu1 %3881 }
0x2d64   :  { %3886 = vst.msk [vmem:[#allocation4 + $0x8] sm:$0x10] %vm1764_vm6, %v3882_v42  ;;  %v3880_v8 = vpop.permute.xlu0 %3879 }
0x2d65   :  { %3885 = vst.msk [vmem:[#allocation4] sm:$0x10] %vm1764_vm6, %v3880_v8 }
0x2d66   :  { %v7849_v51 = vpop.eup %7848 }
0x2d67   :  { %v4028_v28 = vpop.permute.xlu1 %4027  ;;  %v7851_v19 = vpop.eup %7850  ;;  %v2761_v44 = vadd.f32 1.0, %v7849_v51 }
0x2d68   :  { %4032 = vst.msk [vmem:[#allocation4 + $0x8] sm:$0x20] %vm1460_vm5, %v4028_v28  ;;  %v4026_v53 = vpop.permute.xlu0 %4025  ;;  %v7853_v43 = vpop.eup %7852  ;;  %v2900_v57 = vadd.f32 1.0, %v7851_v19 }
0x2d69   :  { %4031 = vst.msk [vmem:[#allocation4] sm:$0x20] %vm1460_vm5, %v4026_v53  ;;  %7856 = vrcp.f32 %v2761_v44  ;;  %v2899_v37 = vadd.f32 1.0, %v7853_v43  ;;  %v9604_v52 = vpop.eup %7854 }
0x2d6a   :  { %7858 = vrcp.f32 %v2900_v57 }
0x2d6b   :  { %v4174_v15 = vpop.permute.xlu1 %4173  ;;  %7860 = vrcp.f32 %v2899_v37  ;;  %v2951_v37 = vrot.slane %v9299_v63, 1 }
0x2d6c   :  { %4178 = vst.msk [vmem:[#allocation4 + $0x8] sm:$0x40] %vm1157_vm4, %v4174_v15  ;;  %v4172_v23 = vpop.permute.xlu0 %4171 }
0x2d6d   :  { %4177 = vst.msk [vmem:[#allocation4] sm:$0x40] %vm1157_vm4, %v4172_v23 }
0x2d73   :  { %v9606_v50 = vpop.eup %7856 }
0x2d74   :  { %v7859_v27 = vpop.eup %7858  ;;  %v2803_v19 = vmul.f32 %v9606_v50, %v2799_v7 }
0x2d75   :  { %v7861_v10 = vpop.eup %7860 }
0x2dc2   :  { %v4320_v41 = vpop.permute.xlu1 %4319 }
0x2dc3   :  { %4324 = vst.msk [vmem:[#allocation4 + $0x8] sm:$0x80] %vm855_vm3, %v4320_v41  ;;  %v4318_v60 = vpop.permute.xlu0 %4317 }
0x2dc4   :  { %4323 = vst.msk [vmem:[#allocation4] sm:$0x80] %vm855_vm3, %v4318_v60 }
0x2dc6   :  { %v2770_v38 = vpop.permute.xlu1 %2769 }
0x2dc7   :  { %v2774_v56 = vmul.f32 %v9604_v52, %v2770_v38  ;;  %v2768_v55 = vpop.permute.xlu0 %2767 }
0x2dc8   :  { %v2773_v26 = vmul.f32 %v9606_v50, %v2768_v55 }
0x2dc9   :  { %2779 = vrot.lane.b32.xlu1 %v2774_v56, %s8462_s20 }
0x2dca   :  { %2777 = vrot.lane.b32.xlu0 %v2773_v26, %s8462_s20  ;;  %v2922_v20 = vpop.permute.xlu1 %2921  ;;  %v9612_v14 = vld [vmem:[#allocation4 + $0x8] sm:$0xff] }
0x2dcb   :  { %v2926_v3 = vmul.f32 %v7859_v27, %v2922_v20  ;;  %v2920_v13 = vpop.permute.xlu0 %2919  ;;  %v9614_v22 = vld [vmem:[#allocation4] sm:$0xff] }
0x2dcc   :  { %v2925_v24 = vmul.f32 %v7861_v10, %v2920_v13  ;;  %v4331_v42 = vpack.c.bf16 %v9612_v14, %v9614_v22 }
0x2dcd   :  { %2931 = vrot.lane.b32.xlu1 %v2926_v3, %s8462_s20 }
0x2dce   :  { %7077 = vmatmul.mubr.msk.bf16.vlgmr.msra.gmra.mrb[36].mxu1 %vm374_vm1, %v4331_v42  ;;  %2929 = vrot.lane.b32.xlu0 %v2925_v24, %s8462_s20 }
0x2dcf   :  { %7088 = vmatprep.mubr.msk.bf16.mxu1 %vm8459_vm0, %v8458_v0 }
0x2e3b   :  { %v2780_v8 = vpop.permute.xlu1 %2779 }
0x2e3c   :  { %v2784_v28 = vadd.f32 %v2780_v8, %v8806_v9  ;;  %v2778_v53 = vpop.permute.xlu0 %2777 }
0x2e3d   :  { %v2783_v15 = vadd.f32 %v2778_v53, %v8800_v5  ;;  %v2906_v5 = vadd.f32 %v9571_v25, %v8810_v12 }
0x2e3e   :  { %7862 = vtanh.f32 %v2784_v28 }
0x2e3f   :  { %7864 = vtanh.f32 %v2783_v15  ;;  %v2932_v23 = vpop.permute.xlu1 %2931 }
0x2e40   :  { %v2936_v33 = vadd.f32 %v2932_v23, %v8810_v12  ;;  %v2930_v61 = vpop.permute.xlu0 %2929  ;;  %v2788_v12 = vsub.f32 1.0, %v9604_v52 }
0x2e41   :  { %v2935_v54 = vadd.f32 %v2930_v61, %v8897_v4 }
0x2e42   :  { %7866 = vtanh.f32 %v2936_v33 }
0x2e43   :  { %7868 = vtanh.f32 %v2935_v54 }
0x2e48   :  { %v7863_v32 = vpop.eup %7862 }
0x2e49   :  { %v7865_v29 = vpop.eup %7864  ;;  %2793 = vrot.lane.b32.xlu1 %v7863_v32, %s8463_s4 }
0x2e4a   :  { %2791 = vrot.lane.b32.xlu0 %v7865_v29, %s8463_s4 }
0x2e4c   :  { %v7867_v9 = vpop.eup %7866 }
0x2e4d   :  { %v7869_v6 = vpop.eup %7868  ;;  %2945 = vrot.lane.b32.xlu1 %v7867_v9, %s8463_s4 }
0x2e4e   :  { %2943 = vrot.lane.b32.xlu0 %v7869_v6, %s8463_s4 }
0x2e51   :  { %848 = vrot.lane.b32.xlu1 %v8819_v39, %s8463_s4  ;;  %v2905_v39 = vadd.f32 %v9573_v2, %v8897_v4  ;;  %v2800_v4 = vrot.slane %v9205_v47, 7  ;;  %v2787_v2 = vsub.f32 1.0, %v9606_v50 }
0x2e52   :  { %846 = vrot.lane.b32.xlu0 %v8822_v45, %s8463_s4  ;;  %v6489_v45 = vmul.f32 -1.442695, %v2906_v5 }
0x2e53   :  { %v2804_v21 = vmul.f32 %v9604_v52, %v2800_v4 }
0x2e54   :  { %7870 = vpow2.f32 %v6489_v45 }
0x2e55   :  { %1150 = vrot.lane.b32.xlu1 %v8878_v46, %s8463_s4 }
0x2e56   :  { %1148 = vrot.lane.b32.xlu0 %v8873_v40, %s8463_s4  ;;  %v6488_v40 = vmul.f32 -1.442695, %v2905_v39 }
0x2e58   :  { %7872 = vpow2.f32 %v6488_v40 }
0x2e59   :  { %1453 = vrot.lane.b32.xlu1 %v8941_v35, %s8463_s4 }
0x2e5a   :  { %1451 = vrot.lane.b32.xlu0 %v8943_v36, %s8463_s4 }
0x2e5d   :  { %1757 = vrot.lane.b32.xlu1 %v9006_v58, %s8463_s4 }
0x2e5e   :  { %1755 = vrot.lane.b32.xlu0 %v9008_v59, %s8463_s4  ;;  %v7871_v59 = vpop.eup %7870 }
0x2e61   :  { %2061 = vrot.lane.b32.xlu1 %v9071_v17, %s8463_s4 }
0x2e62   :  { %2059 = vrot.lane.b32.xlu0 %v9073_v18, %s8463_s4  ;;  %v7873_v17 = vpop.eup %7872  ;;  %v2914_v18 = vadd.f32 1.0, %v7871_v59  ;;  %v6520_v59 = vld [vmem:[#allocation22] ss:$0 sm:$0xff] }
0x2e64   :  { %7874 = vrcp.f32 %v2914_v18 }
0x2e65   :  { %2363 = vrot.lane.b32.xlu1 %v9138_v31, %s8463_s4  ;;  %v2913_v31 = vadd.f32 1.0, %v7873_v17 }
0x2e66   :  { %2361 = vrot.lane.b32.xlu0 %v9140_v34, %s8463_s4 }
0x2e67   :  { %7876 = vrcp.f32 %v2913_v31 }
0x2e69   :  { %2663 = vrot.lane.b32.xlu1 %v9205_v47, %s8463_s4 }
0x2e6a   :  { %2661 = vrot.lane.b32.xlu0 %v9207_v1, %s8463_s4 }
0x2e6e   :  { %v7875_v34 = vpop.eup %7874 }
0x2e6f   :  { %v2940_v57 = vsub.f32 1.0, %v7875_v34  ;;  %v2955_v38 = vmul.f32 %v7875_v34, %v2951_v37 }
0x2e71   :  { %v7877_v48 = vpop.eup %7876 }
0x2e72   :  { %v2939_v60 = vsub.f32 1.0, %v7877_v48  ;;  %v2954_v1 = vmul.f32 %v7877_v48, %v2809_v30 }
0x2ea1   :  { %v9663_v46 = vpop.f32.mrb[36].mxu1 }
0x2ea2   :  { %v7078_v35 = vpop.f32.mrb[37].mxu1  ;;  %v4379_v31 = vadd.f32 %v6520_v59, %v9663_v46 }
0x2ea3   :  { %v9665_v36 = vpop.f32.mrb[38].mxu1 }
0x2ea4   :  { %v7079_v58 = vpop.f32.mrb[39].mxu1  ;;  %v4385_v4 = vpack.c.bf16 %v4379_v31, %v4379_v31 }
0x2ebb   :  { %v2794_v25 = vpop.permute.xlu1 %2793 }
0x2ebc   :  { %v2798_v51 = vmul.f32 %v2794_v25, %v2788_v12  ;;  %v2792_v49 = vpop.permute.xlu0 %2791  ;;  %v4382_v12 = vadd.f32 %v6520_v59, %v9665_v36  ;;  %v4608_v59 = vld [vmem:[%s10217_s1] sm:$0xff] }
0x2ebd   :  { %v2797_v44 = vmul.f32 %v2792_v49, %v2787_v2 }
0x2ebe   :  { %v2806_v43 = vadd.f32 %v2804_v21, %v2798_v51  ;;  %v4386_v34 = vpack.c.bf16 %v4382_v12, %v4382_v12  ;;  %v4611_v12 = vld [vmem:[%s10217_s1 + $0x18] sm:$0xff] }
0x2ebf   :  { %v2805_v41 = vadd.f32 %v2803_v19, %v2797_v44  ;;  %v2946_v47 = vpop.permute.xlu1 %2945 }
0x2ec0   :  { %v2950_v56 = vmul.f32 %v2946_v47, %v2940_v57  ;;  %v2944_v55 = vpop.permute.xlu0 %2943  ;;  %2962 = vrot.lane.b32.xlu1 %v2806_v43, %s8463_s4 }
0x2ec1   :  { %v2949_v52 = vmul.f32 %v2944_v55, %v2939_v60  ;;  %2960 = vrot.lane.b32.xlu0 %v2805_v41, %s8463_s4 }
0x2ec2   :  { %v2957_v50 = vadd.f32 %v2955_v38, %v2950_v56 }
0x2ec3   :  { %v2956_v26 = vadd.f32 %v2954_v1, %v2949_v52  ;;  %v849_v27 = vpop.permute.xlu1 %848 }
0x2ec4   :  { %2969 = vst.msk [vmem:[#allocation3 + $0x8] sm:$0x1] %vm852_vm11, %v2957_v50  ;;  %854 = vst.msk [vmem:[#allocation2 + $0x8] sm:$0x1] %vm852_vm11, %v849_v27  ;;  %v847_v63 = vpop.permute.xlu0 %846 }
0x2ec5   :  { %2968 = vst.msk [vmem:[#allocation3] sm:$0x1] %vm852_vm11, %v2956_v26  ;;  %853 = vst.msk [vmem:[#allocation2] sm:$0x1] %vm852_vm11, %v847_v63 }
0x2ec7   :  { %v1151_v20 = vpop.permute.xlu1 %1150 }
0x2ec8   :  { %1156 = vst.msk [vmem:[#allocation2 + $0x8] sm:$0x2] %vm1154_vm10, %v1151_v20  ;;  %v1149_v11 = vpop.permute.xlu0 %1148 }
0x2ec9   :  { %1155 = vst.msk [vmem:[#allocation2] sm:$0x2] %vm1154_vm10, %v1149_v11 }
0x2ecb   :  { %v1454_v30 = vpop.permute.xlu1 %1453  ;;  %v2973_v10 = vld [vmem:[#allocation3 + $0x8] sm:$0xff] }
0x2ecc   :  { %1459 = vst.msk [vmem:[#allocation2 + $0x8] sm:$0x4] %vm1457_vm8, %v1454_v30  ;;  %v1452_v3 = vpop.permute.xlu0 %1451  ;;  %v2972_v13 = vld [vmem:[#allocation3] sm:$0xff] }
0x2ecd   :  { %1458 = vst.msk [vmem:[#allocation2] sm:$0x4] %vm1457_vm8, %v1452_v3  ;;  %v7516_v24 = vpack.i.bf16 %v2973_v10, %v2972_v13 }
0x2ecf   :  { %7517 = vrot.lane.b32.xlu0 %v7516_v24, %s8464_s25  ;;  %v1758_v42 = vpop.permute.xlu1 %1757 }
0x2ed0   :  { %1763 = vst.msk [vmem:[#allocation2 + $0x8] sm:$0x8] %vm1761_vm7, %v1758_v42  ;;  %v1756_v8 = vpop.permute.xlu0 %1755 }
0x2ed1   :  { %1762 = vst.msk [vmem:[#allocation2] sm:$0x8] %vm1761_vm7, %v1756_v8 }
0x2ed3   :  { %v2062_v28 = vpop.permute.xlu1 %2061 }
0x2ed4   :  { %2066 = vst.msk [vmem:[#allocation2 + $0x8] sm:$0x10] %vm1764_vm6, %v2062_v28  ;;  %v2060_v53 = vpop.permute.xlu0 %2059 }
0x2ed5   :  { %2065 = vst.msk [vmem:[#allocation2] sm:$0x10] %vm1764_vm6, %v2060_v53 }
0x2ed7   :  { %v2364_v15 = vpop.permute.xlu1 %2363 }
0x2ed8   :  { %2368 = vst.msk [vmem:[#allocation2 + $0x8] sm:$0x20] %vm1460_vm5, %v2364_v15  ;;  %v2362_v23 = vpop.permute.xlu0 %2361 }
0x2ed9   :  { %2367 = vst.msk [vmem:[#allocation2] sm:$0x20] %vm1460_vm5, %v2362_v23 }
0x2edb   :  { %v2664_v33 = vpop.permute.xlu1 %2663 }
0x2edc   :  { %2668 = vst.msk [vmem:[#allocation2 + $0x8] sm:$0x40] %vm1157_vm4, %v2664_v33  ;;  %v2662_v61 = vpop.permute.xlu0 %2661 }
0x2edd   :  { %2667 = vst.msk [vmem:[#allocation2] sm:$0x40] %vm1157_vm4, %v2662_v61 }
0x2f32   :  { %v2963_v54 = vpop.permute.xlu1 %2962 }
0x2f33   :  { %2967 = vst.msk [vmem:[#allocation2 + $0x8] sm:$0x80] %vm855_vm3, %v2963_v54  ;;  %v2961_v32 = vpop.permute.xlu0 %2960 }
0x2f34   :  { %2966 = vst.msk [vmem:[#allocation2] sm:$0x80] %vm855_vm3, %v2961_v32 }
0x2f3a   :  { %v2971_v39 = vld [vmem:[#allocation2 + $0x8] sm:$0xff] }
0x2f3b   :  { %v2970_v5 = vld [vmem:[#allocation2] sm:$0xff] }
0x2f41   :  { %v7518_v29 = vpop.permute.xlu0 %7517 }
0x2f42   :  { %v7520_v9 = vunpack.i.h.bf16 %v7518_v29  ;;  %v7519_v6 = vunpack.i.l.bf16 %v7518_v29 }
0x2f44   :  { %v2982_v45 = vsel %vm374_vm1, %v2970_v5, %v7519_v6  ;;  %v2983_v40 = vsel %vm374_vm1, %v2971_v39, %v7520_v9 }
0x2f45   :  { %v4387_v35 = vpack.c.bf16 %v2982_v45, %v2982_v45  ;;  %v4388_v58 = vpack.c.bf16 %v2983_v40, %v2983_v40 }
0x2f47   :  { %v4394_v17 = vsel %vm4389_vm12, %v4387_v35, 0  ;;  %v4440_v18 = vsel %vm4389_vm12, %v4388_v58, 0  ;;  %v4511_v25 = vsel %vm4510_vm13, %v4387_v35, 0  ;;  %v4556_v2 = vsel %vm4510_vm13, %v4388_v58, 0 }
0x2f48   :  { %7081 = vmatpush3.bf16.xpose.msra.mxu0 %v4394_v17  ;;  %7087 = vmatpush3.bf16.xpose.msra.mxu1 %v4440_v18  ;;  %v4609_v17 = vld [vmem:[%s10217_s1 + $0x8] sm:$0xff]  ;;  %v4610_v18 = vld [vmem:[%s10217_s1 + $0x10] sm:$0xff] }
0x2f49   :  { %7092 = vmatprep.subr.bf16.mxu0 %v8458_v0  ;;  %7098 = vmatprep.subr.bf16.mxu1 %v8458_v0  ;;  %v4621_v31 = vpack.c.bf16 %v4609_v17, %v4608_v59 }
0x2f4f   :  { %7083 = vmatmul.mubr.msk.bf16.vlgmr.msra.gmra.mrb[36].mxu0 %vm4389_vm12, %v4385_v4  ;;  %7089 = vmatmul.mubr.msk.bf16.vlgmr.msra.gmra.mrb[40].mxu1 %vm4389_vm12, %v4386_v34  ;;  %v4622_v4 = vpack.c.bf16 %v4611_v12, %v4610_v18  ;;  %v4612_v34 = vld [vmem:[%s10217_s1 + $0x20] sm:$0xff]  ;;  %v9807_v12 = vld [vmem:[#allocation26] ss:$0 sm:$0xff] }
0x2f50   :  { %7093 = vmatpush3.bf16.msra.mxu0 %v4511_v25  ;;  %7099 = vmatpush3.bf16.msra.mxu1 %v4556_v2  ;;  %v4613_v25 = vld [vmem:[%s10217_s1 + $0x28] sm:$0xff] }
0x2f51   :  { %7094 = vmatprep.mubr.msk.bf16.mxu0 %vm8459_vm0, %v8458_v0  ;;  %7100 = vmatprep.mubr.msk.bf16.mxu1 %vm8459_vm0, %v8458_v0  ;;  %v4623_v2 = vpack.c.bf16 %v4613_v25, %v4612_v34 }
0x2f52   :  { %7104 = vmatprep.subr.bf16.mxu0 %v8458_v0  ;;  %7120 = vmatprep.subr.bf16.mxu1 %v8458_v0 }
0x3022   :  { %v4430_v46 = vpop.f32.mrb[36].mxu0  ;;  %v4476_v36 = vpop.f32.mrb[40].mxu1 }
0x3023   :  { %v7084_v7 = vpop.f32.mrb[37].mxu0  ;;  %v7090_v48 = vpop.f32.mrb[41].mxu1  ;;  %v4483_v21 = vsel %vm4482_vm14, %v4430_v46, -inf  ;;  %v4486_v51 = vsel %vm4482_vm14, %v4476_v36, -inf }
0x3024   :  { %4484 = vmax.xlane.f32.xlu1 %v4483_v21  ;;  %v4433_v49 = vpop.f32.mrb[38].mxu0  ;;  %4487 = vmax.xlane.f32.xlu0 %v4486_v51  ;;  %v4479_v19 = vpop.f32.mrb[42].mxu1  ;;  %v4616_v48 = vld [vmem:[%s10217_s1 + $0x40] sm:$0xff]  ;;  %v4617_v21 = vld [vmem:[%s10217_s1 + $0x48] sm:$0xff] }
0x3025   :  { %v7085_v44 = vpop.f32.mrb[39].mxu0  ;;  %v7091_v43 = vpop.f32.mrb[43].mxu1  ;;  %v4625_v51 = vpack.c.bf16 %v4617_v21, %v4616_v48  ;;  %v4618_v49 = vld [vmem:[%s10217_s1 + $0x50] sm:$0xff]  ;;  %v4619_v19 = vld [vmem:[%s10217_s1 + $0x58] sm:$0xff] }
0x3026   :  { %v4626_v44 = vpack.c.bf16 %v4619_v19, %v4618_v49 }
0x30b1   :  { %v4485_v57 = vpop.xlane.xlu1 %4484  ;;  %v4488_v37 = vpop.xlane.xlu0 %4487 }
0x30b2   :  { %v4489_v41 = vsub.f32 %v4430_v46, %v4485_v57  ;;  %v4490_v47 = vsub.f32 %v4476_v36, %v4488_v37  ;;  %v4614_v46 = vld [vmem:[%s10217_s1 + $0x30] sm:$0xff]  ;;  %v4615_v36 = vld [vmem:[%s10217_s1 + $0x38] sm:$0xff] }
0x30b3   :  { %v4624_v7 = vpack.c.bf16 %v4615_v36, %v4614_v46  ;;  %v6528_v46 = vld [vmem:[#allocation25] ss:$0 sm:$0xff] }
0x30b4   :  { %v4491_v60 = vmul.f32 1.442695, %v4489_v41  ;;  %v4493_v38 = vmul.f32 1.442695, %v4490_v47 }
0x30b6   :  { %7878 = vpow2.f32 %v4491_v60 }
0x30b7   :  { %7880 = vpow2.f32 %v4493_v38 }
0x30c0   :  { %v7879_v56 = vpop.eup %7878 }
0x30c1   :  { %v7881_v55 = vpop.eup %7880  ;;  %v4495_v1 = vsel %vm4482_vm14, %v7879_v56, 0.0 }
0x30c2   :  { %4496 = vadd.xlane.f32.xlu0 %v4495_v1  ;;  %v4498_v52 = vsel %vm4482_vm14, %v7881_v55, 0.0 }
0x30c3   :  { %4499 = vadd.xlane.f32.xlu1 %v4498_v52 }
0x314f   :  { %v4497_v50 = vpop.xlane.xlu0 %4496 }
0x3150   :  { %v4500_v26 = vpop.xlane.xlu1 %4499  ;;  %7882 = vrcp.f32 %v4497_v50 }
0x3151   :  { %7884 = vrcp.f32 %v4500_v26 }
0x315a   :  { %v7883_v27 = vpop.eup %7882 }
0x315b   :  { %v7885_v63 = vpop.eup %7884  ;;  %v4502_v20 = vmul.f32 %v7883_v27, %v7879_v56 }
0x315c   :  { %v4504_v11 = vmul.f32 %v7885_v63, %v7881_v55 }
0x315d   :  { %v4505_v30 = vpack.c.bf16 %v4502_v20, %v4502_v20  ;;  %v6022_v10 = vrot.slane %v4502_v20, 1  ;;  %v6027_v3 = vrot.slane %v4502_v20, 2  ;;  %v6033_v13 = vrot.slane %v4502_v20, 3 }
0x315e   :  { %v4506_v24 = vpack.c.bf16 %v4504_v11, %v4504_v11  ;;  %v6028_v42 = vrot.slane %v4504_v11, 1  ;;  %v6034_v8 = vrot.slane %v4504_v11, 2  ;;  %v6039_v28 = vrot.slane %v4502_v20, 4 }
0x315f   :  { %7095 = vmatmul.mubr.msk.bf16.vlgmr.msra.gmra.mrb[40].mxu0 %vm4482_vm14, %v4505_v30  ;;  %v9721_v53 = vsel %vm859_vm2, %v4504_v11, %v6022_v10  ;;  %v6040_v15 = vrot.slane %v4504_v11, 3  ;;  %v6045_v23 = vrot.slane %v4502_v20, 5  ;;  %v6046_v33 = vrot.slane %v4504_v11, 4  ;;  %v4682_v10 = vld [vmem:[%s10218_s3 + $0x18] sm:$0xff] }
0x3160   :  { %7101 = vmatmul.mubr.msk.bf16.vlgmr.msra.gmra.mrb[44].mxu1 %vm4482_vm14, %v4506_v24  ;;  %7116 = vmatprep.mubr.msk.bf16.mxu0 %vm8459_vm0, %v8458_v0  ;;  %v9727_v61 = vsel %vm859_vm2, %v6028_v42, %v6027_v3  ;;  %v9730_v54 = vsel %vm859_vm2, %v6034_v8, %v6033_v13  ;;  %v6019_v32 = vrot.slane %v4504_v11, 7  ;;  %v6051_v29 = vrot.slane %v4502_v20, 6  ;;  %v4738_v13 = vld [vmem:[%s10219_s9 + $0x8] sm:$0xff]  ;;  %v4739_v42 = vld [vmem:[%s10219_s9 + $0x10] sm:$0xff]  ;;  %v4740_v8 = vld [vmem:[%s10219_s9 + $0x18] sm:$0xff] }
0x3161   :  { %7124 = vmatprep.mubr.msk.bf16.mxu1 %vm8459_vm0, %v8458_v0  ;;  %v9735_v9 = vsel %vm859_vm2, %v6040_v15, %v6039_v28  ;;  %v9738_v6 = vsel %vm859_vm2, %v6046_v33, %v6045_v23  ;;  %v6052_v5 = vrot.slane %v4504_v11, 5  ;;  %v6057_v39 = vrot.slane %v4502_v20, 7  ;;  %7105 = vmatpush3.bf16.msra.mxu0 %v4621_v31  ;;  %v6526_v15 = vld [vmem:[#allocation23] ss:$0 sm:$0xff] }
0x3162   :  { %v9741_v45 = vsel %vm859_vm2, %v6019_v32, %v4502_v20  ;;  %v6058_v40 = vrot.slane %v4504_v11, 6  ;;  %7106 = vmatprep.subr.bf16.mxu0 %v8458_v0  ;;  %v4679_v20 = vld [vmem:[%s10218_s3] sm:$0xff]  ;;  %v4680_v11 = vld [vmem:[%s10218_s3 + $0x8] sm:$0xff]  ;;  %v9789_v28 = vpack.c.bf16 %v4740_v8, %v4739_v42 }
0x3163   :  { %v9744_v35 = vsel %vm859_vm2, %v6052_v5, %v6051_v29  ;;  %v4684_v30 = vpack.c.bf16 %v4680_v11, %v4679_v20 }
0x3164   :  { %v9747_v58 = vsel %vm859_vm2, %v6058_v40, %v6057_v39 }
0x3165   :  { %7107 = vmatpush3.bf16.msra.mxu0 %v4622_v4  ;;  %7121 = vmatpush3.bf16.msra.mxu1 %v4684_v30 }
0x3166   :  { %7108 = vmatprep.subr.bf16.mxu0 %v8458_v0  ;;  %7122 = vmatprep.subr.bf16.mxu1 %v8458_v0 }
0x3169   :  { %7109 = vmatpush3.bf16.msra.mxu0 %v4623_v2 }
0x316a   :  { %7110 = vmatprep.subr.bf16.mxu0 %v8458_v0 }
0x316d   :  { %7111 = vmatpush3.bf16.msra.mxu0 %v4624_v7 }
0x316e   :  { %7112 = vmatprep.subr.bf16.mxu0 %v8458_v0 }
0x3171   :  { %7113 = vmatpush3.bf16.msra.mxu0 %v4625_v51 }
0x3172   :  { %7114 = vmatprep.subr.bf16.mxu0 %v8458_v0 }
0x3175   :  { %7115 = vmatpush3.bf16.msra.mxu0 %v4626_v44 }
0x3176   :  { %7408 = vmatprep.subr.bf16.mxu0 %v8460_v16 }
0x3232   :  { %v4547_v43 = vpop.f32.mrb[40].mxu0 }
0x3233   :  { %v4592_v57 = vpop.f32.mrb[44].mxu1  ;;  %v7096_v37 = vpop.f32.mrb[41].mxu0 }
0x3234   :  { %v7521_v41 = vpack.i.bf16 %v4592_v57, %v4547_v43  ;;  %v7102_v47 = vpop.f32.mrb[45].mxu1  ;;  %v4550_v60 = vpop.f32.mrb[42].mxu0 }
0x3235   :  { %v4595_v38 = vpop.f32.mrb[46].mxu1  ;;  %v7097_v56 = vpop.f32.mrb[43].mxu0 }
0x3236   :  { %7522 = vrot.lane.b32.xlu0 %v7521_v41, %s8464_s25  ;;  %v7103_v55 = vpop.f32.mrb[47].mxu1 }
0x32a8   :  { %v7523_v1 = vpop.permute.xlu0 %7522 }
0x32a9   :  { %v7525_v52 = vunpack.i.h.bf16 %v7523_v1  ;;  %v7524_v50 = vunpack.i.l.bf16 %v7523_v1 }
0x32ab   :  { %v4607_v26 = vsel %vm374_vm1, %v9612_v14, %v7525_v52  ;;  %v4606_v27 = vsel %vm374_vm1, %v9614_v22, %v7524_v50  ;;  %v4681_v14 = vld [vmem:[%s10218_s3 + $0x10] sm:$0xff]  ;;  %v4737_v22 = vld [vmem:[%s10219_s9] sm:$0xff] }
0x32ac   :  { %v4620_v63 = vpack.c.bf16 %v4607_v26, %v4606_v27  ;;  %v4685_v3 = vpack.c.bf16 %v4682_v10, %v4681_v14  ;;  %v9783_v24 = vpack.c.bf16 %v4738_v13, %v4737_v22 }
0x32ae   :  { %7117 = vmatmul.mubr.msk.bf16.vlgmr.msra.gmra.mrb[44].mxu0 %vm4634_vm15, %v4620_v63  ;;  %7123 = vmatpush3.bf16.msra.mxu1 %v4685_v3 }
0x32af   :  { %7158 = vmatprep.mubr.msk.f32.mxu0 %vm8459_vm0, %v8458_v0  ;;  %7396 = vmatprep.subr.bf16.mxu1 %v8460_v16 }
0x32b0   :  { %7410 = vmatpush3.bf16.msra.mxu0 %v9783_v24 }
0x32b1   :  { %7411 = vmatprep.subr.bf16.mxu0 %v8460_v16 }
0x32b4   :  { %7413 = vmatpush3.bf16.msra.mxu0 %v9789_v28 }
0x32b5   :  { %7420 = vmatprep.subr.bf16.mxu0 %v8460_v16 }
0x3381   :  { %v4672_v23 = vpop.f32.mrb[44].mxu0 }
0x3382   :  { %v7118_v33 = vpop.f32.mrb[45].mxu0  ;;  %v4673_v29 = vadd.f32 %v6526_v15, %v4672_v23 }
0x3383   :  { %v4675_v32 = vpop.f32.mrb[46].mxu0 }
0x3384   :  { %v4676_v5 = vadd.f32 %v6526_v15, %v4675_v32  ;;  %v7119_v39 = vpop.f32.mrb[47].mxu0 }
0x3386   :  { %v4683_v40 = vpack.c.bf16 %v4676_v5, %v4673_v29 }
0x3388   :  { %7125 = vmatmul.mubr.msk.bf16.vlgmr.msra.gmra.mrb[48].mxu1 %vm374_vm1, %v4683_v40 }
0x3389   :  { %7398 = vmatpush3.bf16.msra.mxu1 %v9783_v24  ;;  %7136 = vmatprep.mubr.msk.f32.mxu1 %vm8459_vm0, %v8458_v0 }
0x338a   :  { %7399 = vmatprep.subr.bf16.mxu1 %v8460_v16 }
0x338d   :  { %7401 = vmatpush3.bf16.msra.mxu1 %v9789_v28 }
0x338e   :  { %7402 = vmatprep.subr.bf16.mxu1 %v8460_v16 }
0x3390   :  { %7137 = vmatmul.mubr.f32.vlgmr.msra.gmra.mrb[52].mxu1 %v8458_v0 }
0x3391   :  { %7404 = vmatpush3.bf16.msra.mxu1 %v9783_v24  ;;  %7147 = vmatprep.mubr.msk.f32.mxu1 %vm8459_vm0, %v8458_v0 }
0x3392   :  { %7405 = vmatprep.subr.bf16.mxu1 %v8460_v16 }
0x3395   :  { %7407 = vmatpush3.bf16.msra.mxu1 %v9789_v28 }
0x3396   :  { %7414 = vmatprep.subr.bf16.mxu1 %v8460_v16 }
0x345b   :  { %v4730_v59 = vpop.f32.mrb[48].mxu1 }
0x345c   :  { %v7126_v17 = vpop.f32.mrb[49].mxu1  ;;  %v9815_v48 = vadd.f32 %v6528_v46, %v4730_v59 }
0x345d   :  { %v4733_v18 = vpop.f32.mrb[50].mxu1 }
0x345e   :  { %v7127_v31 = vpop.f32.mrb[51].mxu1  ;;  %v9812_v36 = vadd.f32 %v6528_v46, %v4733_v18 }
0x3463   :  { %v4814_v4 = vpop.f32.mrb[52].mxu1 }
0x3464   :  { %v4815_v34 = vadd.f32 %v9807_v12, %v4814_v4  ;;  %v7138_v25 = vpop.f32.mrb[53].mxu1 }
0x3466   :  { %v4819_v2 = vrot.slane %v4815_v34, 1  ;;  %v4822_v21 = vadd.f32 %v4815_v34, %v9815_v48 }
0x3468   :  { %4838 = vrot.lane.b32.xlu1 %v4819_v2, %s8462_s20  ;;  %v4823_v7 = vadd.f32 %v4819_v2, %v9812_v36  ;;  %v6531_v49 = vmul.f32 -1.442695, %v4822_v21 }
0x346a   :  { %v6532_v51 = vmul.f32 -1.442695, %v4823_v7 }
0x346c   :  { %4836 = vrot.lane.b32.xlu1 %v4815_v34, %s8462_s20  ;;  %7886 = vpow2.f32 %v6532_v51 }
0x346d   :  { %7888 = vpow2.f32 %v6531_v49 }
0x3476   :  { %v7887_v19 = vpop.eup %7886 }
0x3477   :  { %v4831_v44 = vadd.f32 1.0, %v7887_v19  ;;  %v7889_v43 = vpop.eup %7888 }
0x3478   :  { %v4830_v57 = vadd.f32 1.0, %v7889_v43 }
0x3479   :  { %7890 = vrcp.f32 %v4831_v44 }
0x347a   :  { %7892 = vrcp.f32 %v4830_v57 }
0x3483   :  { %v7891_v37 = vpop.eup %7890 }
0x3484   :  { %v7893_v60 = vpop.eup %7892  ;;  %v4857_v63 = vsub.f32 1.0, %v7891_v37  ;;  %v4869_v11 = vmul.f32 0.0, %v7891_v37 }
0x3485   :  { %v4856_v10 = vsub.f32 1.0, %v7893_v60  ;;  %v4868_v22 = vmul.f32 0.0, %v7893_v60 }
0x34da   :  { %v4839_v41 = vpop.permute.xlu1 %4838 }
0x34db   :  { %v4843_v47 = vmul.f32 %v7891_v37, %v4839_v41 }
0x34dd   :  { %4848 = vrot.lane.b32.xlu0 %v4843_v47, %s8462_s20 }
0x34de   :  { %v4837_v38 = vpop.permute.xlu1 %4836 }
0x34df   :  { %v4842_v56 = vmul.f32 %v7893_v60, %v4837_v38 }
0x34e1   :  { %4846 = vrot.lane.b32.xlu1 %v4842_v56, %s8462_s20 }
0x354f   :  { %v4849_v55 = vpop.permute.xlu0 %4848 }
0x3550   :  { %v4853_v1 = vadd.f32 %v4849_v55, %v9812_v36 }
0x3552   :  { %7894 = vtanh.f32 %v4853_v1 }
0x3553   :  { %v4847_v52 = vpop.permute.xlu1 %4846 }
0x3554   :  { %v4852_v50 = vadd.f32 %v4847_v52, %v9815_v48 }
0x3556   :  { %7896 = vtanh.f32 %v4852_v50 }
0x355c   :  { %v7895_v26 = vpop.eup %7894 }
0x355d   :  { %4862 = vrot.lane.b32.xlu0 %v7895_v26, %s8463_s4 }
0x3560   :  { %v7897_v27 = vpop.eup %7896 }
0x3561   :  { %4860 = vrot.lane.b32.xlu1 %v7897_v27, %s8463_s4 }
0x35cf   :  { %v4863_v20 = vpop.permute.xlu0 %4862 }
0x35d0   :  { %v4867_v30 = vmul.f32 %v4863_v20, %v4857_v63 }
0x35d2   :  { %v9824_v14 = vadd.f32 %v4869_v11, %v4867_v30 }
0x35d3   :  { %v4861_v3 = vpop.permute.xlu1 %4860 }
0x35d4   :  { %v4866_v13 = vmul.f32 %v4861_v3, %v4856_v10  ;;  %v4882_v42 = vrot.slane %v9824_v14, 7 }
0x35d6   :  { %v9827_v8 = vadd.f32 %v4868_v22, %v4866_v13 }
0x35d8   :  { %v4883_v15 = vsel %vm859_vm2, %v4882_v42, %v9827_v8  ;;  %v5008_v38 = vrot.slane %v9827_v8, 7 }
0x35d9   :  { %4884 = vrot.lane.b32.xlu0 %v4883_v15, %s8463_s4 }
0x364b   :  { %v4885_v23 = vpop.permute.xlu0 %4884 }
0x364c   :  { %7148 = vmatmul.mubr.msk.f32.vlgmr.msra.gmra.mrb[54].mxu1 %vm374_vm1, %v4885_v23 }
0x364d   :  { %7416 = vmatpush3.bf16.msra.mxu1 %v9783_v24  ;;  %7169 = vmatprep.mubr.msk.f32.mxu1 %vm8459_vm0, %v8458_v0 }
0x364e   :  { %7417 = vmatprep.subr.bf16.mxu1 %v8460_v16 }
0x3651   :  { %7419 = vmatpush3.bf16.msra.mxu1 %v9789_v28 }
0x3652   :  { %7426 = vmatprep.subr.bf16.mxu1 %v8460_v16 }
0x371f   :  { %v4954_v33 = vpop.f32.mrb[54].mxu1 }
0x3720   :  { %v4955_v32 = vadd.f32 %v9807_v12, %v4954_v33  ;;  %v7149_v29 = vpop.f32.mrb[55].mxu1 }
0x3722   :  { %v4959_v5 = vrot.slane %v4955_v32, 7  ;;  %4978 = vrot.lane.b32.xlu0 %v4955_v32, %s8462_s20  ;;  %v4963_v39 = vadd.f32 %v4955_v32, %v9812_v36 }
0x3724   :  { %4976 = vrot.lane.b32.xlu1 %v4959_v5, %s8462_s20  ;;  %v4962_v40 = vadd.f32 %v4959_v5, %v9815_v48  ;;  %v6535_v59 = vmul.f32 -1.442695, %v4963_v39 }
0x3726   :  { %v6534_v17 = vmul.f32 -1.442695, %v4962_v40  ;;  %7898 = vpow2.f32 %v6535_v59 }
0x3728   :  { %7900 = vpow2.f32 %v6534_v17 }
0x3730   :  { %v7899_v18 = vpop.eup %7898 }
0x3731   :  { %v4971_v4 = vadd.f32 1.0, %v7899_v18 }
0x3732   :  { %v7901_v31 = vpop.eup %7900 }
0x3733   :  { %v4970_v34 = vadd.f32 1.0, %v7901_v31  ;;  %7902 = vrcp.f32 %v4971_v4 }
0x3735   :  { %7904 = vrcp.f32 %v4970_v34 }
0x373d   :  { %v7903_v25 = vpop.eup %7902 }
0x373e   :  { %v4997_v47 = vsub.f32 1.0, %v7903_v25  ;;  %v5012_v50 = vmul.f32 %v7903_v25, %v4882_v42 }
0x373f   :  { %v7905_v7 = vpop.eup %7904 }
0x3740   :  { %v4996_v60 = vsub.f32 1.0, %v7905_v7  ;;  %v5011_v1 = vmul.f32 %v7905_v7, %v5008_v38 }
0x3794   :  { %v4979_v2 = vpop.permute.xlu0 %4978 }
0x3795   :  { %v4983_v46 = vmul.f32 %v7903_v25, %v4979_v2 }
0x3796   :  { %v4977_v21 = vpop.permute.xlu1 %4976 }
0x3797   :  { %v4982_v51 = vmul.f32 %v7905_v7, %v4977_v21  ;;  %4988 = vrot.lane.b32.xlu0 %v4983_v46, %s8462_s20 }
0x3799   :  { %4986 = vrot.lane.b32.xlu1 %v4982_v51, %s8462_s20 }
0x3809   :  { %v4989_v49 = vpop.permute.xlu0 %4988 }
0x380a   :  { %v4993_v19 = vadd.f32 %v4989_v49, %v9812_v36 }
0x380b   :  { %v4987_v44 = vpop.permute.xlu1 %4986 }
0x380c   :  { %7906 = vtanh.f32 %v4993_v19  ;;  %v4992_v43 = vadd.f32 %v4987_v44, %v9815_v48 }
0x380e   :  { %7908 = vtanh.f32 %v4992_v43 }
0x3816   :  { %v7907_v57 = vpop.eup %7906 }
0x3817   :  { %5002 = vrot.lane.b32.xlu0 %v7907_v57, %s8463_s4 }
0x3818   :  { %v7909_v37 = vpop.eup %7908 }
0x3819   :  { %5000 = vrot.lane.b32.xlu1 %v7909_v37, %s8463_s4 }
0x3889   :  { %v5003_v41 = vpop.permute.xlu0 %5002 }
0x388a   :  { %v5007_v55 = vmul.f32 %v5003_v41, %v4997_v47 }
0x388b   :  { %v5001_v56 = vpop.permute.xlu1 %5000 }
0x388c   :  { %v5006_v52 = vmul.f32 %v5001_v56, %v4996_v60  ;;  %v9853_v27 = vadd.f32 %v5012_v50, %v5007_v55 }
0x388e   :  { %v9851_v26 = vadd.f32 %v5011_v1, %v5006_v52  ;;  %v5153_v49 = vrot.slane %v9853_v27, 7 }
0x3890   :  { %v5025_v63 = vrot.slane %v9851_v26, 1  ;;  %v5152_v43 = vrot.slane %v9851_v26, 7 }
0x3892   :  { %v5026_v20 = vsel %vm859_vm2, %v9853_v27, %v5025_v63 }
0x3893   :  { %5027 = vrot.lane.b32.xlu1 %v5026_v20, %s8463_s4 }
0x3905   :  { %v5028_v11 = vpop.permute.xlu1 %5027 }
0x3906   :  { %7159 = vmatmul.mubr.msk.f32.vlgmr.msra.gmra.mrb[48].mxu0 %vm374_vm1, %v5028_v11 }
0x3907   :  { %7422 = vmatpush3.bf16.msra.mxu0 %v9783_v24  ;;  %7180 = vmatprep.mubr.msk.f32.mxu0 %vm8459_vm0, %v8458_v0 }
0x3908   :  { %7423 = vmatprep.subr.bf16.mxu0 %v8460_v16 }
0x390b   :  { %7425 = vmatpush3.bf16.msra.mxu0 %v9789_v28 }
0x390c   :  { %7432 = vmatprep.subr.bf16.mxu0 %v8460_v16 }
0x39d9   :  { %v5097_v30 = vpop.f32.mrb[48].mxu0 }
0x39da   :  { %v5098_v10 = vadd.f32 %v9807_v12, %v5097_v30  ;;  %v7160_v3 = vpop.f32.mrb[49].mxu0 }
0x39dc   :  { %v5102_v22 = vrot.slane %v5098_v10, 6  ;;  %v5103_v13 = vrot.slane %v5098_v10, 7 }
0x39de   :  { %5122 = vrot.lane.b32.xlu1 %v5103_v13, %s8462_s20  ;;  %5120 = vrot.lane.b32.xlu0 %v5102_v22, %s8462_s20  ;;  %v5106_v42 = vadd.f32 %v5102_v22, %v9815_v48  ;;  %v5107_v15 = vadd.f32 %v5103_v13, %v9812_v36 }
0x39e0   :  { %v6537_v23 = vmul.f32 -1.442695, %v5106_v42  ;;  %v6538_v33 = vmul.f32 -1.442695, %v5107_v15 }
0x39e2   :  { %7910 = vpow2.f32 %v6537_v23 }
0x39e3   :  { %7912 = vpow2.f32 %v6538_v33 }
0x39ec   :  { %v7911_v32 = vpop.eup %7910 }
0x39ed   :  { %v7913_v29 = vpop.eup %7912  ;;  %v5114_v5 = vadd.f32 1.0, %v7911_v32 }
0x39ee   :  { %v5115_v39 = vadd.f32 1.0, %v7913_v29 }
0x39ef   :  { %7914 = vrcp.f32 %v5114_v5 }
0x39f0   :  { %7916 = vrcp.f32 %v5115_v39 }
0x39f9   :  { %v7915_v40 = vpop.eup %7914 }
0x39fa   :  { %v7917_v59 = vpop.eup %7916  ;;  %v5140_v44 = vsub.f32 1.0, %v7915_v40  ;;  %v5156_v47 = vmul.f32 %v7915_v40, %v5152_v43 }
0x39fb   :  { %v5141_v51 = vsub.f32 1.0, %v7917_v59  ;;  %v5157_v57 = vmul.f32 %v7917_v59, %v5153_v49 }
0x3a50   :  { %v5123_v17 = vpop.permute.xlu1 %5122  ;;  %v5121_v18 = vpop.permute.xlu0 %5120 }
0x3a51   :  { %v5127_v31 = vmul.f32 %v7917_v59, %v5123_v17  ;;  %v5126_v4 = vmul.f32 %v7915_v40, %v5121_v18 }
0x3a53   :  { %5132 = vrot.lane.b32.xlu1 %v5127_v31, %s8462_s20  ;;  %5130 = vrot.lane.b32.xlu0 %v5126_v4, %s8462_s20 }
0x3ac5   :  { %v5133_v34 = vpop.permute.xlu1 %5132  ;;  %v5131_v25 = vpop.permute.xlu0 %5130 }
0x3ac6   :  { %v5137_v2 = vadd.f32 %v5133_v34, %v9812_v36  ;;  %v5136_v46 = vadd.f32 %v5131_v25, %v9815_v48 }
0x3ac8   :  { %7918 = vtanh.f32 %v5137_v2 }
0x3ac9   :  { %7920 = vtanh.f32 %v5136_v46 }
0x3ad2   :  { %v7919_v7 = vpop.eup %7918 }
0x3ad3   :  { %v7921_v21 = vpop.eup %7920  ;;  %5146 = vrot.lane.b32.xlu1 %v7919_v7, %s8463_s4 }
0x3ad4   :  { %5144 = vrot.lane.b32.xlu0 %v7921_v21, %s8463_s4 }
0x3b45   :  { %v5147_v19 = vpop.permute.xlu1 %5146 }
0x3b46   :  { %v5151_v37 = vmul.f32 %v5147_v19, %v5141_v51  ;;  %v5145_v41 = vpop.permute.xlu0 %5144 }
0x3b47   :  { %v5150_v60 = vmul.f32 %v5145_v41, %v5140_v44 }
0x3b48   :  { %v9879_v38 = vadd.f32 %v5157_v57, %v5151_v37 }
0x3b49   :  { %v9881_v56 = vadd.f32 %v5156_v47, %v5150_v60 }
0x3b4a   :  { %v5171_v55 = vrot.slane %v9879_v38, 1  ;;  %v5299_v7 = vrot.slane %v9879_v38, 7 }
0x3b4b   :  { %v5170_v1 = vrot.slane %v9881_v56, 2  ;;  %v5298_v49 = vrot.slane %v9881_v56, 7 }
0x3b4d   :  { %v5172_v52 = vsel %vm859_vm2, %v5171_v55, %v5170_v1 }
0x3b4e   :  { %5173 = vrot.lane.b32.xlu0 %v5172_v52, %s8463_s4 }
0x3bc0   :  { %v5174_v50 = vpop.permute.xlu0 %5173 }
0x3bc1   :  { %7170 = vmatmul.mubr.msk.f32.vlgmr.msra.gmra.mrb[56].mxu1 %vm374_vm1, %v5174_v50 }
0x3bc2   :  { %7428 = vmatpush3.bf16.msra.mxu1 %v9783_v24  ;;  %7191 = vmatprep.mubr.msk.f32.mxu1 %vm8459_vm0, %v8458_v0 }
0x3bc3   :  { %7429 = vmatprep.subr.bf16.mxu1 %v8460_v16 }
0x3bc6   :  { %7431 = vmatpush3.bf16.msra.mxu1 %v9789_v28 }
0x3bc7   :  { %7438 = vmatprep.subr.bf16.mxu1 %v8460_v16 }
0x3c94   :  { %v5243_v63 = vpop.f32.mrb[56].mxu1 }
0x3c95   :  { %v5244_v20 = vadd.f32 %v9807_v12, %v5243_v63  ;;  %v7171_v11 = vpop.f32.mrb[57].mxu1 }
0x3c97   :  { %v5248_v30 = vrot.slane %v5244_v20, 5  ;;  %v5249_v10 = vrot.slane %v5244_v20, 6 }
0x3c99   :  { %5268 = vrot.lane.b32.xlu0 %v5249_v10, %s8462_s20  ;;  %5266 = vrot.lane.b32.xlu1 %v5248_v30, %s8462_s20  ;;  %v5252_v3 = vadd.f32 %v5248_v30, %v9815_v48  ;;  %v5253_v22 = vadd.f32 %v5249_v10, %v9812_v36 }
0x3c9b   :  { %v6540_v13 = vmul.f32 -1.442695, %v5252_v3  ;;  %v6541_v42 = vmul.f32 -1.442695, %v5253_v22 }
0x3c9d   :  { %7922 = vpow2.f32 %v6540_v13 }
0x3c9e   :  { %7924 = vpow2.f32 %v6541_v42 }
0x3ca7   :  { %v7923_v15 = vpop.eup %7922 }
0x3ca8   :  { %v7925_v23 = vpop.eup %7924  ;;  %v5260_v33 = vadd.f32 1.0, %v7923_v15 }
0x3ca9   :  { %v5261_v32 = vadd.f32 1.0, %v7925_v23 }
0x3caa   :  { %7926 = vrcp.f32 %v5260_v33 }
0x3cab   :  { %7928 = vrcp.f32 %v5261_v32 }
0x3cb4   :  { %v7927_v29 = vpop.eup %7926 }
0x3cb5   :  { %v7929_v5 = vpop.eup %7928  ;;  %v5286_v51 = vsub.f32 1.0, %v7927_v29  ;;  %v5302_v57 = vmul.f32 %v7927_v29, %v5298_v49 }
0x3cb6   :  { %v5287_v46 = vsub.f32 1.0, %v7929_v5  ;;  %v5303_v19 = vmul.f32 %v7929_v5, %v5299_v7 }
0x3d0b   :  { %v5269_v39 = vpop.permute.xlu0 %5268  ;;  %v5267_v40 = vpop.permute.xlu1 %5266 }
0x3d0c   :  { %v5273_v59 = vmul.f32 %v7929_v5, %v5269_v39  ;;  %v5272_v17 = vmul.f32 %v7927_v29, %v5267_v40 }
0x3d0e   :  { %5278 = vrot.lane.b32.xlu0 %v5273_v59, %s8462_s20  ;;  %5276 = vrot.lane.b32.xlu1 %v5272_v17, %s8462_s20 }
0x3d80   :  { %v5279_v18 = vpop.permute.xlu0 %5278  ;;  %v5277_v31 = vpop.permute.xlu1 %5276 }
0x3d81   :  { %v5283_v4 = vadd.f32 %v5279_v18, %v9812_v36  ;;  %v5282_v34 = vadd.f32 %v5277_v31, %v9815_v48 }
0x3d83   :  { %7930 = vtanh.f32 %v5283_v4 }
0x3d84   :  { %7932 = vtanh.f32 %v5282_v34 }
0x3d8d   :  { %v7931_v25 = vpop.eup %7930 }
0x3d8e   :  { %v7933_v2 = vpop.eup %7932  ;;  %5292 = vrot.lane.b32.xlu0 %v7931_v25, %s8463_s4 }
0x3d8f   :  { %5290 = vrot.lane.b32.xlu1 %v7933_v2, %s8463_s4 }
0x3e00   :  { %v5293_v21 = vpop.permute.xlu0 %5292 }
0x3e01   :  { %v5297_v44 = vmul.f32 %v5293_v21, %v5287_v46  ;;  %v5291_v43 = vpop.permute.xlu1 %5290 }
0x3e02   :  { %v5296_v37 = vmul.f32 %v5291_v43, %v5286_v51 }
0x3e03   :  { %v9907_v41 = vadd.f32 %v5303_v19, %v5297_v44 }
0x3e04   :  { %v9909_v47 = vadd.f32 %v5302_v57, %v5296_v37 }
0x3e05   :  { %v5317_v60 = vrot.slane %v9907_v41, 2  ;;  %v5445_v46 = vrot.slane %v9907_v41, 7 }
0x3e06   :  { %v5316_v55 = vrot.slane %v9909_v47, 3  ;;  %v5444_v51 = vrot.slane %v9909_v47, 7 }
0x3e08   :  { %v5318_v1 = vsel %vm859_vm2, %v5317_v60, %v5316_v55 }
0x3e09   :  { %5319 = vrot.lane.b32.xlu1 %v5318_v1, %s8463_s4 }
0x3e7b   :  { %v5320_v52 = vpop.permute.xlu1 %5319 }
0x3e7c   :  { %7181 = vmatmul.mubr.msk.f32.vlgmr.msra.gmra.mrb[50].mxu0 %vm374_vm1, %v5320_v52 }
0x3e7d   :  { %7434 = vmatpush3.bf16.msra.mxu0 %v9783_v24  ;;  %7202 = vmatprep.mubr.msk.f32.mxu0 %vm8459_vm0, %v8458_v0 }
0x3e7e   :  { %7435 = vmatprep.subr.bf16.mxu0 %v8460_v16 }
0x3e81   :  { %7437 = vmatpush3.bf16.msra.mxu0 %v9789_v28 }
0x3e82   :  { %7216 = vmatprep.subr.bf16.mxu0 %v8458_v0 }
0x3f4f   :  { %v5389_v50 = vpop.f32.mrb[50].mxu0 }
0x3f50   :  { %v5390_v63 = vadd.f32 %v9807_v12, %v5389_v50  ;;  %v7182_v20 = vpop.f32.mrb[51].mxu0 }
0x3f52   :  { %v5394_v11 = vrot.slane %v5390_v63, 4  ;;  %v5395_v30 = vrot.slane %v5390_v63, 5 }
0x3f54   :  { %5414 = vrot.lane.b32.xlu1 %v5395_v30, %s8462_s20  ;;  %5412 = vrot.lane.b32.xlu0 %v5394_v11, %s8462_s20  ;;  %v5398_v10 = vadd.f32 %v5394_v11, %v9815_v48  ;;  %v5399_v3 = vadd.f32 %v5395_v30, %v9812_v36 }
0x3f56   :  { %v6543_v22 = vmul.f32 -1.442695, %v5398_v10  ;;  %v6544_v13 = vmul.f32 -1.442695, %v5399_v3 }
0x3f58   :  { %7934 = vpow2.f32 %v6543_v22 }
0x3f59   :  { %7936 = vpow2.f32 %v6544_v13 }
0x3f62   :  { %v7935_v42 = vpop.eup %7934 }
0x3f63   :  { %v7937_v15 = vpop.eup %7936  ;;  %v5406_v23 = vadd.f32 1.0, %v7935_v42 }
0x3f64   :  { %v5407_v33 = vadd.f32 1.0, %v7937_v15 }
0x3f65   :  { %7938 = vrcp.f32 %v5406_v23 }
0x3f66   :  { %7940 = vrcp.f32 %v5407_v33 }
0x3f6f   :  { %v7939_v32 = vpop.eup %7938 }
0x3f70   :  { %v7941_v29 = vpop.eup %7940  ;;  %v5432_v21 = vsub.f32 1.0, %v7939_v32  ;;  %v5448_v43 = vmul.f32 %v7939_v32, %v5444_v51 }
0x3f71   :  { %v5433_v2 = vsub.f32 1.0, %v7941_v29  ;;  %v5449_v49 = vmul.f32 %v7941_v29, %v5445_v46 }
0x3fc6   :  { %v5415_v5 = vpop.permute.xlu1 %5414  ;;  %v5413_v39 = vpop.permute.xlu0 %5412 }
0x3fc7   :  { %v5419_v40 = vmul.f32 %v7941_v29, %v5415_v5  ;;  %v5418_v59 = vmul.f32 %v7939_v32, %v5413_v39 }
0x3fc9   :  { %5424 = vrot.lane.b32.xlu1 %v5419_v40, %s8462_s20  ;;  %5422 = vrot.lane.b32.xlu0 %v5418_v59, %s8462_s20 }
0x403b   :  { %v5425_v17 = vpop.permute.xlu1 %5424  ;;  %v5423_v18 = vpop.permute.xlu0 %5422 }
0x403c   :  { %v5429_v31 = vadd.f32 %v5425_v17, %v9812_v36  ;;  %v5428_v4 = vadd.f32 %v5423_v18, %v9815_v48 }
0x403e   :  { %7942 = vtanh.f32 %v5429_v31 }
0x403f   :  { %7944 = vtanh.f32 %v5428_v4 }
0x4048   :  { %v7943_v34 = vpop.eup %7942 }
0x4049   :  { %v7945_v25 = vpop.eup %7944  ;;  %5438 = vrot.lane.b32.xlu1 %v7943_v34, %s8463_s4 }
0x404a   :  { %5436 = vrot.lane.b32.xlu0 %v7945_v25, %s8463_s4 }
0x40bb   :  { %v5439_v7 = vpop.permute.xlu1 %5438 }
0x40bc   :  { %v5443_v19 = vmul.f32 %v5439_v7, %v5433_v2  ;;  %v5437_v44 = vpop.permute.xlu0 %5436 }
0x40bd   :  { %v5442_v57 = vmul.f32 %v5437_v44, %v5432_v21 }
0x40be   :  { %v9935_v37 = vadd.f32 %v5449_v49, %v5443_v19 }
0x40bf   :  { %v9937_v60 = vadd.f32 %v5448_v43, %v5442_v57 }
0x40c0   :  { %v5463_v55 = vrot.slane %v9935_v37, 3  ;;  %v5591_v25 = vrot.slane %v9935_v37, 7 }
0x40c1   :  { %v5462_v1 = vrot.slane %v9937_v60, 4  ;;  %v5590_v7 = vrot.slane %v9937_v60, 7 }
0x40c3   :  { %v5464_v52 = vsel %vm859_vm2, %v5463_v55, %v5462_v1 }
0x40c4   :  { %5465 = vrot.lane.b32.xlu0 %v5464_v52, %s8463_s4 }
0x4136   :  { %v5466_v50 = vpop.permute.xlu0 %5465 }
0x4137   :  { %7192 = vmatmul.mubr.msk.f32.vlgmr.msra.gmra.mrb[58].mxu1 %vm374_vm1, %v5466_v50 }
0x4138   :  { %7440 = vmatpush3.bf16.msra.mxu1 %v9783_v24  ;;  %7213 = vmatprep.mubr.msk.f32.mxu1 %vm8459_vm0, %v8458_v0 }
0x4139   :  { %7441 = vmatprep.subr.bf16.mxu1 %v8460_v16 }
0x413c   :  { %7443 = vmatpush3.bf16.msra.mxu1 %v9789_v28 }
0x413d   :  { %7224 = vmatprep.subr.bf16.mxu1 %v8458_v0 }
0x420a   :  { %v5535_v63 = vpop.f32.mrb[58].mxu1 }
0x420b   :  { %v5536_v20 = vadd.f32 %v9807_v12, %v5535_v63  ;;  %v7193_v11 = vpop.f32.mrb[59].mxu1 }
0x420d   :  { %v5540_v30 = vrot.slane %v5536_v20, 3  ;;  %v5541_v10 = vrot.slane %v5536_v20, 4 }
0x420f   :  { %5560 = vrot.lane.b32.xlu0 %v5541_v10, %s8462_s20  ;;  %5558 = vrot.lane.b32.xlu1 %v5540_v30, %s8462_s20  ;;  %v5544_v24 = vadd.f32 %v5540_v30, %v9815_v48  ;;  %v5545_v3 = vadd.f32 %v5541_v10, %v9812_v36 }
0x4211   :  { %v6546_v22 = vmul.f32 -1.442695, %v5544_v24  ;;  %v6547_v16 = vmul.f32 -1.442695, %v5545_v3 }
0x4213   :  { %7946 = vpow2.f32 %v6546_v22 }
0x4214   :  { %7948 = vpow2.f32 %v6547_v16 }
0x421d   :  { %v7947_v28 = vpop.eup %7946 }
0x421e   :  { %v7949_v13 = vpop.eup %7948  ;;  %v5552_v42 = vadd.f32 1.0, %v7947_v28 }
0x421f   :  { %v5553_v15 = vadd.f32 1.0, %v7949_v13 }
0x4220   :  { %7950 = vrcp.f32 %v5552_v42 }
0x4221   :  { %7952 = vrcp.f32 %v5553_v15 }
0x422a   :  { %v7951_v23 = vpop.eup %7950 }
0x422b   :  { %v7953_v33 = vpop.eup %7952  ;;  %v5578_v46 = vsub.f32 1.0, %v7951_v23  ;;  %v5594_v19 = vmul.f32 %v7951_v23, %v5590_v7 }
0x422c   :  { %v5579_v34 = vsub.f32 1.0, %v7953_v33  ;;  %v5595_v21 = vmul.f32 %v7953_v33, %v5591_v25 }
0x4281   :  { %v5561_v32 = vpop.permute.xlu0 %5560  ;;  %v5559_v29 = vpop.permute.xlu1 %5558 }
0x4282   :  { %v5565_v5 = vmul.f32 %v7953_v33, %v5561_v32  ;;  %v5564_v39 = vmul.f32 %v7951_v23, %v5559_v29 }
0x4284   :  { %5570 = vrot.lane.b32.xlu0 %v5565_v5, %s8462_s20  ;;  %5568 = vrot.lane.b32.xlu1 %v5564_v39, %s8462_s20 }
0x42f6   :  { %v5571_v40 = vpop.permute.xlu0 %5570  ;;  %v5569_v59 = vpop.permute.xlu1 %5568 }
0x42f7   :  { %v5575_v17 = vadd.f32 %v5571_v40, %v9812_v36  ;;  %v5574_v18 = vadd.f32 %v5569_v59, %v9815_v48 }
0x42f9   :  { %7954 = vtanh.f32 %v5575_v17 }
0x42fa   :  { %7956 = vtanh.f32 %v5574_v18 }
0x4303   :  { %v7955_v31 = vpop.eup %7954 }
0x4304   :  { %v7957_v4 = vpop.eup %7956  ;;  %5584 = vrot.lane.b32.xlu0 %v7955_v31, %s8463_s4 }
0x4305   :  { %5582 = vrot.lane.b32.xlu1 %v7957_v4, %s8463_s4 }
0x4376   :  { %v5585_v2 = vpop.permute.xlu0 %5584 }
0x4377   :  { %v5589_v51 = vmul.f32 %v5585_v2, %v5579_v34  ;;  %v5583_v49 = vpop.permute.xlu1 %5582 }
0x4378   :  { %v5588_v44 = vmul.f32 %v5583_v49, %v5578_v46 }
0x4379   :  { %v9963_v43 = vadd.f32 %v5595_v21, %v5589_v51 }
0x437a   :  { %v9965_v57 = vadd.f32 %v5594_v19, %v5588_v44 }
0x437b   :  { %v5609_v55 = vrot.slane %v9963_v43, 4  ;;  %v5737_v25 = vrot.slane %v9963_v43, 7 }
0x437c   :  { %v5608_v1 = vrot.slane %v9965_v57, 5  ;;  %v5736_v7 = vrot.slane %v9965_v57, 7 }
0x437e   :  { %v5610_v52 = vsel %vm859_vm2, %v5609_v55, %v5608_v1 }
0x437f   :  { %5611 = vrot.lane.b32.xlu1 %v5610_v52, %s8463_s4 }
0x43f1   :  { %v5612_v50 = vpop.permute.xlu1 %5611 }
0x43f2   :  { %7203 = vmatmul.mubr.msk.f32.vlgmr.msra.gmra.mrb[52].mxu0 %vm374_vm1, %v5612_v50 }
0x43f3   :  { %7220 = vmatprep.mubr.msk.bf16.mxu0 %vm8459_vm0, %v8458_v0 }
0x44c5   :  { %v5681_v63 = vpop.f32.mrb[52].mxu0 }
0x44c6   :  { %v5682_v20 = vadd.f32 %v9807_v12, %v5681_v63  ;;  %v7204_v11 = vpop.f32.mrb[53].mxu0 }
0x44c8   :  { %v5686_v30 = vrot.slane %v5682_v20, 2  ;;  %v5687_v10 = vrot.slane %v5682_v20, 3 }
0x44ca   :  { %5706 = vrot.lane.b32.xlu1 %v5687_v10, %s8462_s20  ;;  %5704 = vrot.lane.b32.xlu0 %v5686_v30, %s8462_s20  ;;  %v5690_v24 = vadd.f32 %v5686_v30, %v9815_v48  ;;  %v5691_v3 = vadd.f32 %v5687_v10, %v9812_v36 }
0x44cc   :  { %v6549_v22 = vmul.f32 -1.442695, %v5690_v24  ;;  %v6550_v16 = vmul.f32 -1.442695, %v5691_v3 }
0x44ce   :  { %7958 = vpow2.f32 %v6549_v22 }
0x44cf   :  { %7960 = vpow2.f32 %v6550_v16 }
0x44d8   :  { %v7959_v28 = vpop.eup %7958 }
0x44d9   :  { %v7961_v13 = vpop.eup %7960  ;;  %v5698_v42 = vadd.f32 1.0, %v7959_v28 }
0x44da   :  { %v5699_v15 = vadd.f32 1.0, %v7961_v13 }
0x44db   :  { %7962 = vrcp.f32 %v5698_v42 }
0x44dc   :  { %7964 = vrcp.f32 %v5699_v15 }
0x44e5   :  { %v7963_v23 = vpop.eup %7962 }
0x44e6   :  { %v7965_v33 = vpop.eup %7964  ;;  %v5724_v46 = vsub.f32 1.0, %v7963_v23  ;;  %v5740_v19 = vmul.f32 %v7963_v23, %v5736_v7 }
0x44e7   :  { %v5725_v34 = vsub.f32 1.0, %v7965_v33  ;;  %v5741_v21 = vmul.f32 %v7965_v33, %v5737_v25 }
0x453c   :  { %v5707_v32 = vpop.permute.xlu1 %5706  ;;  %v5705_v29 = vpop.permute.xlu0 %5704 }
0x453d   :  { %v5711_v5 = vmul.f32 %v7965_v33, %v5707_v32  ;;  %v5710_v39 = vmul.f32 %v7963_v23, %v5705_v29 }
0x453f   :  { %5716 = vrot.lane.b32.xlu1 %v5711_v5, %s8462_s20  ;;  %5714 = vrot.lane.b32.xlu0 %v5710_v39, %s8462_s20 }
0x45b1   :  { %v5717_v40 = vpop.permute.xlu1 %5716  ;;  %v5715_v59 = vpop.permute.xlu0 %5714 }
0x45b2   :  { %v5721_v17 = vadd.f32 %v5717_v40, %v9812_v36  ;;  %v5720_v18 = vadd.f32 %v5715_v59, %v9815_v48 }
0x45b4   :  { %7966 = vtanh.f32 %v5721_v17 }
0x45b5   :  { %7968 = vtanh.f32 %v5720_v18 }
0x45be   :  { %v7967_v31 = vpop.eup %7966 }
0x45bf   :  { %v7969_v4 = vpop.eup %7968  ;;  %5730 = vrot.lane.b32.xlu1 %v7967_v31, %s8463_s4 }
0x45c0   :  { %5728 = vrot.lane.b32.xlu0 %v7969_v4, %s8463_s4 }
0x4631   :  { %v5731_v2 = vpop.permute.xlu1 %5730 }
0x4632   :  { %v5735_v51 = vmul.f32 %v5731_v2, %v5725_v34  ;;  %v5729_v49 = vpop.permute.xlu0 %5728 }
0x4633   :  { %v5734_v44 = vmul.f32 %v5729_v49, %v5724_v46 }
0x4634   :  { %v9987_v55 = vadd.f32 %v5741_v21, %v5735_v51 }
0x4635   :  { %v9989_v1 = vadd.f32 %v5740_v19, %v5734_v44 }
0x4636   :  { %v5755_v52 = vrot.slane %v9987_v55, 5 }
0x4637   :  { %v5754_v50 = vrot.slane %v9989_v1, 6 }
0x4639   :  { %v5756_v63 = vsel %vm859_vm2, %v5755_v52, %v5754_v50 }
0x463a   :  { %5757 = vrot.lane.b32.xlu0 %v5756_v63, %s8463_s4 }
0x46ac   :  { %v5758_v20 = vpop.permute.xlu0 %5757 }
0x46ad   :  { %7214 = vmatmul.mubr.msk.f32.vlgmr.msra.gmra.mrb[60].mxu1 %vm374_vm1, %v5758_v20 }
0x46ae   :  { %7226 = vmatprep.mubr.msk.bf16.mxu1 %vm8459_vm0, %v8458_v0 }
0x4780   :  { %v5827_v11 = vpop.f32.mrb[60].mxu1 }
0x4781   :  { %v5828_v30 = vadd.f32 %v9807_v12, %v5827_v11  ;;  %v7215_v10 = vpop.f32.mrb[61].mxu1 }
0x4783   :  { %v5832_v24 = vrot.slane %v5828_v30, 1  ;;  %v5833_v3 = vrot.slane %v5828_v30, 2 }
0x4785   :  { %5852 = vrot.lane.b32.xlu0 %v5833_v3, %s8462_s20  ;;  %5850 = vrot.lane.b32.xlu1 %v5832_v24, %s8462_s20  ;;  %v5836_v22 = vadd.f32 %v5832_v24, %v9815_v48  ;;  %v5837_v16 = vadd.f32 %v5833_v3, %v9812_v36 }
0x4787   :  { %v6552_v28 = vmul.f32 -1.442695, %v5836_v22  ;;  %v6553_v13 = vmul.f32 -1.442695, %v5837_v16 }
0x4789   :  { %7970 = vpow2.f32 %v6552_v28 }
0x478a   :  { %7972 = vpow2.f32 %v6553_v13  ;;  %v6075_v13 = vld [vmem:[#allocation29] sm:$0xff] }
0x4793   :  { %v7971_v42 = vpop.eup %7970 }
0x4794   :  { %v7973_v15 = vpop.eup %7972  ;;  %v5844_v23 = vadd.f32 1.0, %v7971_v42  ;;  %v6077_v42 = vpack.c.bf16 %v6075_v13, %v6075_v13 }
0x4795   :  { %v5845_v33 = vadd.f32 1.0, %v7973_v15 }
0x4796   :  { %7974 = vrcp.f32 %v5844_v23  ;;  %v6089_v15 = vsel %vm4510_vm13, %v6077_v42, 0  ;;  %v6554_v23 = vld [vmem:[#allocation28] ss:$0 sm:$0xff] }
0x4797   :  { %7976 = vrcp.f32 %v5845_v33  ;;  %7225 = vmatpush3.bf16.msra.mxu1 %v6089_v15 }
0x4798   :  { %7238 = vmatprep.subr.bf16.mxu1 %v8458_v0 }
0x47a0   :  { %v7975_v12 = vpop.eup %7974 }
0x47a1   :  { %v7977_v32 = vpop.eup %7976 }
0x47f7   :  { %v5853_v29 = vpop.permute.xlu0 %5852  ;;  %v5851_v5 = vpop.permute.xlu1 %5850 }
0x47f8   :  { %v5857_v39 = vmul.f32 %v7977_v32, %v5853_v29  ;;  %v5856_v40 = vmul.f32 %v7975_v12, %v5851_v5 }
0x47fa   :  { %5862 = vrot.lane.b32.xlu0 %v5857_v39, %s8462_s20  ;;  %5860 = vrot.lane.b32.xlu1 %v5856_v40, %s8462_s20 }
0x486c   :  { %v5863_v59 = vpop.permute.xlu0 %5862  ;;  %v5861_v17 = vpop.permute.xlu1 %5860 }
0x486d   :  { %v5867_v18 = vadd.f32 %v5863_v59, %v9812_v36  ;;  %v5866_v31 = vadd.f32 %v5861_v17, %v9815_v48  ;;  %v5902_v36 = vld [vmem:[%s10220_s2] sm:$0xff]  ;;  %v5903_v48 = vld [vmem:[%s10220_s2 + $0x8] sm:$0xff] }
0x486f   :  { %7978 = vtanh.f32 %v5867_v18 }
0x4870   :  { %7980 = vtanh.f32 %v5866_v31 }
0x4879   :  { %v7979_v4 = vpop.eup %7978 }
0x487a   :  { %v7981_v34 = vpop.eup %7980  ;;  %5876 = vrot.lane.b32.xlu0 %v7979_v4, %s8463_s4 }
0x487b   :  { %5874 = vrot.lane.b32.xlu1 %v7981_v34, %s8463_s4 }
0x487e   :  { %4876 = vrot.lane.b32.xlu0 %v9824_v14, %s8463_s4  ;;  %v5904_v14 = vld [vmem:[%s10220_s2 + $0x10] sm:$0xff] }
0x487f   :  { %4874 = vrot.lane.b32.xlu1 %v9827_v8, %s8463_s4  ;;  %v5907_v8 = vpack.c.bf16 %v5903_v48, %v5902_v36 }
0x4881   :  { %7217 = vmatpush3.bf16.msra.mxu0 %v5907_v8 }
0x4882   :  { %5019 = vrot.lane.b32.xlu0 %v9853_v27, %s8463_s4  ;;  %7218 = vmatprep.subr.bf16.mxu0 %v8458_v0 }
0x4883   :  { %5017 = vrot.lane.b32.xlu1 %v9851_v26, %s8463_s4  ;;  %v5905_v26 = vld [vmem:[%s10220_s2 + $0x18] sm:$0xff] }
0x4884   :  { %v5908_v27 = vpack.c.bf16 %v5905_v26, %v5904_v14 }
0x4886   :  { %5164 = vrot.lane.b32.xlu0 %v9879_v38, %s8463_s4  ;;  %v5871_v38 = vsub.f32 1.0, %v7977_v32  ;;  %7219 = vmatpush3.bf16.msra.mxu0 %v5908_v27 }
0x4887   :  { %5162 = vrot.lane.b32.xlu1 %v9881_v56, %s8463_s4  ;;  %v5883_v56 = vrot.slane %v9987_v55, 7  ;;  %7230 = vmatprep.subr.bf16.mxu0 %v8458_v0 }
0x488a   :  { %5310 = vrot.lane.b32.xlu0 %v9907_v41, %s8463_s4 }
0x488b   :  { %5308 = vrot.lane.b32.xlu1 %v9909_v47, %s8463_s4  ;;  %v5870_v47 = vsub.f32 1.0, %v7975_v12 }
0x488e   :  { %5456 = vrot.lane.b32.xlu0 %v9935_v37, %s8463_s4  ;;  %v5882_v37 = vrot.slane %v9989_v1, 7 }
0x488f   :  { %5454 = vrot.lane.b32.xlu1 %v9937_v60, %s8463_s4  ;;  %v5887_v60 = vmul.f32 %v7977_v32, %v5883_v56 }
0x4890   :  { %v5886_v25 = vmul.f32 %v7975_v12, %v5882_v37 }
0x4892   :  { %5602 = vrot.lane.b32.xlu0 %v9963_v43, %s8463_s4 }
0x4893   :  { %5600 = vrot.lane.b32.xlu1 %v9965_v57, %s8463_s4 }
0x4896   :  { %5748 = vrot.lane.b32.xlu0 %v9987_v55, %s8463_s4 }
0x4897   :  { %5746 = vrot.lane.b32.xlu1 %v9989_v1, %s8463_s4 }
0x48ec   :  { %v5877_v41 = vpop.permute.xlu0 %5876 }
0x48ed   :  { %v5881_v43 = vmul.f32 %v5877_v41, %v5871_v38  ;;  %v5875_v57 = vpop.permute.xlu1 %5874 }
0x48ee   :  { %v5880_v2 = vmul.f32 %v5875_v57, %v5870_v47 }
0x48ef   :  { %v5889_v46 = vadd.f32 %v5887_v60, %v5881_v43 }
0x48f0   :  { %v5888_v7 = vadd.f32 %v5886_v25, %v5880_v2  ;;  %v4877_v21 = vpop.permute.xlu0 %4876 }
0x48f1   :  { %4881 = vst.msk [vmem:[#allocation5 + $0x8] sm:$0x1] %vm852_vm11, %v4877_v21  ;;  %v4875_v51 = vpop.permute.xlu1 %4874  ;;  %5894 = vrot.lane.b32.xlu0 %v5889_v46, %s8463_s4  ;;  %v6134_v46 = vld [vmem:[%s10221_s7] sm:$0xff] }
0x48f2   :  { %4880 = vst.msk [vmem:[#allocation5] sm:$0x1] %vm852_vm11, %v4875_v51  ;;  %5892 = vrot.lane.b32.xlu1 %v5888_v7, %s8463_s4  ;;  %v6135_v7 = vld [vmem:[%s10221_s7 + $0x8] sm:$0xff]  ;;  %v6136_v51 = vld [vmem:[%s10221_s7 + $0x10] sm:$0xff] }
0x48f3   :  { %v6139_v21 = vpack.c.bf16 %v6135_v7, %v6134_v46 }
0x48f4   :  { %v5020_v49 = vpop.permute.xlu0 %5019 }
0x48f5   :  { %5024 = vst.msk [vmem:[#allocation5 + $0x8] sm:$0x2] %vm1154_vm10, %v5020_v49  ;;  %v5018_v19 = vpop.permute.xlu1 %5017  ;;  %v6137_v49 = vld [vmem:[%s10221_s7 + $0x18] sm:$0xff] }
0x48f6   :  { %5023 = vst.msk [vmem:[#allocation5] sm:$0x2] %vm1154_vm10, %v5018_v19  ;;  %v6140_v19 = vpack.c.bf16 %v6137_v49, %v6136_v51 }
0x48f8   :  { %v5165_v44 = vpop.permute.xlu0 %5164 }
0x48f9   :  { %5169 = vst.msk [vmem:[#allocation5 + $0x8] sm:$0x4] %vm1457_vm8, %v5165_v44  ;;  %v5163_v55 = vpop.permute.xlu1 %5162 }
0x48fa   :  { %5168 = vst.msk [vmem:[#allocation5] sm:$0x4] %vm1457_vm8, %v5163_v55  ;;  %v6556_v55 = vld [vmem:[#allocation31] ss:$0 sm:$0xff] }
0x48fc   :  { %v5311_v1 = vpop.permute.xlu0 %5310 }
0x48fd   :  { %5315 = vst.msk [vmem:[#allocation5 + $0x8] sm:$0x8] %vm1761_vm7, %v5311_v1  ;;  %v5309_v52 = vpop.permute.xlu1 %5308 }
0x48fe   :  { %5314 = vst.msk [vmem:[#allocation5] sm:$0x8] %vm1761_vm7, %v5309_v52 }
0x4900   :  { %v5457_v50 = vpop.permute.xlu0 %5456 }
0x4901   :  { %5461 = vst.msk [vmem:[#allocation5 + $0x8] sm:$0x10] %vm1764_vm6, %v5457_v50  ;;  %v5455_v63 = vpop.permute.xlu1 %5454 }
0x4902   :  { %5460 = vst.msk [vmem:[#allocation5] sm:$0x10] %vm1764_vm6, %v5455_v63  ;;  %vm6071_vm6 = vcmask 457728  }
0x4904   :  { %v5603_v20 = vpop.permute.xlu0 %5602 }
0x4905   :  { %5607 = vst.msk [vmem:[#allocation5 + $0x8] sm:$0x20] %vm1460_vm5, %v5603_v20  ;;  %v5601_v11 = vpop.permute.xlu1 %5600 }
0x4906   :  { %5606 = vst.msk [vmem:[#allocation5] sm:$0x20] %vm1460_vm5, %v5601_v11  ;;  %vm6014_vm5 = vcmask 916480  }
0x4908   :  { %v5749_v30 = vpop.permute.xlu0 %5748 }
0x4909   :  { %5753 = vst.msk [vmem:[#allocation5 + $0x8] sm:$0x40] %vm1157_vm4, %v5749_v30  ;;  %v5747_v10 = vpop.permute.xlu1 %5746 }
0x490a   :  { %5752 = vst.msk [vmem:[#allocation5] sm:$0x40] %vm1157_vm4, %v5747_v10  ;;  %vm6068_vm4 = vcmask 326656  }
0x4963   :  { %v5895_v24 = vpop.permute.xlu0 %5894 }
0x4964   :  { %5899 = vst.msk [vmem:[#allocation5 + $0x8] sm:$0x80] %vm855_vm3, %v5895_v24  ;;  %v5893_v3 = vpop.permute.xlu1 %5892 }
0x4965   :  { %5898 = vst.msk [vmem:[#allocation5] sm:$0x80] %vm855_vm3, %v5893_v3  ;;  %vm6011_vm3 = vcmask 654336  }
0x496b   :  { %v5901_v22 = vld [vmem:[#allocation5 + $0x8] sm:$0xff] }
0x496c   :  { %v5900_v16 = vld [vmem:[#allocation5] sm:$0xff] }
0x496d   :  { %v5906_v28 = vpack.c.bf16 %v5901_v22, %v5900_v16 }
0x496f   :  { %7221 = vmatmul.mubr.msk.bf16.vlgmr.msra.gmra.mrb[56].mxu0 %vm374_vm1, %v5906_v28 }
0x4970   :  { %7234 = vmatprep.mubr.msk.bf16.mxu0 %vm8459_vm0, %v8458_v0  ;;  %7231 = vmatpush3.bf16.msra.mxu0 %v6139_v21 }
0x4971   :  { %7232 = vmatprep.subr.bf16.mxu0 %v8458_v0 }
0x4974   :  { %7233 = vmatpush3.bf16.msra.mxu0 %v6140_v19 }
0x4975   :  { %7244 = vmatprep.subr.bf16.mxu0 %v8458_v0 }
0x4a42   :  { %v5953_v33 = vpop.f32.mrb[56].mxu0 }
0x4a43   :  { %v5954_v12 = vadd.f32 %v6554_v23, %v5953_v33  ;;  %v7222_v32 = vpop.f32.mrb[57].mxu0 }
0x4a44   :  { %v5956_v29 = vpop.f32.mrb[58].mxu0 }
0x4a45   :  { %v5957_v5 = vadd.f32 %v6554_v23, %v5956_v29  ;;  %v7223_v39 = vpop.f32.mrb[59].mxu0  ;;  %v5965_v40 = vrot.slane %v5954_v12, 1  ;;  %v5970_v59 = vrot.slane %v5954_v12, 2  ;;  %v5976_v17 = vrot.slane %v5954_v12, 3 }
0x4a46   :  { %v5982_v18 = vrot.slane %v5954_v12, 4  ;;  %v5988_v31 = vrot.slane %v5954_v12, 5  ;;  %v5994_v4 = vrot.slane %v5954_v12, 6  ;;  %v6000_v47 = vrot.slane %v5954_v12, 7  ;;  %v6558_v39 = vld [vmem:[#allocation32] ss:$0 sm:$0xff] }
0x4a47   :  { %v6076_v34 = vpack.c.bf16 %v5957_v5, %v5954_v12  ;;  %v10069_v36 = vsel %vm859_vm2, %v5957_v5, %v5965_v40  ;;  %v5971_v48 = vrot.slane %v5957_v5, 1  ;;  %v5977_v14 = vrot.slane %v5957_v5, 2 }
0x4a48   :  { %v5983_v8 = vrot.slane %v5957_v5, 3  ;;  %v5989_v26 = vrot.slane %v5957_v5, 4  ;;  %v5962_v27 = vrot.slane %v5957_v5, 7  ;;  %v5995_v38 = vrot.slane %v5957_v5, 5 }
0x4a49   :  { %6193 = vrot.lane.b32.xlu1 %v6076_v34, %s8465_s29  ;;  %7227 = vmatmul.mubr.msk.bf16.vlgmr.msra.gmra.mrb[64].mxu1 %vm4482_vm14, %v6076_v34  ;;  %v10073_v56 = vsel %vm859_vm2, %v5971_v48, %v5970_v59  ;;  %v10076_v41 = vsel %vm859_vm2, %v5977_v14, %v5976_v17  ;;  %v6001_v37 = vrot.slane %v5957_v5, 6 }
0x4a4a   :  { %7239 = vmatpush3.bf16.msra.mxu1 %v6089_v15  ;;  %7240 = vmatprep.mubr.msk.bf16.mxu1 %vm8459_vm0, %v8458_v0  ;;  %v10081_v60 = vsel %vm859_vm2, %v5983_v8, %v5982_v18  ;;  %v10084_v43 = vsel %vm859_vm2, %v5989_v26, %v5988_v31  ;;  %v10087_v57 = vsel %vm859_vm2, %v5962_v27, %v5954_v12 }
0x4a4b   :  { %v10090_v25 = vsel %vm859_vm2, %v5995_v38, %v5994_v4  ;;  %v10093_v2 = vsel %vm859_vm2, %v6001_v37, %v6000_v47 }
0x4abb   :  { %v6194_v44 = vpop.permute.xlu1 %6193 }
0x4abc   :  { %7241 = vmatmul.mubr.msk.bf16.vlgmr.msra.gmra.mrb[68].mxu1 %vm4482_vm14, %v6194_v44 }
0x4b1c   :  { %v6125_v1 = vpop.f32.mrb[64].mxu1 }
0x4b1d   :  { %v6126_v52 = vadd.f32 %v6556_v55, %v6125_v1  ;;  %v7228_v50 = vpop.f32.mrb[65].mxu1 }
0x4b1e   :  { %v6128_v63 = vpop.f32.mrb[66].mxu1 }
0x4b1f   :  { %v6129_v20 = vadd.f32 %v6556_v55, %v6128_v63  ;;  %v7229_v11 = vpop.f32.mrb[67].mxu1  ;;  %v6132_v30 = vmax.f32 %v6126_v52, 0.0 }
0x4b21   :  { %v6133_v10 = vmax.f32 %v6129_v20, 0.0 }
0x4b23   :  { %v6138_v24 = vpack.c.bf16 %v6133_v10, %v6132_v30 }
0x4b25   :  { %7235 = vmatmul.mubr.msk.bf16.vlgmr.msra.gmra.mrb[60].mxu0 %vm374_vm1, %v6138_v24 }
0x4b26   :  { %7245 = vmatpush3.bf16.msra.mxu0 %v6139_v21  ;;  %7248 = vmatprep.mubr.msk.bf16.mxu0 %vm8459_vm0, %v8458_v0  ;;  %vm6008_vm0 = vcmask 392192  }
0x4b27   :  { %7246 = vmatprep.subr.bf16.mxu0 %v8458_v0 }
0x4b2a   :  { %7247 = vmatpush3.bf16.msra.mxu0 %v6140_v19 }
0x4b8f   :  { %v6232_v3 = vpop.f32.mrb[68].mxu1 }
0x4b90   :  { %v6233_v22 = vadd.f32 %v6556_v55, %v6232_v3  ;;  %v7242_v16 = vpop.f32.mrb[69].mxu1 }
0x4b91   :  { %v6235_v28 = vpop.f32.mrb[70].mxu1 }
0x4b92   :  { %v6236_v13 = vadd.f32 %v6556_v55, %v6235_v28  ;;  %v7243_v42 = vpop.f32.mrb[71].mxu1  ;;  %v6239_v15 = vmax.f32 %v6233_v22, 0.0 }
0x4b94   :  { %v6240_v23 = vmax.f32 %v6236_v13, 0.0 }
0x4b96   :  { %v6241_v33 = vpack.c.bf16 %v6240_v23, %v6239_v15 }
0x4b98   :  { %7249 = vmatmul.mubr.msk.bf16.vlgmr.msra.gmra.mrb[64].mxu0 %vm374_vm1, %v6241_v33 }
0x4bf8   :  { %v6185_v12 = vpop.f32.mrb[60].mxu0 }
0x4bf9   :  { %v7236_v32 = vpop.f32.mrb[61].mxu0 }
0x4bfa   :  { %v6188_v29 = vpop.f32.mrb[62].mxu0 }
0x4bfb   :  { %v7237_v5 = vpop.f32.mrb[63].mxu0  ;;  %v6189_v4 = vadd.f32 %v6558_v39, %v6188_v29 }
0x4c6b   :  { %v6279_v40 = vpop.f32.mrb[64].mxu0 }
0x4c6c   :  { %v6280_v59 = vadd.f32 %v6558_v39, %v6279_v40  ;;  %v7250_v0 = vpop.f32.mrb[65].mxu0 }
0x4c6d   :  { %v6282_v17 = vpop.f32.mrb[66].mxu0 }
0x4c6e   :  { %v6283_v18 = vadd.f32 %v6558_v39, %v6282_v17  ;;  %6288 = vrot.lane.b32.xlu0 %v6280_v59, %s8464_s25  ;;  %v7251_v31 = vpop.f32.mrb[67].mxu0 }
0x4c70   :  { %6290 = vrot.lane.b32.xlu1 %v6283_v18, %s8464_s25 }
0x4c72   :  { %6024 = vrot.lane.b32.xlu0 %v9721_v53, %s8442_s14  ;;  %s8469_s14 = smov 40   ;;  %v6186_v53 = vadd.f32 %v6558_v39, %v6185_v12 }
0x4c74   :  { %5967 = vrot.lane.b32.xlu1 %v10069_v36, %s8466_s0 }
0x4c76   :  { %6030 = vrot.lane.b32.xlu0 %v9727_v61, %s8466_s0 }
0x4c78   :  { %5973 = vrot.lane.b32.xlu1 %v10073_v56, %s8464_s25 }
0x4c7a   :  { %6036 = vrot.lane.b32.xlu0 %v9730_v54, %s8467_s10 }
0x4c7c   :  { %5979 = vrot.lane.b32.xlu1 %v10076_v41, %s8468_s24 }
0x4c7e   :  { %6042 = vrot.lane.b32.xlu0 %v9735_v9, %s8464_s25 }
0x4c80   :  { %5985 = vrot.lane.b32.xlu1 %v10081_v60, %s8462_s20 }
0x4c82   :  { %6048 = vrot.lane.b32.xlu0 %v9738_v6, %s8469_s14 }
0x4c84   :  { %5991 = vrot.lane.b32.xlu1 %v10084_v43, %s8470_s11 }
0x4ce0   :  { %v6289_v61 = vpop.permute.xlu0 %6288 }
0x4ce1   :  { %v6294_v54 = vsel %vm374_vm1, %v6186_v53, %v6289_v61 }
0x4ce2   :  { %v6291_v34 = vpop.permute.xlu1 %6290  ;;  %v6301_v36 = vrot.slane %v6294_v54, 1  ;;  %v6310_v48 = vrot.slane %v6294_v54, 3  ;;  %v6320_v14 = vrot.slane %v6294_v54, 5  ;;  %v6330_v8 = vrot.slane %v6294_v54, 7 }
0x4ce3   :  { %v6295_v9 = vsel %vm374_vm1, %v6189_v4, %v6291_v34  ;;  %v6306_v26 = vrot.slane %v6294_v54, 2  ;;  %v6316_v27 = vrot.slane %v6294_v54, 4  ;;  %v6326_v43 = vrot.slane %v6294_v54, 6 }
0x4ce4   :  { %v6302_v38 = vsel %vm859_vm2, %v6295_v9, %v6301_v36  ;;  %v6311_v6 = vrot.slane %v6295_v9, 2  ;;  %v6321_v56 = vrot.slane %v6295_v9, 4  ;;  %v6331_v41 = vrot.slane %v6295_v9, 6  ;;  %v6025_v52 = vpop.permute.xlu0 %6024 }
0x4ce5   :  { %6303 = vrot.lane.b32.xlu1 %v6302_v38, %s8462_s20  ;;  %v6298_v47 = vrot.slane %v6295_v9, 7  ;;  %v6307_v37 = vrot.slane %v6295_v9, 1  ;;  %v6317_v60 = vrot.slane %v6295_v9, 3  ;;  %v6327_v51 = vrot.slane %v6295_v9, 5 }
0x4ce6   :  { %v6312_v46 = vsel %vm859_vm2, %v6311_v6, %v6310_v48  ;;  %v6322_v7 = vsel %vm859_vm2, %v6321_v56, %v6320_v14  ;;  %v6332_v21 = vsel %vm859_vm2, %v6331_v41, %v6330_v8  ;;  %v5968_v1 = vpop.permute.xlu1 %5967  ;;  %v6063_v40 = vsel %vm4482_vm14, %v9741_v45, %v6025_v52 }
0x4ce7   :  { %6313 = vrot.lane.b32.xlu0 %v6312_v46, %s8462_s20  ;;  %v6299_v49 = vsel %vm859_vm2, %v6298_v47, %v6294_v54  ;;  %v6308_v19 = vsel %vm859_vm2, %v6307_v37, %v6306_v26  ;;  %v6318_v44 = vsel %vm859_vm2, %v6317_v60, %v6316_v27  ;;  %v6328_v55 = vsel %vm859_vm2, %v6327_v51, %v6326_v43 }
0x4ce8   :  { %v6031_v63 = vpop.permute.xlu0 %6030  ;;  %v6006_v33 = vsel %vm2997_vm9, %v10087_v57, %v5968_v1  ;;  %vm6065_vm2 = vcmask 195584  }
0x4ce9   :  { %6323 = vrot.lane.b32.xlu1 %v6322_v7, %s8462_s20 }
0x4cea   :  { %v5974_v50 = vpop.permute.xlu1 %5973 }
0x4ceb   :  { %6333 = vrot.lane.b32.xlu0 %v6332_v21, %s8462_s20  ;;  %v6007_v29 = vsel %vm374_vm1, %v6006_v33, %v5974_v50 }
0x4cec   :  { %v6037_v11 = vpop.permute.xlu0 %6036 }
0x4ced   :  { %5997 = vrot.lane.b32.xlu1 %v10090_v25, %s8463_s4  ;;  %v8473_v25 = vmov 1983009808  }
0x4cee   :  { %v5980_v20 = vpop.permute.xlu1 %5979  ;;  %v6347_v22 = vunpack.c.l.s4 %v8473_v25 }
0x4cef   :  { %6054 = vrot.lane.b32.xlu0 %v9744_v35, %s8468_s24  ;;  %v6009_v59 = vsel %vm6008_vm0, %v6007_v29, %v5980_v20 }
0x4cf0   :  { %v6043_v10 = vpop.permute.xlu0 %6042  ;;  %v6348_v35 = vunpack.c.0.s8 %v6347_v22 }
0x4cf1   :  { %6003 = vrot.lane.b32.xlu1 %v10093_v2, %s8471_s15 }
0x4cf2   :  { %v5986_v30 = vpop.permute.xlu1 %5985  ;;  %v6351_v15 = vsub.s32 %v6348_v35, %v8796_v62  ;;  %v6064_v62 = vsel %vm2997_vm9, %v6063_v40, %v6031_v63 }
0x4cf3   :  { %6060 = vrot.lane.b32.xlu0 %v9747_v58, %s8472_s6  ;;  %v6010_v57 = vsel %vm4389_vm12, %v6009_v59, %v5986_v30  ;;  %v6066_v31 = vsel %vm6065_vm2, %v6064_v62, %v6037_v11 }
0x4cf4   :  { %v6049_v3 = vpop.permute.xlu0 %6048  ;;  %v6067_v61 = vsel %vm374_vm1, %v6066_v31, %v6043_v10 }
0x4cf5   :  { %v6069_v34 = vsel %vm6068_vm4, %v6067_v61, %v6049_v3 }
0x4cf6   :  { %v5992_v24 = vpop.permute.xlu1 %5991 }
0x4cf7   :  { %v6012_v53 = vsel %vm6011_vm3, %v6010_v57, %v5992_v24 }
0x4d57   :  { %v6304_v16 = vpop.permute.xlu1 %6303 }
0x4d58   :  { %v6336_v2 = vsel %vm4389_vm12, %v6299_v49, %v6304_v16 }
0x4d59   :  { %v6314_v28 = vpop.permute.xlu0 %6313 }
0x4d5a   :  { %v6337_v13 = vsel %vm4389_vm12, %v6308_v19, %v6314_v28 }
0x4d5b   :  { %v6344_v58 = vcombine.low %v6336_v2, %v6337_v13  ;;  %v6324_v42 = vpop.permute.xlu1 %6323 }
0x4d5c   :  { %v6338_v12 = vsel %vm4389_vm12, %v6318_v44, %v6324_v42 }
0x4d5d   :  { %v6334_v23 = vpop.permute.xlu0 %6333  ;;  %v6352_v0 = vrot.slane %v6344_v58, %v6351_v15 }
0x4d5e   :  { %v6339_v32 = vsel %vm4389_vm12, %v6328_v55, %v6334_v23 }
0x4d5f   :  { %v6345_v5 = vcombine.low %v6338_v12, %v6339_v32  ;;  %v5998_v39 = vpop.permute.xlu1 %5997 }
0x4d60   :  { %v6013_v45 = vsel %vm4634_vm15, %v6012_v53, %v5998_v39 }
0x4d61   :  { %v6359_v17 = vrot.slane %v6345_v5, %v6351_v15  ;;  %v6055_v18 = vpop.permute.xlu0 %6054 }
0x4d62   :  { %v6070_v48 = vsel %vm6008_vm0, %v6069_v34, %v6055_v18 }
0x4d63   :  { %v6360_v4 = vcombine.low %v6352_v0, %v6359_v17  ;;  %v6004_v54 = vpop.permute.xlu1 %6003 }
0x4d64   :  { %v6015_v36 = vsel %vm6014_vm5, %v6013_v45, %v6004_v54 }
0x4d65   :  { %6362 = vst [vmem:[%s8662_s27] sm:$0xff] %v6360_v4  ;;  %6016 = vst [vmem:[%s8652_s8] sm:$0x3] %v6015_v36  ;;  %v6061_v14 = vpop.permute.xlu0 %6060 }
0x4d66   :  { %v6072_v9 = vsel %vm6071_vm6, %v6070_v48, %v6061_v14 }
0x4d67   :  { %v6073_v8 = vsel %vm4389_vm12, %v6072_v9, 0.0 }
0x4d68   :  { %6074 = vst [vmem:[%s8657_s13] sm:$0x3] %v6073_v8 }
0x4d69   :  { %6375 = vsyncpa [#allocation7], 1 }
0x4d6a   :  { %6376 = vsyncpa [#allocation9], 1 }
0x4d6b   :  { %6377 = vsyncpa [#allocation12], 1 }
0x4d6c   :  { %6378 = vsyncpa [#allocation15], 1 }
0x4d6d   :  { %6379 = vsyncpa [#allocation18], 1 }
0x4d6e   :  { %6380 = vsyncpa [#allocation21], 1 }
0x4d6f   :  { %6381 = vsyncpa [#allocation24], 1 }
0x4d70   :  { %6382 = vsyncpa [#allocation27], 1 }
0x4d71   :  { %6383 = vsyncpa [#allocation30], 1 }
0x4d72   :  { %6384 = vsyncpa [#allocation33], 1 }

</bundles_post_ra>
